<compile_context>
chip_gen: v5e
topology: v5e:2x2
jax: 0.10.0
libtpu: 0.0.40
codegen_flags: <defaults>
</compile_context>

<pallas_src>
import jax
import jax.numpy as jnp
from jax import lax
from jax.experimental import pallas as pl
from jax.experimental.pallas import tpu as pltpu

_LANE = 128


def _edge_block_kernel(si_ref, di_ref, e_ref, src_tab_ref, dst_tab_ref,
                       w1_ref, b1_ref, w2_ref, b2_ref, g_ref, beta_ref, o_ref):
    """One tile of edges: gather -> Linear -> SiLU -> Linear -> LayerNorm -> +residual."""
    tile = e_ref.shape[0]
    n_src = src_tab_ref.shape[0]
    n_dst = dst_tab_ref.shape[0]

    # Edge features read from HBM exactly once (matmul input + residual), in f32.
    e_f32 = e_ref[...].astype(jnp.float32)

    # Fused gather: one-hot(indices) @ node_table keeps the gathered node
    # activations entirely on-chip (no HBM round-trip of E x (Ds+Dd) bytes).
    # Node tables are small and resident in VMEM as single-buffered constants.
    # TODO(synk): for production-scale node tables that do not fit VMEM, switch
    # to scalar-prefetch indices + memory_space=pl.ANY tables with a per-tile
    # make_async_copy DMA gather instead of the one-hot matmul.
    oh_src = (si_ref[...] == lax.broadcasted_iota(jnp.int32, (tile, n_src), 1)
              ).astype(jnp.bfloat16)
    oh_dst = (di_ref[...] == lax.broadcasted_iota(jnp.int32, (tile, n_dst), 1)
              ).astype(jnp.bfloat16)
    src_g = jnp.dot(oh_src, src_tab_ref[...],
                    preferred_element_type=jnp.float32).astype(jnp.bfloat16)
    dst_g = jnp.dot(oh_dst, dst_tab_ref[...],
                    preferred_element_type=jnp.float32).astype(jnp.bfloat16)

    # Single K=(Ds+Dd+De) matmul (better MXU depth utilization on v6e/v7x than
    # three K=128 passes).  bf16 operands, f32 MXU accumulation.
    x = jnp.concatenate([src_g, dst_g, e_f32.astype(jnp.bfloat16)], axis=-1)
    h = jnp.dot(x, w1_ref[...], preferred_element_type=jnp.float32) + b1_ref[...]

    # SiLU in f32 (sigmoid goes to the EUP).
    h = h * jax.nn.sigmoid(h)

    # Linear(hidden_dim -> output_edge_dim).
    y = jnp.dot(h.astype(jnp.bfloat16), w2_ref[...],
                preferred_element_type=jnp.float32) + b2_ref[...]

    # LayerNorm over the feature axis, eps = 1e-5 (PyTorch default), f32.
    mean = jnp.mean(y, axis=-1, keepdims=True)
    var = jnp.mean((y - mean) ** 2, axis=-1, keepdims=True)
    y = (y - mean) * lax.rsqrt(var + 1e-5)
    y = y * g_ref[...] + beta_ref[...]

    # Residual connection with the original (f32) edge features.
    o_ref[...] = (y + e_f32).astype(o_ref.dtype)


def _vmem_capacity_bytes():
    try:
        return int(pltpu.get_tpu_info().vmem_capacity_bytes)
    except Exception:
        return 64 * 1024 * 1024   # conservative default: v7x per-TensorCore VMEM


def _ceil_lanes(d):
    return -(-d // _LANE) * _LANE


def _tile_vmem_bytes(tile_e, n_src, n_dst, ds, dd, de, h, single_buffer_consts):
    """Conservative per-tile VMEM residency estimate (bytes)."""
    # Double-buffered streaming blocks: 2 index columns (lane-padded), edges in, out.
    stream = 2 * tile_e * (2 * _ceil_lanes(1) * 4
                           + _ceil_lanes(de) * 4
                           + _ceil_lanes(de) * 4)
    cbuf = 1 if single_buffer_consts else 2
    consts = cbuf * (n_src * _ceil_lanes(ds) * 2
                     + n_dst * _ceil_lanes(dd) * 2
                     + (ds + dd + de) * _ceil_lanes(h) * 2
                     + h * _ceil_lanes(de) * 2
                     + 8 * _ceil_lanes(h) * 4
                     + 3 * 8 * _ceil_lanes(de) * 4)
    # In-kernel intermediates: one-hots, concat activations, h (f32), y, e_f32.
    inter = tile_e * (_ceil_lanes(n_src) * 2 + _ceil_lanes(n_dst) * 2
                      + _ceil_lanes(ds + dd + de) * 2
                      + _ceil_lanes(h) * 4
                      + 3 * _ceil_lanes(de) * 4)
    return stream + consts + inter


def _choose_tile_e(num_edges, n_src, n_dst, ds, dd, de, h, vmem_budget):
    """Largest MXU-friendly edge tile fitting the VMEM budget; keep >= 2 grid
    steps when possible so both v7x TensorCores get work."""
    candidates = (2048, 1024, 512, 256, 128)
    fitting = [c for c in candidates
               if _tile_vmem_bytes(c, n_src, n_dst, ds, dd, de, h, True) <= vmem_budget]
    if not fitting:
        fitting = [128]
    for c in fitting:
        if pl.cdiv(num_edges, c) >= 2:
            return c
    return fitting[-1]


def mesh_edge_block(src_node_features, dst_node_features, edge_features,
                    src_indices, dst_indices, params, *, tile_e=None):
    """Pallas implementation of MeshEdgeBlock.forward (single-process communicator)."""
    E, De = edge_features.shape
    n_src, Ds = src_node_features.shape
    n_dst, Dd = dst_node_features.shape
    assert De % _LANE == 0, "output_edge_dim must be lane-dense (multiple of 128)"

    # Node tables & weights in bf16 for the MXU; biases / LayerNorm affine stay f32.
    src_tab = src_node_features.astype(jnp.bfloat16)
    dst_tab = dst_node_features.astype(jnp.bfloat16)
    w1 = params["w1"].astype(jnp.bfloat16)             # (Ds+Dd+De, H)
    w2 = params["w2"].astype(jnp.bfloat16)             # (H, De)
    b1 = params["b1"].astype(jnp.float32)
    b2 = params["b2"].astype(jnp.float32)
    gamma = params["gamma"].astype(jnp.float32)
    beta = params["beta"].astype(jnp.float32)
    H = w1.shape[1]

    # Indices as lane-1 int32 columns, consumed in-kernel for the fused gather.
    src_idx2d = src_indices.astype(jnp.int32).reshape(E, 1)
    dst_idx2d = dst_indices.astype(jnp.int32).reshape(E, 1)

    vmem_cap = _vmem_capacity_bytes()
    if tile_e is None:
        tile_e = _choose_tile_e(E, n_src, n_dst, Ds, Dd, De, H,
                                vmem_budget=int(0.45 * vmem_cap))
    n_tiles = pl.cdiv(E, tile_e)   # no wrapper pad: Pallas masks the ragged last tile

    need = _tile_vmem_bytes(tile_e, n_src, n_dst, Ds, Dd, De, H, True)
    vmem_limit = int(min(0.7 * vmem_cap, max(2 * need, 32 * 1024 * 1024)))

    cost = pl.CostEstimate(
        flops=2 * E * (n_src * Ds + n_dst * Dd + (Ds + Dd + De) * H + H * De),
        transcendentals=E * H,                          # sigmoid
        bytes_accessed=(2 * E * 4                       # indices
                        + 2 * E * De * 4                # f32 edges in + out
                        + (n_src * Ds + n_dst * Dd) * 2         # bf16 node tables
                        + ((Ds + Dd + De) * H + H * De) * 2     # bf16 weights
                        + (H + 3 * De) * 4),            # biases / gamma / beta
    )

    def build(single_buffer_consts):
        const_kw = {"pipeline_mode": pl.Buffered(1)} if single_buffer_consts else {}
        row_spec = lambda shape: pl.BlockSpec(shape, lambda i: (i, 0))
        const_spec = lambda shape: pl.BlockSpec(shape, lambda i: (0, 0), **const_kw)
        return pl.pallas_call(
            _edge_block_kernel,
            out_shape=jax.ShapeDtypeStruct((E, De), edge_features.dtype),
            grid_spec=pltpu.PrefetchScalarGridSpec(
                num_scalar_prefetch=0,
                grid=(n_tiles,),
                in_specs=[
                    row_spec((tile_e, 1)),           # src indices (int32)
                    row_spec((tile_e, 1)),           # dst indices (int32)
                    row_spec((tile_e, De)),          # edge features (f32)
                    const_spec((n_src, Ds)),         # src node table (bf16)
                    const_spec((n_dst, Dd)),         # dst node table (bf16)
                    const_spec((Ds + Dd + De, H)),   # W1 (full, merged K)
                    const_spec((1, H)),              # b1
                    const_spec((H, De)),             # W2
                    const_spec((1, De)),             # b2
                    const_spec((1, De)),             # LayerNorm gamma
                    const_spec((1, De)),             # LayerNorm beta
                ],
                out_specs=pl.BlockSpec((tile_e, De), lambda i: (i, 0)),
            ),
            compiler_params=pltpu.CompilerParams(
                dimension_semantics=("parallel",),   # edge axis shards across v7x TCs
                vmem_limit_bytes=vmem_limit,
            ),
            cost_estimate=cost,
        )

    args = (src_idx2d, dst_idx2d, edge_features, src_tab, dst_tab,
            w1, b1, w2, b2, gamma, beta)
    try:
        return build(True)(*args)
    except Exception:
        # Fallback if this JAX version rejects single-buffered constant blocks.
        return build(False)(*args)


def _reference(src_node_features, dst_node_features, edge_features,
               src_indices, dst_indices, params):
    """Pure-JAX reference using the same bf16 matmul / f32 norm precision."""
    src_g = jnp.take(src_node_features, src_indices, axis=0).astype(jnp.bfloat16)
    dst_g = jnp.take(dst_node_features, dst_indices, axis=0).astype(jnp.bfloat16)
    e_b = edge_features.astype(jnp.bfloat16)
    x = jnp.concatenate([src_g, dst_g, e_b], axis=-1)
    w1 = params["w1"].astype(jnp.bfloat16)
    w2 = params["w2"].astype(jnp.bfloat16)
    h = jnp.dot(x, w1, preferred_element_type=jnp.float32) + params["b1"]
    h = h * jax.nn.sigmoid(h)
    y = jnp.dot(h.astype(jnp.bfloat16), w2,
                preferred_element_type=jnp.float32) + params["b2"]
    mean = jnp.mean(y, axis=-1, keepdims=True)
    var = jnp.mean((y - mean) ** 2, axis=-1, keepdims=True)
    y = (y - mean) * lax.rsqrt(var + 1e-5)
    y = y * params["gamma"] + params["beta"]
    return y + edge_features


if __name__ == "__main__":
    key = jax.random.PRNGKey(0)

    # Small but lane-dense (multiple-of-128) shapes consistent with the module.
    n_src, n_dst = 128, 128          # number of src / dst nodes
    num_edges = 512                  # number of edges
    d_src, d_dst, d_edge = 128, 128, 128   # output_edge_dim == d_edge (residual)
    hidden = 256
    d_in = d_src + d_dst + d_edge

    ks = jax.random.split(key, 9)
    src_nodes = jax.random.normal(ks[0], (n_src, d_src), jnp.float32)
    dst_nodes = jax.random.normal(ks[1], (n_dst, d_dst), jnp.float32)
    edges = jax.random.normal(ks[2], (num_edges, d_edge), jnp.float32)
    src_idx = jax.random.randint(ks[3], (num_edges,), 0, n_src, jnp.int32)
    dst_idx = jax.random.randint(ks[4], (num_edges,), 0, n_dst, jnp.int32)

    # Deterministic parameter init (MeshGraphMLP: Linear, SiLU, Linear, LayerNorm).
    params = {
        "w1": jax.random.normal(ks[5], (d_in, hidden), jnp.float32) * 0.05,
        "b1": jax.random.normal(ks[6], (1, hidden), jnp.float32) * 0.01,
        "w2": jax.random.normal(ks[7], (hidden, d_edge), jnp.float32) * 0.05,
        "b2": jax.random.normal(ks[8], (1, d_edge), jnp.float32) * 0.01,
        "gamma": jnp.ones((1, d_edge), jnp.float32),
        "beta": jnp.zeros((1, d_edge), jnp.float32),
    }

    out = mesh_edge_block(src_nodes, dst_nodes, edges, src_idx, dst_idx, params)
    out = jax.block_until_ready(out)

    ref = _reference(src_nodes, dst_nodes, edges, src_idx, dst_idx, params)
    assert out.shape == (num_edges, d_edge)
    assert jnp.allclose(out, ref, atol=2e-2, rtol=2e-2), (
        float(jnp.max(jnp.abs(out - ref))))

    print("KERNEL_OK")
</pallas_src>

<mosaic_0001>
module attributes {stable_mosaic.version = 11 : i64} {
  func.func @_edge_block_kernel(%arg0: i32, %arg1: memref<256x1xi32, #tpu.memory_space<vmem>>, %arg2: memref<256x1xi32, #tpu.memory_space<vmem>>, %arg3: memref<256x128xf32, #tpu.memory_space<vmem>>, %arg4: memref<128x128xbf16, #tpu.memory_space<vmem>>, %arg5: memref<128x128xbf16, #tpu.memory_space<vmem>>, %arg6: memref<384x256xbf16, #tpu.memory_space<vmem>>, %arg7: memref<1x256xf32, #tpu.memory_space<vmem>>, %arg8: memref<256x128xbf16, #tpu.memory_space<vmem>>, %arg9: memref<1x128xf32, #tpu.memory_space<vmem>>, %arg10: memref<1x128xf32, #tpu.memory_space<vmem>>, %arg11: memref<1x128xf32, #tpu.memory_space<vmem>>, %arg12: memref<256x128xf32, #tpu.memory_space<vmem>>) attributes {dimension_semantics = [#tpu.dimension_semantics<parallel>], iteration_bounds = array<i64: 2>, scalar_prefetch = 0 : i64, scratch_operands = 0 : i64, tpu.core_type = #tpu.core_type<tc>, window_params = [{transform_indices = @transform_0, window_bounds = array<i64: 256, 1>}, {transform_indices = @transform_1, window_bounds = array<i64: 256, 1>}, {transform_indices = @transform_2, window_bounds = array<i64: 256, 128>}, {pipeline_mode = #tpu.pipeline_mode<synchronous>, transform_indices = @transform_3, window_bounds = array<i64: 128, 128>}, {pipeline_mode = #tpu.pipeline_mode<synchronous>, transform_indices = @transform_4, window_bounds = array<i64: 128, 128>}, {pipeline_mode = #tpu.pipeline_mode<synchronous>, transform_indices = @transform_5, window_bounds = array<i64: 384, 256>}, {pipeline_mode = #tpu.pipeline_mode<synchronous>, transform_indices = @transform_6, window_bounds = array<i64: 1, 256>}, {pipeline_mode = #tpu.pipeline_mode<synchronous>, transform_indices = @transform_7, window_bounds = array<i64: 256, 128>}, {pipeline_mode = #tpu.pipeline_mode<synchronous>, transform_indices = @transform_8, window_bounds = array<i64: 1, 128>}, {pipeline_mode = #tpu.pipeline_mode<synchronous>, transform_indices = @transform_9, window_bounds = array<i64: 1, 128>}, {pipeline_mode = #tpu.pipeline_mode<synchronous>, transform_indices = @transform_10, window_bounds = array<i64: 1, 128>}, {transform_indices = @transform_11, window_bounds = array<i64: 256, 128>}]} {
    %c0 = arith.constant 0 : index
    %c0_0 = arith.constant 0 : index
    %0 = vector.load %arg3[%c0, %c0_0] : memref<256x128xf32, #tpu.memory_space<vmem>>, vector<256x128xf32>
    %c0_1 = arith.constant 0 : index
    %c0_2 = arith.constant 0 : index
    %1 = vector.load %arg1[%c0_1, %c0_2] : memref<256x1xi32, #tpu.memory_space<vmem>>, vector<256x1xi32>
    %2 = tpu.iota {dimensions = array<i32: 1>} : vector<256x128xi32>
    %3 = vector.broadcast %1 : vector<256x1xi32> to vector<256x128xi32>
    %4 = arith.cmpi eq, %3, %2 : vector<256x128xi32>
    %5 = arith.extui %4 : vector<256x128xi1> to vector<256x128xi32>
    %6 = arith.sitofp %5 : vector<256x128xi32> to vector<256x128xf32>
    %7 = arith.truncf %6 : vector<256x128xf32> to vector<256x128xbf16>
    %c0_3 = arith.constant 0 : index
    %c0_4 = arith.constant 0 : index
    %8 = vector.load %arg2[%c0_3, %c0_4] : memref<256x1xi32, #tpu.memory_space<vmem>>, vector<256x1xi32>
    %9 = tpu.iota {dimensions = array<i32: 1>} : vector<256x128xi32>
    %10 = vector.broadcast %8 : vector<256x1xi32> to vector<256x128xi32>
    %11 = arith.cmpi eq, %10, %9 : vector<256x128xi32>
    %12 = arith.extui %11 : vector<256x128xi1> to vector<256x128xi32>
    %13 = arith.sitofp %12 : vector<256x128xi32> to vector<256x128xf32>
    %14 = arith.truncf %13 : vector<256x128xf32> to vector<256x128xbf16>
    %c0_5 = arith.constant 0 : index
    %c0_6 = arith.constant 0 : index
    %15 = vector.load %arg4[%c0_5, %c0_6] : memref<128x128xbf16, #tpu.memory_space<vmem>>, vector<128x128xbf16>
    %cst = arith.constant dense<0.000000e+00> : vector<256x128xf32>
    %16 = tpu.matmul %7, %15, %cst {dimension_numbers = #tpu.dot_dimension_numbers<[1], [0], [0], [1], [0, 0, 1, 1], [], []>} : vector<256x128xbf16>, vector<128x128xbf16>, vector<256x128xf32> -> vector<256x128xf32>
    %17 = arith.truncf %16 : vector<256x128xf32> to vector<256x128xbf16>
    %c0_7 = arith.constant 0 : index
    %c0_8 = arith.constant 0 : index
    %18 = vector.load %arg5[%c0_7, %c0_8] : memref<128x128xbf16, #tpu.memory_space<vmem>>, vector<128x128xbf16>
    %cst_9 = arith.constant dense<0.000000e+00> : vector<256x128xf32>
    %19 = tpu.matmul %14, %18, %cst_9 {dimension_numbers = #tpu.dot_dimension_numbers<[1], [0], [0], [1], [0, 0, 1, 1], [], []>} : vector<256x128xbf16>, vector<128x128xbf16>, vector<256x128xf32> -> vector<256x128xf32>
    %20 = arith.truncf %19 : vector<256x128xf32> to vector<256x128xbf16>
    %21 = arith.truncf %0 : vector<256x128xf32> to vector<256x128xbf16>
    %22 = tpu.concatenate %17, %20, %21 in 1 : vector<256x128xbf16>, vector<256x128xbf16>, vector<256x128xbf16> -> vector<256x384xbf16>
    %c0_10 = arith.constant 0 : index
    %c0_11 = arith.constant 0 : index
    %23 = vector.load %arg6[%c0_10, %c0_11] : memref<384x256xbf16, #tpu.memory_space<vmem>>, vector<384x256xbf16>
    %cst_12 = arith.constant dense<0.000000e+00> : vector<256x256xf32>
    %24 = tpu.matmul %22, %23, %cst_12 {dimension_numbers = #tpu.dot_dimension_numbers<[1], [0], [0], [1], [0, 0, 1, 1], [], []>} : vector<256x384xbf16>, vector<384x256xbf16>, vector<256x256xf32> -> vector<256x256xf32>
    %c0_13 = arith.constant 0 : index
    %c0_14 = arith.constant 0 : index
    %25 = vector.load %arg7[%c0_13, %c0_14] : memref<1x256xf32, #tpu.memory_space<vmem>>, vector<1x256xf32>
    %26 = vector.broadcast %25 : vector<1x256xf32> to vector<256x256xf32>
    %27 = arith.addf %24, %26 : vector<256x256xf32>
    %28 = arith.negf %27 : vector<256x256xf32>
    %29 = math.exp %28 : vector<256x256xf32>
    %cst_15 = arith.constant 1.000000e+00 : f32
    %30 = vector.broadcast %cst_15 : f32 to vector<256x256xf32>
    %31 = arith.addf %30, %29 : vector<256x256xf32>
    %32 = arith.divf %30, %31 : vector<256x256xf32>
    %33 = arith.mulf %27, %32 : vector<256x256xf32>
    %34 = arith.truncf %33 : vector<256x256xf32> to vector<256x256xbf16>
    %c0_16 = arith.constant 0 : index
    %c0_17 = arith.constant 0 : index
    %35 = vector.load %arg8[%c0_16, %c0_17] : memref<256x128xbf16, #tpu.memory_space<vmem>>, vector<256x128xbf16>
    %cst_18 = arith.constant dense<0.000000e+00> : vector<256x128xf32>
    %36 = tpu.matmul %34, %35, %cst_18 {dimension_numbers = #tpu.dot_dimension_numbers<[1], [0], [0], [1], [0, 0, 1, 1], [], []>} : vector<256x256xbf16>, vector<256x128xbf16>, vector<256x128xf32> -> vector<256x128xf32>
    %c0_19 = arith.constant 0 : index
    %c0_20 = arith.constant 0 : index
    %37 = vector.load %arg9[%c0_19, %c0_20] : memref<1x128xf32, #tpu.memory_space<vmem>>, vector<1x128xf32>
    %38 = vector.broadcast %37 : vector<1x128xf32> to vector<256x128xf32>
    %39 = arith.addf %36, %38 : vector<256x128xf32>
    %cst_21 = arith.constant dense<0.000000e+00> : vector<256xf32>
    %40 = vector.multi_reduction <add>, %39, %cst_21 [1] : vector<256x128xf32> to vector<256xf32>
    %41 = vector.shape_cast %40 : vector<256xf32> to vector<256x1xf32>
    %cst_22 = arith.constant 1.280000e+02 : f32
    %42 = vector.broadcast %cst_22 : f32 to vector<256x1xf32>
    %43 = arith.divf %41, %42 : vector<256x1xf32>
    %44 = vector.broadcast %43 : vector<256x1xf32> to vector<256x128xf32>
    %45 = arith.subf %39, %44 : vector<256x128xf32>
    %46 = arith.mulf %45, %45 : vector<256x128xf32>
    %cst_23 = arith.constant dense<0.000000e+00> : vector<256xf32>
    %47 = vector.multi_reduction <add>, %46, %cst_23 [1] : vector<256x128xf32> to vector<256xf32>
    %48 = vector.shape_cast %47 : vector<256xf32> to vector<256x1xf32>
    %cst_24 = arith.constant 1.280000e+02 : f32
    %49 = vector.broadcast %cst_24 : f32 to vector<256x1xf32>
    %50 = arith.divf %48, %49 : vector<256x1xf32>
    %51 = vector.broadcast %43 : vector<256x1xf32> to vector<256x128xf32>
    %52 = arith.subf %39, %51 : vector<256x128xf32>
    %cst_25 = arith.constant 9.99999974E-6 : f32
    %53 = vector.broadcast %cst_25 : f32 to vector<256x1xf32>
    %54 = arith.addf %50, %53 : vector<256x1xf32>
    %55 = math.rsqrt %54 : vector<256x1xf32>
    %56 = vector.broadcast %55 : vector<256x1xf32> to vector<256x128xf32>
    %57 = arith.mulf %52, %56 : vector<256x128xf32>
    %c0_26 = arith.constant 0 : index
    %c0_27 = arith.constant 0 : index
    %58 = vector.load %arg10[%c0_26, %c0_27] : memref<1x128xf32, #tpu.memory_space<vmem>>, vector<1x128xf32>
    %59 = vector.broadcast %58 : vector<1x128xf32> to vector<256x128xf32>
    %60 = arith.mulf %57, %59 : vector<256x128xf32>
    %c0_28 = arith.constant 0 : index
    %c0_29 = arith.constant 0 : index
    %61 = vector.load %arg11[%c0_28, %c0_29] : memref<1x128xf32, #tpu.memory_space<vmem>>, vector<1x128xf32>
    %62 = vector.broadcast %61 : vector<1x128xf32> to vector<256x128xf32>
    %63 = arith.addf %60, %62 : vector<256x128xf32>
    %64 = arith.addf %63, %0 : vector<256x128xf32>
    %c0_30 = arith.constant 0 : index
    %c0_31 = arith.constant 0 : index
    %65 = vector.load %arg12[%c0_30, %c0_31] : memref<256x128xf32, #tpu.memory_space<vmem>>, vector<256x128xf32>
    tpu.vector_store %arg12[%c0_30, %c0_31], %64 {strides = array<i32>} : memref<256x128xf32, #tpu.memory_space<vmem>>, vector<256x128xf32>,
    return
  }
  func.func @transform_0(%arg0: i32) -> (i32, i32) {
    %c0_i32 = arith.constant 0 : i32
    %c0_i32_0 = arith.constant 0 : i32
    return %arg0, %c0_i32 : i32, i32
  }
  func.func @transform_1(%arg0: i32) -> (i32, i32) {
    %c0_i32 = arith.constant 0 : i32
    %c0_i32_0 = arith.constant 0 : i32
    return %arg0, %c0_i32 : i32, i32
  }
  func.func @transform_2(%arg0: i32) -> (i32, i32) {
    %c0_i32 = arith.constant 0 : i32
    %c0_i32_0 = arith.constant 0 : i32
    return %arg0, %c0_i32 : i32, i32
  }
  func.func @transform_3(%arg0: i32) -> (i32, i32) {
    %c0_i32 = arith.constant 0 : i32
    %c0_i32_0 = arith.constant 0 : i32
    %c0_i32_1 = arith.constant 0 : i32
    return %c0_i32, %c0_i32_0 : i32, i32
  }
  func.func @transform_4(%arg0: i32) -> (i32, i32) {
    %c0_i32 = arith.constant 0 : i32
    %c0_i32_0 = arith.constant 0 : i32
    %c0_i32_1 = arith.constant 0 : i32
    return %c0_i32, %c0_i32_0 : i32, i32
  }
  func.func @transform_5(%arg0: i32) -> (i32, i32) {
    %c0_i32 = arith.constant 0 : i32
    %c0_i32_0 = arith.constant 0 : i32
    %c0_i32_1 = arith.constant 0 : i32
    return %c0_i32, %c0_i32_0 : i32, i32
  }
  func.func @transform_6(%arg0: i32) -> (i32, i32) {
    %c0_i32 = arith.constant 0 : i32
    %c0_i32_0 = arith.constant 0 : i32
    %c0_i32_1 = arith.constant 0 : i32
    return %c0_i32, %c0_i32_0 : i32, i32
  }
  func.func @transform_7(%arg0: i32) -> (i32, i32) {
    %c0_i32 = arith.constant 0 : i32
    %c0_i32_0 = arith.constant 0 : i32
    %c0_i32_1 = arith.constant 0 : i32
    return %c0_i32, %c0_i32_0 : i32, i32
  }
  func.func @transform_8(%arg0: i32) -> (i32, i32) {
    %c0_i32 = arith.constant 0 : i32
    %c0_i32_0 = arith.constant 0 : i32
    %c0_i32_1 = arith.constant 0 : i32
    return %c0_i32, %c0_i32_0 : i32, i32
  }
  func.func @transform_9(%arg0: i32) -> (i32, i32) {
    %c0_i32 = arith.constant 0 : i32
    %c0_i32_0 = arith.constant 0 : i32
    %c0_i32_1 = arith.constant 0 : i32
    return %c0_i32, %c0_i32_0 : i32, i32
  }
  func.func @transform_10(%arg0: i32) -> (i32, i32) {
    %c0_i32 = arith.constant 0 : i32
    %c0_i32_0 = arith.constant 0 : i32
    %c0_i32_1 = arith.constant 0 : i32
    return %c0_i32, %c0_i32_0 : i32, i32
  }
  func.func @transform_11(%arg0: i32) -> (i32, i32) {
    %c0_i32 = arith.constant 0 : i32
    %c0_i32_0 = arith.constant 0 : i32
    return %arg0, %c0_i32 : i32, i32
  }
}

module attributes {stable_mosaic.version = 11 : i64} {
  func.func @_edge_block_kernel(%arg0: i32, %arg1: memref<256x1xi32, #tpu.memory_space<vmem>>, %arg2: memref<256x1xi32, #tpu.memory_space<vmem>>, %arg3: memref<256x128xf32, #tpu.memory_space<vmem>>, %arg4: memref<128x128xbf16, #tpu.memory_space<vmem>>, %arg5: memref<128x128xbf16, #tpu.memory_space<vmem>>, %arg6: memref<384x256xbf16, #tpu.memory_space<vmem>>, %arg7: memref<1x256xf32, #tpu.memory_space<vmem>>, %arg8: memref<256x128xbf16, #tpu.memory_space<vmem>>, %arg9: memref<1x128xf32, #tpu.memory_space<vmem>>, %arg10: memref<1x128xf32, #tpu.memory_space<vmem>>, %arg11: memref<1x128xf32, #tpu.memory_space<vmem>>, %arg12: memref<256x128xf32, #tpu.memory_space<vmem>>) attributes {dimension_semantics = [#tpu.dimension_semantics<parallel>], iteration_bounds = array<i64: 2>, scalar_prefetch = 0 : i64, scratch_operands = 0 : i64, tpu.core_type = #tpu.core_type<tc>, window_params = [{transform_indices = @transform_0, window_bounds = array<i64: 256, 1>}, {transform_indices = @transform_1, window_bounds = array<i64: 256, 1>}, {transform_indices = @transform_2, window_bounds = array<i64: 256, 128>}, {pipeline_mode = #tpu.pipeline_mode<synchronous>, transform_indices = @transform_3, window_bounds = array<i64: 128, 128>}, {pipeline_mode = #tpu.pipeline_mode<synchronous>, transform_indices = @transform_4, window_bounds = array<i64: 128, 128>}, {pipeline_mode = #tpu.pipeline_mode<synchronous>, transform_indices = @transform_5, window_bounds = array<i64: 384, 256>}, {pipeline_mode = #tpu.pipeline_mode<synchronous>, transform_indices = @transform_6, window_bounds = array<i64: 1, 256>}, {pipeline_mode = #tpu.pipeline_mode<synchronous>, transform_indices = @transform_7, window_bounds = array<i64: 256, 128>}, {pipeline_mode = #tpu.pipeline_mode<synchronous>, transform_indices = @transform_8, window_bounds = array<i64: 1, 128>}, {pipeline_mode = #tpu.pipeline_mode<synchronous>, transform_indices = @transform_9, window_bounds = array<i64: 1, 128>}, {pipeline_mode = #tpu.pipeline_mode<synchronous>, transform_indices = @transform_10, window_bounds = array<i64: 1, 128>}, {transform_indices = @transform_11, window_bounds = array<i64: 256, 128>}]} {
    %c0 = arith.constant 0 : index
    %c0_0 = arith.constant 0 : index
    %0 = vector.load %arg3[%c0, %c0_0] : memref<256x128xf32, #tpu.memory_space<vmem>>, vector<256x128xf32>
    %c0_1 = arith.constant 0 : index
    %c0_2 = arith.constant 0 : index
    %1 = vector.load %arg1[%c0_1, %c0_2] : memref<256x1xi32, #tpu.memory_space<vmem>>, vector<256x1xi32>
    %2 = tpu.iota {dimensions = array<i32: 1>} : vector<256x128xi32>
    %3 = vector.broadcast %1 : vector<256x1xi32> to vector<256x128xi32>
    %4 = arith.cmpi eq, %3, %2 : vector<256x128xi32>
    %5 = arith.extui %4 : vector<256x128xi1> to vector<256x128xi32>
    %6 = arith.sitofp %5 : vector<256x128xi32> to vector<256x128xf32>
    %7 = arith.truncf %6 : vector<256x128xf32> to vector<256x128xbf16>
    %c0_3 = arith.constant 0 : index
    %c0_4 = arith.constant 0 : index
    %8 = vector.load %arg2[%c0_3, %c0_4] : memref<256x1xi32, #tpu.memory_space<vmem>>, vector<256x1xi32>
    %9 = tpu.iota {dimensions = array<i32: 1>} : vector<256x128xi32>
    %10 = vector.broadcast %8 : vector<256x1xi32> to vector<256x128xi32>
    %11 = arith.cmpi eq, %10, %9 : vector<256x128xi32>
    %12 = arith.extui %11 : vector<256x128xi1> to vector<256x128xi32>
    %13 = arith.sitofp %12 : vector<256x128xi32> to vector<256x128xf32>
    %14 = arith.truncf %13 : vector<256x128xf32> to vector<256x128xbf16>
    %c0_5 = arith.constant 0 : index
    %c0_6 = arith.constant 0 : index
    %15 = vector.load %arg4[%c0_5, %c0_6] : memref<128x128xbf16, #tpu.memory_space<vmem>>, vector<128x128xbf16>
    %cst = arith.constant dense<0.000000e+00> : vector<256x128xf32>
    %16 = tpu.matmul %7, %15, %cst {dimension_numbers = #tpu.dot_dimension_numbers<[1], [0], [0], [1], [0, 0, 1, 1], [], []>} : vector<256x128xbf16>, vector<128x128xbf16>, vector<256x128xf32> -> vector<256x128xf32>
    %17 = arith.truncf %16 : vector<256x128xf32> to vector<256x128xbf16>
    %c0_7 = arith.constant 0 : index
    %c0_8 = arith.constant 0 : index
    %18 = vector.load %arg5[%c0_7, %c0_8] : memref<128x128xbf16, #tpu.memory_space<vmem>>, vector<128x128xbf16>
    %cst_9 = arith.constant dense<0.000000e+00> : vector<256x128xf32>
    %19 = tpu.matmul %14, %18, %cst_9 {dimension_numbers = #tpu.dot_dimension_numbers<[1], [0], [0], [1], [0, 0, 1, 1], [], []>} : vector<256x128xbf16>, vector<128x128xbf16>, vector<256x128xf32> -> vector<256x128xf32>
    %20 = arith.truncf %19 : vector<256x128xf32> to vector<256x128xbf16>
    %21 = arith.truncf %0 : vector<256x128xf32> to vector<256x128xbf16>
    %22 = tpu.concatenate %17, %20, %21 in 1 : vector<256x128xbf16>, vector<256x128xbf16>, vector<256x128xbf16> -> vector<256x384xbf16>
    %c0_10 = arith.constant 0 : index
    %c0_11 = arith.constant 0 : index
    %23 = vector.load %arg6[%c0_10, %c0_11] : memref<384x256xbf16, #tpu.memory_space<vmem>>, vector<384x256xbf16>
    %cst_12 = arith.constant dense<0.000000e+00> : vector<256x256xf32>
    %24 = tpu.matmul %22, %23, %cst_12 {dimension_numbers = #tpu.dot_dimension_numbers<[1], [0], [0], [1], [0, 0, 1, 1], [], []>} : vector<256x384xbf16>, vector<384x256xbf16>, vector<256x256xf32> -> vector<256x256xf32>
    %c0_13 = arith.constant 0 : index
    %c0_14 = arith.constant 0 : index
    %25 = vector.load %arg7[%c0_13, %c0_14] : memref<1x256xf32, #tpu.memory_space<vmem>>, vector<1x256xf32>
    %26 = vector.broadcast %25 : vector<1x256xf32> to vector<256x256xf32>
    %27 = arith.addf %24, %26 : vector<256x256xf32>
    %28 = arith.negf %27 : vector<256x256xf32>
    %29 = math.exp %28 : vector<256x256xf32>
    %cst_15 = arith.constant 1.000000e+00 : f32
    %30 = vector.broadcast %cst_15 : f32 to vector<256x256xf32>
    %31 = arith.addf %30, %29 : vector<256x256xf32>
    %32 = arith.divf %30, %31 : vector<256x256xf32>
    %33 = arith.mulf %27, %32 : vector<256x256xf32>
    %34 = arith.truncf %33 : vector<256x256xf32> to vector<256x256xbf16>
    %c0_16 = arith.constant 0 : index
    %c0_17 = arith.constant 0 : index
    %35 = vector.load %arg8[%c0_16, %c0_17] : memref<256x128xbf16, #tpu.memory_space<vmem>>, vector<256x128xbf16>
    %cst_18 = arith.constant dense<0.000000e+00> : vector<256x128xf32>
    %36 = tpu.matmul %34, %35, %cst_18 {dimension_numbers = #tpu.dot_dimension_numbers<[1], [0], [0], [1], [0, 0, 1, 1], [], []>} : vector<256x256xbf16>, vector<256x128xbf16>, vector<256x128xf32> -> vector<256x128xf32>
    %c0_19 = arith.constant 0 : index
    %c0_20 = arith.constant 0 : index
    %37 = vector.load %arg9[%c0_19, %c0_20] : memref<1x128xf32, #tpu.memory_space<vmem>>, vector<1x128xf32>
    %38 = vector.broadcast %37 : vector<1x128xf32> to vector<256x128xf32>
    %39 = arith.addf %36, %38 : vector<256x128xf32>
    %cst_21 = arith.constant dense<0.000000e+00> : vector<256xf32>
    %40 = vector.multi_reduction <add>, %39, %cst_21 [1] : vector<256x128xf32> to vector<256xf32>
    %41 = vector.shape_cast %40 : vector<256xf32> to vector<256x1xf32>
    %cst_22 = arith.constant 1.280000e+02 : f32
    %42 = vector.broadcast %cst_22 : f32 to vector<256x1xf32>
    %43 = arith.divf %41, %42 : vector<256x1xf32>
    %44 = vector.broadcast %43 : vector<256x1xf32> to vector<256x128xf32>
    %45 = arith.subf %39, %44 : vector<256x128xf32>
    %46 = arith.mulf %45, %45 : vector<256x128xf32>
    %cst_23 = arith.constant dense<0.000000e+00> : vector<256xf32>
    %47 = vector.multi_reduction <add>, %46, %cst_23 [1] : vector<256x128xf32> to vector<256xf32>
    %48 = vector.shape_cast %47 : vector<256xf32> to vector<256x1xf32>
    %cst_24 = arith.constant 1.280000e+02 : f32
    %49 = vector.broadcast %cst_24 : f32 to vector<256x1xf32>
    %50 = arith.divf %48, %49 : vector<256x1xf32>
    %51 = vector.broadcast %43 : vector<256x1xf32> to vector<256x128xf32>
    %52 = arith.subf %39, %51 : vector<256x128xf32>
    %cst_25 = arith.constant 9.99999974E-6 : f32
    %53 = vector.broadcast %cst_25 : f32 to vector<256x1xf32>
    %54 = arith.addf %50, %53 : vector<256x1xf32>
    %55 = math.rsqrt %54 : vector<256x1xf32>
    %56 = vector.broadcast %55 : vector<256x1xf32> to vector<256x128xf32>
    %57 = arith.mulf %52, %56 : vector<256x128xf32>
    %c0_26 = arith.constant 0 : index
    %c0_27 = arith.constant 0 : index
    %58 = vector.load %arg10[%c0_26, %c0_27] : memref<1x128xf32, #tpu.memory_space<vmem>>, vector<1x128xf32>
    %59 = vector.broadcast %58 : vector<1x128xf32> to vector<256x128xf32>
    %60 = arith.mulf %57, %59 : vector<256x128xf32>
    %c0_28 = arith.constant 0 : index
    %c0_29 = arith.constant 0 : index
    %61 = vector.load %arg11[%c0_28, %c0_29] : memref<1x128xf32, #tpu.memory_space<vmem>>, vector<1x128xf32>
    %62 = vector.broadcast %61 : vector<1x128xf32> to vector<256x128xf32>
    %63 = arith.addf %60, %62 : vector<256x128xf32>
    %64 = arith.addf %63, %0 : vector<256x128xf32>
    %c0_30 = arith.constant 0 : index
    %c0_31 = arith.constant 0 : index
    %65 = vector.load %arg12[%c0_30, %c0_31] : memref<256x128xf32, #tpu.memory_space<vmem>>, vector<256x128xf32>
    tpu.vector_store %arg12[%c0_30, %c0_31], %64 {strides = array<i32>} : memref<256x128xf32, #tpu.memory_space<vmem>>, vector<256x128xf32>,
    return
  }
  func.func @transform_0(%arg0: i32) -> (i32, i32) {
    %c0_i32 = arith.constant 0 : i32
    %c0_i32_0 = arith.constant 0 : i32
    return %arg0, %c0_i32 : i32, i32
  }
  func.func @transform_1(%arg0: i32) -> (i32, i32) {
    %c0_i32 = arith.constant 0 : i32
    %c0_i32_0 = arith.constant 0 : i32
    return %arg0, %c0_i32 : i32, i32
  }
  func.func @transform_2(%arg0: i32) -> (i32, i32) {
    %c0_i32 = arith.constant 0 : i32
    %c0_i32_0 = arith.constant 0 : i32
    return %arg0, %c0_i32 : i32, i32
  }
  func.func @transform_3(%arg0: i32) -> (i32, i32) {
    %c0_i32 = arith.constant 0 : i32
    %c0_i32_0 = arith.constant 0 : i32
    %c0_i32_1 = arith.constant 0 : i32
    return %c0_i32, %c0_i32_0 : i32, i32
  }
  func.func @transform_4(%arg0: i32) -> (i32, i32) {
    %c0_i32 = arith.constant 0 : i32
    %c0_i32_0 = arith.constant 0 : i32
    %c0_i32_1 = arith.constant 0 : i32
    return %c0_i32, %c0_i32_0 : i32, i32
  }
  func.func @transform_5(%arg0: i32) -> (i32, i32) {
    %c0_i32 = arith.constant 0 : i32
    %c0_i32_0 = arith.constant 0 : i32
    %c0_i32_1 = arith.constant 0 : i32
    return %c0_i32, %c0_i32_0 : i32, i32
  }
  func.func @transform_6(%arg0: i32) -> (i32, i32) {
    %c0_i32 = arith.constant 0 : i32
    %c0_i32_0 = arith.constant 0 : i32
    %c0_i32_1 = arith.constant 0 : i32
    return %c0_i32, %c0_i32_0 : i32, i32
  }
  func.func @transform_7(%arg0: i32) -> (i32, i32) {
    %c0_i32 = arith.constant 0 : i32
    %c0_i32_0 = arith.constant 0 : i32
    %c0_i32_1 = arith.constant 0 : i32
    return %c0_i32, %c0_i32_0 : i32, i32
  }
  func.func @transform_8(%arg0: i32) -> (i32, i32) {
    %c0_i32 = arith.constant 0 : i32
    %c0_i32_0 = arith.constant 0 : i32
    %c0_i32_1 = arith.constant 0 : i32
    return %c0_i32, %c0_i32_0 : i32, i32
  }
  func.func @transform_9(%arg0: i32) -> (i32, i32) {
    %c0_i32 = arith.constant 0 : i32
    %c0_i32_0 = arith.constant 0 : i32
    %c0_i32_1 = arith.constant 0 : i32
    return %c0_i32, %c0_i32_0 : i32, i32
  }
  func.func @transform_10(%arg0: i32) -> (i32, i32) {
    %c0_i32 = arith.constant 0 : i32
    %c0_i32_0 = arith.constant 0 : i32
    %c0_i32_1 = arith.constant 0 : i32
    return %c0_i32, %c0_i32_0 : i32, i32
  }
  func.func @transform_11(%arg0: i32) -> (i32, i32) {
    %c0_i32 = arith.constant 0 : i32
    %c0_i32_0 = arith.constant 0 : i32
    return %arg0, %c0_i32 : i32, i32
  }
}

</mosaic_0001>

<bundles_post_ra>
// kernel: tpu_custom_call.1
= control target key start
LH: loop header
LB: loop body
LE: loop exit
PB: predicated region body
PF: predicated region fallthrough
CT: control target
= control target key end

     0   :  { %s9171_s0 = inlined_call_operand.vmem [shape: s32[512,1], index: 0, kind: input, shape index: {}]   ;;  %s9172_s1 = inlined_call_operand.vmem [shape: s32[512,1], index: 1, kind: input, shape index: {}]   ;;  %s9173_s2 = inlined_call_operand.vmem [shape: f32[512,128], index: 2, kind: input, shape index: {}]   ;;  %s9174_s3 = inlined_call_operand.hbm [shape: bf16[128,128], index: 3, kind: input, shape index: {}]   ;;  %s9175_s4 = inlined_call_operand.hbm [shape: bf16[128,128], index: 4, kind: input, shape index: {}]   ;;  %s9176_s5 = inlined_call_operand.vmem [shape: bf16[384,256], index: 5, kind: input, shape index: {}]   ;;  %s9177_s6 = inlined_call_operand.vmem [shape: f32[1,256], index: 6, kind: input, shape index: {}]   ;;  %s9178_s7 = inlined_call_operand.vmem [shape: bf16[256,128], index: 7, kind: input, shape index: {}]   ;;  %s9179_s8 = inlined_call_operand.vmem [shape: f32[1,128], index: 8, kind: input, shape index: {}]   ;;  %s9180_s9 = inlined_call_operand.vmem [shape: f32[1,128], index: 9, kind: input, shape index: {}]   ;;  %s9181_s10 = inlined_call_operand.hbm [shape: f32[1,128], index: 10, kind: input, shape index: {}]   ;;  %s9182_s11 = inlined_call_operand.hbm [shape: f32[512,128], index: 11, kind: output, shape index: {}]  }
   0x1   :  { %9201 = sst [smem:[#allocation31_spill]] %s9174_s3 }
   0x2   :  { %9202 = sst [smem:[#allocation32_spill]] %s9175_s4 }
   0x3   :  { %16 = vsyncpa [#allocation3], 0 }
   0x4   :  { %17 = vsyncpa [#allocation6], 0 }
   0x5   :  { %18 = vsyncpa [#allocation4], 0 }
   0x6   :  { %20 = vsyncpa [#allocation4 + $0x1], 0  ;;  %s6354_s17 = smov 0   ;;  %s6356_s18 = smov 0  }
   0x7   :  { %s6358_s19 = smov 0   ;;  %s6360_s20 = smov 0  }
   0x8 LB: > { %9203 = sst [smem:[#allocation12_spill]] %s6278_s19  ;;  %s6375_s21 = sadd.s32 4294967295, %s6282_s20   ;;  %s6282_s20 = sphi %s6360_s20, %s9314_s20   ;;  %s6278_s19 = sphi %s6358_s19, %s9316_s19   ;;  %s6274_s18 = sphi %s6356_s18, %s9318_s18   ;;  %s6270_s17 = sphi %s6354_s17, %s9317_s17  }
   0x9   : > { %s5050_s22 = sadd.s32 4294967294, %s6282_s20   ;;  %s6379_s23 = sadd.s32 1, %s6282_s20  }
   0xa   : > { %9204 = sst [smem:[#allocation13_spill]] %s6379_s23  ;;  %s279_s24 = sadd.s32 1, %s6278_s19 }
   0xb   : > { %s276_s25 = ssub.s32 %s6282_s20, %s6379_s23  ;;  %p289_p0 = scmp.ne.s32.totalorder %s6278_s19, %s6274_s18 }
   0xc   : > { %p277_p1 = scmp.eq.s32.totalorder %s276_s25, 0  ;;  %p290_p2 = scmp.eq.s32.totalorder %s6375_s21, 1 }
   0xd   : > { %p295_p3 = scmp.ne.s32.totalorder %s6274_s18, %s6270_s17  ;;  %p296_p4 = scmp.eq.s32.totalorder %s5050_s22, 1 }
   0xe   : > { %s6390_s26 = scalar_select %p277_p1, %s6278_s19, %s279_s24  }
   0xf   : > { %p6392_p5 = por %p290_p2, %p289_p0  ;;  %p6396_p6 = por %p296_p4, %p295_p3 }
  0x10   : > { %9205 = sst [smem:[#allocation14_spill]] %s6390_s26  ;;  %p5051_p7 = scmp.ge.s32.totalorder %s6282_s20, 1 }
  0x11   : > { %p303_p8 = scmp.lt.s32.totalorder %s6282_s20, 3  ;;  %p5709_p9 = scmp.eq.s32.totalorder %s6375_s21, 0 }
  0x12   : > { %s9209_s4 = sld [smem:[#allocation32_spill]]  ;;  %s6284_s24 = smov [#allocation5]  }
  0x13   : > { %p6403_p10 = pnand %p5051_p7, %p303_p8  ;;  %s9210_s3 = sld [smem:[#allocation31_spill]] }
  0x14   : > { %s330_s25 = sshll.u32 %s6284_s24, 4  ;;  %s6285_s30 = smov 64   ;;  %s331_s25 = int_to_ptr.vmem [resolvable:$true] %s330_s25 }
  0x15   : > { %p5695_p11 = pneg %p6403_p10  ;;  %s6286_s12 = smov 4  }
  0x16   : > { %s6288_s19 = smov [#allocation7]  }
  0x17   : > { %p6417_p12 = pnand %p5709_p9, %p5695_p11  ;;  %s360_s23 = sshll.u32 %s6288_s19, 4  ;;  %s361_s23 = int_to_ptr.vmem [resolvable:$true] %s360_s23 }
  0x18   : > { %s328_s13 = sshll.u32 %s9209_s4, 4  ;;  %s6287_s4 = smov [#allocation2]   ;;  %s329_s13 = int_to_ptr.hbm [resolvable:$true] %s328_s13 }
  0x19   : > { %s314_s16 = sshll.u32 %s9210_s3, 4  ;;  %s316_s26 = sshll.u32 %s6287_s4, 4  ;;  %s315_s16 = int_to_ptr.hbm [resolvable:$true] %s314_s16  ;;  %s317_s26 = int_to_ptr.vmem [resolvable:$true] %s316_s26 }
  0x1a   : > { %5701 = dma.hbm_to_vmem [thread:$0]  (!%p6417_p12), %s329_s13, 1024, %s331_s25, [#allocation6], %s6285_s30, %s6285_s30, %s6286_s12  }
  0x1b   : > { %s358_s3 = sshll.u32 %s9181_s10, 4  ;;  %400 = sbr.rel (%p6403_p10) target bundleno = 1424 (0x590), region = 64  ;;  %s359_s3 = int_to_ptr.hbm [resolvable:$true] %s358_s3 }
  0x1c   : > { %5698 = dma.hbm_to_vmem [thread:$0]  (!%p6417_p12), %s315_s16, 1024, %s317_s26, [#allocation3], %s6285_s30, %s6285_s30, %s6286_s12  }
  0x1d   : > { %5704 = dma.hbm_to_vmem [thread:$0]  (!%p6417_p12), %s359_s3, 16, %s361_s23, [#allocation6]  }
  0x20   : > { %6257 = dma.done.wait (%p5709_p9), [#allocation3], 1024  }
  0x21   : > { %6259 = vsyncadd (%p5709_p9), [#allocation3], 4294966272 }
  0x22   : > { %6261 = dma.done.wait (%p5709_p9), [#allocation6], 1040  }
  0x23   : > { %6263 = vsyncadd (%p5709_p9), [#allocation6], 4294966256  ;;  %s5061_s4 = sshll.u32 %s6375_s21, 5  ;;  %v6289_v0 = vmov 0   ;;  %v5591_v22 = vld [vmem:[#allocation2 + $0x38] sm:$0xff]  ;;  %v5590_v23 = vld [vmem:[#allocation2 + $0x30] sm:$0xff]  ;;  %v544_v53 = vlaneseq }
  0x24   : > { %5760 = vset.pattern.permute.xlu2 %v6289_v0  ;;  %5759 = vset.pattern.permute.xlu1 %v6289_v0  ;;  %p462_p13 = scmp.lt.s32.totalorder %s5061_s4, 63  ;;  %v5589_v27 = vld [vmem:[#allocation2 + $0x28] sm:$0xff]  ;;  %v5588_v28 = vld [vmem:[#allocation2 + $0x20] sm:$0xff]  ;;  %v5599_v29 = vld [vmem:[#allocation5 + $0x38] sm:$0xff]  ;;  %v6290_v63 = vmov 1.0|1.0  }
  0x25   : > { %5758 = vset.pattern.permute.xlu0 %v6289_v0  ;;  %5665 = vmatpush.bf16.msra.mxu2 %v5591_v22  ;;  %v5587_v33 = vld [vmem:[#allocation2 + $0x18] sm:$0xff]  ;;  %v5598_v34 = vld [vmem:[#allocation5 + $0x30] sm:$0xff]  ;;  %v5597_v37 = vld [vmem:[#allocation5 + $0x28] sm:$0xff]  ;;  %v6492_v56 = vand.u32 127, %v544_v53  ;;  %s458_s22 = sand.u32 1, %s6274_s18   ;;  %s5664_s12 = sshll.u32 %s6375_s21, 8 }
  0x26   : > { %s9320_s4 = smov (!%p462_p13, %s5061_s4), 63  ;;  %1058 = vmatpush.bf16.msra.mxu0 %v5591_v22  ;;  %1243 = vmatpush.bf16.msra.mxu1 %v5599_v29  ;;  %v5586_v36 = vld [vmem:[#allocation2 + $0x10] sm:$0xff]  ;;  %v5585_v40 = vld [vmem:[#allocation2 + $0x8] sm:$0xff]  ;;  %v5596_v41 = vld [vmem:[#allocation5 + $0x20] sm:$0xff]  ;;  %s5060_s24 = sshll.u32 %s458_s22, 8 }
  0x27   : > { %s6441_s3 = sshll.u32 %s9320_s4, 3  ;;  %5673 = vmatpush.bf16.msra.mxu3 %v5599_v29  ;;  %v5584_v42 = vld [vmem:[#allocation2] sm:$0xff]  ;;  %v5595_v43 = vld [vmem:[#allocation5 + $0x18] sm:$0xff]  ;;  %v5594_v47 = vld [vmem:[#allocation5 + $0x10] sm:$0xff]  ;;  %s8866_s25 = scalar_lea.vmem [#allocation8], %s5060_s24 }
  0x28   : > { %s6447_s26 = scalar_lea.vmem %s9172_s1, %s6441_s3  ;;  %s6454_s16 = scalar_lea.vmem %s9171_s0, %s6441_s3  ;;  %v5593_v48 = vld [vmem:[#allocation5 + $0x8] sm:$0xff]  ;;  %v5592_v52 = vld [vmem:[#allocation5] sm:$0xff] }
  0x29   : > { %v754_v1 = vld [vmem:[%s6447_s26] sm:$0xff]  ;;  %v755_v4 = vld [vmem:[%s6447_s26 + $0x8] sm:$0xff]  ;;  %v514_v8 = vld [vmem:[%s6454_s16 + $0x10] sm:$0xff]  ;;  %5666 = vmatpush.bf16.msra.mxu2 %v5590_v23  ;;  %s6820_s14 = scalar_lea.vmem %s9173_s2, %s6441_s3  ;;  %s4929_s4 = scalar_lea.hbm %s9182_s11, %s5664_s12 }
  0x2a   : > { %787 = vperm.xlu1 %5759, %v754_v1   ;;  %v528_v2 = vld [vmem:[%s6454_s16 + $0x80] sm:$0xff]  ;;  %v529_v5 = vld [vmem:[%s6454_s16 + $0x88] sm:$0xff]  ;;  %v756_v10 = vld [vmem:[%s6447_s26 + $0x10] sm:$0xff]  ;;  %1059 = vmatpush.bf16.msra.mxu0 %v5590_v23  ;;  %s4930_s21 = sshll.u32 %s8866_s25, 4  ;;  %s4932_s19 = sshll.u32 %s4929_s4, 4  ;;  %s4931_s21 = int_to_ptr.vmem [resolvable:$true] %s4930_s21  ;;  %s4933_s19 = int_to_ptr.hbm [resolvable:$true] %s4932_s19 }
  0x2b   : > { %v512_v3 = vld [vmem:[%s6454_s16] sm:$0xff]  ;;  %595 = vperm.xlu2 %5760, %v528_v2   ;;  %v513_v6 = vld [vmem:[%s6454_s16 + $0x8] sm:$0xff]  ;;  %v757_v11 = vld [vmem:[%s6447_s26 + $0x18] sm:$0xff]  ;;  %1244 = vmatpush.bf16.msra.mxu1 %v5598_v34  ;;  %s4918_s3 = scalar_lea.sflag [#allocation4], %s458_s22  ;;  %s6226_s23 = sshra.s32 %s4933_s19, 4  ;;  %s6227_s23 = int_to_ptr.hbm [resolvable:$true] %s6226_s23 }
  0x2c   : > { %547 = vperm.xlu0 %5758, %v512_v3   ;;  %v771_v7 = vld [vmem:[%s6447_s26 + $0x88] sm:$0xff]  ;;  %v770_v9 = vld [vmem:[%s6447_s26 + $0x80] sm:$0xff]  ;;  %v515_v12 = vld [vmem:[%s6454_s16 + $0x18] sm:$0xff]  ;;  %5674 = vmatpush.bf16.msra.mxu3 %v5598_v34  ;;  %s6228_s29 = scalar_lea.hbm %s6227_s23, 256  ;;  %s6232_s30 = scalar_lea.hbm %s9182_s11, 512 }
  0x2d   : > { %v531_v13 = vld [vmem:[%s6454_s16 + $0x98] sm:$0xff]  ;;  %v772_v14 = vld [vmem:[%s6447_s26 + $0x90] sm:$0xff]  ;;  %v516_v16 = vld [vmem:[%s6454_s16 + $0x20] sm:$0xff]  ;;  %5667 = vmatpush.bf16.msra.mxu2 %v5589_v27  ;;  %p6229_p0 = scmp.ne.s32.totalorder %s6227_s23, %s6228_s29  ;;  %p6233_p3 = scmp.lt.s32.totalorder %s6227_s23, %s9182_s11 }
  0x2e   : > { %v530_v15 = vld [vmem:[%s6454_s16 + $0x90] sm:$0xff]  ;;  %v517_v17 = vld [vmem:[%s6454_s16 + $0x28] sm:$0xff]  ;;  %v773_v18 = vld [vmem:[%s6447_s26 + $0x98] sm:$0xff]  ;;  %1060 = vmatpush.bf16.msra.mxu0 %v5589_v27  ;;  %p6234_p4 = scmp.lt.s32.totalorder %s6232_s30, %s6228_s29 }
  0x2f   : > { %v759_v19 = vld [vmem:[%s6447_s26 + $0x28] sm:$0xff]  ;;  %v532_v20 = vld [vmem:[%s6454_s16 + $0xa0] sm:$0xff]  ;;  %v519_v30 = vld [vmem:[%s6454_s16 + $0x38] sm:$0xff]  ;;  %1245 = vmatpush.bf16.msra.mxu1 %v5597_v37  ;;  %p6230_p1 = pnand %p6229_p0, %p6392_p5 }
  0x30   : > { %v758_v21 = vld [vmem:[%s6447_s26 + $0x20] sm:$0xff]  ;;  %v775_v25 = vld [vmem:[%s6447_s26 + $0xa8] sm:$0xff]  ;;  %v760_v31 = vld [vmem:[%s6447_s26 + $0x30] sm:$0xff]  ;;  %5675 = vmatpush.bf16.msra.mxu3 %v5597_v37  ;;  %p6235_p7 = por %p6234_p4, %p6233_p3 }
  0x31   : > { %v774_v24 = vld [vmem:[%s6447_s26 + $0xa0] sm:$0xff]  ;;  %v533_v26 = vld [vmem:[%s6454_s16 + $0xa8] sm:$0xff]  ;;  %v518_v32 = vld [vmem:[%s6454_s16 + $0x30] sm:$0xff]  ;;  %5668 = vmatpush.bf16.msra.mxu2 %v5588_v28  ;;  %p6231_p2 = pneg %p6230_p1 }
  0x32   : > { %790 = vperm.xlu1 %5759, %v755_v4   ;;  %1061 = vmatpush.bf16.msra.mxu0 %v5588_v28  ;;  %v534_v35 = vld [vmem:[%s6454_s16 + $0xb0] sm:$0xff]  ;;  %v535_v38 = vld [vmem:[%s6454_s16 + $0xb8] sm:$0xff]  ;;  %v520_v45 = vld [vmem:[%s6454_s16 + $0x40] sm:$0xff] }
  0x33   : > { %598 = vperm.xlu2 %5760, %v529_v5   ;;  %v761_v39 = vld [vmem:[%s6447_s26 + $0x38] sm:$0xff]  ;;  %1246 = vmatpush.bf16.msra.mxu1 %v5596_v41  ;;  %v776_v46 = vld [vmem:[%s6447_s26 + $0xb0] sm:$0xff]  ;;  %v762_v49 = vld [vmem:[%s6447_s26 + $0x40] sm:$0xff]  ;;  %p6236_p8 = pnand %p6235_p7, %p6231_p2 }
  0x34   : > { %550 = vperm.xlu0 %5758, %v513_v6   ;;  %5676 = vmatpush.bf16.msra.mxu3 %v5596_v41  ;;  %v777_v44 = vld [vmem:[%s6447_s26 + $0xb8] sm:$0xff]  ;;  %v763_v50 = vld [vmem:[%s6447_s26 + $0x48] sm:$0xff]  ;;  %v778_v57 = vld [vmem:[%s6447_s26 + $0xc0] sm:$0xff] }
  0x35   : > { %5669 = vmatpush.bf16.msra.mxu2 %v5587_v33  ;;  %v521_v51 = vld [vmem:[%s6454_s16 + $0x48] sm:$0xff]  ;;  %v536_v58 = vld [vmem:[%s6454_s16 + $0xc0] sm:$0xff]  ;;  %v522_v60 = vld [vmem:[%s6454_s16 + $0x50] sm:$0xff] }
  0x36   : > { %1062 = vmatpush.bf16.msra.mxu0 %v5587_v33  ;;  %v537_v55 = vld [vmem:[%s6454_s16 + $0xc8] sm:$0xff]  ;;  %v523_v61 = vld [vmem:[%s6454_s16 + $0x58] sm:$0xff]  ;;  %v538_v2 = vld [vmem:[%s6454_s16 + $0xd0] sm:$0xff] }
  0x37   : > { %1247 = vmatpush.bf16.msra.mxu1 %v5595_v43  ;;  %v779_v62 = vld [vmem:[%s6447_s26 + $0xc8] sm:$0xff]  ;;  %v765_v1 = vld [vmem:[%s6447_s26 + $0x58] sm:$0xff]  ;;  %v764_v3 = vld [vmem:[%s6447_s26 + $0x50] sm:$0xff] }
  0x38   : > { %5677 = vmatpush.bf16.msra.mxu3 %v5595_v43  ;;  %v5317_v27 = vld [vmem:[%s9176_s5 + $0x70] sm:$0xf]  ;;  %v5615_v28 = vld [vmem:[%s9176_s5 + $0x74] sm:$0xf0]  ;;  %v782_v29 = vld [vmem:[%s6447_s26 + $0xe0] sm:$0xff] }
  0x39   : > { %5670 = vmatpush.bf16.msra.mxu2 %v5586_v36  ;;  %v768_v37 = vld [vmem:[%s6447_s26 + $0x70] sm:$0xff]  ;;  %v543_v43 = vld [vmem:[%s6454_s16 + $0xf8] sm:$0xff] }
  0x3a   : > { %838 = vperm.xlu1 %5759, %v771_v7   ;;  %1063 = vmatpush.bf16.msra.mxu0 %v5586_v36  ;;  %v780_v7 = vld [vmem:[%s6447_s26 + $0xd0] sm:$0xff] }
  0x3b   : > { %553 = vperm.xlu2 %5760, %v514_v8   ;;  %1248 = vmatpush.bf16.msra.mxu1 %v5594_v47  ;;  %v781_v8 = vld [vmem:[%s6447_s26 + $0xd8] sm:$0xff] }
  0x3c   : > { %835 = vperm.xlu0 %5758, %v770_v9   ;;  %5678 = vmatpush.bf16.msra.mxu3 %v5594_v47  ;;  %v539_v9 = vld [vmem:[%s6454_s16 + $0xd8] sm:$0xff]  ;;  %v542_v47 = vld [vmem:[%s6454_s16 + $0xf0] sm:$0xff] }
  0x3d   : > { %5671 = vmatpush.bf16.msra.mxu2 %v5585_v40 }
  0x3e   : > { %1064 = vmatpush.bf16.msra.mxu0 %v5585_v40 }
  0x3f   : > { %1249 = vmatpush.bf16.msra.mxu1 %v5593_v48 }
  0x40   : > { %5679 = vmatpush.bf16.msra.mxu3 %v5593_v48 }
  0x41   : > { %5672 = vmatpush.bf16.msra.mxu2 %v5584_v42 }
  0x42   : > { %793 = vperm.xlu1 %5759, %v756_v10   ;;  %1065 = vmatpush.bf16.msra.mxu0 %v5584_v42 }
  0x43   : > { %796 = vperm.xlu2 %5760, %v757_v11   ;;  %1250 = vmatpush.bf16.msra.mxu1 %v5592_v52 }
  0x44   : > { %556 = vperm.xlu0 %5758, %v515_v12   ;;  %5680 = vmatpush.bf16.msra.mxu3 %v5592_v52 }
  0x4a   : > { %604 = vperm.xlu1 %5759, %v531_v13   ;;  %v525_v13 = vld [vmem:[%s6454_s16 + $0x68] sm:$0xff] }
  0x4b   : > { %841 = vperm.xlu2 %5760, %v772_v14   ;;  %v766_v14 = vld [vmem:[%s6447_s26 + $0x60] sm:$0xff] }
  0x4c   : > { %601 = vperm.xlu0 %5758, %v530_v15   ;;  %v524_v15 = vld [vmem:[%s6454_s16 + $0x60] sm:$0xff] }
  0x52   : > { %559 = vperm.xlu1 %5759, %v516_v16  }
  0x53   : > { %562 = vperm.xlu2 %5760, %v517_v17  }
  0x54   : > { %844 = vperm.xlu0 %5758, %v773_v18  }
  0x5a   : > { %802 = vperm.xlu1 %5759, %v759_v19   ;;  %v540_v19 = vld [vmem:[%s6454_s16 + $0xe0] sm:$0xff] }
  0x5b   : > { %607 = vperm.xlu2 %5760, %v532_v20   ;;  %v541_v20 = vld [vmem:[%s6454_s16 + $0xe8] sm:$0xff] }
  0x5c   : > { %799 = vperm.xlu0 %5758, %v758_v21   ;;  %v767_v21 = vld [vmem:[%s6447_s26 + $0x68] sm:$0xff] }
  0x62   : > { %847 = vperm.xlu1 %5759, %v774_v24  }
  0x63   : > { %850 = vperm.xlu2 %5760, %v775_v25   ;;  %v783_v25 = vld [vmem:[%s6447_s26 + $0xe8] sm:$0xff] }
  0x64   : > { %610 = vperm.xlu0 %5758, %v533_v26   ;;  %v526_v26 = vld [vmem:[%s6454_s16 + $0x70] sm:$0xff] }
  0x6a   : > { %568 = vperm.xlu1 %5759, %v519_v30   ;;  %v5318_v30 = vor.u32 %v5615_v28, %v5317_v27 }
  0x6b   : > { %805 = vperm.xlu2 %5760, %v760_v31   ;;  %v5381_v31 = vld [vmem:[%s9176_s5 + $0xf0] sm:$0xf] }
  0x6c   : > { %565 = vperm.xlu0 %5758, %v518_v32   ;;  %v5631_v32 = vld [vmem:[%s9176_s5 + $0xf4] sm:$0xf0]  ;;  %1978 = vmatpush.bf16.msrb.mxu2 %v5318_v30 }
  0x6d   : > { %v5382_v33 = vor.u32 %v5631_v32, %v5381_v31  ;;  %v5445_v31 = vld [vmem:[%s9176_s5 + $0x170] sm:$0xf]  ;;  %v5647_v32 = vld [vmem:[%s9176_s5 + $0x174] sm:$0xf0] }
  0x6f   : > { %2067 = vmatpush.bf16.msrb.mxu3 %v5382_v33  ;;  %v5277_v33 = vld [vmem:[%s9176_s5 + $0x20] sm:$0xf] }
  0x72   : > { %613 = vperm.xlu1 %5759, %v534_v35  }
  0x73   : > { %616 = vperm.xlu2 %5760, %v535_v38   ;;  %v769_v38 = vld [vmem:[%s6447_s26 + $0x78] sm:$0xff] }
  0x74   : > { %808 = vperm.xlu0 %5758, %v761_v39   ;;  %v527_v39 = vld [vmem:[%s6454_s16 + $0x78] sm:$0xff] }
  0x7a   : > { %856 = vperm.xlu1 %5759, %v777_v44   ;;  %v784_v44 = vld [vmem:[%s6447_s26 + $0xf0] sm:$0xff] }
  0x7b   : > { %571 = vperm.xlu2 %5760, %v520_v45   ;;  %v5309_v45 = vld [vmem:[%s9176_s5 + $0x60] sm:$0xf] }
  0x7c   : > { %853 = vperm.xlu0 %5758, %v776_v46   ;;  %v5613_v46 = vld [vmem:[%s9176_s5 + $0x64] sm:$0xf0] }
  0x7d   : > { %v5310_v48 = vor.u32 %v5613_v46, %v5309_v45  ;;  %v5645_v45 = vld [vmem:[%s9176_s5 + $0x164] sm:$0xf0]  ;;  %v5612_v46 = vld [vmem:[%s9176_s5 + $0x64] sm:$0xf] }
  0x7f   : > { %1979 = vmatpush.bf16.msrb.mxu2 %v5310_v48 }
  0x82   : > { %811 = vperm.xlu1 %5759, %v762_v49   ;;  %v5373_v49 = vld [vmem:[%s9176_s5 + $0xe0] sm:$0xf] }
  0x83   : > { %814 = vperm.xlu2 %5760, %v763_v50   ;;  %v5629_v50 = vld [vmem:[%s9176_s5 + $0xe4] sm:$0xf0] }
  0x84   : > { %574 = vperm.xlu0 %5758, %v521_v51   ;;  %v5374_v51 = vor.u32 %v5629_v50, %v5373_v49  ;;  %v5311_v49 = vld [vmem:[%s9176_s5 + $0x68] sm:$0xf0] }
  0x85   : > { %v596_v54 = vpop.permute.xlu2 %595 }
  0x86   : > { %vm658_vm0 = vcmp.eq.s32.totalorder %v596_v54, %v6492_v56  ;;  %2068 = vmatpush.bf16.msrb.mxu3 %v5374_v51  ;;  %v5314_v51 = vor.u32 %v5612_v46, %v5311_v49  ;;  %v5617_v46 = vld [vmem:[%s9176_s5 + $0x84] sm:$0xf0] }
  0x8a   : > { %622 = vperm.xlu1 %5759, %v537_v55   ;;  %v785_v55 = vld [vmem:[%s6447_s26 + $0xf8] sm:$0xff] }
  0x8b   : > { %859 = vperm.xlu2 %5760, %v778_v57  }
  0x8c   : > { %619 = vperm.xlu0 %5758, %v536_v58  }
  0x8d   : > { %v599_v59 = vpop.permute.xlu2 %598 }
  0x8e   : > { %vm659_vm1 = vcmp.eq.s32.totalorder %v599_v59, %v6492_v56  ;;  %v5301_v59 = vld [vmem:[%s9176_s5 + $0x50] sm:$0xf] }
  0x8f   : > { %vm5179_vm2 = vmpackc.low %vm659_vm1, %vm658_vm0 }
  0x90   : > { %5180 = vmatmul.msk.bf16.vlgmr.msra.gmra.mxu2 %vm5179_vm2, %v6290_v63 }
  0x92   : > { %577 = vperm.xlu1 %5759, %v522_v60   ;;  %v5611_v60 = vld [vmem:[%s9176_s5 + $0x54] sm:$0xf0] }
  0x93   : > { %580 = vperm.xlu2 %5760, %v523_v61  }
  0x94   : > { %862 = vperm.xlu0 %5758, %v779_v62   ;;  %v5302_v62 = vor.u32 %v5611_v60, %v5301_v59  ;;  %v5421_v59 = vld [vmem:[%s9176_s5 + $0x140] sm:$0xf]  ;;  %v5641_v60 = vld [vmem:[%s9176_s5 + $0x144] sm:$0xf0] }
  0x95   : > { %v554_v0 = vpop.permute.xlu2 %553 }
  0x96   : > { %vm644_vm14 = vcmp.eq.s32.totalorder %v554_v0, %v6492_v56  ;;  %v5365_v0 = vld [vmem:[%s9176_s5 + $0xd0] sm:$0xf]  ;;  %1980 = vmatpush.bf16.msrb.mxu2 %v5302_v62 }
  0x9a   : > { %820 = vperm.xlu1 %5759, %v765_v1   ;;  %v5627_v1 = vld [vmem:[%s9176_s5 + $0xd4] sm:$0xf0] }
  0x9b   : > { %625 = vperm.xlu2 %5760, %v538_v2   ;;  %v5366_v2 = vor.u32 %v5627_v1, %v5365_v0  ;;  %v5422_v1 = vor.u32 %v5641_v60, %v5421_v59  ;;  %v481_v60 = vld [vmem:[%s6820_s14 + $0x8] sm:$0xff] }
  0x9c   : > { %817 = vperm.xlu0 %5758, %v764_v3   ;;  %v788_v4 = vpop.permute.xlu1 %787 }
  0x9d   : > { %v797_v5 = vpop.permute.xlu2 %796  ;;  %vm882_vm3 = vcmp.eq.s32.totalorder %v788_v4, %v6492_v56  ;;  %2069 = vmatpush.bf16.msrb.mxu3 %v5366_v2  ;;  %v5295_v2 = vld [vmem:[%s9176_s5 + $0x48] sm:$0xf0] }
  0x9e   : > { %v548_v6 = vpop.permute.xlu0 %547  ;;  %vm885_vm12 = vcmp.eq.s32.totalorder %v797_v5, %v6492_v56 }
  0x9f   : > { %vm642_vm5 = vcmp.eq.s32.totalorder %v548_v6, %v6492_v56 }
  0xa2   : > { %865 = vperm.xlu1 %5759, %v780_v7  }
  0xa3   : > { %868 = vperm.xlu2 %5760, %v781_v8   ;;  %v5293_v8 = vld [vmem:[%s9176_s5 + $0x40] sm:$0xf] }
  0xa4   : > { %628 = vperm.xlu0 %5758, %v539_v9   ;;  %v791_v10 = vpop.permute.xlu1 %790  ;;  %v5609_v9 = vld [vmem:[%s9176_s5 + $0x44] sm:$0xf0] }
  0xa5   : > { %vm883_vm4 = vcmp.eq.s32.totalorder %v791_v10, %v6492_v56  ;;  %v6510_v11 = vpop.permute.xlu2 %841  ;;  %v5294_v10 = vor.u32 %v5609_v9, %v5293_v8  ;;  %v5603_v8 = vld [vmem:[%s9176_s5 + $0x14] sm:$0xf0] }
  0xa6   : > { %v551_v12 = vpop.permute.xlu0 %550  ;;  %vm5227_vm6 = vmpackc.low %vm883_vm4, %vm882_vm3 }
  0xa7   : > { %vm643_vm7 = vcmp.eq.s32.totalorder %v551_v12, %v6492_v56  ;;  %5228 = vmatmul.msk.bf16.vlgmr.msra.gmra.mxu1 %vm5227_vm6, %v6290_v63  ;;  %v5625_v12 = vld [vmem:[%s9176_s5 + $0xc4] sm:$0xf0]  ;;  %1981 = vmatpush.bf16.msrb.mxu2 %v5294_v10  ;;  %v5606_v10 = vld [vmem:[%s9176_s5 + $0x34] sm:$0xf] }
  0xa8   : > { %vm5163_vm8 = vmpackc.low %vm643_vm7, %vm642_vm5  ;;  %vm900_vm7 = vcmp.eq.s32.totalorder %v6510_v11, %v6492_v56  ;;  %v5357_v11 = vld [vmem:[%s9176_s5 + $0xc0] sm:$0xf] }
  0xa9   : > { %5164 = vmatmul.msk.bf16.vlgmr.msra.gmra.mxu0 %vm5163_vm8, %v6290_v63 }
  0xaa   : > { %586 = vperm.xlu1 %5759, %v525_v13   ;;  %v5358_v13 = vor.u32 %v5625_v12, %v5357_v11  ;;  %v5333_v12 = vld [vmem:[%s9176_s5 + $0x90] sm:$0xf] }
  0xab   : > { %823 = vperm.xlu2 %5760, %v766_v14  }
  0xac   : > { %583 = vperm.xlu0 %5758, %v524_v15   ;;  %v839_v16 = vpop.permute.xlu1 %838  ;;  %2070 = vmatpush.bf16.msrb.mxu3 %v5358_v13  ;;  %v5619_v13 = vld [vmem:[%s9176_s5 + $0x94] sm:$0xf0] }
  0xad   : > { %vm899_vm9 = vcmp.eq.s32.totalorder %v839_v16, %v6492_v56  ;;  %v563_v17 = vpop.permute.xlu2 %562 }
  0xae   : > { %v836_v18 = vpop.permute.xlu0 %835  ;;  %vm647_vm5 = vcmp.eq.s32.totalorder %v563_v17, %v6492_v56 }
  0xaf   : > { %vm898_vm10 = vcmp.eq.s32.totalorder %v836_v18, %v6492_v56 }
  0xb0   : > { %vm5243_vm11 = vmpackc.low %vm899_vm9, %vm898_vm10 }
  0xb1   : > { %5244 = vmatmul.msk.bf16.vlgmr.msra.gmra.mxu3 %vm5243_vm11, %v6290_v63 }
  0xb2   : > { %631 = vperm.xlu1 %5759, %v540_v19  }
  0xb3   : > { %634 = vperm.xlu2 %5760, %v541_v20   ;;  %v5285_v20 = vld [vmem:[%s9176_s5 + $0x30] sm:$0xf] }
  0xb4   : > { %826 = vperm.xlu0 %5758, %v767_v21   ;;  %v794_v22 = vpop.permute.xlu1 %793  ;;  %v5607_v21 = vld [vmem:[%s9176_s5 + $0x34] sm:$0xf0] }
  0xb5   : > { %vm884_vm13 = vcmp.eq.s32.totalorder %v794_v22, %v6492_v56  ;;  %v6527_v23 = vpop.permute.xlu2 %607  ;;  %v5286_v22 = vor.u32 %v5607_v21, %v5285_v20 }
  0xb6   : > { %v557_v24 = vpop.permute.xlu0 %556  ;;  %vm5229_vm15 = vmpackc.low %vm885_vm12, %vm884_vm13 }
  0xb7   : > { %vm645_vm0 = vcmp.eq.s32.totalorder %v557_v24, %v6492_v56  ;;  %5230 = vmatmul.msk.bf16.gmra.mxu1 %vm5229_vm15, %v6290_v63  ;;  %v5623_v24 = vld [vmem:[%s9176_s5 + $0xb4] sm:$0xf0]  ;;  %1982 = vmatpush.bf16.msrb.mxu2 %v5286_v22  ;;  %v5279_v22 = vld [vmem:[%s9176_s5 + $0x28] sm:$0xf0] }
  0xb8   : > { %vm5165_vm1 = vmpackc.low %vm645_vm0, %vm644_vm14  ;;  %vm662_vm0 = vcmp.eq.s32.totalorder %v6527_v23, %v6492_v56  ;;  %v5349_v23 = vld [vmem:[%s9176_s5 + $0xb0] sm:$0xf] }
  0xb9   : > { %5166 = vmatmul.msk.bf16.gmra.mxu0 %vm5165_vm1, %v6290_v63 }
  0xba   : > { %874 = vperm.xlu1 %5759, %v783_v25   ;;  %v5350_v25 = vor.u32 %v5623_v24, %v5349_v23 }
  0xbb   : > { %589 = vperm.xlu2 %5760, %v526_v26  }
  0xbc   : > { %871 = vperm.xlu0 %5758, %v782_v29   ;;  %v605_v34 = vpop.permute.xlu1 %604  ;;  %2071 = vmatpush.bf16.msrb.mxu3 %v5350_v25 }
  0xbd   : > { %vm661_vm2 = vcmp.eq.s32.totalorder %v605_v34, %v6492_v56  ;;  %v851_v35 = vpop.permute.xlu2 %850  ;;  %v5605_v34 = vld [vmem:[%s9176_s5 + $0x24] sm:$0xf0] }
  0xbe   : > { %v602_v36 = vpop.permute.xlu0 %601  ;;  %vm903_vm14 = vcmp.eq.s32.totalorder %v851_v35, %v6492_v56  ;;  %v5446_v35 = vor.u32 %v5647_v32, %v5445_v31  ;;  %v5389_v32 = vld [vmem:[%s9176_s5 + $0x100] sm:$0xf] }
  0xbf   : > { %vm660_vm3 = vcmp.eq.s32.totalorder %v602_v36, %v6492_v56  ;;  %v5614_v36 = vld [vmem:[%s9176_s5 + $0x74] sm:$0xf] }
  0xc0   : > { %vm5181_vm4 = vmpackc.low %vm661_vm2, %vm660_vm3  ;;  %2156 = vmatpush.bf16.msrb.mxu0 %v5446_v35 }
  0xc1   : > { %5182 = vmatmul.msk.bf16.gmra.mxu2 %vm5181_vm4, %v6290_v63 }
  0xc2   : > { %829 = vperm.xlu1 %5759, %v768_v37   ;;  %v5278_v37 = vor.u32 %v5605_v34, %v5277_v33  ;;  %v5633_v33 = vld [vmem:[%s9176_s5 + $0x104] sm:$0xf0]  ;;  %v5600_v34 = vld [vmem:[%s9176_s5 + $0x4] sm:$0xf] }
  0xc3   : > { %832 = vperm.xlu2 %5760, %v769_v38   ;;  %v5341_v38 = vld [vmem:[%s9176_s5 + $0xa0] sm:$0xf] }
  0xc4   : > { %592 = vperm.xlu0 %5758, %v527_v39   ;;  %v560_v40 = vpop.permute.xlu1 %559  ;;  %v5621_v39 = vld [vmem:[%s9176_s5 + $0xa4] sm:$0xf0]  ;;  %1983 = vmatpush.bf16.msrb.mxu2 %v5278_v37  ;;  %v5263_v37 = vld [vmem:[%s9176_s5 + $0x8] sm:$0xf0] }
  0xc5   : > { %vm646_vm6 = vcmp.eq.s32.totalorder %v560_v40, %v6492_v56  ;;  %v6556_v41 = vpop.permute.xlu2 %805  ;;  %v5319_v40 = vld [vmem:[%s9176_s5 + $0x78] sm:$0xf0] }
  0xc6   : > { %v845_v42 = vpop.permute.xlu0 %844  ;;  %vm5167_vm8 = vmpackc.low %vm647_vm5, %vm646_vm6 }
  0xc7   : > { %vm901_vm9 = vcmp.eq.s32.totalorder %v845_v42, %v6492_v56  ;;  %v5342_v42 = vor.u32 %v5621_v39, %v5341_v38  ;;  %v5266_v39 = vor.u32 %v5600_v34, %v5263_v37 }
  0xc8   : > { %vm5245_vm10 = vmpackc.low %vm901_vm9, %vm900_vm7  ;;  %vm888_vm9 = vcmp.eq.s32.totalorder %v6556_v41, %v6492_v56 }
  0xc9   : > { %5168 = vmatmul.msk.bf16.gmra.mxu0 %vm5167_vm8, %v6290_v63  ;;  %5246 = vmatmul.msk.bf16.gmra.mxu3 %vm5245_vm10, %v6290_v63 }
  0xca   : > { %640 = vperm.xlu1 %5759, %v543_v43   ;;  %v5322_v43 = vor.u32 %v5614_v36, %v5319_v40  ;;  %2072 = vmatpush.bf16.msrb.mxu3 %v5342_v42  ;;  %v5390_v36 = vor.u32 %v5633_v33, %v5389_v32  ;;  %v5601_v42 = vld [vmem:[%s9176_s5 + $0x4] sm:$0xf0] }
  0xcb   : > { %877 = vperm.xlu2 %5760, %v784_v44   ;;  %v5437_v44 = vld [vmem:[%s9176_s5 + $0x160] sm:$0xf] }
  0xcc   : > { %637 = vperm.xlu0 %5758, %v542_v47   ;;  %v803_v52 = vpop.permute.xlu1 %802  ;;  %2245 = vmatpush.bf16.msrb.mxu1 %v5322_v43  ;;  %v5438_v48 = vor.u32 %v5645_v45, %v5437_v44  ;;  %v5325_v45 = vld [vmem:[%s9176_s5 + $0x80] sm:$0xf] }
  0xcd   : > { %vm887_vm11 = vcmp.eq.s32.totalorder %v803_v52, %v6492_v56  ;;  %v617_v54 = vpop.permute.xlu2 %616  ;;  %v5429_v52 = vld [vmem:[%s9176_s5 + $0x150] sm:$0xf] }
  0xce   : > { %v800_v53 = vpop.permute.xlu0 %799  ;;  %vm665_vm7 = vcmp.eq.s32.totalorder %v617_v54, %v6492_v56  ;;  %2157 = vmatpush.bf16.msrb.mxu0 %v5438_v48 }
  0xcf   : > { %vm886_vm12 = vcmp.eq.s32.totalorder %v800_v53, %v6492_v56  ;;  %v5643_v53 = vld [vmem:[%s9176_s5 + $0x154] sm:$0xf0] }
  0xd0   : > { %vm5231_vm13 = vmpackc.low %vm887_vm11, %vm886_vm12  ;;  %v5430_v54 = vor.u32 %v5643_v53, %v5429_v52  ;;  %2246 = vmatpush.bf16.msrb.mxu1 %v5314_v51 }
  0xd1   : > { %5232 = vmatmul.msk.bf16.gmra.mxu1 %vm5231_vm13, %v6290_v63 }
  0xd2   : > { %2158 = vmatpush.bf16.msrb.mxu0 %v5430_v54 }
  0xd4   : > { %880 = vperm.xlu0 %5758, %v785_v55   ;;  %v848_v57 = vpop.permute.xlu1 %847  ;;  %v5610_v55 = vld [vmem:[%s9176_s5 + $0x54] sm:$0xf] }
  0xd5   : > { %vm902_vm15 = vcmp.eq.s32.totalorder %v848_v57, %v6492_v56  ;;  %v572_v61 = vpop.permute.xlu2 %571  ;;  %v5303_v57 = vld [vmem:[%s9176_s5 + $0x58] sm:$0xf0] }
  0xd6   : > { %v611_v58 = vpop.permute.xlu0 %610  ;;  %vm5247_vm1 = vmpackc.low %vm903_vm14, %vm902_vm15  ;;  %2159 = vmatpush.bf16.msrb.mxu0 %v5422_v1 }
  0xd7   : > { %vm663_vm2 = vcmp.eq.s32.totalorder %v611_v58, %v6492_v56  ;;  %v5306_v58 = vor.u32 %v5610_v55, %v5303_v57  ;;  %v5630_v55 = vld [vmem:[%s9176_s5 + $0xf4] sm:$0xf]  ;;  %v5383_v57 = vld [vmem:[%s9176_s5 + $0xf8] sm:$0xf0] }
  0xd8   : > { %vm5183_vm3 = vmpackc.low %vm663_vm2, %vm662_vm0  ;;  %vm650_vm2 = vcmp.eq.s32.totalorder %v572_v61, %v6492_v56  ;;  %v5608_v61 = vld [vmem:[%s9176_s5 + $0x44] sm:$0xf]  ;;  %v5386_v59 = vor.u32 %v5630_v55, %v5383_v57 }
  0xd9   : > { %5184 = vmatmul.msk.bf16.gmra.mxu2 %vm5183_vm3, %v6290_v63  ;;  %5248 = vmatmul.msk.bf16.gmra.mxu3 %vm5247_vm1, %v6290_v63 }
  0xda   : > { %2247 = vmatpush.bf16.msrb.mxu1 %v5306_v58  ;;  %v480_v58 = vld [vmem:[%s6820_s14] sm:$0xff] }
  0xdc   : > { %v569_v3 = vpop.permute.xlu1 %568 }
  0xdd   : > { %vm649_vm4 = vcmp.eq.s32.totalorder %v569_v3, %v6492_v56  ;;  %v815_v5 = vpop.permute.xlu2 %814 }
  0xde   : > { %v566_v4 = vpop.permute.xlu0 %565  ;;  %vm891_vm0 = vcmp.eq.s32.totalorder %v815_v5, %v6492_v56  ;;  %v5413_v5 = vld [vmem:[%s9176_s5 + $0x130] sm:$0xf] }
  0xdf   : > { %vm648_vm5 = vcmp.eq.s32.totalorder %v566_v4, %v6492_v56  ;;  %v5298_v4 = vor.u32 %v5608_v61, %v5295_v2  ;;  %v5646_v61 = vld [vmem:[%s9176_s5 + $0x174] sm:$0xf] }
  0xe0   : > { %vm5169_vm6 = vmpackc.low %vm649_vm4, %vm648_vm5 }
  0xe1   : > { %5170 = vmatmul.msk.bf16.gmra.mxu0 %vm5169_vm6, %v6290_v63  ;;  %2248 = vmatpush.bf16.msrb.mxu1 %v5298_v4  ;;  %v1365_v4 = vpack.c.bf16 %v481_v60, %v481_v60 }
  0xe4   : > { %v614_v6 = vpop.permute.xlu1 %613 }
  0xe5   : > { %vm664_vm8 = vcmp.eq.s32.totalorder %v614_v6, %v6492_v56  ;;  %v860_v14 = vpop.permute.xlu2 %859  ;;  %v5639_v6 = vld [vmem:[%s9176_s5 + $0x134] sm:$0xf0] }
  0xe6   : > { %v809_v7 = vpop.permute.xlu0 %808  ;;  %vm5185_vm10 = vmpackc.low %vm665_vm7, %vm664_vm8  ;;  %v5414_v9 = vor.u32 %v5639_v6, %v5413_v5 }
  0xe7   : > { %vm889_vm11 = vcmp.eq.s32.totalorder %v809_v7, %v6492_v56  ;;  %v5269_v7 = vld [vmem:[%s9176_s5 + $0x10] sm:$0xf] }
  0xe8   : > { %vm5233_vm12 = vmpackc.low %vm889_vm11, %vm888_vm9  ;;  %vm906_vm11 = vcmp.eq.s32.totalorder %v860_v14, %v6492_v56  ;;  %v5270_v11 = vor.u32 %v5603_v8, %v5269_v7  ;;  %v5287_v14 = vld [vmem:[%s9176_s5 + $0x38] sm:$0xf0]  ;;  %2160 = vmatpush.bf16.msrb.mxu0 %v5414_v9  ;;  %v1621_v9 = vunpack.c.l.b16 %v1365_v4 }
  0xe9   : > { %5186 = vmatmul.msk.bf16.gmra.mxu2 %vm5185_vm10, %v6290_v63  ;;  %5234 = vmatmul.msk.bf16.gmra.mxu1 %vm5233_vm12, %v6290_v63 }
  0xea   : > { %1984 = vmatpush.bf16.msrb.mxu2 %v5270_v11 }
  0xec   : > { %v857_v15 = vpop.permute.xlu1 %856 }
  0xed   : > { %vm905_vm13 = vcmp.eq.s32.totalorder %v857_v15, %v6492_v56  ;;  %v581_v19 = vpop.permute.xlu2 %580  ;;  %v5334_v15 = vor.u32 %v5619_v13, %v5333_v12 }
  0xee   : > { %v854_v16 = vpop.permute.xlu0 %853  ;;  %vm653_vm9 = vcmp.eq.s32.totalorder %v581_v19, %v6492_v56  ;;  %v5604_v19 = vld [vmem:[%s9176_s5 + $0x24] sm:$0xf] }
  0xef   : > { %vm904_vm14 = vcmp.eq.s32.totalorder %v854_v16, %v6492_v56  ;;  %v5290_v16 = vor.u32 %v5606_v10, %v5287_v14  ;;  %2073 = vmatpush.bf16.msrb.mxu3 %v5334_v15  ;;  %v5282_v24 = vor.u32 %v5604_v19, %v5279_v22  ;;  %v483_v22 = vld [vmem:[%s6820_s14 + $0x18] sm:$0xff] }
  0xf0   : > { %vm5249_vm15 = vmpackc.low %vm905_vm13, %vm904_vm14 }
  0xf1   : > { %5250 = vmatmul.msk.bf16.gmra.mxu3 %vm5249_vm15, %v6290_v63  ;;  %2249 = vmatpush.bf16.msrb.mxu1 %v5290_v16 }
  0xf4   : > { %v812_v17 = vpop.permute.xlu1 %811 }
  0xf5   : > { %vm890_vm1 = vcmp.eq.s32.totalorder %v812_v17, %v6492_v56  ;;  %v6646_v28 = vpop.permute.xlu2 %625  ;;  %v5405_v17 = vld [vmem:[%s9176_s5 + $0x120] sm:$0xf]  ;;  %2250 = vmatpush.bf16.msrb.mxu1 %v5282_v24 }
  0xf6   : > { %v575_v18 = vpop.permute.xlu0 %574  ;;  %vm5235_vm3 = vmpackc.low %vm891_vm0, %vm890_vm1 }
  0xf7   : > { %vm651_vm4 = vcmp.eq.s32.totalorder %v575_v18, %v6492_v56  ;;  %v5637_v18 = vld [vmem:[%s9176_s5 + $0x124] sm:$0xf0] }
  0xf8   : > { %vm5171_vm5 = vmpackc.low %vm651_vm4, %vm650_vm2  ;;  %vm668_vm4 = vcmp.eq.s32.totalorder %v6646_v28, %v6492_v56  ;;  %v5406_v21 = vor.u32 %v5637_v18, %v5405_v17 }
  0xf9   : > { %5172 = vmatmul.msk.bf16.gmra.mxu0 %vm5171_vm5, %v6290_v63  ;;  %5236 = vmatmul.msk.bf16.gmra.mxu1 %vm5235_vm3, %v6290_v63 }
  0xfa   : > { %2161 = vmatpush.bf16.msrb.mxu0 %v5406_v21  ;;  %v482_v21 = vld [vmem:[%s6820_s14 + $0x10] sm:$0xff] }
  0xfb   : > { %v1366_v24 = vpack.c.bf16 %v482_v21, %v482_v21 }
  0xfc   : > { %v623_v26 = vpop.permute.xlu1 %622 }
  0xfd   : > { %vm667_vm6 = vcmp.eq.s32.totalorder %v623_v26, %v6492_v56  ;;  %v869_v41 = vpop.permute.xlu2 %868  ;;  %v5397_v26 = vld [vmem:[%s9176_s5 + $0x110] sm:$0xf] }
  0xfe   : > { %v620_v27 = vpop.permute.xlu0 %619  ;;  %vm909_vm2 = vcmp.eq.s32.totalorder %v869_v41, %v6492_v56  ;;  %v5261_v41 = vld [vmem:[%s9176_s5] sm:$0xf] }
  0xff   : > { %vm666_vm7 = vcmp.eq.s32.totalorder %v620_v27, %v6492_v56  ;;  %v5635_v27 = vld [vmem:[%s9176_s5 + $0x114] sm:$0xf0]  ;;  %v5262_v44 = vor.u32 %v5601_v42, %v5261_v41  ;;  %v5628_v42 = vld [vmem:[%s9176_s5 + $0xe4] sm:$0xf] }
 0x100   : > { %vm5187_vm8 = vmpackc.low %vm667_vm6, %vm666_vm7  ;;  %v5398_v28 = vor.u32 %v5635_v27, %v5397_v26 }
 0x101   : > { %5188 = vmatmul.msk.bf16.gmra.mxu2 %vm5187_vm8, %v6290_v63 }
 0x102   : > { %2162 = vmatpush.bf16.msrb.mxu0 %v5398_v28  ;;  %1985 = vmatpush.bf16.msrb.mxu2 %v5262_v44  ;;  %v484_v44 = vld [vmem:[%s6820_s14 + $0x20] sm:$0xff] }
 0x104   : > { %v578_v29 = vpop.permute.xlu1 %577 }
 0x105   : > { %vm652_vm10 = vcmp.eq.s32.totalorder %v578_v29, %v6492_v56  ;;  %v6715_v62 = vpop.permute.xlu2 %823  ;;  %v5602_v29 = vld [vmem:[%s9176_s5 + $0x14] sm:$0xf] }
 0x106   : > { %v863_v30 = vpop.permute.xlu0 %862  ;;  %vm5173_vm12 = vmpackc.low %vm653_vm9, %vm652_vm10  ;;  %2163 = vmatpush.bf16.msrb.mxu0 %v5390_v36  ;;  %2334 = vmatpush.bf16.msra.mxu2 %v5386_v59 }
 0x107   : > { %vm907_vm13 = vcmp.eq.s32.totalorder %v863_v30, %v6492_v56  ;;  %v5271_v30 = vld [vmem:[%s9176_s5 + $0x18] sm:$0xf0] }
 0x108   : > { %vm5251_vm14 = vmpackc.low %vm907_vm13, %vm906_vm11  ;;  %v5274_v31 = vor.u32 %v5602_v29, %v5271_v30  ;;  %v1622_v30 = vunpack.c.l.b16 %v1366_v24 }
 0x109   : > { %5174 = vmatmul.msk.bf16.gmra.mxu0 %vm5173_vm12, %v6290_v63  ;;  %5252 = vmatmul.msk.bf16.gmra.mxu3 %vm5251_vm14, %v6290_v63  ;;  %vm894_vm14 = vcmp.eq.s32.totalorder %v6715_v62, %v6492_v56  ;;  %v5447_v62 = vld [vmem:[%s9176_s5 + $0x178] sm:$0xf0] }
 0x10a   : > { %2251 = vmatpush.bf16.msrb.mxu1 %v5274_v31 }
 0x10c   : > { %v821_v47 = vpop.permute.xlu1 %820 }
 0x10d   : > { %vm893_vm15 = vcmp.eq.s32.totalorder %v821_v47, %v6492_v56  ;;  %v635_v25 = vpop.permute.xlu2 %634  ;;  %v5326_v47 = vor.u32 %v5617_v46, %v5325_v45 }
 0x10e   : > { %v818_v50 = vpop.permute.xlu0 %817  ;;  %vm671_vm11 = vcmp.eq.s32.totalorder %v635_v25, %v6492_v56  ;;  %2252 = vmatpush.bf16.msrb.mxu1 %v5266_v39  ;;  %v1367_v25 = vpack.c.bf16 %v483_v22, %v483_v22 }
 0x10f   : > { %vm892_vm0 = vcmp.eq.s32.totalorder %v818_v50, %v6492_v56  ;;  %2074 = vmatpush.bf16.msrb.mxu3 %v5326_v47  ;;  %v485_v47 = vld [vmem:[%s6820_s14 + $0x28] sm:$0xff] }
 0x110   : > { %vm5237_vm1 = vmpackc.low %vm893_vm15, %vm892_vm0 }
 0x111   : > { %5238 = vmatmul.msk.bf16.gmra.mxu1 %vm5237_vm1, %v6290_v63 }
 0x113   : > { %v6843_v10 = vpop.f32.mrf.mxu2 }
 0x114   : > { %v866_v0 = vpop.permute.xlu1 %865 }
 0x115   : > { %vm908_vm3 = vcmp.eq.s32.totalorder %v866_v0, %v6492_v56  ;;  %v590_v40 = vpop.permute.xlu2 %589  ;;  %v5450_v0 = vor.u32 %v5646_v61, %v5447_v62 }
 0x116   : > { %v629_v3 = vpop.permute.xlu0 %628  ;;  %vm5253_vm5 = vmpackc.low %vm909_vm2, %vm908_vm3 }
 0x117   : > { %vm669_vm6 = vcmp.eq.s32.totalorder %v629_v3, %v6492_v56  ;;  %v1364_v3 = vpack.c.bf16 %v480_v58, %v480_v58  ;;  %2423 = vmatpush.bf16.msra.mxu3 %v5450_v0 }
 0x118   : > { %vm5189_vm7 = vmpackc.low %vm669_vm6, %vm668_vm4 }
 0x119   : > { %5190 = vmatmul.msk.bf16.gmra.mxu2 %vm5189_vm7, %v6290_v63  ;;  %5254 = vmatmul.msk.bf16.gmra.mxu3 %vm5253_vm5, %v6290_v63  ;;  %vm656_vm7 = vcmp.eq.s32.totalorder %v590_v40, %v6492_v56  ;;  %v1620_v8 = vunpack.c.l.b16 %v1364_v3 }
 0x11b   : > { %v6847_v15 = vpack.c.b16 %v1621_v9, %v1620_v8 }
 0x11c   : > { %v587_v20 = vpop.permute.xlu1 %586 }
 0x11d   : > { %vm655_vm8 = vcmp.eq.s32.totalorder %v587_v20, %v6492_v56  ;;  %v833_v50 = vpop.permute.xlu2 %832 }
 0x11e   : > { %v584_v23 = vpop.permute.xlu0 %583  ;;  %vm897_vm4 = vcmp.eq.s32.totalorder %v833_v50, %v6492_v56 }
 0x11f   : > { %vm654_vm9 = vcmp.eq.s32.totalorder %v584_v23, %v6492_v56  ;;  %v6855_v23 = vpop.f32.mrf.mxu2 }
 0x120   : > { %vm5175_vm10 = vmpackc.low %vm655_vm8, %vm654_vm9 }
 0x121   : > { %5176 = vmatmul.msk.bf16.gmra.mxu0 %vm5175_vm10, %v6290_v63 }
 0x124   : > { %v632_v35 = vpop.permute.xlu1 %631  ;;  %v6812_v52 = vpop.f32.mrf.mxu1 }
 0x125   : > { %vm670_vm12 = vcmp.eq.s32.totalorder %v632_v35, %v6492_v56  ;;  %v878_v12 = vpop.permute.xlu2 %877 }
 0x126   : > { %vm5191_vm13 = vmpackc.low %vm671_vm11, %vm670_vm12  ;;  %v827_v38 = vpop.permute.xlu0 %826  ;;  %v1067_v43 = vpop.f32.mrf.mxu0 }
 0x127   : > { %vm895_vm15 = vcmp.eq.s32.totalorder %v827_v38, %v6492_v56  ;;  %v1147_v11 = vpack.c.bf16 %v1067_v43, %v1067_v43  ;;  %v5375_v43 = vld [vmem:[%s9176_s5 + $0xe8] sm:$0xf0] }
 0x128   : > { %vm5239_vm0 = vmpackc.low %vm895_vm15, %vm894_vm14  ;;  %v5378_v45 = vor.u32 %v5628_v42, %v5375_v43  ;;  %v5367_v42 = vld [vmem:[%s9176_s5 + $0xd8] sm:$0xf0]  ;;  %v488_v43 = vld [vmem:[%s6820_s14 + $0x40] sm:$0xff] }
 0x129   : > { %5192 = vmatmul.msk.bf16.gmra.mxu2 %vm5191_vm13, %v6290_v63  ;;  %5240 = vmatmul.msk.bf16.gmra.mxu1 %vm5239_vm0, %v6290_v63  ;;  %v1428_v16 = vunpack.c.l.b16 %v1147_v11  ;;  %vm912_vm13 = vcmp.eq.s32.totalorder %v878_v12, %v6492_v56  ;;  %v486_v12 = vld [vmem:[%s6820_s14 + $0x30] sm:$0xff] }
 0x12a   : > { %2335 = vmatpush.bf16.msra.mxu2 %v5378_v45 }
 0x12c   : > { %v875_v48 = vpop.permute.xlu1 %874  ;;  %v1254_v5 = vpop.f32.mrf.mxu1 }
 0x12d   : > { %vm911_vm1 = vcmp.eq.s32.totalorder %v875_v48, %v6492_v56  ;;  %v1333_v27 = vpack.c.bf16 %v1254_v5, %v1254_v5  ;;  %v5644_v48 = vld [vmem:[%s9176_s5 + $0x164] sm:$0xf] }
 0x12e   : > { %v872_v49 = vpop.permute.xlu0 %871  ;;  %v1069_v51 = vpop.f32.mrf.mxu0 }
 0x12f   : > { %vm910_vm2 = vcmp.eq.s32.totalorder %v872_v49, %v6492_v56  ;;  %v1148_v7 = vpack.c.bf16 %v1069_v51, %v1069_v51  ;;  %v1525_v33 = vunpack.c.l.b16 %v1333_v27  ;;  %v5439_v49 = vld [vmem:[%s9176_s5 + $0x168] sm:$0xf0] }
 0x130   : > { %vm5255_vm3 = vmpackc.low %vm911_vm1, %vm910_vm2  ;;  %v5442_v51 = vor.u32 %v5644_v48, %v5439_v49  ;;  %v5431_v48 = vld [vmem:[%s9176_s5 + $0x158] sm:$0xf0] }
 0x131   : > { %5256 = vmatmul.msk.bf16.gmra.mxu3 %vm5255_vm3, %v6290_v63  ;;  %v1429_v13 = vunpack.c.l.b16 %v1148_v7 }
 0x132   : > { %2424 = vmatpush.bf16.msra.mxu3 %v5442_v51 }
 0x133   : > { %v1460_v20 = vpack.c.b16 %v1429_v13, %v1428_v16  ;;  %v487_v13 = vld [vmem:[%s6820_s14 + $0x38] sm:$0xff] }
 0x134   : > { %v830_v53 = vpop.permute.xlu1 %829  ;;  %v6845_v14 = vpop.f32.mrf.mxu3 }
 0x135   : > { %vm896_vm5 = vcmp.eq.s32.totalorder %v830_v53, %v6492_v56  ;;  %v1257_v19 = vpop.f32.mrf.mxu1  ;;  %v1369_v53 = vpack.c.bf16 %v485_v47, %v485_v47  ;;  %v5642_v47 = vld [vmem:[%s9176_s5 + $0x154] sm:$0xf] }
 0x136   : > { %vm5241_vm6 = vmpackc.low %vm897_vm4, %vm896_vm5  ;;  %v593_v54 = vpop.permute.xlu0 %592  ;;  %v1072_v2 = vpop.f32.mrf.mxu0  ;;  %v1334_v59 = vpack.c.bf16 %v1257_v19, %v1257_v19  ;;  %v1371_v19 = vpack.c.bf16 %v487_v13, %v487_v13  ;;  %v5434_v49 = vor.u32 %v5642_v47, %v5431_v48 }
 0x137   : > { %vm657_vm8 = vcmp.eq.s32.totalorder %v593_v54, %v6492_v56  ;;  %v1149_v31 = vpack.c.bf16 %v1072_v2, %v1072_v2  ;;  %v1625_v61 = vunpack.c.l.b16 %v1369_v53 }
 0x138   : > { %vm5177_vm9 = vmpackc.low %vm657_vm8, %vm656_vm7  ;;  %v1526_v4 = vunpack.c.l.b16 %v1334_v59  ;;  %v1627_v27 = vunpack.c.l.b16 %v1371_v19  ;;  %2425 = vmatpush.bf16.msra.mxu3 %v5434_v49  ;;  %v490_v19 = vld [vmem:[%s6820_s14 + $0x50] sm:$0xff] }
 0x139   : > { %5178 = vmatmul.msk.bf16.gmra.mxu0 %vm5177_vm9, %v6290_v63  ;;  %5242 = vmatmul.msk.bf16.gmra.mxu1 %vm5241_vm6, %v6290_v63  ;;  %v1430_v38 = vunpack.c.l.b16 %v1149_v31 }
 0x13c   : > { %v641_v1 = vpop.permute.xlu1 %640  ;;  %v6857_v26 = vpop.f32.mrf.mxu3 }
 0x13d   : > { %vm673_vm10 = vcmp.eq.s32.totalorder %v641_v1, %v6492_v56  ;;  %v1259_v32 = vpop.f32.mrf.mxu1 }
 0x13e   : > { %v638_v6 = vpop.permute.xlu0 %637  ;;  %v1074_v18 = vpop.f32.mrf.mxu0  ;;  %v1335_v55 = vpack.c.bf16 %v1259_v32, %v1259_v32 }
 0x13f   : > { %vm672_vm11 = vcmp.eq.s32.totalorder %v638_v6, %v6492_v56  ;;  %v1150_v28 = vpack.c.bf16 %v1074_v18, %v1074_v18  ;;  %v1370_v18 = vpack.c.bf16 %v486_v12, %v486_v12 }
 0x140   : > { %vm5193_vm12 = vmpackc.low %vm673_vm10, %vm672_vm11  ;;  %v1527_v0 = vunpack.c.l.b16 %v1335_v55 }
 0x141   : > { %5194 = vmatmul.msk.bf16.gmra.mxu2 %vm5193_vm12, %v6290_v63  ;;  %v1431_v34 = vunpack.c.l.b16 %v1150_v28 }
 0x142   : > { %v6893_v8 = vpack.c.b16 %v1527_v0, %v1526_v4 }
 0x143   : > { %v1461_v41 = vpack.c.b16 %v1431_v34, %v1430_v38 }
 0x144   : > { %v6861_v35 = vpop.f32.mrf.mxu2 }
 0x146   : > { %v881_v17 = vpop.permute.xlu0 %880  ;;  %v1077_v29 = vpop.f32.mrf.mxu0 }
 0x147   : > { %vm913_vm14 = vcmp.eq.s32.totalorder %v881_v17, %v6492_v56  ;;  %v1332_v56 = vpack.c.bf16 %v6812_v52, %v6812_v52  ;;  %v1368_v52 = vpack.c.bf16 %v484_v44, %v484_v44  ;;  %v1151_v62 = vpack.c.bf16 %v1077_v29, %v1077_v29 }
 0x148   : > { %vm5257_vm15 = vmpackc.low %vm913_vm14, %vm912_vm13 }
 0x149   : > { %5258 = vmatmul.msk.bf16.gmra.mxu3 %vm5257_vm15, %v6290_v63  ;;  %2164 = vmatmul.bf16.vlgmr.msrb.gmra.mxu0 %v6847_v15  ;;  %v1623_v63 = vunpack.c.l.b16 %v1367_v25  ;;  %v1524_v36 = vunpack.c.l.b16 %v1332_v56  ;;  %v1624_v60 = vunpack.c.l.b16 %v1368_v52  ;;  %v1432_v6 = vunpack.c.l.b16 %v1151_v62 }
 0x14a   : > { %2253 = vmatmul.bf16.vlgmr.msrb.gmra.mxu1 %v1460_v20  ;;  %v1626_v25 = vunpack.c.l.b16 %v1370_v18  ;;  %v1372_v52 = vpack.c.bf16 %v488_v43, %v488_v43 }
 0x14b   : > { %v6863_v37 = vpack.c.b16 %v1623_v63, %v1622_v30  ;;  %v6867_v40 = vpack.c.b16 %v1525_v33, %v1524_v36  ;;  %v6889_v5 = vpack.c.b16 %v1625_v61, %v1624_v60 }
 0x14c   : > { %v6865_v39 = vpop.f32.mrf.mxu3  ;;  %v6885_v54 = vpop.f32.mrf.mxu2  ;;  %v6905_v32 = vpack.c.b16 %v1627_v27, %v1626_v25  ;;  %v1628_v61 = vunpack.c.l.b16 %v1372_v52  ;;  %v1374_v25 = vpack.c.bf16 %v490_v19, %v490_v19  ;;  %v5624_v52 = vld [vmem:[%s9176_s5 + $0xc4] sm:$0xf] }
 0x14e   : > { %v1262_v46 = vpop.f32.mrf.mxu1  ;;  %v1079_v50 = vpop.f32.mrf.mxu0 }
 0x14f   : > { %v1152_v57 = vpack.c.bf16 %v1079_v50, %v1079_v50  ;;  %v1336_v24 = vpack.c.bf16 %v1262_v46, %v1262_v46  ;;  %v489_v46 = vld [vmem:[%s6820_s14 + $0x48] sm:$0xff] }
 0x150   : > { %v1373_v53 = vpack.c.bf16 %v489_v46, %v489_v46 }
 0x151   : > { %1986 = vmatmul.bf16.vlgmr.msrb.gmra.mxu2 %v1460_v20  ;;  %v1433_v2 = vunpack.c.l.b16 %v1152_v57  ;;  %v1528_v63 = vunpack.c.l.b16 %v1336_v24 }
 0x152   : > { %v1629_v62 = vunpack.c.l.b16 %v1373_v53  ;;  %v5359_v53 = vld [vmem:[%s9176_s5 + $0xc8] sm:$0xf0] }
 0x153   : > { %v1462_v9 = vpack.c.b16 %v1433_v2, %v1432_v6 }
 0x154   : > { %v6887_v58 = vpop.f32.mrf.mxu3 }
 0x156   : > { %v1264_v3 = vpop.f32.mrf.mxu1 }
 0x157   : > { %v1337_v20 = vpack.c.bf16 %v1264_v3, %v1264_v3 }
 0x159   : > { %2075 = vmatmul.bf16.vlgmr.msrb.gmra.mxu3 %v6867_v40  ;;  %2169 = vmatmul.bf16.gmra.mxu0 %v6863_v37  ;;  %v1529_v56 = vunpack.c.l.b16 %v1337_v20  ;;  %v491_v20 = vld [vmem:[%s6820_s14 + $0x58] sm:$0xff] }
 0x15a   : > { %2258 = vmatmul.bf16.gmra.mxu1 %v1461_v41  ;;  %v1375_v27 = vpack.c.bf16 %v491_v20, %v491_v20 }
 0x15b   : > { %v6907_v36 = vpack.c.b16 %v1529_v56, %v1528_v63 }
 0x15c   : > { %v6891_v7 = vpop.f32.mrf.mxu2  ;;  %v6897_v11 = vpop.f32.mrf.mxu3 }
 0x15e   : > { %v1082_v1 = vpop.f32.mrf.mxu0 }
 0x15f   : > { %v1153_v28 = vpack.c.bf16 %v1082_v1, %v1082_v1 }
 0x161   : > { %1991 = vmatmul.bf16.gmra.mxu2 %v1461_v41  ;;  %v1434_v33 = vunpack.c.l.b16 %v1153_v28  ;;  %v5626_v41 = vld [vmem:[%s9176_s5 + $0xd4] sm:$0xf] }
 0x162   : > { %v5370_v44 = vor.u32 %v5626_v41, %v5367_v42 }
 0x164   : > { %v6901_v21 = vpop.f32.mrf.mxu2  ;;  %v6903_v29 = vpop.f32.mrf.mxu3  ;;  %2336 = vmatpush.bf16.msra.mxu2 %v5370_v44 }
 0x166   : > { %v1267_v16 = vpop.f32.mrf.mxu1  ;;  %v1084_v17 = vpop.f32.mrf.mxu0 }
 0x167   : > { %v1154_v22 = vpack.c.bf16 %v1084_v17, %v1084_v17  ;;  %v1338_v60 = vpack.c.bf16 %v1267_v16, %v1267_v16 }
 0x169   : > { %2080 = vmatmul.bf16.gmra.mxu3 %v6893_v8  ;;  %2174 = vmatmul.bf16.gmra.mxu0 %v6889_v5  ;;  %v1435_v30 = vunpack.c.l.b16 %v1154_v22  ;;  %v1530_v4 = vunpack.c.l.b16 %v1338_v60  ;;  %v5362_v60 = vor.u32 %v5624_v52, %v5359_v53 }
 0x16a   : > { %2263 = vmatmul.bf16.gmra.mxu1 %v1462_v9 }
 0x16b   : > { %v1463_v38 = vpack.c.b16 %v1435_v30, %v1434_v33  ;;  %v1631_v33 = vunpack.c.l.b16 %v1375_v27  ;;  %2337 = vmatpush.bf16.msra.mxu2 %v5362_v60 }
 0x16c   : > { %v6918_v45 = vpop.f32.mrf.mxu2 }
 0x16e   : > { %v1269_v34 = vpop.f32.mrf.mxu1 }
 0x16f   : > { %v1339_v55 = vpack.c.bf16 %v1269_v34, %v1269_v34 }
 0x171   : > { %1996 = vmatmul.bf16.gmra.mxu2 %v1462_v9  ;;  %v1531_v1 = vunpack.c.l.b16 %v1339_v55  ;;  %v6931_v9 = vpack.c.b16 %v1629_v62, %v1628_v61  ;;  %v5640_v55 = vld [vmem:[%s9176_s5 + $0x144] sm:$0xf]  ;;  %v5423_v61 = vld [vmem:[%s9176_s5 + $0x148] sm:$0xf0] }
 0x172   : > { %v5426_v62 = vor.u32 %v5640_v55, %v5423_v61 }
 0x173   : > { %v6935_v17 = vpack.c.b16 %v1531_v1, %v1530_v4 }
 0x174   : > { %v6927_v50 = vpop.f32.mrf.mxu3  ;;  %v6929_v2 = vpop.f32.mrf.mxu2  ;;  %2426 = vmatpush.bf16.msra.mxu3 %v5426_v62 }
 0x176   : > { %v1087_v31 = vpop.f32.mrf.mxu0  ;;  %v1272_v57 = vpop.f32.mrf.mxu1 }
 0x177   : > { %v1155_v0 = vpack.c.bf16 %v1087_v31, %v1087_v31  ;;  %v1340_v63 = vpack.c.bf16 %v1272_v57, %v1272_v57  ;;  %v1630_v31 = vunpack.c.l.b16 %v1374_v25  ;;  %v492_v57 = vld [vmem:[%s6820_s14 + $0x60] sm:$0xff] }
 0x179   : > { %2085 = vmatmul.bf16.gmra.mxu3 %v6907_v36  ;;  %2179 = vmatmul.bf16.gmra.mxu0 %v6905_v32  ;;  %v1436_v12 = vunpack.c.l.b16 %v1155_v0  ;;  %v1532_v43 = vunpack.c.l.b16 %v1340_v63  ;;  %v6945_v44 = vpack.c.b16 %v1631_v33, %v1630_v31 }
 0x17a   : > { %2268 = vmatmul.bf16.gmra.mxu1 %v1463_v38 }
 0x17c   : > { %v6933_v13 = vpop.f32.mrf.mxu3 }
 0x17e   : > { %v1089_v51 = vpop.f32.mrf.mxu0  ;;  %v1274_v18 = vpop.f32.mrf.mxu1 }
 0x17f   : > { %v1156_v59 = vpack.c.bf16 %v1089_v51, %v1089_v51  ;;  %v1341_v56 = vpack.c.bf16 %v1274_v18, %v1274_v18 }
 0x181   : > { %2001 = vmatmul.bf16.gmra.mxu2 %v1463_v38  ;;  %v1437_v3 = vunpack.c.l.b16 %v1156_v59  ;;  %v1533_v41 = vunpack.c.l.b16 %v1341_v56  ;;  %v493_v59 = vld [vmem:[%s6820_s14 + $0x68] sm:$0xff] }
 0x182   : > { %v1377_v4 = vpack.c.bf16 %v493_v59, %v493_v59 }
 0x183   : > { %v1464_v16 = vpack.c.b16 %v1437_v3, %v1436_v12  ;;  %v6949_v48 = vpack.c.b16 %v1533_v41, %v1532_v43  ;;  %v1376_v3 = vpack.c.bf16 %v492_v57, %v492_v57  ;;  %v494_v43 = vld [vmem:[%s6820_s14 + $0x70] sm:$0xff] }
 0x184   : > { %v6941_v22 = vpop.f32.mrf.mxu2  ;;  %v1633_v19 = vunpack.c.l.b16 %v1377_v4  ;;  %v1378_v52 = vpack.c.bf16 %v494_v43, %v494_v43 }
 0x185   : > { %v1632_v18 = vunpack.c.l.b16 %v1376_v3 }
 0x186   : > { %v1092_v6 = vpop.f32.mrf.mxu0  ;;  %v1634_v60 = vunpack.c.l.b16 %v1378_v52 }
 0x187   : > { %v1157_v34 = vpack.c.bf16 %v1092_v6, %v1092_v6 }
 0x189   : > { %2090 = vmatmul.bf16.gmra.mxu3 %v6935_v17  ;;  %2184 = vmatmul.bf16.gmra.mxu0 %v6931_v9  ;;  %v1438_v46 = vunpack.c.l.b16 %v1157_v34 }
 0x18a   : > { %2273 = vmatmul.bf16.gmra.mxu1 %v1464_v16 }
 0x18c   : > { %v6943_v28 = vpop.f32.mrf.mxu3  ;;  %v6947_v47 = vpop.f32.mrf.mxu2 }
 0x18e   : > { %v1094_v24 = vpop.f32.mrf.mxu0  ;;  %v1277_v38 = vpop.f32.mrf.mxu1 }
 0x18f   : > { %v1158_v30 = vpack.c.bf16 %v1094_v24, %v1094_v24 }
 0x191   : > { %2006 = vmatmul.bf16.gmra.mxu2 %v1464_v16  ;;  %v1439_v42 = vunpack.c.l.b16 %v1158_v30  ;;  %v1342_v16 = vpack.c.bf16 %v1277_v38, %v1277_v38  ;;  %v6973_v30 = vpack.c.b16 %v1633_v19, %v1632_v18  ;;  %v496_v19 = vld [vmem:[%s6820_s14 + $0x80] sm:$0xff] }
 0x193   : > { %v1465_v51 = vpack.c.b16 %v1439_v42, %v1438_v46  ;;  %v1534_v27 = vunpack.c.l.b16 %v1342_v16  ;;  %9212 = vst [vmem:[#allocation15_spill] sm:$0xff] %v6973_v30  ;;  %v495_v46 = vld [vmem:[%s6820_s14 + $0x78] sm:$0xff] }
 0x194   : > { %v6951_v49 = vpop.f32.mrf.mxu3  ;;  %v1379_v53 = vpack.c.bf16 %v495_v46, %v495_v46  ;;  %v1380_v46 = vpack.c.bf16 %v496_v19, %v496_v19 }
 0x196   : > { %v1279_v0 = vpop.f32.mrf.mxu1  ;;  %v1635_v61 = vunpack.c.l.b16 %v1379_v53 }
 0x197   : > { %v1343_v12 = vpack.c.bf16 %v1279_v0, %v1279_v0 }
 0x198   : > { %v6987_v4 = vpack.c.b16 %v1635_v61, %v1634_v60 }
 0x199   : > { %2095 = vmatmul.bf16.gmra.mxu3 %v6949_v48  ;;  %2189 = vmatmul.bf16.gmra.mxu0 %v6945_v44  ;;  %v1535_v24 = vunpack.c.l.b16 %v1343_v12 }
 0x19a   : > { %2278 = vmatmul.bf16.gmra.mxu1 %v1465_v51  ;;  %9213 = vst [vmem:[#allocation16_spill] sm:$0xff] %v6987_v4 }
 0x19b   : > { %v6975_v33 = vpack.c.b16 %v1535_v24, %v1534_v27  ;;  %v5622_v24 = vld [vmem:[%s9176_s5 + $0xb4] sm:$0xf]  ;;  %v497_v27 = vld [vmem:[%s6820_s14 + $0x88] sm:$0xff] }
 0x19c   : > { %v6969_v6 = vpop.f32.mrf.mxu2  ;;  %v6971_v20 = vpop.f32.mrf.mxu3  ;;  %v1381_v52 = vpack.c.bf16 %v497_v27, %v497_v27 }
 0x19e   : > { %v1097_v1 = vpop.f32.mrf.mxu0 }
 0x19f   : > { %v1159_v25 = vpack.c.bf16 %v1097_v1, %v1097_v1 }
 0x1a1   : > { %2011 = vmatmul.bf16.gmra.mxu2 %v1465_v51  ;;  %v1440_v34 = vunpack.c.l.b16 %v1159_v25  ;;  %v5351_v25 = vld [vmem:[%s9176_s5 + $0xb8] sm:$0xf0] }
 0x1a4   : > { %v6977_v41 = vpop.f32.mrf.mxu2  ;;  %v6983_v51 = vpop.f32.mrf.mxu3 }
 0x1a6   : > { %v1099_v56 = vpop.f32.mrf.mxu0  ;;  %v1282_v31 = vpop.f32.mrf.mxu1 }
 0x1a7   : > { %v1160_v63 = vpack.c.bf16 %v1099_v56, %v1099_v56  ;;  %v1344_v59 = vpack.c.bf16 %v1282_v31, %v1282_v31  ;;  %v5354_v56 = vor.u32 %v5622_v24, %v5351_v25  ;;  %v5415_v31 = vld [vmem:[%s9176_s5 + $0x138] sm:$0xf0]  ;;  %v1636_v24 = vunpack.c.l.b16 %v1380_v46  ;;  %v498_v46 = vld [vmem:[%s6820_s14 + $0x90] sm:$0xff] }
 0x1a8   : > { %v1637_v25 = vunpack.c.l.b16 %v1381_v52  ;;  %v499_v52 = vld [vmem:[%s6820_s14 + $0x98] sm:$0xff] }
 0x1a9   : > { %v1441_v38 = vunpack.c.l.b16 %v1160_v63  ;;  %2100 = vmatmul.bf16.gmra.mxu3 %v6975_v33  ;;  %2194 = vmatmul.bf16.gmra.mxu0 %v6973_v30  ;;  %v1536_v3 = vunpack.c.l.b16 %v1344_v59  ;;  %v5638_v63 = vld [vmem:[%s9176_s5 + $0x134] sm:$0xf] }
 0x1aa   : > { %2338 = vmatpush.bf16.msra.mxu2 %v5354_v56 }
 0x1ab   : > { %v1466_v42 = vpack.c.b16 %v1441_v38, %v1440_v34  ;;  %v5418_v34 = vor.u32 %v5638_v63, %v5415_v31 }
 0x1ac   : > { %v6985_v62 = vpop.f32.mrf.mxu2 }
 0x1ad   : > { %2283 = vmatmul.bf16.gmra.mxu1 %v1466_v42  ;;  %2427 = vmatpush.bf16.msra.mxu3 %v5418_v34  ;;  %v7011_v34 = vpack.c.b16 %v1637_v25, %v1636_v24  ;;  %v1349_v25 = vpack.c.bf16 %v6857_v26, %v6857_v26 }
 0x1ae   : > { %v1284_v55 = vpop.f32.mrf.mxu1 }
 0x1af   : > { %v1345_v57 = vpack.c.bf16 %v1284_v55, %v1284_v55  ;;  %9214 = vst [vmem:[#allocation17_spill] sm:$0xff] %v7011_v34 }
 0x1b1   : > { %2016 = vmatmul.bf16.gmra.mxu2 %v1466_v42  ;;  %v1537_v0 = vunpack.c.l.b16 %v1345_v57 }
 0x1b3   : > { %v6989_v18 = vpack.c.b16 %v1537_v0, %v1536_v3 }
 0x1b4   : > { %v1322_v1 = vpop.f32.mrf.mxu3  ;;  %v7007_v42 = vpop.f32.mrf.mxu2 }
 0x1b5   : > { %v1360_v38 = vpack.c.bf16 %v1322_v1, %v1322_v1 }
 0x1b6   : > { %v1102_v12 = vpop.f32.mrf.mxu0  ;;  %v1287_v16 = vpop.f32.mrf.mxu1 }
 0x1b7   : > { %v1161_v53 = vpack.c.bf16 %v1102_v12, %v1102_v12  ;;  %v1552_v60 = vunpack.c.l.b16 %v1360_v38  ;;  %v1346_v1 = vpack.c.bf16 %v1287_v16, %v1287_v16  ;;  %v1163_v16 = vpack.c.bf16 %v6843_v10, %v6843_v10 }
 0x1b8   : > { %v1348_v10 = vpack.c.bf16 %v6845_v14, %v6845_v14  ;;  %v1732_v14 = vld [vmem:[%s9177_s6] sm:$0x3] }
 0x1b9   : > { %2105 = vmatmul.bf16.gmra.mxu3 %v6989_v18  ;;  %2199 = vmatmul.bf16.gmra.mxu0 %v6987_v4  ;;  %v1442_v4 = vunpack.c.l.b16 %v1161_v53  ;;  %v1538_v12 = vunpack.c.l.b16 %v1346_v1 }
 0x1bc   : > { %v1324_v43 = vpop.f32.mrf.mxu3 }
 0x1bd   : > { %v1361_v55 = vpack.c.bf16 %v1324_v43, %v1324_v43 }
 0x1be   : > { %v1104_v57 = vpop.f32.mrf.mxu0  ;;  %v1289_v59 = vpop.f32.mrf.mxu1 }
 0x1bf   : > { %v1553_v61 = vunpack.c.l.b16 %v1361_v55  ;;  %v1162_v0 = vpack.c.bf16 %v1104_v57, %v1104_v57  ;;  %v1347_v3 = vpack.c.bf16 %v1289_v59, %v1289_v59 }
 0x1c1   : > { %v1443_v56 = vunpack.c.l.b16 %v1162_v0  ;;  %v7009_v63 = vpack.c.b16 %v1553_v61, %v1552_v60  ;;  %v1539_v19 = vunpack.c.l.b16 %v1347_v3  ;;  %v1382_v60 = vpack.c.bf16 %v498_v46, %v498_v46 }
 0x1c2   : > { %v1383_v61 = vpack.c.bf16 %v499_v52, %v499_v52  ;;  %v1444_v0 = vunpack.c.l.b16 %v1163_v16  ;;  %v1540_v52 = vunpack.c.l.b16 %v1348_v10  ;;  %v1165_v10 = vpack.c.bf16 %v6861_v35, %v6861_v35 }
 0x1c3   : > { %v1467_v27 = vpack.c.b16 %v1443_v56, %v1442_v4  ;;  %v7013_v43 = vpack.c.b16 %v1539_v19, %v1538_v12  ;;  %v1164_v4 = vpack.c.bf16 %v6855_v23, %v6855_v23  ;;  %v1638_v19 = vunpack.c.l.b16 %v1382_v60 }
 0x1c4   : > { %v1142_v31 = vpop.f32.mrf.mxu2 }
 0x1c5   : > { %2021 = vmatmul.bf16.gmra.mxu2 %v1467_v27  ;;  %2288 = vmatmul.bf16.gmra.mxu1 %v1467_v27  ;;  %9215 = vst [vmem:[#allocation18_spill] sm:$0xff] %v7013_v43  ;;  %v1177_v53 = vpack.c.bf16 %v1142_v31, %v1142_v31  ;;  %v1445_v24 = vunpack.c.l.b16 %v1164_v4  ;;  %v1639_v27 = vunpack.c.l.b16 %v1383_v61  ;;  %v1541_v31 = vunpack.c.l.b16 %v1349_v25  ;;  %v501_v25 = vld [vmem:[%s6820_s14 + $0xa8] sm:$0xff] }
 0x1c6   : > { %v2165_v38 = vpop.f32.mrf.mxu0  ;;  %v7034_v61 = vperm.slane %v1732_v14, 0 }
 0x1c7   : > { %v1458_v1 = vunpack.c.l.b16 %v1177_v53  ;;  %v7029_v26 = vpack.c.b16 %v1639_v27, %v1638_v19 }
 0x1c9   : > { %2110 = vmatmul.bf16.gmra.mxu3 %v7013_v43  ;;  %2204 = vmatmul.bf16.gmra.mxu0 %v7011_v34  ;;  %9216 = vst [vmem:[#allocation19_spill] sm:$0xff] %v7029_v26 }
 0x1cc   : > { %v1144_v55 = vpop.f32.mrf.mxu2  ;;  %v1327_v57 = vpop.f32.mrf.mxu3 }
 0x1cd   : > { %v1178_v59 = vpack.c.bf16 %v1144_v55, %v1144_v55  ;;  %v1362_v12 = vpack.c.bf16 %v1327_v57, %v1327_v57  ;;  %v1468_v55 = vpack.c.b16 %v1445_v24, %v1444_v0  ;;  %v7036_v57 = vpack.c.b16 %v1541_v31, %v1540_v52  ;;  %v500_v24 = vld [vmem:[%s6820_s14 + $0xa0] sm:$0xff] }
 0x1ce   : > { %v2167_v3 = vpop.f32.mrf.mxu0 }
 0x1cf   : > { %v1459_v56 = vunpack.c.l.b16 %v1178_v59  ;;  %v1554_v59 = vunpack.c.l.b16 %v1362_v12  ;;  %9217 = vst [vmem:[#allocation20_spill] sm:$0xff] %v7036_v57  ;;  %v1384_v12 = vpack.c.bf16 %v500_v24, %v500_v24 }
 0x1d1   : > { %v7027_v23 = vpack.c.b16 %v1459_v56, %v1458_v1  ;;  %v1166_v1 = vpack.c.bf16 %v6885_v54, %v6885_v54  ;;  %v1350_v54 = vpack.c.bf16 %v6865_v39, %v6865_v39  ;;  %v1640_v35 = vunpack.c.l.b16 %v1384_v12 }
 0x1d3   : > { %v1447_v52 = vunpack.c.l.b16 %v1166_v1 }
 0x1d4   : > { %v1329_v46 = vpop.f32.mrf.mxu3  ;;  %v1987_v16 = vpop.f32.mrf.mxu2 }
 0x1d5   : > { %v1363_v4 = vpack.c.bf16 %v1329_v46, %v1329_v46  ;;  %2026 = vmatmul.bf16.gmra.mxu2 %v1468_v55  ;;  %2293 = vmatmul.bf16.gmra.mxu1 %v1468_v55  ;;  %v1988_v56 = vadd.f32 %v1987_v16, %v7034_v61  ;;  %v1385_v55 = vpack.c.bf16 %v501_v25, %v501_v25 }
 0x1d6   : > { %v2170_v53 = vpop.f32.mrf.mxu0 }
 0x1d7   : > { %v1555_v60 = vunpack.c.l.b16 %v1363_v4  ;;  %v1351_v4 = vpack.c.bf16 %v6887_v58, %v6887_v58  ;;  %v1542_v58 = vunpack.c.l.b16 %v1350_v54 }
 0x1d9   : > { %2115 = vmatmul.bf16.gmra.mxu3 %v7036_v57  ;;  %2209 = vmatmul.bf16.gmra.mxu0 %v7029_v26  ;;  %v7040_v0 = vpack.c.b16 %v1555_v60, %v1554_v59  ;;  %v1446_v59 = vunpack.c.l.b16 %v1165_v10  ;;  %v1641_v60 = vunpack.c.l.b16 %v1385_v55  ;;  %v1543_v26 = vunpack.c.l.b16 %v1351_v4  ;;  %v503_v4 = vld [vmem:[%s6820_s14 + $0xb8] sm:$0xff] }
 0x1db   : > { %v1469_v25 = vpack.c.b16 %v1447_v52, %v1446_v59  ;;  %v7059_v10 = vpack.c.b16 %v1641_v60, %v1640_v35  ;;  %v502_v52 = vld [vmem:[%s6820_s14 + $0xb0] sm:$0xff]  ;;  %v1168_v59 = vpack.c.bf16 %v6901_v21, %v6901_v21 }
 0x1dc   : > { %v1989_v19 = vpop.f32.mrf.mxu2  ;;  %v2076_v27 = vpop.f32.mrf.mxu3  ;;  %v1386_v60 = vpack.c.bf16 %v502_v52, %v502_v52 }
 0x1dd   : > { %v2077_v31 = vadd.f32 %v2076_v27, %v1988_v56  ;;  %v1990_v24 = vadd.f32 %v1989_v19, %v7034_v61  ;;  %9218 = vst [vmem:[#allocation21_spill] sm:$0xff] %v7059_v10 }
 0x1de   : > { %v7049_v46 = vpop.f32.mrf.mxu0 }
 0x1df   : > { %v7053_v14 = vadd.f32 %v2165_v38, %v2077_v31  ;;  %v7065_v31 = vpack.c.b16 %v1543_v26, %v1542_v58  ;;  %v1449_v58 = vunpack.c.l.b16 %v1168_v59 }
 0x1e1   : > { %v5451_v16 = vmul.f32 -1.442695, %v7053_v14  ;;  %9219 = vst [vmem:[#allocation22_spill] sm:$0xff] %v7065_v31 }
 0x1e3   : > { %5764 = vpow2.f32 %v5451_v16  ;;  %v1167_v16 = vpack.c.bf16 %v6891_v7, %v6891_v7 }
 0x1e4   : > { %v1992_v1 = vpop.f32.mrf.mxu2  ;;  %v2078_v56 = vpop.f32.mrf.mxu3 }
 0x1e5   : > { %v2079_v38 = vadd.f32 %v2078_v56, %v1990_v24  ;;  %2031 = vmatmul.bf16.gmra.mxu2 %v1469_v25  ;;  %2298 = vmatmul.bf16.gmra.mxu1 %v1469_v25  ;;  %v1993_v54 = vadd.f32 %v1992_v1, %v7034_v61  ;;  %v1387_v24 = vpack.c.bf16 %v503_v4, %v503_v4 }
 0x1e6   : > { %v7061_v39 = vpop.f32.mrf.mxu0  ;;  %v1353_v25 = vpack.c.bf16 %v6903_v29, %v6903_v29  ;;  %v1352_v1 = vpack.c.bf16 %v6897_v11, %v6897_v11 }
 0x1e7   : > { %v7063_v27 = vadd.f32 %v2167_v3, %v2079_v38  ;;  %v1643_v7 = vunpack.c.l.b16 %v1387_v24  ;;  %v5620_v24 = vld [vmem:[%s9176_s5 + $0xa4] sm:$0xf] }
 0x1e8   : > { %v1545_v52 = vunpack.c.l.b16 %v1353_v25  ;;  %v5343_v25 = vld [vmem:[%s9176_s5 + $0xa8] sm:$0xf0] }
 0x1e9   : > { %v5765_v12 = vpop.eup %5764  ;;  %v5453_v19 = vmul.f32 -1.442695, %v7063_v27  ;;  %2120 = vmatmul.bf16.gmra.mxu3 %v7065_v31  ;;  %2214 = vmatmul.bf16.gmra.mxu0 %v7059_v10  ;;  %v1642_v10 = vunpack.c.l.b16 %v1386_v60 }
 0x1ea   : > { %v7070_v55 = vadd.f32 1.0, %v5765_v12  ;;  %v1448_v12 = vunpack.c.l.b16 %v1167_v16  ;;  %v1544_v16 = vunpack.c.l.b16 %v1352_v1  ;;  %v1170_v1 = vpack.c.bf16 %v6929_v2, %v6929_v2 }
 0x1eb   : > { %5766 = vpow2.f32 %v5453_v19 }
 0x1ec   : > { %5768 = vrcp.f32 %v7070_v55  ;;  %v1994_v3 = vpop.f32.mrf.mxu2  ;;  %v2081_v26 = vpop.f32.mrf.mxu3  ;;  %v1470_v59 = vpack.c.b16 %v1449_v58, %v1448_v12  ;;  %v1169_v58 = vpack.c.bf16 %v6918_v45, %v6918_v45  ;;  %v5346_v12 = vor.u32 %v5620_v24, %v5343_v25 }
 0x1ed   : > { %v2082_v35 = vadd.f32 %v2081_v26, %v1993_v54  ;;  %v7121_v45 = vpack.c.b16 %v1545_v52, %v1544_v16  ;;  %v1451_v31 = vunpack.c.l.b16 %v1170_v1  ;;  %vm2773_vm1 = vweird.f32 %v7070_v55 }
 0x1ee   : > { %v7082_v56 = vpop.f32.mrf.mxu0  ;;  %2339 = vmatpush.bf16.msra.mxu2 %v5346_v12  ;;  %v1450_v25 = vunpack.c.l.b16 %v1169_v58 }
 0x1ef   : > { %v7084_v21 = vadd.f32 %v2170_v53, %v2082_v35  ;;  %v1995_v53 = vadd.f32 %v1994_v3, %v7034_v61  ;;  %v7103_v3 = vpack.c.b16 %v1643_v7, %v1642_v10  ;;  %9221 = vst [vmem:[#allocation24_spill] sm:$0xff] %v7121_v45 }
 0x1f0   : > { %v1471_v57 = vpack.c.b16 %v1451_v31, %v1450_v25 }
 0x1f1   : > { %v5767_v38 = vpop.eup %5766  ;;  %v5455_v19 = vmul.f32 -1.442695, %v7084_v21  ;;  %9220 = vst [vmem:[#allocation23_spill] sm:$0xff] %v7103_v3 }
 0x1f2   : > { %v7089_v54 = vpop.eup %5768  ;;  %v7091_v4 = vadd.f32 1.0, %v5767_v38 }
 0x1f3   : > { %v2769_v29 = vmul.f32 %v7089_v54, %v7070_v55  ;;  %5770 = vpow2.f32 %v5455_v19  ;;  %v5636_v19 = vld [vmem:[%s9176_s5 + $0x124] sm:$0xf]  ;;  %vm2774_vm0 = vweird.f32 %v7089_v54 }
 0x1f4   : > { %5772 = vrcp.f32 %v7091_v4  ;;  %v1997_v11 = vpop.f32.mrf.mxu2  ;;  %v2083_v26 = vpop.f32.mrf.mxu3  ;;  %vm7144_vm2 = vmor %vm2773_vm1, %vm2774_vm0  ;;  %vm2803_vm5 = vweird.f32 %v7091_v4 }
 0x1f5   : > { %v2770_v35 = vsub.f32 1.0, %v2769_v29  ;;  %v2084_v60 = vadd.f32 %v2083_v26, %v1995_v53  ;;  %2036 = vmatmul.bf16.gmra.mxu2 %v1470_v59  ;;  %2303 = vmatmul.bf16.gmra.mxu1 %v1470_v59  ;;  %v5407_v29 = vld [vmem:[%s9176_s5 + $0x128] sm:$0xf0]  ;;  %v504_v26 = vld [vmem:[%s6820_s14 + $0xc0] sm:$0xff] }
 0x1f6   : > { %v7109_v38 = vpop.f32.mrf.mxu0  ;;  %v5410_v2 = vor.u32 %v5636_v19, %v5407_v29  ;;  %v1388_v1 = vpack.c.bf16 %v504_v26, %v504_v26  ;;  %v2777_v19 = vand.u32 2147483647, %v7070_v55 }
 0x1f7   : > { %v2771_v10 = vmul.f32 %v7089_v54, %v2770_v35  ;;  %v7119_v7 = vadd.f32 %v7049_v46, %v2084_v60  ;;  %v505_v46 = vld [vmem:[%s6820_s14 + $0xc8] sm:$0xff]  ;;  %v2779_v35 = vand.u32 2147483648, %v7070_v55  ;;  %v1998_v60 = vadd.f32 %v1997_v11, %v7034_v61  ;;  %v7151_v55 = vpop.f32.mrf.mxu1 }
 0x1f8   : > { %2428 = vmatpush.bf16.msra.mxu3 %v5410_v2  ;;  %v1354_v2 = vpack.c.bf16 %v6927_v50, %v6927_v50  ;;  %v2809_v11 = vand.u32 2147483648, %v7091_v4  ;;  %9224 = vst [vmem:[#allocation25_spill] sm:$0xff] %v7151_v55  ;;  %v1644_v43 = vunpack.c.l.b16 %v1388_v1  ;;  %vm2778_vm4 = vcmp.eq.f32.partialorder %v2777_v19, 8.507059e+37 }
 0x1f9   : > { %v5771_v53 = vpop.eup %5770  ;;  %v5457_v59 = vmul.f32 -1.442695, %v7119_v7  ;;  %2125 = vmatmul.bf16.gmra.mxu3 %v7121_v45  ;;  %2219 = vmatmul.bf16.gmra.mxu0 %v7103_v3  ;;  %v2772_v52 = vadd.f32 %v7089_v54, %v2771_v10  ;;  %v1389_v10 = vpack.c.bf16 %v505_v46, %v505_v46 }
 0x1fa   : > { %v5773_v24 = vpop.eup %5772  ;;  %v7127_v34 = vadd.f32 1.0, %v5771_v53  ;;  %v1355_v53 = vpack.c.bf16 %v6933_v13, %v6933_v13  ;;  %v2807_v13 = vand.u32 2147483647, %v7091_v4  ;;  %v1546_v25 = vunpack.c.l.b16 %v1354_v2 }
 0x1fb   : > { %v2799_v16 = vmul.f32 %v5773_v24, %v7091_v4  ;;  %5774 = vpow2.f32 %v5457_v59  ;;  %v2776_v50 = vsel %vm7144_vm2, %v7089_v54, %v2772_v52  ;;  %vm2804_vm3 = vweird.f32 %v5773_v24 }
 0x1fc   : > { %5776 = vrcp.f32 %v7127_v34  ;;  %v1999_v12 = vpop.f32.mrf.mxu2  ;;  %v2086_v58 = vpop.f32.mrf.mxu3  ;;  %vm2805_vm6 = vmor %vm2803_vm5, %vm2804_vm3  ;;  %v2810_v54 = vor.u32 1.1754944e-38, %v2809_v11  ;;  %vm2808_vm7 = vcmp.eq.f32.partialorder %v2807_v13, 8.507059e+37  ;;  %v1171_v2 = vpack.c.bf16 %v6941_v22, %v6941_v22  ;;  %v506_v13 = vld [vmem:[%s6820_s14 + $0xd0] sm:$0xff] }
 0x1fd   : > { %v2800_v29 = vsub.f32 1.0, %v2799_v16  ;;  %v2087_v26 = vadd.f32 %v2086_v58, %v1998_v60  ;;  %v2780_v16 = vor.u32 1.1754944e-38, %v2779_v35  ;;  %v1645_v58 = vunpack.c.l.b16 %v1389_v10 }
 0x1fe   : > { %v7149_v3 = vpop.f32.mrf.mxu0  ;;  %v2000_v4 = vadd.f32 %v1999_v12, %v7034_v61  ;;  %vm2833_vm10 = vweird.f32 %v7127_v34 }
 0x1ff   : > { %v2801_v46 = vmul.f32 %v5773_v24, %v2800_v29  ;;  %v7158_v45 = vadd.f32 %v7061_v39, %v2087_v26  ;;  %v2781_v59 = vsel %vm2778_vm4, %v2780_v16, %v2776_v50  ;;  %v1547_v29 = vunpack.c.l.b16 %v1355_v53  ;;  %v507_v16 = vld [vmem:[%s6820_s14 + $0xd8] sm:$0xff] }
 0x200   : > { %v7171_v11 = vmul.f32 %v2781_v59, %v7053_v14  ;;  %v5655_v14 = vld [vmem:[%s9178_s7 + $0x38] sm:$0xff] }
 0x201   : > { %v5775_v30 = vpop.eup %5774  ;;  %v2802_v60 = vadd.f32 %v5773_v24, %v2801_v46  ;;  %v5459_v35 = vmul.f32 -1.442695, %v7158_v45  ;;  %v7192_v22 = vpack.c.b16 %v1547_v29, %v1546_v25  ;;  %3956 = vmatpush.bf16.msra.mxu0 %v5655_v14  ;;  %v7197_v46 = vpop.f32.mrf.mxu1 }
 0x202   : > { %v7161_v55 = vpop.eup %5776  ;;  %v7163_v52 = vadd.f32 1.0, %v5775_v30 }
 0x203   : > { %v2806_v39 = vsel %vm2805_vm6, %v5773_v24, %v2802_v60  ;;  %v2829_v31 = vmul.f32 %v7161_v55, %v7127_v34  ;;  %v7176_v24 = vpack.c.b16 %v1645_v58, %v1644_v43  ;;  %v1172_v43 = vpack.c.bf16 %v6947_v47, %v6947_v47  ;;  %9226 = vst [vmem:[#allocation27_spill] sm:$0xff] %v7192_v22 }
 0x204   : > { %v2811_v1 = vsel %vm2808_vm7, %v2810_v54, %v2806_v39  ;;  %5778 = vrcp.f32 %v7163_v52  ;;  %v2002_v19 = vpop.f32.mrf.mxu2  ;;  %v2088_v10 = vpop.f32.mrf.mxu3  ;;  %v1452_v47 = vunpack.c.l.b16 %v1171_v2  ;;  %v1357_v2 = vpack.c.bf16 %v6951_v49, %v6951_v49 }
 0x205   : > { %v7174_v30 = vmul.f32 %v2811_v1, %v7063_v27  ;;  %5780 = vpow2.f32 %v5459_v35  ;;  %2041 = vmatmul.bf16.gmra.mxu2 %v1471_v57  ;;  %2308 = vmatmul.bf16.gmra.mxu1 %v1471_v57  ;;  %9225 = vst [vmem:[#allocation26_spill] sm:$0xff] %v7176_v24  ;;  %v2830_v53 = vsub.f32 1.0, %v2829_v31  ;;  %v2089_v12 = vadd.f32 %v2088_v10, %v2000_v4  ;;  %v5663_v27 = vld [vmem:[%s9178_s7 + $0x78] sm:$0xff] }
 0x206   : > { %v7183_v26 = vpop.f32.mrf.mxu0  ;;  %4045 = vmatpush.bf16.msra.mxu1 %v5663_v27  ;;  %v1453_v35 = vunpack.c.l.b16 %v1172_v43  ;;  %v2003_v39 = vadd.f32 %v2002_v19, %v7034_v61  ;;  %v1390_v4 = vpack.c.bf16 %v506_v13, %v506_v13  ;;  %v1391_v10 = vpack.c.bf16 %v507_v16, %v507_v16  ;;  %v5654_v16 = vld [vmem:[%s9178_s7 + $0x30] sm:$0xff] }
 0x207   : > { %v7195_v50 = vadd.f32 %v7082_v56, %v2089_v12  ;;  %v2831_v58 = vmul.f32 %v7161_v55, %v2830_v53  ;;  %v1356_v56 = vpack.c.bf16 %v6943_v28, %v6943_v28  ;;  %v2839_v53 = vand.u32 2147483648, %v7127_v34  ;;  %3957 = vmatpush.bf16.msra.mxu0 %v5654_v16 }
 0x208   : > { %vm2834_vm8 = vweird.f32 %v7161_v55  ;;  %v2869_v19 = vand.u32 2147483648, %v7163_v52  ;;  %v2867_v13 = vand.u32 2147483647, %v7163_v52  ;;  %vm2863_vm12 = vweird.f32 %v7163_v52 }
 0x209   : > { %2130 = vmatmul.bf16.gmra.mxu3 %v7192_v22  ;;  %2224 = vmatmul.bf16.gmra.mxu0 %v7176_v24  ;;  %v5461_v59 = vmul.f32 -1.442695, %v7195_v50  ;;  %v2832_v28 = vadd.f32 %v7161_v55, %v2831_v58  ;;  %v2837_v58 = vand.u32 2147483647, %v7127_v34  ;;  %vm7229_vm11 = vmor %vm2833_vm10, %vm2834_vm8  ;;  %v2840_v34 = vor.u32 1.1754944e-38, %v2839_v53 }
 0x20a   : > { %v5779_v60 = vpop.eup %5778  ;;  %vm2868_vm14 = vcmp.eq.f32.partialorder %v2867_v13, 8.507059e+37  ;;  %v1173_v16 = vpack.c.bf16 %v6969_v6, %v6969_v6 }
 0x20b   : > { %v5781_v54 = vpop.eup %5780  ;;  %v2859_v29 = vmul.f32 %v5779_v60, %v7163_v52  ;;  %5782 = vpow2.f32 %v5461_v59  ;;  %vm2864_vm9 = vweird.f32 %v5779_v60  ;;  %v1646_v59 = vunpack.c.l.b16 %v1390_v4  ;;  %v5653_v52 = vld [vmem:[%s9178_s7 + $0x28] sm:$0xff] }
 0x20c   : > { %v7209_v31 = vadd.f32 1.0, %v5781_v54  ;;  %v2004_v25 = vpop.f32.mrf.mxu2  ;;  %v2091_v1 = vpop.f32.mrf.mxu3  ;;  %v1647_v54 = vunpack.c.l.b16 %v1391_v10  ;;  %v2836_v57 = vsel %vm7229_vm11, %v7161_v55, %v2832_v28  ;;  %vm2865_vm13 = vmor %vm2863_vm12, %vm2864_vm9  ;;  %v2870_v4 = vor.u32 1.1754944e-38, %v2869_v19  ;;  %3958 = vmatpush.bf16.msra.mxu0 %v5653_v52 }
 0x20d   : > { %v2860_v12 = vsub.f32 1.0, %v2859_v29  ;;  %v2092_v14 = vadd.f32 %v2091_v1, %v2003_v39  ;;  %v1472_v1 = vpack.c.b16 %v1453_v35, %v1452_v47  ;;  %v7239_v10 = vpop.f32.mrf.mxu1  ;;  %v1548_v35 = vunpack.c.l.b16 %v1356_v56 }
 0x20e   : > { %5784 = vrcp.f32 %v7209_v31  ;;  %v7218_v27 = vpop.f32.mrf.mxu0  ;;  %vm2838_vm15 = vcmp.eq.f32.partialorder %v2837_v58, 8.507059e+37  ;;  %v7248_v28 = vpack.c.b16 %v1647_v54, %v1646_v59  ;;  %v2005_v13 = vadd.f32 %v2004_v25, %v7034_v61  ;;  %v5618_v25 = vld [vmem:[%s9176_s5 + $0x94] sm:$0xf]  ;;  %v5335_v54 = vld [vmem:[%s9176_s5 + $0x98] sm:$0xf0] }
 0x20f   : > { %v2861_v43 = vmul.f32 %v5779_v60, %v2860_v12  ;;  %v7222_v49 = vadd.f32 %v7109_v38, %v2092_v14  ;;  %v1549_v14 = vunpack.c.l.b16 %v1357_v2  ;;  %v2841_v19 = vsel %vm2838_vm15, %v2840_v34, %v2836_v57 }
 0x210   : > { %9229 = vst [vmem:[#allocation28_spill] sm:$0xff] %v7248_v28  ;;  %v1174_v57 = vpack.c.bf16 %v6977_v41, %v6977_v41  ;;  %v7275_v41 = vmul.f32 %v2841_v19, %v7084_v21  ;;  %v5338_v29 = vor.u32 %v5618_v25, %v5335_v54  ;;  %v1454_v34 = vunpack.c.l.b16 %v1173_v16 }
 0x211   : > { %v2862_v39 = vadd.f32 %v5779_v60, %v2861_v43  ;;  %v5463_v38 = vmul.f32 -1.442695, %v7222_v49  ;;  %v5783_v12 = vpop.eup %5782  ;;  %v7269_v6 = vpack.c.b16 %v1549_v14, %v1548_v35  ;;  %v508_v35 = vld [vmem:[%s6820_s14 + $0xe0] sm:$0xff]  ;;  %v2899_v54 = vand.u32 2147483648, %v7209_v31 }
 0x212   : > { %v7241_v43 = vadd.f32 1.0, %v5783_v12  ;;  %2340 = vmatpush.bf16.msra.mxu2 %v5338_v29  ;;  %v1455_v19 = vunpack.c.l.b16 %v1174_v57  ;;  %vm2893_vm1 = vweird.f32 %v7209_v31 }
 0x213   : > { %v2866_v24 = vsel %vm2865_vm13, %v5779_v60, %v2862_v39  ;;  %5786 = vpow2.f32 %v5463_v38  ;;  %9230 = vst [vmem:[#allocation29_spill] sm:$0xff] %v7269_v6  ;;  %v5634_v39 = vld [vmem:[%s9176_s5 + $0x114] sm:$0xf]  ;;  %v5399_v38 = vld [vmem:[%s9176_s5 + $0x118] sm:$0xf0] }
 0x214   : > { %v7246_v47 = vpop.eup %5784  ;;  %v2871_v55 = vsel %vm2868_vm14, %v2870_v4, %v2866_v24  ;;  %v2007_v2 = vpop.f32.mrf.mxu2  ;;  %5788 = vrcp.f32 %v7241_v43  ;;  %v5402_v21 = vor.u32 %v5634_v39, %v5399_v38  ;;  %v1358_v4 = vpack.c.bf16 %v6971_v20, %v6971_v20  ;;  %v5651_v20 = vld [vmem:[%s9178_s7 + $0x18] sm:$0xff] }
 0x215   : > { %v2093_v53 = vpop.f32.mrf.mxu3  ;;  %v2889_v60 = vmul.f32 %v7246_v47, %v7209_v31  ;;  %2046 = vmatmul.bf16.gmra.mxu2 %v1472_v1  ;;  %2313 = vmatmul.bf16.gmra.mxu1 %v1472_v1  ;;  %v7257_v56 = vmul.f32 %v2871_v55, %v7119_v7  ;;  %v5652_v7 = vld [vmem:[%s9178_s7 + $0x20] sm:$0xff]  ;;  %v509_v55 = vld [vmem:[%s6820_s14 + $0xe8] sm:$0xff]  ;;  %vm2894_vm0 = vweird.f32 %v7246_v47  ;;  %v2008_v57 = vadd.f32 %v2007_v2, %v7034_v61 }
 0x216   : > { %v7259_v24 = vpop.f32.mrf.mxu0  ;;  %v2094_v59 = vadd.f32 %v2093_v53, %v2005_v13  ;;  %3959 = vmatpush.bf16.msra.mxu0 %v5652_v7  ;;  %2429 = vmatpush.bf16.msra.mxu3 %v5402_v21  ;;  %v1392_v7 = vpack.c.bf16 %v508_v35, %v508_v35  ;;  %v1393_v29 = vpack.c.bf16 %v509_v55, %v509_v55  ;;  %v2897_v39 = vand.u32 2147483647, %v7209_v31  ;;  %vm7317_vm2 = vmor %vm2893_vm1, %vm2894_vm0  ;;  %v5650_v31 = vld [vmem:[%s9178_s7 + $0x10] sm:$0xff] }
 0x217   : > { %v2890_v58 = vsub.f32 1.0, %v2889_v60  ;;  %v1359_v60 = vpack.c.bf16 %v6983_v51, %v6983_v51  ;;  %v7308_v51 = vpop.f32.mrf.mxu1  ;;  %v1550_v21 = vunpack.c.l.b16 %v1358_v4  ;;  %v2927_v35 = vand.u32 2147483647, %v7241_v43 }
 0x218   : > { %v7285_v14 = vadd.f32 %v7149_v3, %v2094_v59  ;;  %v2929_v55 = vand.u32 2147483648, %v7241_v43  ;;  %vm2898_vm4 = vcmp.eq.f32.partialorder %v2897_v39, 8.507059e+37  ;;  %vm2923_vm5 = vweird.f32 %v7241_v43 }
 0x219   : > { %v5787_v1 = vpop.eup %5786  ;;  %v2891_v12 = vmul.f32 %v7246_v47, %v2890_v58  ;;  %2135 = vmatmul.bf16.gmra.mxu3 %v7269_v6  ;;  %2229 = vmatmul.bf16.gmra.mxu0 %v7248_v28  ;;  %v1551_v2 = vunpack.c.l.b16 %v1359_v60  ;;  %vm2928_vm7 = vcmp.eq.f32.partialorder %v2927_v35, 8.507059e+37 }
 0x21a   : > { %v7291_v52 = vadd.f32 1.0, %v5787_v1  ;;  %v5789_v3 = vpop.eup %5788  ;;  %v5465_v13 = vmul.f32 -1.442695, %v7285_v14  ;;  %3960 = vmatpush.bf16.msra.mxu0 %v5651_v20  ;;  %v2900_v20 = vor.u32 1.1754944e-38, %v2899_v54 }
 0x21b   : > { %v2892_v16 = vadd.f32 %v7246_v47, %v2891_v12  ;;  %v2919_v58 = vmul.f32 %v5789_v3, %v7241_v43  ;;  %vm2924_vm3 = vweird.f32 %v5789_v3 }
 0x21c   : > { %5790 = vrcp.f32 %v7291_v52  ;;  %v2009_v59 = vpop.f32.mrf.mxu2  ;;  %vm2925_vm6 = vmor %vm2923_vm5, %vm2924_vm3  ;;  %vm2953_vm9 = vweird.f32 %v7291_v52 }
 0x21d   : > { %v2096_v25 = vpop.f32.mrf.mxu3  ;;  %5792 = vpow2.f32 %v5465_v13  ;;  %v2920_v38 = vsub.f32 1.0, %v2919_v58  ;;  %v2896_v13 = vsel %vm7317_vm2, %v7246_v47, %v2892_v16  ;;  %v1473_v58 = vpack.c.b16 %v1455_v19, %v1454_v34  ;;  %v5649_v19 = vld [vmem:[%s9178_s7 + $0x8] sm:$0xff] }
 0x21e   : > { %v2097_v1 = vadd.f32 %v2096_v25, %v2008_v57  ;;  %v7313_v12 = vpop.f32.mrf.mxu0  ;;  %v1648_v57 = vunpack.c.l.b16 %v1392_v7  ;;  %v1649_v25 = vunpack.c.l.b16 %v1393_v29  ;;  %3961 = vmatpush.bf16.msra.mxu0 %v5650_v31  ;;  %v2901_v47 = vsel %vm2898_vm4, %v2900_v20, %v2896_v13 }
 0x21f   : > { %v2921_v4 = vmul.f32 %v5789_v3, %v2920_v38  ;;  %v2930_v16 = vor.u32 1.1754944e-38, %v2929_v55  ;;  %v2010_v34 = vadd.f32 %v2009_v59, %v7034_v61  ;;  %v5662_v59 = vld [vmem:[%s9178_s7 + $0x70] sm:$0xff]  ;;  %v7358_v35 = vpop.f32.mrf.mxu1  ;;  %v7363_v13 = vpack.c.b16 %v1551_v2, %v1550_v21 }
 0x220   : > { %v7330_v60 = vadd.f32 %v7183_v26, %v2097_v1  ;;  %v7347_v55 = vpack.c.b16 %v1649_v25, %v1648_v57  ;;  %4046 = vmatpush.bf16.msra.mxu1 %v5662_v59  ;;  %v1175_v21 = vpack.c.bf16 %v6985_v62, %v6985_v62  ;;  %v1176_v2 = vpack.c.bf16 %v7007_v42, %v7007_v42 }
 0x221   : > { %v2922_v6 = vadd.f32 %v5789_v3, %v2921_v4 }
 0x222   : > { %v7332_v28 = vpop.eup %5790  ;;  %v5467_v22 = vmul.f32 -1.442695, %v7330_v60  ;;  %3962 = vmatpush.bf16.msra.mxu0 %v5649_v19 }
 0x223   : > { %v5793_v53 = vpop.eup %5792  ;;  %v2949_v26 = vmul.f32 %v7332_v28, %v7291_v52  ;;  %v2926_v54 = vsel %vm2925_vm6, %v5789_v3, %v2922_v6  ;;  %v7350_v6 = vmul.f32 %v2901_v47, %v7158_v45  ;;  %v5648_v45 = vld [vmem:[%s9178_s7] sm:$0xff]  ;;  %vm2954_vm8 = vweird.f32 %v7332_v28 }
 0x224   : > { %v7342_v7 = vadd.f32 1.0, %v5793_v53  ;;  %5794 = vpow2.f32 %v5467_v22  ;;  %v2012_v43 = vpop.f32.mrf.mxu2  ;;  %v2931_v39 = vsel %vm2928_vm7, %v2930_v16, %v2926_v54  ;;  %v2957_v47 = vand.u32 2147483647, %v7291_v52  ;;  %vm7395_vm10 = vmor %vm2953_vm9, %vm2954_vm8 }
 0x225   : > { %v2098_v29 = vpop.f32.mrf.mxu3  ;;  %v2950_v38 = vsub.f32 1.0, %v2949_v26  ;;  %2051 = vmatmul.bf16.gmra.mxu2 %v1473_v58  ;;  %2318 = vmatmul.bf16.gmra.mxu1 %v1473_v58  ;;  %v7353_v22 = vmul.f32 %v2931_v39, %v7195_v50  ;;  %v511_v58 = vld [vmem:[%s6820_s14 + $0xf8] sm:$0xff]  ;;  %v2013_v42 = vadd.f32 %v2012_v43, %v7034_v61  ;;  %v1457_v39 = vunpack.c.l.b16 %v1176_v2 }
 0x226   : > { %v2099_v1 = vadd.f32 %v2098_v29, %v2010_v34  ;;  %5796 = vrcp.f32 %v7342_v7  ;;  %v7356_v3 = vpop.f32.mrf.mxu0  ;;  %3963 = vmatpush.bf16.msra.mxu0 %v5648_v45  ;;  %v1395_v19 = vpack.c.bf16 %v511_v58, %v511_v58  ;;  %v1456_v29 = vunpack.c.l.b16 %v1175_v21 }
 0x227   : > { %v2951_v4 = vmul.f32 %v7332_v28, %v2950_v38  ;;  %v2959_v38 = vand.u32 2147483648, %v7291_v52  ;;  %v2989_v45 = vand.u32 2147483648, %v7342_v7  ;;  %vm7399_vm11 = vcmp.eq.f32.partialorder %v2957_v47, 8.507059e+37  ;;  %v7404_v52 = vpop.f32.mrf.mxu1 }
 0x228   : > { %v7361_v31 = vadd.f32 %v7218_v27, %v2099_v1  ;;  %v510_v27 = vld [vmem:[%s6820_s14 + $0xf0] sm:$0xff]  ;;  %vm2983_vm13 = vweird.f32 %v7342_v7  ;;  %v1474_v50 = vpack.c.b16 %v1457_v39, %v1456_v29 }
 0x229   : > { %2140 = vmatmul.bf16.gmra.mxu3 %v7363_v13  ;;  %2234 = vmatmul.bf16.gmra.mxu0 %v7347_v55  ;;  %v1394_v34 = vpack.c.bf16 %v510_v27, %v510_v27  ;;  %v2952_v54 = vadd.f32 %v7332_v28, %v2951_v4  ;;  %v2987_v27 = vand.u32 2147483647, %v7342_v7  ;;  %v2960_v47 = vor.u32 1.1754944e-38, %v2959_v38 }
 0x22a   : > { %v5469_v20 = vmul.f32 -1.442695, %v7361_v31  ;;  %v5795_v57 = vpop.eup %5794 }
 0x22b   : > { %v7380_v25 = vadd.f32 1.0, %v5795_v57  ;;  %v1650_v58 = vunpack.c.l.b16 %v1394_v34  ;;  %v1651_v57 = vunpack.c.l.b16 %v1395_v19  ;;  %v2956_v2 = vsel %vm7395_vm10, %v7332_v28, %v2952_v54  ;;  %v5616_v34 = vld [vmem:[%s9176_s5 + $0x84] sm:$0xf]  ;;  %v5327_v19 = vld [vmem:[%s9176_s5 + $0x88] sm:$0xf0] }
 0x22c   : > { %5798 = vpow2.f32 %v5469_v20  ;;  %v5797_v53 = vpop.eup %5796  ;;  %v2014_v16 = vpop.f32.mrf.mxu2  ;;  %v5330_v38 = vor.u32 %v5616_v34, %v5327_v19  ;;  %vm2988_vm15 = vcmp.eq.f32.partialorder %v2987_v27, 8.507059e+37  ;;  %v5632_v34 = vld [vmem:[%s9176_s5 + $0x104] sm:$0xf] }
 0x22d   : > { %v2101_v26 = vpop.f32.mrf.mxu3  ;;  %v2979_v62 = vmul.f32 %v5797_v53, %v7342_v7  ;;  %5800 = vrcp.f32 %v7380_v25  ;;  %vm2984_vm12 = vweird.f32 %v5797_v53  ;;  %v2961_v7 = vsel %vm7399_vm11, %v2960_v47, %v2956_v2 }
 0x22e   : > { %v7389_v1 = vpop.f32.mrf.mxu0  ;;  %v2102_v20 = vadd.f32 %v2101_v26, %v2013_v42  ;;  %vm2985_vm14 = vmor %vm2983_vm13, %vm2984_vm12  ;;  %v2015_v39 = vadd.f32 %v2014_v16, %v7034_v61  ;;  %2341 = vmatpush.bf16.msra.mxu2 %v5330_v38  ;;  %v7441_v16 = vmul.f32 %v2961_v7, %v7222_v49  ;;  %v3019_v7 = vand.u32 2147483648, %v7380_v25 }
 0x22f   : > { %v2980_v59 = vsub.f32 1.0, %v2979_v62  ;;  %vm3013_vm1 = vweird.f32 %v7380_v25 }
 0x230   : > { %v7410_v62 = vadd.f32 %v7259_v24, %v2102_v20 }
 0x231   : > { %v2981_v26 = vmul.f32 %v5797_v53, %v2980_v59  ;;  %v2990_v59 = vor.u32 1.1754944e-38, %v2989_v45  ;;  %v7430_v45 = vpack.c.b16 %v1651_v57, %v1650_v58 }
 0x232   : > { %v5799_v21 = vpop.eup %5798  ;;  %v5471_v24 = vmul.f32 -1.442695, %v7410_v62 }
 0x233   : > { %v7413_v42 = vadd.f32 1.0, %v5799_v21  ;;  %v7421_v28 = vpop.eup %5800  ;;  %v2982_v54 = vadd.f32 %v5797_v53, %v2981_v26  ;;  %9237 = vst [vmem:[#allocation30_spill] sm:$0xff] %v7430_v45 }
 0x234   : > { %v3009_v29 = vmul.f32 %v7421_v28, %v7380_v25  ;;  %v2017_v43 = vpop.f32.mrf.mxu2  ;;  %vm3014_vm0 = vweird.f32 %v7421_v28 }
 0x235   : > { %5802 = vrcp.f32 %v7413_v42  ;;  %v2103_v20 = vpop.f32.mrf.mxu3  ;;  %v2986_v4 = vsel %vm2985_vm14, %v5797_v53, %v2982_v54  ;;  %2056 = vmatmul.bf16.gmra.mxu2 %v1474_v50  ;;  %2323 = vmatmul.bf16.gmra.mxu1 %v1474_v50  ;;  %v5391_v53 = vld [vmem:[%s9176_s5 + $0x108] sm:$0xf0]  ;;  %v2018_v38 = vadd.f32 %v2017_v43, %v7034_v61  ;;  %vm7466_vm2 = vmor %vm3013_vm1, %vm3014_vm0  ;;  %v3049_v43 = vand.u32 2147483648, %v7413_v42 }
 0x236   : > { %5804 = vpow2.f32 %v5471_v24  ;;  %v2991_v21 = vsel %vm2988_vm15, %v2990_v59, %v2986_v4  ;;  %v3010_v26 = vsub.f32 1.0, %v3009_v29  ;;  %v2104_v2 = vadd.f32 %v2103_v20, %v2015_v39  ;;  %v7432_v47 = vpop.f32.mrf.mxu0 }
 0x237   : > { %v7444_v50 = vmul.f32 %v2991_v21, %v7285_v14  ;;  %v5394_v27 = vor.u32 %v5632_v34, %v5391_v53  ;;  %v7455_v14 = vpop.f32.mrf.mxu1  ;;  %v3017_v20 = vand.u32 2147483647, %v7380_v25  ;;  %vm3043_vm5 = vweird.f32 %v7413_v42 }
 0x238   : > { %v3011_v58 = vmul.f32 %v7421_v28, %v3010_v26  ;;  %v7448_v57 = vadd.f32 %v7313_v12, %v2104_v2  ;;  %v3047_v2 = vand.u32 2147483647, %v7413_v42  ;;  %v3050_v19 = vor.u32 1.1754944e-38, %v3049_v43 }
 0x239   : > { %2145 = vmatmul.bf16.gmra.mxu3 %v7009_v63  ;;  %2239 = vmatmul.bf16.gmra.mxu0 %v7430_v45  ;;  %vm3018_vm4 = vcmp.eq.f32.partialorder %v3017_v20, 8.507059e+37 }
 0x23a   : > { %v5473_v49 = vmul.f32 -1.442695, %v7448_v57  ;;  %2430 = vmatpush.bf16.msra.mxu3 %v5394_v27  ;;  %v3012_v24 = vadd.f32 %v7421_v28, %v3011_v58  ;;  %v3020_v58 = vor.u32 1.1754944e-38, %v3019_v7  ;;  %vm3048_vm7 = vcmp.eq.f32.partialorder %v3047_v2, 8.507059e+37 }
 0x23b   : > { %v5803_v54 = vpop.eup %5802 }
 0x23c   : > { %v5805_v59 = vpop.eup %5804  ;;  %v3039_v12 = vmul.f32 %v5803_v54, %v7413_v42  ;;  %5806 = vpow2.f32 %v5473_v49  ;;  %v3016_v53 = vsel %vm7466_vm2, %v7421_v28, %v3012_v24  ;;  %vm3044_vm3 = vweird.f32 %v5803_v54  ;;  %v2019_v49 = vpop.f32.mrf.mxu2 }
 0x23d   : > { %v7462_v29 = vadd.f32 1.0, %v5805_v59  ;;  %v2106_v39 = vpop.f32.mrf.mxu3  ;;  %vm3045_vm6 = vmor %vm3043_vm5, %vm3044_vm3  ;;  %v2020_v7 = vadd.f32 %v2019_v49, %v7034_v61  ;;  %v9240_v49 = vpack.c.bf16 %v7174_v30, %v7171_v11 }
 0x23e   : > { %v3040_v4 = vsub.f32 1.0, %v3039_v12  ;;  %v2107_v21 = vadd.f32 %v2106_v39, %v2018_v38  ;;  %v7473_v34 = vpop.f32.mrf.mxu0  ;;  %v3021_v39 = vsel %vm3018_vm4, %v3020_v58, %v3016_v53 }
 0x23f   : > { %5808 = vrcp.f32 %v7462_v29  ;;  %v7486_v20 = vpop.f32.mrf.mxu1  ;;  %v7489_v42 = vmul.f32 %v3021_v39, %v7330_v60  ;;  %v5661_v60 = vld [vmem:[%s9178_s7 + $0x68] sm:$0xff]  ;;  %vm3073_vm9 = vweird.f32 %v7462_v29 }
 0x240   : > { %v3041_v27 = vmul.f32 %v5803_v54, %v3040_v4  ;;  %v7479_v25 = vadd.f32 %v7356_v3, %v2107_v21  ;;  %4047 = vmatpush.bf16.msra.mxu1 %v5661_v60 }
 0x242   : > { %v3042_v59 = vadd.f32 %v5803_v54, %v3041_v27  ;;  %v5475_v12 = vmul.f32 -1.442695, %v7479_v25  ;;  %v5807_v38 = vpop.eup %5806 }
 0x243   : > { %v7483_v28 = vadd.f32 1.0, %v5807_v38 }
 0x244   : > { %v3046_v45 = vsel %vm3045_vm6, %v5803_v54, %v3042_v59  ;;  %5810 = vpow2.f32 %v5475_v12 }
 0x245   : > { %v5809_v24 = vpop.eup %5808  ;;  %v3051_v3 = vsel %vm3048_vm7, %v3050_v19, %v3046_v45  ;;  %v2108_v4 = vpop.f32.mrf.mxu3  ;;  %5812 = vrcp.f32 %v7483_v28  ;;  %2061 = vmatmul.bf16.gmra.mxu2 %v7027_v23  ;;  %2328 = vmatmul.bf16.gmra.mxu1 %v7027_v23  ;;  %vm3103_vm13 = vweird.f32 %v7483_v28 }
 0x246   : > { %v7492_v21 = vmul.f32 %v3051_v3, %v7361_v31  ;;  %v3069_v26 = vmul.f32 %v5809_v24, %v7462_v29  ;;  %v2109_v45 = vadd.f32 %v2108_v4, %v2020_v7  ;;  %v7498_v19 = vpop.f32.mrf.mxu0  ;;  %vm3074_vm8 = vweird.f32 %v5809_v24 }
 0x247   : > { %v3079_v3 = vand.u32 2147483648, %v7462_v29  ;;  %v3077_v7 = vand.u32 2147483647, %v7462_v29  ;;  %vm7523_vm10 = vmor %vm3073_vm9, %vm3074_vm8 }
 0x248   : > { %v3070_v54 = vsub.f32 1.0, %v3069_v26  ;;  %v3800_v31 = vpack.c.bf16 %v7492_v21, %v7489_v42  ;;  %v7506_v2 = vadd.f32 %v7389_v1, %v2109_v45  ;;  %v2022_v43 = vpop.f32.mrf.mxu2  ;;  %v3107_v45 = vand.u32 2147483647, %v7483_v28 }
 0x249   : > { %2150 = vmatmul.bf16.gmra.mxu3 %v7040_v0  ;;  %3964 = vmatmul.bf16.vlgmr.msra.gmra.mxu0 %v9240_v49  ;;  %v2023_v38 = vadd.f32 %v2022_v43, %v7034_v61  ;;  %vm3078_vm12 = vcmp.eq.f32.partialorder %v3077_v7, 8.507059e+37 }
 0x24a   : > { %v5811_v53 = vpop.eup %5810  ;;  %v3071_v27 = vmul.f32 %v5809_v24, %v3070_v54  ;;  %v5477_v58 = vmul.f32 -1.442695, %v7506_v2  ;;  %v3109_v54 = vand.u32 2147483648, %v7483_v28  ;;  %vm3108_vm15 = vcmp.eq.f32.partialorder %v3107_v45, 8.507059e+37 }
 0x24b   : > { %v7509_v23 = vadd.f32 1.0, %v5811_v53  ;;  %v5813_v59 = vpop.eup %5812 }
 0x24c   : > { %v3072_v12 = vadd.f32 %v5809_v24, %v3071_v27  ;;  %v3099_v1 = vmul.f32 %v5813_v59, %v7483_v28  ;;  %vm3104_vm11 = vweird.f32 %v5813_v59  ;;  %v3080_v27 = vor.u32 1.1754944e-38, %v3079_v3 }
 0x24d   : > { %5814 = vrcp.f32 %v7509_v23  ;;  %v2111_v39 = vpop.f32.mrf.mxu3  ;;  %vm3105_vm14 = vmor %vm3103_vm13, %vm3104_vm11  ;;  %v3110_v26 = vor.u32 1.1754944e-38, %v3109_v54  ;;  %vm3133_vm1 = vweird.f32 %v7509_v23 }
 0x24e   : > { %5816 = vpow2.f32 %v5477_v58  ;;  %v3100_v4 = vsub.f32 1.0, %v3099_v1  ;;  %v2112_v11 = vadd.f32 %v2111_v39, %v2023_v38  ;;  %v7521_v30 = vpop.f32.mrf.mxu0  ;;  %v3076_v60 = vsel %vm7523_vm10, %v5809_v24, %v3072_v12 }
 0x24f   : > { %v3081_v39 = vsel %vm3078_vm12, %v3080_v27, %v3076_v60 }
 0x250   : > { %v3101_v43 = vmul.f32 %v5813_v59, %v3100_v4  ;;  %v7532_v53 = vadd.f32 %v7432_v47, %v2112_v11  ;;  %v2024_v29 = vpop.f32.mrf.mxu2  ;;  %v7543_v28 = vmul.f32 %v3081_v39, %v7410_v62 }
 0x251   : > { %v2025_v47 = vadd.f32 %v2024_v29, %v7034_v61 }
 0x252   : > { %v3102_v49 = vadd.f32 %v5813_v59, %v3101_v43  ;;  %v5479_v1 = vmul.f32 -1.442695, %v7532_v53 }
 0x253   : > { %v7534_v58 = vpop.eup %5814 }
 0x254   : > { %v5817_v38 = vpop.eup %5816  ;;  %v3129_v24 = vmul.f32 %v7534_v58, %v7509_v23  ;;  %v3106_v12 = vsel %vm3105_vm14, %v5813_v59, %v3102_v49  ;;  %5818 = vpow2.f32 %v5479_v1  ;;  %vm3134_vm0 = vweird.f32 %v7534_v58 }
 0x255   : > { %v2730_v3 = vadd.f32 1.0, %v5817_v38  ;;  %v2113_v4 = vpop.f32.mrf.mxu3  ;;  %v3111_v7 = vsel %vm3108_vm15, %v3110_v26, %v3106_v12  ;;  %2342 = vmatmul.bf16.vlgmr.msra.gmra.mxu2 %v6867_v40  ;;  %vm7572_vm2 = vmor %vm3133_vm1, %vm3134_vm0 }
 0x256   : > { %v3130_v11 = vsub.f32 1.0, %v3129_v24  ;;  %v2114_v43 = vadd.f32 %v2113_v4, %v2025_v47  ;;  %v7546_v54 = vmul.f32 %v3111_v7, %v7448_v57  ;;  %v7548_v60 = vpop.f32.mrf.mxu0  ;;  %v9243_v57 = vpack.c.bf16 %v7257_v56, %v7275_v41 }
 0x257   : > { %5820 = vrcp.f32 %v2730_v3  ;;  %v3137_v56 = vand.u32 2147483647, %v7509_v23  ;;  %v3169_v47 = vand.u32 2147483648, %v2730_v3  ;;  %vm3163_vm5 = vweird.f32 %v2730_v3 }
 0x258   : > { %v7551_v59 = vadd.f32 %v7473_v34, %v2114_v43  ;;  %v2027_v45 = vpop.f32.mrf.mxu2  ;;  %v3802_v29 = vpack.c.bf16 %v7546_v54, %v7543_v28  ;;  %v3131_v27 = vmul.f32 %v7534_v58, %v3130_v11 }
 0x259   : > { %2431 = vmatmul.bf16.vlgmr.msra.gmra.mxu3 %v6847_v15  ;;  %3969 = vmatmul.bf16.gmra.mxu0 %v9243_v57  ;;  %v2028_v1 = vadd.f32 %v2027_v45, %v7034_v61  ;;  %v3139_v15 = vand.u32 2147483648, %v7509_v23  ;;  %v3167_v23 = vand.u32 2147483647, %v2730_v3  ;;  %vm3138_vm4 = vcmp.eq.f32.partialorder %v3137_v56, 8.507059e+37 }
 0x25a   : > { %v5481_v40 = vmul.f32 -1.442695, %v7551_v59  ;;  %v5819_v62 = vpop.eup %5818  ;;  %v3132_v39 = vadd.f32 %v7534_v58, %v3131_v27 }
 0x25b   : > { %v7561_v49 = vadd.f32 1.0, %v5819_v62  ;;  %vm3168_vm7 = vcmp.eq.f32.partialorder %v3167_v23, 8.507059e+37 }
 0x25c   : > { %5822 = vpow2.f32 %v5481_v40  ;;  %v3136_v45 = vsel %vm7572_vm2, %v7534_v58, %v3132_v39  ;;  %v3140_v40 = vor.u32 1.1754944e-38, %v3139_v15 }
 0x25d   : > { %v5821_v34 = vpop.eup %5820  ;;  %v2116_v38 = vpop.f32.mrf.mxu3  ;;  %5824 = vrcp.f32 %v7561_v49  ;;  %vm3193_vm9 = vweird.f32 %v7561_v49 }
 0x25e   : > { %v3159_v26 = vmul.f32 %v5821_v34, %v2730_v3  ;;  %v2117_v24 = vadd.f32 %v2116_v38, %v2028_v1  ;;  %v7570_v12 = vpop.f32.mrf.mxu0  ;;  %vm3164_vm3 = vweird.f32 %v5821_v34  ;;  %v5660_v3 = vld [vmem:[%s9178_s7 + $0x60] sm:$0xff] }
 0x25f   : > { %vm3165_vm6 = vmor %vm3163_vm5, %vm3164_vm3  ;;  %4048 = vmatpush.bf16.msra.mxu1 %v5660_v3 }
 0x260   : > { %v3160_v41 = vsub.f32 1.0, %v3159_v26  ;;  %v7577_v7 = vadd.f32 %v7498_v19, %v2117_v24  ;;  %v2029_v11 = vpop.f32.mrf.mxu2  ;;  %v3170_v19 = vor.u32 1.1754944e-38, %v3169_v47  ;;  %v3141_v26 = vsel %vm3138_vm4, %v3140_v40, %v3136_v45 }
 0x261   : > { %v2030_v58 = vadd.f32 %v2029_v11, %v7034_v61  ;;  %v7593_v47 = vmul.f32 %v3141_v26, %v7479_v25 }
 0x262   : > { %v5823_v43 = vpop.eup %5822  ;;  %v3161_v27 = vmul.f32 %v5821_v34, %v3160_v41  ;;  %v5483_v57 = vmul.f32 -1.442695, %v7577_v7 }
 0x263   : > { %v7582_v62 = vadd.f32 1.0, %v5823_v43  ;;  %v5825_v1 = vpop.eup %5824 }
 0x264   : > { %v3162_v38 = vadd.f32 %v5821_v34, %v3161_v27  ;;  %v3189_v24 = vmul.f32 %v5825_v1, %v7561_v49  ;;  %vm3194_vm8 = vweird.f32 %v5825_v1 }
 0x265   : > { %5826 = vrcp.f32 %v7582_v62  ;;  %v2118_v39 = vpop.f32.mrf.mxu3  ;;  %2347 = vmatmul.bf16.gmra.mxu2 %v6893_v8  ;;  %vm7617_vm10 = vmor %vm3193_vm9, %vm3194_vm8  ;;  %vm3223_vm13 = vweird.f32 %v7582_v62 }
 0x266   : > { %v3166_v41 = vsel %vm3165_vm6, %v5821_v34, %v3162_v38  ;;  %5828 = vpow2.f32 %v5483_v57  ;;  %v3190_v4 = vsub.f32 1.0, %v3189_v24  ;;  %v2119_v56 = vadd.f32 %v2118_v39, %v2030_v58  ;;  %v7601_v8 = vpop.f32.mrf.mxu0 }
 0x267   : > { %v3171_v15 = vsel %vm3168_vm7, %v3170_v19, %v3166_v41  ;;  %v3199_v19 = vand.u32 2147483648, %v7561_v49  ;;  %v3197_v24 = vand.u32 2147483647, %v7561_v49  ;;  %v3227_v39 = vand.u32 2147483647, %v7582_v62 }
 0x268   : > { %v7596_v43 = vmul.f32 %v3171_v15, %v7506_v2  ;;  %v3191_v11 = vmul.f32 %v5825_v1, %v3190_v4  ;;  %v7599_v34 = vadd.f32 %v7521_v30, %v2119_v56  ;;  %v2032_v45 = vpop.f32.mrf.mxu2  ;;  %v9246_v2 = vpack.c.bf16 %v7353_v22, %v7350_v6 }
 0x269   : > { %2436 = vmatmul.bf16.gmra.mxu3 %v6863_v37  ;;  %v2033_v38 = vadd.f32 %v2032_v45, %v7034_v61  ;;  %v3229_v41 = vand.u32 2147483648, %v7582_v62  ;;  %v3200_v49 = vor.u32 1.1754944e-38, %v3199_v19  ;;  %vm3198_vm12 = vcmp.eq.f32.partialorder %v3197_v24, 8.507059e+37 }
 0x26a   : > { %v3804_v27 = vpack.c.bf16 %v7596_v43, %v7593_v47  ;;  %v5485_v25 = vmul.f32 -1.442695, %v7599_v34  ;;  %3974 = vmatmul.bf16.gmra.mxu0 %v9246_v2  ;;  %v3192_v57 = vadd.f32 %v5825_v1, %v3191_v11  ;;  %vm3228_vm15 = vcmp.eq.f32.partialorder %v3227_v39, 8.507059e+37 }
 0x26b   : > { %v5827_v23 = vpop.eup %5826 }
 0x26c   : > { %v5829_v40 = vpop.eup %5828  ;;  %v3219_v30 = vmul.f32 %v5827_v23, %v7582_v62  ;;  %5830 = vpow2.f32 %v5485_v25  ;;  %v3196_v15 = vsel %vm7617_vm10, %v5825_v1, %v3192_v57  ;;  %vm3224_vm11 = vweird.f32 %v5827_v23 }
 0x26d   : > { %v7613_v37 = vadd.f32 1.0, %v5829_v40  ;;  %v2121_v26 = vpop.f32.mrf.mxu3  ;;  %v3201_v2 = vsel %vm3198_vm12, %v3200_v49, %v3196_v15  ;;  %vm3225_vm14 = vmor %vm3223_vm13, %vm3224_vm11  ;;  %v3230_v40 = vor.u32 1.1754944e-38, %v3229_v41 }
 0x26e   : > { %v3220_v58 = vsub.f32 1.0, %v3219_v30  ;;  %v2122_v6 = vadd.f32 %v2121_v26, %v2033_v38  ;;  %v7631_v57 = vpop.f32.mrf.mxu0  ;;  %v7635_v24 = vmul.f32 %v3201_v2, %v7532_v53 }
 0x26f   : > { %5832 = vrcp.f32 %v7613_v37  ;;  %vm3253_vm1 = vweird.f32 %v7613_v37  ;;  %v3257_v2 = vand.u32 2147483647, %v7613_v37 }
 0x270   : > { %v3221_v4 = vmul.f32 %v5827_v23, %v3220_v58  ;;  %v7627_v56 = vadd.f32 %v7548_v60, %v2122_v6  ;;  %v2034_v3 = vpop.f32.mrf.mxu2 }
 0x271   : > { %v2035_v19 = vadd.f32 %v2034_v3, %v7034_v61  ;;  %vm3258_vm4 = vcmp.eq.f32.partialorder %v3257_v2, 8.507059e+37 }
 0x272   : > { %v3222_v11 = vadd.f32 %v5827_v23, %v3221_v4  ;;  %v5487_v45 = vmul.f32 -1.442695, %v7627_v56  ;;  %v5831_v25 = vpop.eup %5830 }
 0x273   : > { %v2738_v1 = vadd.f32 1.0, %v5831_v25  ;;  %v3259_v25 = vand.u32 2147483648, %v7613_v37 }
 0x274   : > { %v3226_v30 = vsel %vm3225_vm14, %v5827_v23, %v3222_v11  ;;  %5834 = vpow2.f32 %v5487_v45 }
 0x275   : > { %v5833_v60 = vpop.eup %5832  ;;  %v3231_v38 = vsel %vm3228_vm15, %v3230_v40, %v3226_v30  ;;  %v2123_v26 = vpop.f32.mrf.mxu3  ;;  %5836 = vrcp.f32 %v2738_v1  ;;  %2352 = vmatmul.bf16.gmra.mxu2 %v6907_v36  ;;  %v9249_v36 = vpack.c.bf16 %v7444_v50, %v7441_v16  ;;  %v3287_v30 = vand.u32 2147483647, %v2738_v1 }
 0x276   : > { %v7638_v62 = vmul.f32 %v3231_v38, %v7551_v59  ;;  %v3249_v58 = vmul.f32 %v5833_v60, %v7613_v37  ;;  %v2124_v23 = vadd.f32 %v2123_v26, %v2035_v19  ;;  %vm3254_vm0 = vweird.f32 %v5833_v60 }
 0x277   : > { %vm7661_vm2 = vmor %vm3253_vm1, %vm3254_vm0  ;;  %v3289_v38 = vand.u32 2147483648, %v2738_v1  ;;  %vm3283_vm5 = vweird.f32 %v2738_v1  ;;  %vm3288_vm7 = vcmp.eq.f32.partialorder %v3287_v30, 8.507059e+37 }
 0x278   : > { %v3250_v6 = vsub.f32 1.0, %v3249_v58  ;;  %v3806_v22 = vpack.c.bf16 %v7638_v62, %v7635_v24  ;;  %v7645_v39 = vadd.f32 %v7570_v12, %v2124_v23  ;;  %v2037_v41 = vpop.f32.mrf.mxu2 }
 0x279   : > { %2441 = vmatmul.bf16.gmra.mxu3 %v6889_v5  ;;  %v2038_v12 = vadd.f32 %v2037_v41, %v7034_v61  ;;  %v7657_v5 = vpop.f32.mrf.mxu0 }
 0x27a   : > { %v5835_v15 = vpop.eup %5834  ;;  %v3251_v53 = vmul.f32 %v5833_v60, %v3250_v6  ;;  %v5489_v4 = vmul.f32 -1.442695, %v7645_v39  ;;  %3979 = vmatmul.bf16.gmra.mxu0 %v9249_v36  ;;  %v3260_v6 = vor.u32 1.1754944e-38, %v3259_v25  ;;  %v3290_v36 = vor.u32 1.1754944e-38, %v3289_v38 }
 0x27b   : > { %v7648_v59 = vadd.f32 1.0, %v5835_v15  ;;  %v5837_v49 = vpop.eup %5836 }
 0x27c   : > { %v3252_v3 = vadd.f32 %v5833_v60, %v3251_v53  ;;  %v3279_v11 = vmul.f32 %v5837_v49, %v2738_v1  ;;  %vm3284_vm3 = vweird.f32 %v5837_v49  ;;  %v5659_v1 = vld [vmem:[%s9178_s7 + $0x58] sm:$0xff] }
 0x27d   : > { %5838 = vrcp.f32 %v7648_v59  ;;  %v2126_v45 = vpop.f32.mrf.mxu3  ;;  %vm3285_vm6 = vmor %vm3283_vm5, %vm3284_vm3  ;;  %4049 = vmatpush.bf16.msra.mxu1 %v5659_v1  ;;  %vm3313_vm9 = vweird.f32 %v7648_v59  ;;  %v3317_v42 = vand.u32 2147483647, %v7648_v59 }
 0x27e   : > { %5840 = vpow2.f32 %v5489_v4  ;;  %v3280_v16 = vsub.f32 1.0, %v3279_v11  ;;  %v2127_v50 = vadd.f32 %v2126_v45, %v2038_v12  ;;  %v3256_v19 = vsel %vm7661_vm2, %v5833_v60, %v3252_v3 }
 0x27f   : > { %v3261_v4 = vsel %vm3258_vm4, %v3260_v6, %v3256_v19  ;;  %vm3318_vm12 = vcmp.eq.f32.partialorder %v3317_v42, 8.507059e+37 }
 0x280   : > { %v3281_v26 = vmul.f32 %v5837_v49, %v3280_v16  ;;  %v7668_v58 = vadd.f32 %v7601_v8, %v2127_v50  ;;  %v2039_v23 = vpop.f32.mrf.mxu2  ;;  %v7681_v16 = vmul.f32 %v3261_v4, %v7577_v7 }
 0x281   : > { %v2040_v3 = vadd.f32 %v2039_v23, %v7034_v61 }
 0x282   : > { %v3282_v37 = vadd.f32 %v5837_v49, %v3281_v26  ;;  %v5491_v15 = vmul.f32 -1.442695, %v7668_v58 }
 0x283   : > { %v7670_v41 = vpop.eup %5838 }
 0x284   : > { %v5841_v53 = vpop.eup %5840  ;;  %v3309_v60 = vmul.f32 %v7670_v41, %v7648_v59  ;;  %v3286_v8 = vsel %vm3285_vm6, %v5837_v49, %v3282_v37  ;;  %5842 = vpow2.f32 %v5491_v15  ;;  %v2222_v49 = vpop.f32.mrf.mxu0  ;;  %vm3314_vm8 = vweird.f32 %v7670_v41 }
 0x285   : > { %v2742_v11 = vadd.f32 1.0, %v5841_v53  ;;  %v2128_v12 = vpop.f32.mrf.mxu3  ;;  %v3291_v45 = vsel %vm3288_vm7, %v3290_v36, %v3286_v8  ;;  %2357 = vmatmul.bf16.gmra.mxu2 %v6935_v17  ;;  %vm7706_vm10 = vmor %vm3313_vm9, %vm3314_vm8 }
 0x286   : > { %v3310_v25 = vsub.f32 1.0, %v3309_v60  ;;  %v2129_v2 = vadd.f32 %v2128_v12, %v2040_v3  ;;  %v7684_v50 = vmul.f32 %v3291_v45, %v7599_v34 }
 0x287   : > { %5844 = vrcp.f32 %v2742_v11  ;;  %v3347_v12 = vand.u32 2147483647, %v2742_v11  ;;  %vm3343_vm13 = vweird.f32 %v2742_v11 }
 0x288   : > { %v7687_v40 = vadd.f32 %v7631_v57, %v2129_v2  ;;  %v2042_v30 = vpop.f32.mrf.mxu2  ;;  %v3808_v17 = vpack.c.bf16 %v7684_v50, %v7681_v16  ;;  %v3311_v38 = vmul.f32 %v7670_v41, %v3310_v25 }
 0x289   : > { %2446 = vmatmul.bf16.gmra.mxu3 %v6905_v32  ;;  %v2043_v26 = vadd.f32 %v2042_v30, %v7034_v61  ;;  %v3319_v32 = vand.u32 2147483648, %v7648_v59  ;;  %vm3348_vm15 = vcmp.eq.f32.partialorder %v3347_v12, 8.507059e+37 }
 0x28a   : > { %v5493_v19 = vmul.f32 -1.442695, %v7687_v40  ;;  %v5843_v7 = vpop.eup %5842  ;;  %3984 = vmatmul.bf16.gmra.mxu0 %v3800_v31  ;;  %v3312_v6 = vadd.f32 %v7670_v41, %v3311_v38  ;;  %v3349_v31 = vand.u32 2147483648, %v2742_v11 }
 0x28b   : > { %v7697_v34 = vadd.f32 1.0, %v5843_v7  ;;  %v3320_v59 = vor.u32 1.1754944e-38, %v3319_v32 }
 0x28c   : > { %5846 = vpow2.f32 %v5493_v19  ;;  %v3316_v3 = vsel %vm7706_vm10, %v7670_v41, %v3312_v6  ;;  %v2225_v45 = vpop.f32.mrf.mxu0 }
 0x28d   : > { %v5845_v57 = vpop.eup %5844  ;;  %v2131_v23 = vpop.f32.mrf.mxu3  ;;  %5848 = vrcp.f32 %v7697_v34  ;;  %v3321_v38 = vsel %vm3318_vm12, %v3320_v59, %v3316_v3  ;;  %vm3373_vm1 = vweird.f32 %v7697_v34  ;;  %v3377_v12 = vand.u32 2147483647, %v7697_v34 }
 0x28e   : > { %v3339_v37 = vmul.f32 %v5845_v57, %v2742_v11  ;;  %v2132_v15 = vadd.f32 %v2131_v23, %v2043_v26  ;;  %vm3344_vm11 = vweird.f32 %v5845_v57  ;;  %v7724_v11 = vmul.f32 %v3321_v38, %v7627_v56 }
 0x28f   : > { %vm3345_vm14 = vmor %vm3343_vm13, %vm3344_vm11  ;;  %vm3378_vm4 = vcmp.eq.f32.partialorder %v3377_v12, 8.507059e+37 }
 0x290   : > { %v3340_v21 = vsub.f32 1.0, %v3339_v37  ;;  %v7711_v4 = vadd.f32 %v7657_v5, %v2132_v15  ;;  %v2044_v36 = vpop.f32.mrf.mxu2  ;;  %v3350_v5 = vor.u32 1.1754944e-38, %v3349_v31 }
 0x291   : > { %v2045_v41 = vadd.f32 %v2044_v36, %v7034_v61 }
 0x292   : > { %v5847_v60 = vpop.eup %5846  ;;  %v3341_v8 = vmul.f32 %v5845_v57, %v3340_v21  ;;  %v5495_v2 = vmul.f32 -1.442695, %v7711_v4 }
 0x293   : > { %v7716_v25 = vadd.f32 1.0, %v5847_v60  ;;  %v5849_v1 = vpop.eup %5848  ;;  %v3379_v60 = vand.u32 2147483648, %v7697_v34 }
 0x294   : > { %v3342_v30 = vadd.f32 %v5845_v57, %v3341_v8  ;;  %v3369_v19 = vmul.f32 %v5849_v1, %v7697_v34  ;;  %vm3374_vm0 = vweird.f32 %v5849_v1  ;;  %v2227_v36 = vpop.f32.mrf.mxu0 }
 0x295   : > { %5850 = vrcp.f32 %v7716_v25  ;;  %v2133_v7 = vpop.f32.mrf.mxu3  ;;  %2362 = vmatmul.bf16.gmra.mxu2 %v6949_v48  ;;  %v7734_v48 = vpop.f32.mrf.mxu1  ;;  %vm7747_vm2 = vmor %vm3373_vm1, %vm3374_vm0  ;;  %v3407_v59 = vand.u32 2147483647, %v7716_v25  ;;  %v3380_v34 = vor.u32 1.1754944e-38, %v3379_v60  ;;  %vm3403_vm5 = vweird.f32 %v7716_v25 }
 0x296   : > { %v3346_v26 = vsel %vm3345_vm14, %v5845_v57, %v3342_v30  ;;  %5852 = vpow2.f32 %v5495_v2  ;;  %v3370_v6 = vsub.f32 1.0, %v3369_v19  ;;  %v2134_v37 = vadd.f32 %v2133_v7, %v2045_v41 }
 0x297   : > { %v3351_v23 = vsel %vm3348_vm15, %v3350_v5, %v3346_v26  ;;  %v3409_v2 = vand.u32 2147483648, %v7716_v25  ;;  %vm3408_vm7 = vcmp.eq.f32.partialorder %v3407_v59, 8.507059e+37 }
 0x298   : > { %v7727_v32 = vmul.f32 %v3351_v23, %v7645_v39  ;;  %v3371_v15 = vmul.f32 %v5849_v1, %v3370_v6  ;;  %v7729_v42 = vadd.f32 %v2222_v49, %v2134_v37  ;;  %v2047_v21 = vpop.f32.mrf.mxu2 }
 0x299   : > { %2451 = vmatmul.bf16.gmra.mxu3 %v6931_v9  ;;  %v2048_v9 = vadd.f32 %v2047_v21, %v7034_v61  ;;  %v3410_v6 = vor.u32 1.1754944e-38, %v3409_v2 }
 0x29a   : > { %v3810_v57 = vpack.c.bf16 %v7727_v32, %v7724_v11  ;;  %v5497_v53 = vmul.f32 -1.442695, %v7729_v42  ;;  %3989 = vmatmul.bf16.gmra.mxu0 %v3802_v29  ;;  %v3372_v39 = vadd.f32 %v5849_v1, %v3371_v15 }
 0x29b   : > { %v5851_v31 = vpop.eup %5850 }
 0x29c   : > { %v5853_v56 = vpop.eup %5852  ;;  %v3399_v49 = vmul.f32 %v5851_v31, %v7716_v25  ;;  %5854 = vpow2.f32 %v5497_v53  ;;  %v3376_v30 = vsel %vm7747_vm2, %v5849_v1, %v3372_v39  ;;  %vm3404_vm3 = vweird.f32 %v5851_v31 }
 0x29d   : > { %v7743_v3 = vadd.f32 1.0, %v5853_v56  ;;  %v2136_v8 = vpop.f32.mrf.mxu3  ;;  %v3381_v23 = vsel %vm3378_vm4, %v3380_v34, %v3376_v30  ;;  %vm3405_vm6 = vmor %vm3403_vm5, %vm3404_vm3 }
 0x29e   : > { %v3400_v28 = vsub.f32 1.0, %v3399_v49  ;;  %v2137_v54 = vadd.f32 %v2136_v8, %v2048_v9  ;;  %v7766_v25 = vmul.f32 %v3381_v23, %v7668_v58  ;;  %v5658_v8 = vld [vmem:[%s9178_s7 + $0x50] sm:$0xff] }
 0x29f   : > { %5856 = vrcp.f32 %v7743_v3  ;;  %4050 = vmatpush.bf16.msra.mxu1 %v5658_v8  ;;  %vm3433_vm9 = vweird.f32 %v7743_v3  ;;  %v3437_v47 = vand.u32 2147483647, %v7743_v3 }
 0x2a0   : > { %v3401_v5 = vmul.f32 %v5851_v31, %v3400_v28  ;;  %v7756_v38 = vadd.f32 %v2225_v45, %v2137_v54  ;;  %v2049_v19 = vpop.f32.mrf.mxu2  ;;  %v7762_v45 = vpop.f32.mrf.mxu1 }
 0x2a1   : > { %v2050_v53 = vadd.f32 %v2049_v19, %v7034_v61  ;;  %vm3438_vm12 = vcmp.eq.f32.partialorder %v3437_v47, 8.507059e+37  ;;  %v9258_v19 = vld [vmem:[#allocation15_spill] sm:$0xff] }
 0x2a2   : > { %v3402_v41 = vadd.f32 %v5851_v31, %v3401_v5  ;;  %v5499_v7 = vmul.f32 -1.442695, %v7756_v38  ;;  %v5855_v26 = vpop.eup %5854 }
 0x2a3   : > { %v7760_v15 = vadd.f32 1.0, %v5855_v26 }
 0x2a4   : > { %v3406_v37 = vsel %vm3405_vm6, %v5851_v31, %v3402_v41  ;;  %5858 = vpow2.f32 %v5499_v7  ;;  %v2230_v31 = vpop.f32.mrf.mxu0 }
 0x2a5   : > { %v5857_v1 = vpop.eup %5856  ;;  %v3411_v21 = vsel %vm3408_vm7, %v3410_v6, %v3406_v37  ;;  %v2138_v56 = vpop.f32.mrf.mxu3  ;;  %5860 = vrcp.f32 %v7760_v15  ;;  %2367 = vmatmul.bf16.gmra.mxu2 %v6975_v33  ;;  %v3467_v41 = vand.u32 2147483647, %v7760_v15  ;;  %v3469_v7 = vand.u32 2147483648, %v7760_v15 }
 0x2a6   : > { %v7769_v39 = vmul.f32 %v3411_v21, %v7687_v40  ;;  %v3429_v49 = vmul.f32 %v5857_v1, %v7743_v3  ;;  %v2139_v9 = vadd.f32 %v2138_v56, %v2050_v53  ;;  %vm3434_vm8 = vweird.f32 %v5857_v1 }
 0x2a7   : > { %vm7796_vm10 = vmor %vm3433_vm9, %vm3434_vm8  ;;  %vm3463_vm13 = vweird.f32 %v7760_v15  ;;  %v3470_v8 = vor.u32 1.1754944e-38, %v3469_v7  ;;  %vm3468_vm15 = vcmp.eq.f32.partialorder %v3467_v41, 8.507059e+37 }
 0x2a8   : > { %v3430_v60 = vsub.f32 1.0, %v3429_v49  ;;  %v3812_v58 = vpack.c.bf16 %v7769_v39, %v7766_v25  ;;  %v7779_v12 = vadd.f32 %v2227_v36, %v2139_v9  ;;  %v2052_v40 = vpop.f32.mrf.mxu2  ;;  %v7792_v34 = vpop.f32.mrf.mxu1 }
 0x2a9   : > { %2456 = vmatmul.bf16.gmra.mxu3 %v6945_v44  ;;  %v2053_v30 = vadd.f32 %v2052_v40, %v7034_v61  ;;  %v3439_v44 = vand.u32 2147483648, %v7743_v3 }
 0x2aa   : > { %v5859_v28 = vpop.eup %5858  ;;  %v3431_v54 = vmul.f32 %v5857_v1, %v3430_v60  ;;  %v5501_v33 = vmul.f32 -1.442695, %v7779_v12  ;;  %3994 = vmatmul.bf16.gmra.mxu0 %v3804_v27 }
 0x2ab   : > { %v7782_v29 = vadd.f32 1.0, %v5859_v28  ;;  %v5861_v59 = vpop.eup %5860  ;;  %v3440_v3 = vor.u32 1.1754944e-38, %v3439_v44 }
 0x2ac   : > { %v3432_v2 = vadd.f32 %v5857_v1, %v3431_v54  ;;  %v3459_v36 = vmul.f32 %v5861_v59, %v7760_v15  ;;  %v2232_v26 = vpop.f32.mrf.mxu0  ;;  %vm3464_vm11 = vweird.f32 %v5861_v59 }
 0x2ad   : > { %5862 = vrcp.f32 %v7782_v29  ;;  %v2141_v5 = vpop.f32.mrf.mxu3  ;;  %vm3465_vm14 = vmor %vm3463_vm13, %vm3464_vm11  ;;  %vm3493_vm1 = vweird.f32 %v7782_v29  ;;  %v3497_v24 = vand.u32 2147483647, %v7782_v29 }
 0x2ae   : > { %5864 = vpow2.f32 %v5501_v33  ;;  %v3460_v43 = vsub.f32 1.0, %v3459_v36  ;;  %v2142_v27 = vadd.f32 %v2141_v5, %v2053_v30  ;;  %v3436_v23 = vsel %vm7796_vm10, %v5857_v1, %v3432_v2 }
 0x2af   : > { %v3441_v60 = vsel %vm3438_vm12, %v3440_v3, %v3436_v23  ;;  %vm3498_vm4 = vcmp.eq.f32.partialorder %v3497_v24, 8.507059e+37 }
 0x2b0   : > { %v3461_v6 = vmul.f32 %v5861_v59, %v3460_v43  ;;  %v7804_v37 = vadd.f32 %v2230_v31, %v2142_v27  ;;  %v2054_v21 = vpop.f32.mrf.mxu2  ;;  %v7815_v15 = vmul.f32 %v3441_v60, %v7711_v4  ;;  %v7822_v44 = vpop.f32.mrf.mxu1 }
 0x2b1   : > { %v2055_v31 = vadd.f32 %v2054_v21, %v7034_v61  ;;  %v3499_v21 = vand.u32 2147483648, %v7782_v29 }
 0x2b2   : > { %v3462_v56 = vadd.f32 %v5861_v59, %v3461_v6  ;;  %v5503_v49 = vmul.f32 -1.442695, %v7804_v37 }
 0x2b3   : > { %v7806_v53 = vpop.eup %5862 }
 0x2b4   : > { %v5865_v9 = vpop.eup %5864  ;;  %v3489_v1 = vmul.f32 %v7806_v53, %v7782_v29  ;;  %v3466_v40 = vsel %vm3465_vm14, %v5861_v59, %v3462_v56  ;;  %5866 = vpow2.f32 %v5503_v49  ;;  %v2235_v27 = vpop.f32.mrf.mxu0  ;;  %vm3494_vm0 = vweird.f32 %v7806_v53 }
 0x2b5   : > { %v2754_v28 = vadd.f32 1.0, %v5865_v9  ;;  %v2143_v54 = vpop.f32.mrf.mxu3  ;;  %v3471_v33 = vsel %vm3468_vm15, %v3470_v8, %v3466_v40  ;;  %2372 = vmatmul.bf16.gmra.mxu2 %v6989_v18  ;;  %vm7843_vm2 = vmor %vm3493_vm1, %vm3494_vm0  ;;  %v3500_v29 = vor.u32 1.1754944e-38, %v3499_v21 }
 0x2b6   : > { %v3490_v2 = vsub.f32 1.0, %v3489_v1  ;;  %v2144_v36 = vadd.f32 %v2143_v54, %v2055_v31  ;;  %v7818_v30 = vmul.f32 %v3471_v33, %v7729_v42 }
 0x2b7   : > { %5868 = vrcp.f32 %v2754_v28  ;;  %v3527_v40 = vand.u32 2147483647, %v2754_v28  ;;  %vm3523_vm5 = vweird.f32 %v2754_v28 }
 0x2b8   : > { %v7820_v5 = vadd.f32 %v2232_v26, %v2144_v36  ;;  %v2057_v59 = vpop.f32.mrf.mxu2  ;;  %v3814_v47 = vpack.c.bf16 %v7818_v30, %v7815_v15  ;;  %v3491_v43 = vmul.f32 %v7806_v53, %v3490_v2  ;;  %v7841_v56 = vpop.f32.mrf.mxu1 }
 0x2b9   : > { %2461 = vmatmul.bf16.gmra.mxu3 %v9258_v19  ;;  %v2058_v7 = vadd.f32 %v2057_v59, %v7034_v61  ;;  %vm3528_vm7 = vcmp.eq.f32.partialorder %v3527_v40, 8.507059e+37 }
 0x2ba   : > { %v5505_v18 = vmul.f32 -1.442695, %v7820_v5  ;;  %v5867_v4 = vpop.eup %5866  ;;  %3999 = vmatmul.bf16.gmra.mxu0 %v3806_v22  ;;  %v3492_v23 = vadd.f32 %v7806_v53, %v3491_v43  ;;  %v3529_v22 = vand.u32 2147483648, %v2754_v28 }
 0x2bb   : > { %v7832_v42 = vadd.f32 1.0, %v5867_v4 }
 0x2bc   : > { %5870 = vpow2.f32 %v5505_v18  ;;  %v3496_v1 = vsel %vm7843_vm2, %v7806_v53, %v3492_v23  ;;  %v3530_v59 = vor.u32 1.1754944e-38, %v3529_v22  ;;  %v2237_v43 = vpop.f32.mrf.mxu0  ;;  %v9262_v22 = vld [vmem:[#allocation16_spill] sm:$0xff] }
 0x2bd   : > { %v5869_v41 = vpop.eup %5868  ;;  %v2146_v26 = vpop.f32.mrf.mxu3  ;;  %5872 = vrcp.f32 %v7832_v42  ;;  %vm3553_vm9 = vweird.f32 %v7832_v42  ;;  %v3557_v16 = vand.u32 2147483647, %v7832_v42 }
 0x2be   : > { %v3519_v6 = vmul.f32 %v5869_v41, %v2754_v28  ;;  %v2147_v3 = vadd.f32 %v2146_v26, %v2058_v7  ;;  %vm3524_vm3 = vweird.f32 %v5869_v41  ;;  %v9261_v7 = vld [vmem:[#allocation18_spill] sm:$0xff] }
 0x2bf   : > { %vm3525_vm6 = vmor %vm3523_vm5, %vm3524_vm3  ;;  %vm3558_vm12 = vcmp.eq.f32.partialorder %v3557_v16, 8.507059e+37 }
 0x2c0   : > { %v3520_v62 = vsub.f32 1.0, %v3519_v6  ;;  %v7847_v9 = vadd.f32 %v2235_v27, %v2147_v3  ;;  %v2059_v60 = vpop.f32.mrf.mxu2  ;;  %v3501_v27 = vsel %vm3498_vm4, %v3500_v29, %v3496_v1  ;;  %v5657_v6 = vld [vmem:[%s9178_s7 + $0x48] sm:$0xff]  ;;  %v3559_v29 = vand.u32 2147483648, %v7832_v42 }
 0x2c1   : > { %v2060_v18 = vadd.f32 %v2059_v60, %v7034_v61  ;;  %v7866_v21 = vmul.f32 %v3501_v27, %v7756_v38  ;;  %4051 = vmatpush.bf16.msra.mxu1 %v5657_v6 }
 0x2c2   : > { %v5871_v8 = vpop.eup %5870  ;;  %v3521_v31 = vmul.f32 %v5869_v41, %v3520_v62  ;;  %v5507_v33 = vmul.f32 -1.442695, %v7847_v9 }
 0x2c3   : > { %v7852_v54 = vadd.f32 1.0, %v5871_v8  ;;  %v7855_v2 = vpop.eup %5872  ;;  %v7877_v8 = vpop.f32.mrf.mxu1 }
 0x2c4   : > { %v3522_v36 = vadd.f32 %v5869_v41, %v3521_v31  ;;  %v3549_v53 = vmul.f32 %v7855_v2, %v7832_v42  ;;  %vm3554_vm8 = vweird.f32 %v7855_v2 }
 0x2c5   : > { %5874 = vrcp.f32 %v7852_v54  ;;  %v2148_v19 = vpop.f32.mrf.mxu3  ;;  %2377 = vmatmul.bf16.gmra.mxu2 %v9261_v7  ;;  %vm7892_vm10 = vmor %vm3553_vm9, %vm3554_vm8  ;;  %v3587_v27 = vand.u32 2147483647, %v7852_v54  ;;  %vm3583_vm13 = vweird.f32 %v7852_v54 }
 0x2c6   : > { %v3526_v4 = vsel %vm3525_vm6, %v5869_v41, %v3522_v36  ;;  %5876 = vpow2.f32 %v5507_v33  ;;  %v3550_v23 = vsub.f32 1.0, %v3549_v53  ;;  %v2149_v28 = vadd.f32 %v2148_v19, %v2060_v18 }
 0x2c7   : > { %v3531_v26 = vsel %vm3528_vm7, %v3530_v59, %v3526_v4  ;;  %v3589_v53 = vand.u32 2147483648, %v7852_v54  ;;  %v3560_v4 = vor.u32 1.1754944e-38, %v3559_v29  ;;  %vm3588_vm15 = vcmp.eq.f32.partialorder %v3587_v27, 8.507059e+37 }
 0x2c8   : > { %v7869_v3 = vmul.f32 %v3531_v26, %v7779_v12  ;;  %v3551_v24 = vmul.f32 %v7855_v2, %v3550_v23  ;;  %v7872_v41 = vadd.f32 %v2237_v43, %v2149_v28  ;;  %v2062_v62 = vpop.f32.mrf.mxu2 }
 0x2c9   : > { %2466 = vmatmul.bf16.gmra.mxu3 %v9262_v22  ;;  %v2063_v40 = vadd.f32 %v2062_v62, %v7034_v61  ;;  %v3590_v62 = vor.u32 1.1754944e-38, %v3589_v53  ;;  %v9266_v53 = vld [vmem:[#allocation17_spill] sm:$0xff] }
 0x2ca   : > { %v3816_v49 = vpack.c.bf16 %v7869_v3, %v7866_v21  ;;  %v5509_v38 = vmul.f32 -1.442695, %v7872_v41  ;;  %4004 = vmatmul.bf16.gmra.mxu0 %v3808_v17  ;;  %v3552_v1 = vadd.f32 %v7855_v2, %v3551_v24  ;;  %v2240_v17 = vpop.f32.mrf.mxu0 }
 0x2cb   : > { %v5875_v60 = vpop.eup %5874  ;;  %v7906_v6 = vpop.f32.mrf.mxu1 }
 0x2cc   : > { %v5877_v12 = vpop.eup %5876  ;;  %v3579_v31 = vmul.f32 %v5875_v60, %v7852_v54  ;;  %5878 = vpow2.f32 %v5509_v38  ;;  %v3556_v18 = vsel %vm7892_vm10, %v7855_v2, %v3552_v1  ;;  %vm3584_vm11 = vweird.f32 %v5875_v60 }
 0x2cd   : > { %v7888_v33 = vadd.f32 1.0, %v5877_v12  ;;  %v2151_v36 = vpop.f32.mrf.mxu3  ;;  %v3561_v24 = vsel %vm3558_vm12, %v3560_v4, %v3556_v18  ;;  %vm3585_vm14 = vmor %vm3583_vm13, %vm3584_vm11  ;;  %v9267_v18 = vld [vmem:[#allocation25_spill] sm:$0xff] }
 0x2ce   : > { %v3580_v50 = vsub.f32 1.0, %v3579_v31  ;;  %v2152_v59 = vadd.f32 %v2151_v36, %v2063_v40  ;;  %v7912_v54 = vmul.f32 %v3561_v24, %v7804_v37  ;;  %v6086_v36 = vld [vmem:[%s9177_s6] sm:$0x3] }
 0x2cf   : > { %5880 = vrcp.f32 %v7888_v33  ;;  %v7923_v16 = vperm.slane %v6086_v36, 1  ;;  %vm3613_vm1 = vweird.f32 %v7888_v33 }
 0x2d0   : > { %v3581_v19 = vmul.f32 %v5875_v60, %v3580_v50  ;;  %v7902_v42 = vadd.f32 %v2240_v17, %v2152_v59  ;;  %v2064_v7 = vpop.f32.mrf.mxu2 }
 0x2d1   : > { %v2065_v1 = vadd.f32 %v2064_v7, %v7034_v61 }
 0x2d2   : > { %v3582_v26 = vadd.f32 %v5875_v60, %v3581_v19  ;;  %v5511_v23 = vmul.f32 -1.442695, %v7902_v42  ;;  %v5879_v28 = vpop.eup %5878  ;;  %v2242_v17 = vpop.f32.mrf.mxu0  ;;  %v2255_v19 = vadd.f32 %v9267_v18, %v7923_v16 }
 0x2d3   : > { %v7908_v2 = vadd.f32 1.0, %v5879_v28 }
 0x2d4   : > { %v3586_v22 = vsel %vm3585_vm14, %v5875_v60, %v3582_v26  ;;  %5882 = vpow2.f32 %v5511_v23  ;;  %v9265_v60 = vld [vmem:[#allocation20_spill] sm:$0xff]  ;;  %v7938_v23 = vpop.f32.mrf.mxu1 }
 0x2d5   : > { %v5881_v38 = vpop.eup %5880  ;;  %v3591_v12 = vsel %vm3588_vm15, %v3590_v62, %v3586_v22  ;;  %v2153_v31 = vpop.f32.mrf.mxu3  ;;  %5884 = vrcp.f32 %v7908_v2  ;;  %2382 = vmatmul.bf16.gmra.mxu2 %v9265_v60  ;;  %vm3643_vm5 = vweird.f32 %v7908_v2 }
 0x2d6   : > { %v7915_v40 = vmul.f32 %v3591_v12, %v7820_v5  ;;  %v3609_v29 = vmul.f32 %v5881_v38, %v7888_v33  ;;  %v2154_v61 = vadd.f32 %v2153_v31, %v2065_v1  ;;  %vm3614_vm0 = vweird.f32 %v5881_v38 }
 0x2d7   : > { %v3619_v12 = vand.u32 2147483648, %v7888_v33  ;;  %v3617_v1 = vand.u32 2147483647, %v7888_v33  ;;  %vm7947_vm2 = vmor %vm3613_vm1, %vm3614_vm0  ;;  %v3647_v31 = vand.u32 2147483647, %v7908_v2  ;;  %v2257_v33 = vadd.f32 %v7197_v46, %v7923_v16 }
 0x2d8   : > { %v3610_v50 = vsub.f32 1.0, %v3609_v29  ;;  %v3818_v37 = vpack.c.bf16 %v7915_v40, %v7912_v54  ;;  %v7927_v5 = vadd.f32 %v2242_v17, %v2154_v61  ;;  %v2343_v59 = vpop.f32.mrf.mxu2  ;;  %v3649_v29 = vand.u32 2147483648, %v7908_v2 }
 0x2d9   : > { %2471 = vmatmul.bf16.gmra.mxu3 %v9266_v53  ;;  %v2344_v62 = vadd.f32 %v2343_v59, %v2255_v19  ;;  %v3620_v17 = vor.u32 1.1754944e-38, %v3619_v12  ;;  %vm3618_vm4 = vcmp.eq.f32.partialorder %v3617_v1, 8.507059e+37  ;;  %vm3648_vm7 = vcmp.eq.f32.partialorder %v3647_v31, 8.507059e+37 }
 0x2da   : > { %v5883_v43 = vpop.eup %5882  ;;  %v3611_v27 = vmul.f32 %v5881_v38, %v3610_v50  ;;  %v5513_v7 = vmul.f32 -1.442695, %v7927_v5  ;;  %4009 = vmatmul.bf16.gmra.mxu0 %v3810_v57 }
 0x2db   : > { %v7932_v4 = vadd.f32 1.0, %v5883_v43  ;;  %v5885_v26 = vpop.eup %5884 }
 0x2dc   : > { %v3612_v28 = vadd.f32 %v5881_v38, %v3611_v27  ;;  %v3639_v24 = vmul.f32 %v5885_v26, %v7908_v2  ;;  %vm3644_vm3 = vweird.f32 %v5885_v26  ;;  %v5656_v2 = vld [vmem:[%s9178_s7 + $0x40] sm:$0xff]  ;;  %v7971_v12 = vpop.f32.mrf.mxu1 }
 0x2dd   : > { %5886 = vrcp.f32 %v7932_v4  ;;  %v2432_v22 = vpop.f32.mrf.mxu3  ;;  %vm3645_vm6 = vmor %vm3643_vm5, %vm3644_vm3  ;;  %4052 = vmatpush.bf16.msra.mxu1 %v5656_v2  ;;  %vm3673_vm9 = vweird.f32 %v7932_v4 }
 0x2de   : > { %5888 = vpow2.f32 %v5513_v7  ;;  %v3640_v11 = vsub.f32 1.0, %v3639_v24  ;;  %v7945_v32 = vadd.f32 %v2432_v22, %v2344_v62  ;;  %v3616_v60 = vsel %vm7947_vm2, %v5881_v38, %v3612_v28  ;;  %v9270_v22 = vld [vmem:[#allocation22_spill] sm:$0xff] }
 0x2df   : > { %v3621_v53 = vsel %vm3618_vm4, %v3620_v17, %v3616_v60  ;;  %v3650_v38 = vor.u32 1.1754944e-38, %v3649_v29 }
 0x2e0   : > { %v3641_v36 = vmul.f32 %v5885_v26, %v3640_v11  ;;  %v5452_v61 = vmul.f32 -1.442695, %v7945_v32  ;;  %v2345_v50 = vpop.f32.mrf.mxu2  ;;  %v7974_v1 = vmul.f32 %v3621_v53, %v7847_v9  ;;  %v2260_v9 = vadd.f32 %v7239_v10, %v7923_v16 }
 0x2e1   : > { %v2346_v19 = vadd.f32 %v2345_v50, %v2257_v33  ;;  %v3679_v53 = vand.u32 2147483648, %v7932_v4 }
 0x2e2   : > { %v3642_v43 = vadd.f32 %v5885_v26, %v3641_v36  ;;  %5890 = vpow2.f32 %v5452_v61  ;;  %v9271_v61 = vld [vmem:[#allocation19_spill] sm:$0xff] }
 0x2e3   : > { %v7958_v59 = vpop.eup %5886 }
 0x2e4   : > { %v5889_v27 = vpop.eup %5888  ;;  %v3669_v18 = vmul.f32 %v7958_v59, %v7932_v4  ;;  %v3646_v7 = vsel %vm3645_vm6, %v5885_v26, %v3642_v43  ;;  %vm3674_vm8 = vweird.f32 %v7958_v59  ;;  %v8000_v39 = vpop.f32.mrf.mxu1 }
 0x2e5   : > { %v7963_v28 = vadd.f32 1.0, %v5889_v27  ;;  %v2434_v46 = vpop.f32.mrf.mxu3  ;;  %v3651_v24 = vsel %vm3648_vm7, %v3650_v38, %v3646_v7  ;;  %2387 = vmatmul.bf16.gmra.mxu2 %v9270_v22  ;;  %v2262_v22 = vadd.f32 %v7308_v51, %v7923_v16  ;;  %vm8011_vm10 = vmor %vm3673_vm9, %vm3674_vm8 }
 0x2e6   : > { %v7965_v62 = vadd.f32 %v2434_v46, %v2346_v19  ;;  %v7977_v26 = vmul.f32 %v3651_v24, %v7872_v41  ;;  %v3670_v11 = vsub.f32 1.0, %v3669_v18 }
 0x2e7   : > { %5892 = vrcp.f32 %v7963_v28  ;;  %v3709_v18 = vand.u32 2147483648, %v7963_v28  ;;  %vm3703_vm12 = vweird.f32 %v7963_v28 }
 0x2e8   : > { %v5454_v57 = vmul.f32 -1.442695, %v7965_v62  ;;  %v5891_v31 = vpop.eup %5890  ;;  %v2348_v29 = vpop.f32.mrf.mxu2  ;;  %v3820_v60 = vpack.c.bf16 %v7977_v26, %v7974_v1  ;;  %v3671_v41 = vmul.f32 %v7958_v59, %v3670_v11 }
 0x2e9   : > { %v7983_v36 = vadd.f32 1.0, %v5891_v31  ;;  %2476 = vmatmul.bf16.gmra.mxu3 %v9271_v61  ;;  %v2349_v33 = vadd.f32 %v2348_v29, %v2260_v9  ;;  %v3680_v31 = vor.u32 1.1754944e-38, %v3679_v53  ;;  %v8023_v9 = vpop.f32.mrf.mxu0  ;;  %v9274_v53 = vld [vmem:[#allocation24_spill] sm:$0xff] }
 0x2ea   : > { %5894 = vpow2.f32 %v5454_v57  ;;  %4014 = vmatmul.bf16.gmra.mxu0 %v3812_v58  ;;  %v3672_v27 = vadd.f32 %v7958_v59, %v3671_v41  ;;  %v3677_v58 = vand.u32 2147483647, %v7932_v4  ;;  %v3707_v4 = vand.u32 2147483647, %v7963_v28 }
 0x2eb   : > { %5896 = vrcp.f32 %v7983_v36  ;;  %v3710_v41 = vor.u32 1.1754944e-38, %v3709_v18  ;;  %v2265_v18 = vadd.f32 %v7358_v35, %v7923_v16  ;;  %vm2788_vm1 = vweird.f32 %v7983_v36 }
 0x2ec   : > { %v3676_v57 = vsel %vm8011_vm10, %v7958_v59, %v3672_v27  ;;  %vm3678_vm13 = vcmp.eq.f32.partialorder %v3677_v58, 8.507059e+37  ;;  %vm3708_vm15 = vcmp.eq.f32.partialorder %v3707_v4, 8.507059e+37  ;;  %v8042_v4 = vpop.f32.mrf.mxu1 }
 0x2ed   : > { %v5893_v50 = vpop.eup %5892  ;;  %v2437_v17 = vpop.f32.mrf.mxu3 }
 0x2ee   : > { %v3699_v43 = vmul.f32 %v5893_v50, %v7963_v28  ;;  %v7997_v10 = vadd.f32 %v2437_v17, %v2349_v33  ;;  %vm3704_vm11 = vweird.f32 %v5893_v50 }
 0x2ef   : > { %vm3705_vm14 = vmor %vm3703_vm12, %vm3704_vm11 }
 0x2f0   : > { %v5895_v38 = vpop.eup %5894  ;;  %v3700_v25 = vsub.f32 1.0, %v3699_v43  ;;  %v5456_v7 = vmul.f32 -1.442695, %v7997_v10  ;;  %v2350_v46 = vpop.f32.mrf.mxu2  ;;  %v3681_v43 = vsel %vm3678_vm13, %v3680_v31, %v3676_v57  ;;  %v2794_v57 = vand.u32 2147483648, %v7983_v36 }
 0x2f1   : > { %v8004_v19 = vadd.f32 1.0, %v5895_v38  ;;  %v8007_v24 = vpop.eup %5896  ;;  %v2351_v51 = vadd.f32 %v2350_v46, %v2262_v22  ;;  %v8036_v46 = vmul.f32 %v3681_v43, %v7902_v42  ;;  %v2792_v42 = vand.u32 2147483647, %v7983_v36 }
 0x2f2   : > { %v3701_v11 = vmul.f32 %v5893_v50, %v3700_v25  ;;  %v2784_v29 = vmul.f32 %v8007_v24, %v7983_v36  ;;  %vm2789_vm0 = vweird.f32 %v8007_v24  ;;  %v2795_v43 = vor.u32 1.1754944e-38, %v2794_v57 }
 0x2f3   : > { %5898 = vrcp.f32 %v8004_v19  ;;  %vm8054_vm2 = vmor %vm2788_vm1, %vm2789_vm0  ;;  %vm2793_vm4 = vcmp.eq.f32.partialorder %v2792_v42, 8.507059e+37  ;;  %vm2818_vm5 = vweird.f32 %v8004_v19 }
 0x2f4   : > { %v3702_v61 = vadd.f32 %v5893_v50, %v3701_v11  ;;  %5900 = vpow2.f32 %v5456_v7  ;;  %v2785_v33 = vsub.f32 1.0, %v2784_v29 }
 0x2f5   : > { %v2439_v17 = vpop.f32.mrf.mxu3  ;;  %2392 = vmatmul.bf16.gmra.mxu2 %v9274_v53 }
 0x2f6   : > { %v3706_v59 = vsel %vm3705_vm14, %v5893_v50, %v3702_v61  ;;  %v8025_v27 = vadd.f32 %v2439_v17, %v2351_v51  ;;  %v2786_v25 = vmul.f32 %v8007_v24, %v2785_v33  ;;  %v2824_v33 = vand.u32 2147483648, %v8004_v19  ;;  %v8066_v17 = vpop.f32.mrf.mxu0 }
 0x2f7   : > { %v3711_v38 = vsel %vm3708_vm15, %v3710_v41, %v3706_v59  ;;  %v2822_v41 = vand.u32 2147483647, %v8004_v19 }
 0x2f8   : > { %v8030_v28 = vmul.f32 %v3711_v38, %v7927_v5  ;;  %v5458_v7 = vmul.f32 -1.442695, %v8025_v27  ;;  %v2353_v50 = vpop.f32.mrf.mxu2  ;;  %v2787_v2 = vadd.f32 %v8007_v24, %v2786_v25  ;;  %v9275_v5 = vld [vmem:[#allocation21_spill] sm:$0xff] }
 0x2f9   : > { %v5899_v58 = vpop.eup %5898  ;;  %2481 = vmatmul.bf16.gmra.mxu3 %v9275_v5  ;;  %v2354_v61 = vadd.f32 %v2353_v50, %v2265_v18  ;;  %v2267_v50 = vadd.f32 %v7404_v52, %v7923_v16  ;;  %vm2823_vm7 = vcmp.eq.f32.partialorder %v2822_v41, 8.507059e+37 }
 0x2fa   : > { %v5901_v22 = vpop.eup %5900  ;;  %v2814_v11 = vmul.f32 %v5899_v58, %v8004_v19  ;;  %5902 = vpow2.f32 %v5458_v7  ;;  %4019 = vmatmul.bf16.gmra.mxu0 %v3814_v47  ;;  %v3822_v35 = vpack.c.bf16 %v8030_v28, %v8036_v46  ;;  %v2791_v30 = vsel %vm8054_vm2, %v8007_v24, %v2787_v2 }
 0x2fb   : > { %v8045_v31 = vadd.f32 1.0, %v5901_v22  ;;  %vm2819_vm3 = vweird.f32 %v5899_v58  ;;  %v2796_v25 = vsel %vm2793_vm4, %v2795_v43, %v2791_v30  ;;  %v2825_v7 = vor.u32 1.1754944e-38, %v2824_v33 }
 0x2fc   : > { %v2815_v29 = vsub.f32 1.0, %v2814_v11  ;;  %vm2820_vm6 = vmor %vm2818_vm5, %vm2819_vm3  ;;  %v3729_v19 = vmul.f32 %v2796_v25, %v7945_v32  ;;  %v9279_v25 = vld [vmem:[#allocation23_spill] sm:$0xff] }
 0x2fd   : > { %5904 = vrcp.f32 %v8045_v31  ;;  %v2442_v15 = vpop.f32.mrf.mxu3  ;;  %vm2848_vm9 = vweird.f32 %v8045_v31 }
 0x2fe   : > { %v2816_v47 = vmul.f32 %v5899_v58, %v2815_v29  ;;  %v8064_v36 = vadd.f32 %v2442_v15, %v2354_v61  ;;  %v8078_v29 = vpop.f32.mrf.mxu1 }
 0x300   : > { %v5903_v59 = vpop.eup %5902  ;;  %v2817_v53 = vadd.f32 %v5899_v58, %v2816_v47  ;;  %v5460_v38 = vmul.f32 -1.442695, %v8064_v36  ;;  %v2355_v24 = vpop.f32.mrf.mxu2 }
 0x301   : > { %v8070_v18 = vadd.f32 1.0, %v5903_v59  ;;  %v2356_v42 = vadd.f32 %v2355_v24, %v2267_v50  ;;  %v8086_v47 = vpop.f32.mrf.mxu0 }
 0x302   : > { %v2821_v22 = vsel %vm2820_vm6, %v5899_v58, %v2817_v53  ;;  %5906 = vpow2.f32 %v5460_v38  ;;  %v9278_v58 = vld [vmem:[#allocation27_spill] sm:$0xff] }
 0x303   : > { %v5905_v2 = vpop.eup %5904  ;;  %v2826_v11 = vsel %vm2823_vm7, %v2825_v7, %v2821_v22  ;;  %5908 = vrcp.f32 %v8070_v18  ;;  %v2854_v7 = vand.u32 2147483648, %v8045_v31  ;;  %vm2878_vm13 = vweird.f32 %v8070_v18  ;;  %v9282_v22 = vld [vmem:[#allocation29_spill] sm:$0xff] }
 0x304   : > { %v3731_v5 = vmul.f32 %v2826_v11, %v7965_v62  ;;  %v2844_v57 = vmul.f32 %v5905_v2, %v8045_v31  ;;  %v2270_v62 = vadd.f32 %v7455_v14, %v7923_v16  ;;  %vm2849_vm8 = vweird.f32 %v5905_v2 }
 0x305   : > { %v2444_v61 = vpop.f32.mrf.mxu3  ;;  %2397 = vmatmul.bf16.gmra.mxu2 %v9278_v58  ;;  %v2852_v14 = vand.u32 2147483647, %v8045_v31  ;;  %vm8099_vm10 = vmor %vm2848_vm9, %vm2849_vm8  ;;  %v2882_v11 = vand.u32 2147483647, %v8070_v18  ;;  %v2855_v31 = vor.u32 1.1754944e-38, %v2854_v7  ;;  %v2272_v58 = vadd.f32 %v7486_v20, %v7923_v16 }
 0x306   : > { %v3793_v51 = vpack.c.bf16 %v3731_v5, %v3729_v19  ;;  %v2845_v33 = vsub.f32 1.0, %v2844_v57  ;;  %v8080_v52 = vadd.f32 %v2444_v61, %v2356_v42  ;;  %v2884_v19 = vand.u32 2147483648, %v8070_v18 }
 0x307   : > { %vm2853_vm12 = vcmp.eq.f32.partialorder %v2852_v14, 8.507059e+37  ;;  %vm2883_vm15 = vcmp.eq.f32.partialorder %v2882_v11, 8.507059e+37 }
 0x308   : > { %v5907_v41 = vpop.eup %5906  ;;  %v2846_v15 = vmul.f32 %v5905_v2, %v2845_v33  ;;  %v5462_v30 = vmul.f32 -1.442695, %v8080_v52  ;;  %4053 = vmatmul.bf16.vlgmr.msra.gmra.mxu1 %v3793_v51  ;;  %v2358_v59 = vpop.f32.mrf.mxu2 }
 0x309   : > { %v5909_v32 = vpop.eup %5908  ;;  %v8088_v43 = vadd.f32 1.0, %v5907_v41  ;;  %2486 = vmatmul.bf16.gmra.mxu3 %v9279_v25  ;;  %v2359_v50 = vadd.f32 %v2358_v59, %v2270_v62 }
 0x30a   : > { %v2847_v53 = vadd.f32 %v5905_v2, %v2846_v15  ;;  %v2874_v38 = vmul.f32 %v5909_v32, %v8070_v18  ;;  %5910 = vpow2.f32 %v5462_v30  ;;  %4024 = vmatmul.bf16.gmra.mxu0 %v3816_v49  ;;  %vm2879_vm11 = vweird.f32 %v5909_v32  ;;  %v8109_v49 = vpop.f32.mrf.mxu1 }
 0x30b   : > { %5912 = vrcp.f32 %v8088_v43  ;;  %vm2880_vm14 = vmor %vm2878_vm13, %vm2879_vm11  ;;  %vm2908_vm1 = vweird.f32 %v8088_v43 }
 0x30c   : > { %v2875_v24 = vsub.f32 1.0, %v2874_v38  ;;  %v2851_v57 = vsel %vm8099_vm10, %v5905_v2, %v2847_v53  ;;  %v2885_v2 = vor.u32 1.1754944e-38, %v2884_v19  ;;  %v8116_v53 = vpop.f32.mrf.mxu0 }
 0x30d   : > { %v2447_v5 = vpop.f32.mrf.mxu3  ;;  %v2856_v41 = vsel %vm2853_vm12, %v2855_v31, %v2851_v57  ;;  %v2275_v57 = vadd.f32 %v7734_v48, %v7923_v16  ;;  %v2912_v48 = vand.u32 2147483647, %v8088_v43 }
 0x30e   : > { %v2876_v21 = vmul.f32 %v5909_v32, %v2875_v24  ;;  %v8107_v3 = vadd.f32 %v2447_v5, %v2359_v50  ;;  %v3733_v18 = vmul.f32 %v2856_v41, %v7997_v10 }
 0x30f   : > { %vm2913_vm4 = vcmp.eq.f32.partialorder %v2912_v48, 8.507059e+37 }
 0x310   : > { %v5911_v42 = vpop.eup %5910  ;;  %v2877_v61 = vadd.f32 %v5909_v32, %v2876_v21  ;;  %v5464_v51 = vmul.f32 -1.442695, %v8107_v3  ;;  %v2360_v30 = vpop.f32.mrf.mxu2 }
 0x311   : > { %v5913_v33 = vpop.eup %5912  ;;  %v2715_v15 = vadd.f32 1.0, %v5911_v42  ;;  %v2361_v20 = vadd.f32 %v2360_v30, %v2272_v58 }
 0x312   : > { %v2881_v62 = vsel %vm2880_vm14, %v5909_v32, %v2877_v61  ;;  %v2904_v59 = vmul.f32 %v5913_v33, %v8088_v43  ;;  %5914 = vpow2.f32 %v5464_v51  ;;  %v8126_v10 = vpop.f32.mrf.mxu1  ;;  %vm2909_vm0 = vweird.f32 %v5913_v33  ;;  %v9283_v61 = vld [vmem:[#allocation26_spill] sm:$0xff] }
 0x313   : > { %v2886_v38 = vsel %vm2883_vm15, %v2885_v2, %v2881_v62  ;;  %5916 = vrcp.f32 %v2715_v15  ;;  %v2914_v51 = vand.u32 2147483648, %v8088_v43  ;;  %vm8140_vm2 = vmor %vm2908_vm1, %vm2909_vm0  ;;  %v2942_v62 = vand.u32 2147483647, %v2715_v15 }
 0x314   : > { %v3735_v25 = vmul.f32 %v2886_v38, %v8025_v27  ;;  %v2905_v7 = vsub.f32 1.0, %v2904_v59  ;;  %v8138_v2 = vpop.f32.mrf.mxu0  ;;  %v2944_v59 = vand.u32 2147483648, %v2715_v15  ;;  %vm2938_vm5 = vweird.f32 %v2715_v15 }
 0x315   : > { %v2449_v14 = vpop.f32.mrf.mxu3  ;;  %2402 = vmatmul.bf16.gmra.mxu2 %v9282_v22  ;;  %vm2943_vm7 = vcmp.eq.f32.partialorder %v2942_v62, 8.507059e+37 }
 0x316   : > { %v2906_v24 = vmul.f32 %v5913_v33, %v2905_v7  ;;  %v8120_v50 = vadd.f32 %v2449_v14, %v2361_v20  ;;  %v3795_v32 = vpack.c.bf16 %v3735_v25, %v3733_v18  ;;  %v2277_v14 = vadd.f32 %v7762_v45, %v7923_v16 }
 0x317   : > { %v2945_v22 = vor.u32 1.1754944e-38, %v2944_v59 }
 0x318   : > { %v5915_v11 = vpop.eup %5914  ;;  %v5466_v19 = vmul.f32 -1.442695, %v8120_v50  ;;  %4058 = vmatmul.bf16.gmra.mxu1 %v3795_v32  ;;  %v2363_v21 = vpop.f32.mrf.mxu2  ;;  %v2907_v31 = vadd.f32 %v5913_v33, %v2906_v24 }
 0x319   : > { %v5917_v5 = vpop.eup %5916  ;;  %v8128_v27 = vadd.f32 1.0, %v5915_v11  ;;  %2491 = vmatmul.bf16.gmra.mxu3 %v9283_v61  ;;  %v2364_v41 = vadd.f32 %v2363_v21, %v2275_v57 }
 0x31a   : > { %v2934_v42 = vmul.f32 %v5917_v5, %v2715_v15  ;;  %5918 = vpow2.f32 %v5466_v19  ;;  %4029 = vmatmul.bf16.gmra.mxu0 %v3818_v37  ;;  %v2911_v18 = vsel %vm8140_vm2, %v5913_v33, %v2907_v31  ;;  %vm2939_vm3 = vweird.f32 %v5917_v5  ;;  %v8157_v15 = vpop.f32.mrf.mxu1 }
 0x31b   : > { %5920 = vrcp.f32 %v8128_v27  ;;  %v2915_v37 = vor.u32 1.1754944e-38, %v2914_v51  ;;  %vm2940_vm6 = vmor %vm2938_vm5, %vm2939_vm3  ;;  %vm2968_vm9 = vweird.f32 %v8128_v27 }
 0x31c   : > { %v2935_v58 = vsub.f32 1.0, %v2934_v42 }
 0x31d   : > { %v2452_v38 = vpop.f32.mrf.mxu3  ;;  %v2916_v24 = vsel %vm2913_vm4, %v2915_v37, %v2911_v18  ;;  %v9286_v18 = vld [vmem:[#allocation28_spill] sm:$0xff] }
 0x31e   : > { %v2936_v54 = vmul.f32 %v5917_v5, %v2935_v58  ;;  %v8146_v40 = vadd.f32 %v2452_v38, %v2364_v41  ;;  %v3737_v21 = vmul.f32 %v2916_v24, %v8064_v36  ;;  %v8166_v58 = vpop.f32.mrf.mxu0  ;;  %v2280_v36 = vadd.f32 %v7792_v34, %v7923_v16 }
 0x31f   : > { %v2972_v34 = vand.u32 2147483647, %v8128_v27 }
 0x320   : > { %v5919_v43 = vpop.eup %5918  ;;  %v2937_v25 = vadd.f32 %v5917_v5, %v2936_v54  ;;  %v5468_v7 = vmul.f32 -1.442695, %v8146_v40  ;;  %v2365_v32 = vpop.f32.mrf.mxu2  ;;  %v2974_v54 = vand.u32 2147483648, %v8128_v27 }
 0x321   : > { %v8149_v20 = vpop.eup %5920  ;;  %v8153_v33 = vadd.f32 1.0, %v5919_v43  ;;  %v2366_v42 = vadd.f32 %v2365_v32, %v2277_v14  ;;  %vm2973_vm12 = vcmp.eq.f32.partialorder %v2972_v34, 8.507059e+37 }
 0x322   : > { %v2941_v11 = vsel %vm2940_vm6, %v5917_v5, %v2937_v25  ;;  %v2964_v19 = vmul.f32 %v8149_v20, %v8128_v27  ;;  %5922 = vpow2.f32 %v5468_v7  ;;  %vm2969_vm8 = vweird.f32 %v8149_v20  ;;  %v8184_v25 = vpop.f32.mrf.mxu1 }
 0x323   : > { %v2946_v57 = vsel %vm2943_vm7, %v2945_v22, %v2941_v11  ;;  %5924 = vrcp.f32 %v8153_v33  ;;  %vm8186_vm10 = vmor %vm2968_vm9, %vm2969_vm8  ;;  %v3002_v14 = vand.u32 2147483647, %v8153_v33  ;;  %v3004_v24 = vand.u32 2147483648, %v8153_v33 }
 0x324   : > { %v3739_v45 = vmul.f32 %v2946_v57, %v8080_v52  ;;  %v2965_v31 = vsub.f32 1.0, %v2964_v19  ;;  %v2975_v27 = vor.u32 1.1754944e-38, %v2974_v54  ;;  %vm2998_vm13 = vweird.f32 %v8153_v33 }
 0x325   : > { %v2454_v61 = vpop.f32.mrf.mxu3  ;;  %2407 = vmatmul.bf16.gmra.mxu2 %v7363_v13  ;;  %vm3003_vm15 = vcmp.eq.f32.partialorder %v3002_v14, 8.507059e+37 }
 0x326   : > { %v2966_v51 = vmul.f32 %v8149_v20, %v2965_v31  ;;  %v8163_v5 = vadd.f32 %v2454_v61, %v2366_v42  ;;  %v3797_v48 = vpack.c.bf16 %v3739_v45, %v3737_v21  ;;  %v2282_v21 = vadd.f32 %v7822_v44, %v7923_v16  ;;  %v8203_v45 = vpop.f32.mrf.mxu0 }
 0x327   : > { %v3005_v31 = vor.u32 1.1754944e-38, %v3004_v24 }
 0x328   : > { %v5923_v41 = vpop.eup %5922  ;;  %v5470_v30 = vmul.f32 -1.442695, %v8163_v5  ;;  %4063 = vmatmul.bf16.gmra.mxu1 %v3797_v48  ;;  %v2368_v59 = vpop.f32.mrf.mxu2  ;;  %v2967_v38 = vadd.f32 %v8149_v20, %v2966_v51 }
 0x329   : > { %v5925_v62 = vpop.eup %5924  ;;  %v8171_v52 = vadd.f32 1.0, %v5923_v41  ;;  %2496 = vmatmul.bf16.gmra.mxu3 %v9286_v18  ;;  %v2369_v43 = vadd.f32 %v2368_v59, %v2280_v36 }
 0x32a   : > { %v2994_v13 = vmul.f32 %v5925_v62, %v8153_v33  ;;  %5926 = vpow2.f32 %v5470_v30  ;;  %4034 = vmatmul.bf16.gmra.mxu0 %v3820_v60  ;;  %v2971_v1 = vsel %vm8186_vm10, %v8149_v20, %v2967_v38  ;;  %vm2999_vm11 = vweird.f32 %v5925_v62  ;;  %v8213_v18 = vpop.f32.mrf.mxu1 }
 0x32b   : > { %5928 = vrcp.f32 %v8171_v52  ;;  %v2976_v20 = vsel %vm2973_vm12, %v2975_v27, %v2971_v1  ;;  %vm3000_vm14 = vmor %vm2998_vm13, %vm2999_vm11  ;;  %v3034_v24 = vand.u32 2147483648, %v8171_v52  ;;  %vm3028_vm1 = vweird.f32 %v8171_v52 }
 0x32c   : > { %v2995_v37 = vsub.f32 1.0, %v2994_v13  ;;  %v3741_v41 = vmul.f32 %v2976_v20, %v8107_v3  ;;  %v2285_v3 = vadd.f32 %v7841_v56, %v7923_v16  ;;  %v3032_v56 = vand.u32 2147483647, %v8171_v52 }
 0x32d   : > { %v2457_v22 = vpop.f32.mrf.mxu3  ;;  %v3035_v46 = vor.u32 1.1754944e-38, %v3034_v24 }
 0x32e   : > { %v2996_v26 = vmul.f32 %v5925_v62, %v2995_v37  ;;  %v8195_v60 = vadd.f32 %v2457_v22, %v2369_v43  ;;  %vm3033_vm4 = vcmp.eq.f32.partialorder %v3032_v56, 8.507059e+37  ;;  %v9291_v56 = vld [vmem:[#allocation30_spill] sm:$0xff] }
 0x330   : > { %v5927_v32 = vpop.eup %5926  ;;  %v2997_v11 = vadd.f32 %v5925_v62, %v2996_v26  ;;  %v5472_v19 = vmul.f32 -1.442695, %v8195_v60  ;;  %v2370_v61 = vpop.f32.mrf.mxu2 }
 0x331   : > { %v8199_v57 = vpop.eup %5928  ;;  %v2723_v42 = vadd.f32 1.0, %v5927_v32  ;;  %v2371_v36 = vadd.f32 %v2370_v61, %v2282_v21 }
 0x332   : > { %v3001_v51 = vsel %vm3000_vm14, %v5925_v62, %v2997_v11  ;;  %v3024_v48 = vmul.f32 %v8199_v57, %v8171_v52  ;;  %5930 = vpow2.f32 %v5472_v19  ;;  %vm3029_vm0 = vweird.f32 %v8199_v57  ;;  %v8244_v61 = vpop.f32.mrf.mxu1 }
 0x333   : > { %v3006_v33 = vsel %vm3003_vm15, %v3005_v31, %v3001_v51  ;;  %5932 = vrcp.f32 %v2723_v42  ;;  %vm8232_vm2 = vmor %vm3028_vm1, %vm3029_vm0  ;;  %v3064_v27 = vand.u32 2147483648, %v2723_v42  ;;  %vm3058_vm5 = vweird.f32 %v2723_v42 }
 0x334   : > { %v3743_v30 = vmul.f32 %v3006_v33, %v8120_v50  ;;  %v3025_v44 = vsub.f32 1.0, %v3024_v48  ;;  %v2287_v31 = vadd.f32 %v7877_v8, %v7923_v16 }
 0x335   : > { %v2459_v59 = vpop.f32.mrf.mxu3  ;;  %2412 = vmatmul.bf16.gmra.mxu2 %v7009_v63  ;;  %v8223_v63 = vpop.f32.mrf.mxu0 }
 0x336   : > { %v3026_v38 = vmul.f32 %v8199_v57, %v3025_v44  ;;  %v8210_v13 = vadd.f32 %v2459_v59, %v2371_v36  ;;  %v3799_v62 = vpack.c.bf16 %v3743_v30, %v3741_v41 }
 0x338   : > { %v5931_v54 = vpop.eup %5930  ;;  %v5474_v34 = vmul.f32 -1.442695, %v8210_v13  ;;  %4068 = vmatmul.bf16.gmra.mxu1 %v3799_v62  ;;  %v2373_v43 = vpop.f32.mrf.mxu2  ;;  %v3027_v7 = vadd.f32 %v8199_v57, %v3026_v38 }
 0x339   : > { %v5933_v37 = vpop.eup %5932  ;;  %v8218_v50 = vadd.f32 1.0, %v5931_v54  ;;  %2501 = vmatmul.bf16.gmra.mxu3 %v7347_v55  ;;  %v2374_v1 = vadd.f32 %v2373_v43, %v2285_v3  ;;  %v3062_v55 = vand.u32 2147483647, %v2723_v42 }
 0x33a   : > { %v3054_v14 = vmul.f32 %v5933_v37, %v2723_v42  ;;  %5934 = vpow2.f32 %v5474_v34  ;;  %4039 = vmatmul.bf16.gmra.mxu0 %v3822_v35  ;;  %v3031_v11 = vsel %vm8232_vm2, %v8199_v57, %v3027_v7  ;;  %vm3059_vm3 = vweird.f32 %v5933_v37 }
 0x33b   : > { %5936 = vrcp.f32 %v8218_v50  ;;  %v3036_v51 = vsel %vm3033_vm4, %v3035_v46, %v3031_v11  ;;  %vm3060_vm6 = vmor %vm3058_vm5, %vm3059_vm3  ;;  %v3065_v57 = vor.u32 1.1754944e-38, %v3064_v27  ;;  %vm3063_vm7 = vcmp.eq.f32.partialorder %v3062_v55, 8.507059e+37 }
 0x33c   : > { %v3055_v22 = vsub.f32 1.0, %v3054_v14  ;;  %v3745_v42 = vmul.f32 %v3036_v51, %v8146_v40  ;;  %v2290_v7 = vadd.f32 %v7906_v6, %v7923_v16  ;;  %vm3088_vm9 = vweird.f32 %v8218_v50 }
 0x33d   : > { %v2462_v32 = vpop.f32.mrf.mxu3 }
 0x33e   : > { %v3056_v19 = vmul.f32 %v5933_v37, %v3055_v22  ;;  %v8239_v28 = vadd.f32 %v2462_v32, %v2374_v1  ;;  %v8258_v22 = vpop.f32.mrf.mxu1  ;;  %v3092_v1 = vand.u32 2147483647, %v8218_v50 }
 0x340   : > { %v5935_v35 = vpop.eup %5934  ;;  %v3057_v52 = vadd.f32 %v5933_v37, %v3056_v19  ;;  %v5476_v21 = vmul.f32 -1.442695, %v8239_v28  ;;  %v2375_v33 = vpop.f32.mrf.mxu2  ;;  %vm3093_vm12 = vcmp.eq.f32.partialorder %v3092_v1, 8.507059e+37 }
 0x341   : > { %v5937_v20 = vpop.eup %5936  ;;  %v2727_v48 = vadd.f32 1.0, %v5935_v35  ;;  %v2376_v8 = vadd.f32 %v2375_v33, %v2287_v31 }
 0x342   : > { %v3061_v41 = vsel %vm3060_vm6, %v5933_v37, %v3057_v52  ;;  %v3084_v30 = vmul.f32 %v5937_v20, %v8218_v50  ;;  %5938 = vpow2.f32 %v5476_v21  ;;  %vm3089_vm8 = vweird.f32 %v5937_v20 }
 0x343   : > { %v3066_v44 = vsel %vm3063_vm7, %v3065_v57, %v3061_v41  ;;  %5940 = vrcp.f32 %v2727_v48  ;;  %vm8264_vm10 = vmor %vm3088_vm9, %vm3089_vm8  ;;  %v3122_v27 = vand.u32 2147483647, %v2727_v48  ;;  %v3124_v32 = vand.u32 2147483648, %v2727_v48 }
 0x344   : > { %v3747_v36 = vmul.f32 %v3066_v44, %v8163_v5  ;;  %v3085_v59 = vsub.f32 1.0, %v3084_v30  ;;  %vm3118_vm13 = vweird.f32 %v2727_v48  ;;  %v2292_v57 = vadd.f32 %v7938_v23, %v7923_v16 }
 0x345   : > { %v2464_v38 = vpop.f32.mrf.mxu3  ;;  %2417 = vmatmul.bf16.gmra.mxu2 %v7040_v0  ;;  %v3094_v0 = vand.u32 2147483648, %v8218_v50  ;;  %v3125_v41 = vor.u32 1.1754944e-38, %v3124_v32  ;;  %vm3123_vm15 = vcmp.eq.f32.partialorder %v3122_v27, 8.507059e+37 }
 0x346   : > { %v3086_v62 = vmul.f32 %v5937_v20, %v3085_v59  ;;  %v8249_v54 = vadd.f32 %v2464_v38, %v2376_v8  ;;  %v3801_v34 = vpack.c.bf16 %v3747_v36, %v3745_v42 }
 0x347   : > { %v3095_v52 = vor.u32 1.1754944e-38, %v3094_v0 }
 0x348   : > { %v5939_v37 = vpop.eup %5938  ;;  %v5478_v3 = vmul.f32 -1.442695, %v8249_v54  ;;  %4073 = vmatmul.bf16.gmra.mxu1 %v3801_v34  ;;  %v2378_v5 = vpop.f32.mrf.mxu2  ;;  %v3087_v14 = vadd.f32 %v5937_v20, %v3086_v62 }
 0x349   : > { %v5941_v43 = vpop.eup %5940  ;;  %v8255_v40 = vadd.f32 1.0, %v5939_v37  ;;  %2506 = vmatmul.bf16.gmra.mxu3 %v9291_v56  ;;  %v2379_v26 = vadd.f32 %v2378_v5, %v2290_v7  ;;  %v8278_v62 = vpop.f32.mrf.mxu1 }
 0x34a   : > { %v3114_v24 = vmul.f32 %v5941_v43, %v2727_v48  ;;  %5942 = vpow2.f32 %v5478_v3  ;;  %v3091_v19 = vsel %vm8264_vm10, %v5937_v20, %v3087_v14  ;;  %vm3119_vm11 = vweird.f32 %v5941_v43 }
 0x34b   : > { %5944 = vrcp.f32 %v8255_v40  ;;  %v3096_v33 = vsel %vm3093_vm12, %v3095_v52, %v3091_v19  ;;  %vm3120_vm14 = vmor %vm3118_vm13, %vm3119_vm11  ;;  %v2295_v14 = vadd.f32 %v7971_v12, %v7923_v16  ;;  %v3154_v0 = vand.u32 2147483648, %v8255_v40 }
 0x34c   : > { %v3115_v6 = vsub.f32 1.0, %v3114_v24  ;;  %v3749_v48 = vmul.f32 %v3096_v33, %v8195_v60  ;;  %vm3148_vm1 = vweird.f32 %v8255_v40  ;;  %v3152_v1 = vand.u32 2147483647, %v8255_v40 }
 0x34d   : > { %v2467_v11 = vpop.f32.mrf.mxu3  ;;  %v2297_v33 = vadd.f32 %v8000_v39, %v7923_v16 }
 0x34e   : > { %v3116_v46 = vmul.f32 %v5941_v43, %v3115_v6  ;;  %v8270_v35 = vadd.f32 %v2467_v11, %v2379_v26  ;;  %vm3153_vm4 = vcmp.eq.f32.partialorder %v3152_v1, 8.507059e+37 }
 0x350   : > { %v5943_v21 = vpop.eup %5942  ;;  %v3117_v50 = vadd.f32 %v5941_v43, %v3116_v46  ;;  %v5480_v31 = vmul.f32 -1.442695, %v8270_v35  ;;  %v2380_v20 = vpop.f32.mrf.mxu2 }
 0x351   : > { %v5945_v51 = vpop.eup %5944  ;;  %v2731_v30 = vadd.f32 1.0, %v5943_v21  ;;  %v2381_v38 = vadd.f32 %v2380_v20, %v2292_v57  ;;  %v8299_v52 = vpop.f32.mrf.mxu1  ;;  %v3155_v21 = vor.u32 1.1754944e-38, %v3154_v0 }
 0x352   : > { %v3121_v44 = vsel %vm3120_vm14, %v5941_v43, %v3117_v50  ;;  %v3144_v42 = vmul.f32 %v5945_v51, %v8255_v40  ;;  %5946 = vpow2.f32 %v5480_v31  ;;  %vm3149_vm0 = vweird.f32 %v5945_v51 }
 0x353   : > { %v3126_v36 = vsel %vm3123_vm15, %v3125_v41, %v3121_v44  ;;  %5948 = vrcp.f32 %v2731_v30  ;;  %vm8291_vm2 = vmor %vm3148_vm1, %vm3149_vm0  ;;  %v3182_v12 = vand.u32 2147483647, %v2731_v30  ;;  %v3184_v27 = vand.u32 2147483648, %v2731_v30 }
 0x354   : > { %v3751_v59 = vmul.f32 %v3126_v36, %v8210_v13  ;;  %v3145_v8 = vsub.f32 1.0, %v3144_v42  ;;  %vm3178_vm5 = vweird.f32 %v2731_v30 }
 0x355   : > { %v2469_v23 = vpop.f32.mrf.mxu3  ;;  %vm3183_vm7 = vcmp.eq.f32.partialorder %v3182_v12, 8.507059e+37 }
 0x356   : > { %v3146_v34 = vmul.f32 %v5945_v51, %v3145_v8  ;;  %v8280_v37 = vadd.f32 %v2469_v23, %v2381_v38  ;;  %v3803_v3 = vpack.c.bf16 %v3751_v59, %v3749_v48 }
 0x358   : > { %v5947_v43 = vpop.eup %5946  ;;  %v5482_v7 = vmul.f32 -1.442695, %v8280_v37  ;;  %4078 = vmatmul.bf16.gmra.mxu1 %v3803_v3  ;;  %v2383_v13 = vpop.f32.mrf.mxu2  ;;  %v3147_v24 = vadd.f32 %v5945_v51, %v3146_v34 }
 0x359   : > { %v5949_v5 = vpop.eup %5948  ;;  %v8285_v60 = vadd.f32 1.0, %v5947_v43  ;;  %v2384_v26 = vadd.f32 %v2383_v13, %v2295_v14  ;;  %v2300_v14 = vadd.f32 %v8042_v4, %v7923_v16  ;;  %v8312_v13 = vpop.f32.mrf.mxu1 }
 0x35a   : > { %v3174_v56 = vmul.f32 %v5949_v5, %v2731_v30  ;;  %5950 = vpow2.f32 %v5482_v7  ;;  %v3151_v11 = vsel %vm8291_vm2, %v5945_v51, %v3147_v24  ;;  %vm3179_vm3 = vweird.f32 %v5949_v5 }
 0x35b   : > { %5952 = vrcp.f32 %v8285_v60  ;;  %v3156_v41 = vsel %vm3153_vm4, %v3155_v21, %v3151_v11  ;;  %vm3180_vm6 = vmor %vm3178_vm5, %vm3179_vm3  ;;  %v3185_v51 = vor.u32 1.1754944e-38, %v3184_v27  ;;  %v3214_v0 = vand.u32 2147483648, %v8285_v60 }
 0x35c   : > { %v3175_v6 = vsub.f32 1.0, %v3174_v56  ;;  %v3753_v30 = vmul.f32 %v3156_v41, %v8239_v28  ;;  %vm3208_vm9 = vweird.f32 %v8285_v60  ;;  %v3212_v1 = vand.u32 2147483647, %v8285_v60 }
 0x35d   : > { %v2472_v32 = vpop.f32.mrf.mxu3  ;;  %v3215_v21 = vor.u32 1.1754944e-38, %v3214_v0 }
 0x35e   : > { %v3176_v19 = vmul.f32 %v5949_v5, %v3175_v6  ;;  %v8297_v46 = vadd.f32 %v2472_v32, %v2384_v26  ;;  %vm3213_vm12 = vcmp.eq.f32.partialorder %v3212_v1, 8.507059e+37 }
 0x360   : > { %v5951_v40 = vpop.eup %5950  ;;  %v3177_v50 = vadd.f32 %v5949_v5, %v3176_v19  ;;  %v5484_v31 = vmul.f32 -1.442695, %v8297_v46  ;;  %v2385_v44 = vpop.f32.mrf.mxu2 }
 0x361   : > { %v5953_v57 = vpop.eup %5952  ;;  %v2735_v20 = vadd.f32 1.0, %v5951_v40  ;;  %v2386_v38 = vadd.f32 %v2385_v44, %v2297_v33  ;;  %v2302_v33 = vadd.f32 %v8078_v29, %v7923_v16 }
 0x362   : > { %v3181_v42 = vsel %vm3180_vm6, %v5949_v5, %v3177_v50  ;;  %v3204_v36 = vmul.f32 %v5953_v57, %v8285_v60  ;;  %5954 = vpow2.f32 %v5484_v31  ;;  %vm3209_vm8 = vweird.f32 %v5953_v57 }
 0x363   : > { %v3186_v48 = vsel %vm3183_vm7, %v3185_v51, %v3181_v42  ;;  %5956 = vrcp.f32 %v2735_v20  ;;  %vm8320_vm10 = vmor %vm3208_vm9, %vm3209_vm8  ;;  %v3242_v55 = vand.u32 2147483647, %v2735_v20  ;;  %v3244_v12 = vand.u32 2147483648, %v2735_v20 }
 0x364   : > { %v3755_v59 = vmul.f32 %v3186_v48, %v8249_v54  ;;  %v3205_v8 = vsub.f32 1.0, %v3204_v36  ;;  %vm3238_vm13 = vweird.f32 %v2735_v20  ;;  %v8335_v48 = vpop.f32.mrf.mxu1 }
 0x365   : > { %v2474_v23 = vpop.f32.mrf.mxu3  ;;  %v3245_v51 = vor.u32 1.1754944e-38, %v3244_v12  ;;  %vm3243_vm15 = vcmp.eq.f32.partialorder %v3242_v55, 8.507059e+37 }
 0x366   : > { %v3206_v39 = vmul.f32 %v5953_v57, %v3205_v8  ;;  %v8307_v34 = vadd.f32 %v2474_v23, %v2386_v38  ;;  %v3805_v3 = vpack.c.bf16 %v3755_v59, %v3753_v30 }
 0x368   : > { %v5955_v43 = vpop.eup %5954  ;;  %v5486_v7 = vmul.f32 -1.442695, %v8307_v34  ;;  %4083 = vmatmul.bf16.gmra.mxu1 %v3805_v3  ;;  %v2388_v54 = vpop.f32.mrf.mxu2  ;;  %v3207_v24 = vadd.f32 %v5953_v57, %v3206_v39 }
 0x369   : > { %v5957_v5 = vpop.eup %5956  ;;  %v8314_v28 = vadd.f32 1.0, %v5955_v43  ;;  %v2389_v26 = vadd.f32 %v2388_v54, %v2300_v14 }
 0x36a   : > { %v3234_v56 = vmul.f32 %v5957_v5, %v2735_v20  ;;  %5958 = vpow2.f32 %v5486_v7  ;;  %v3211_v32 = vsel %vm8320_vm10, %v5953_v57, %v3207_v24  ;;  %vm3239_vm11 = vweird.f32 %v5957_v5 }
 0x36b   : > { %5960 = vrcp.f32 %v8314_v28  ;;  %v3216_v41 = vsel %vm3213_vm12, %v3215_v21, %v3211_v32  ;;  %vm3240_vm14 = vmor %vm3238_vm13, %vm3239_vm11  ;;  %vm3268_vm1 = vweird.f32 %v8314_v28 }
 0x36c   : > { %v3235_v6 = vsub.f32 1.0, %v3234_v56  ;;  %v3757_v30 = vmul.f32 %v3216_v41, %v8270_v35  ;;  %v2305_v35 = vadd.f32 %v8109_v49, %v7923_v16  ;;  %v3274_v56 = vand.u32 2147483648, %v8314_v28 }
 0x36d   : > { %v2477_v27 = vpop.f32.mrf.mxu3 }
 0x36e   : > { %v3236_v11 = vmul.f32 %v5957_v5, %v3235_v6  ;;  %v8326_v19 = vadd.f32 %v2477_v27, %v2389_v26  ;;  %v8351_v6 = vpop.f32.mrf.mxu1  ;;  %v3272_v26 = vand.u32 2147483647, %v8314_v28 }
 0x370   : > { %v5959_v40 = vpop.eup %5958  ;;  %v3237_v60 = vadd.f32 %v5957_v5, %v3236_v11  ;;  %v5488_v50 = vmul.f32 -1.442695, %v8326_v19  ;;  %v2390_v44 = vpop.f32.mrf.mxu2  ;;  %v2307_v11 = vadd.f32 %v8126_v10, %v7923_v16  ;;  %vm3273_vm5 = vcmp.eq.f32.partialorder %v3272_v26, 8.507059e+37 }
 0x371   : > { %v8329_v31 = vpop.eup %5960  ;;  %v2739_v57 = vadd.f32 1.0, %v5959_v40  ;;  %v2391_v8 = vadd.f32 %v2390_v44, %v2302_v33 }
 0x372   : > { %v3241_v42 = vsel %vm3240_vm14, %v5957_v5, %v3237_v60  ;;  %v3264_v36 = vmul.f32 %v8329_v31, %v8314_v28  ;;  %5962 = vpow2.f32 %v5488_v50  ;;  %vm3269_vm0 = vweird.f32 %v8329_v31  ;;  %v8369_v28 = vld [vmem:[%s9179_s8] ss:$0 sm:$0xff] }
 0x373   : > { %v3246_v20 = vsel %vm3243_vm15, %v3245_v51, %v3241_v42  ;;  %5964 = vrcp.f32 %v2739_v57  ;;  %v3302_v4 = vand.u32 2147483647, %v2739_v57  ;;  %v3304_v49 = vand.u32 2147483648, %v2739_v57  ;;  %vm8355_vm2 = vmor %vm3268_vm1, %vm3269_vm0 }
 0x374   : > { %v3759_v59 = vmul.f32 %v3246_v20, %v8280_v37  ;;  %v3265_v29 = vsub.f32 1.0, %v3264_v36  ;;  %v3275_v60 = vor.u32 1.1754944e-38, %v3274_v56  ;;  %vm3298_vm4 = vweird.f32 %v2739_v57 }
 0x375   : > { %v2479_v38 = vpop.f32.mrf.mxu3  ;;  %vm3303_vm7 = vcmp.eq.f32.partialorder %v3302_v4, 8.507059e+37  ;;  %v3305_v10 = vor.u32 1.1754944e-38, %v3304_v49 }
 0x376   : > { %v8339_v23 = vadd.f32 %v2479_v38, %v2391_v8  ;;  %v3807_v39 = vpack.c.bf16 %v3759_v59, %v3757_v30  ;;  %v3266_v3 = vmul.f32 %v8329_v31, %v3265_v29 }
 0x378   : > { %v5963_v43 = vpop.eup %5962  ;;  %v5490_v7 = vmul.f32 -1.442695, %v8339_v23  ;;  %4088 = vmatmul.bf16.gmra.mxu1 %v3807_v39  ;;  %v2393_v54 = vpop.f32.mrf.mxu2  ;;  %v3267_v24 = vadd.f32 %v8329_v31, %v3266_v3 }
 0x379   : > { %v5965_v5 = vpop.eup %5964  ;;  %v8343_v14 = vadd.f32 1.0, %v5963_v43  ;;  %v2394_v1 = vadd.f32 %v2393_v54, %v2305_v35 }
 0x37a   : > { %v3294_v37 = vmul.f32 %v5965_v5, %v2739_v57  ;;  %5966 = vpow2.f32 %v5490_v7  ;;  %vm3299_vm3 = vweird.f32 %v5965_v5  ;;  %v3271_v21 = vsel %vm8355_vm2, %v8329_v31, %v3267_v24 }
 0x37b   : > { %5968 = vrcp.f32 %v8343_v14  ;;  %vm3300_vm6 = vmor %vm3298_vm4, %vm3299_vm3  ;;  %v3276_v31 = vsel %vm3273_vm5, %v3275_v60, %v3271_v21  ;;  %v3966_v57 = vadd.f32 %v8369_v28, %v8023_v9  ;;  %vm3328_vm9 = vweird.f32 %v8343_v14 }
 0x37c   : > { %v3295_v0 = vsub.f32 1.0, %v3294_v37  ;;  %v3761_v8 = vmul.f32 %v3276_v31, %v8297_v46  ;;  %v2310_v46 = vadd.f32 %v8157_v15, %v7923_v16  ;;  %v3332_v49 = vand.u32 2147483647, %v8343_v14 }
 0x37d   : > { %v2482_v55 = vpop.f32.mrf.mxu3  ;;  %v2312_v60 = vadd.f32 %v8184_v25, %v7923_v16 }
 0x37e   : > { %v3296_v27 = vmul.f32 %v5965_v5, %v3295_v0  ;;  %v8359_v32 = vadd.f32 %v2482_v55, %v2394_v1  ;;  %v3968_v0 = vadd.f32 %v8369_v28, %v8066_v17  ;;  %v3334_v1 = vand.u32 2147483648, %v8343_v14 }
 0x37f   : > { %vm3333_vm13 = vcmp.eq.f32.partialorder %v3332_v49, 8.507059e+37 }
 0x380   : > { %v5967_v40 = vpop.eup %5966  ;;  %v3297_v50 = vadd.f32 %v5965_v5, %v3296_v27  ;;  %v5492_v33 = vmul.f32 -1.442695, %v8359_v32  ;;  %v2395_v44 = vpop.f32.mrf.mxu2 }
 0x381   : > { %v8372_v41 = vpop.eup %5968  ;;  %v2743_v51 = vadd.f32 1.0, %v5967_v40  ;;  %v2396_v29 = vadd.f32 %v2395_v44, %v2307_v11 }
 0x382   : > { %v3301_v42 = vsel %vm3300_vm6, %v5965_v5, %v3297_v50  ;;  %v3324_v36 = vmul.f32 %v8372_v41, %v8343_v14  ;;  %5970 = vpow2.f32 %v5492_v33  ;;  %vm3329_vm8 = vweird.f32 %v8372_v41 }
 0x383   : > { %v3306_v20 = vsel %vm3303_vm7, %v3305_v10, %v3301_v42  ;;  %5972 = vrcp.f32 %v2743_v51  ;;  %v3362_v15 = vand.u32 2147483647, %v2743_v51  ;;  %v3364_v55 = vand.u32 2147483648, %v2743_v51  ;;  %vm8399_vm10 = vmor %vm3328_vm9, %vm3329_vm8 }
 0x384   : > { %v3763_v30 = vmul.f32 %v3306_v20, %v8307_v34  ;;  %v3325_v59 = vsub.f32 1.0, %v3324_v36  ;;  %v3335_v33 = vor.u32 1.1754944e-38, %v3334_v1  ;;  %vm3358_vm12 = vweird.f32 %v2743_v51 }
 0x385   : > { %v2484_v38 = vpop.f32.mrf.mxu3  ;;  %v4054_v39 = vpop.f32.mrf.mxu1  ;;  %vm3363_vm15 = vcmp.eq.f32.partialorder %v3362_v15, 8.507059e+37  ;;  %v3365_v42 = vor.u32 1.1754944e-38, %v3364_v55 }
 0x386   : > { %v8380_v3 = vadd.f32 %v2484_v38, %v2396_v29  ;;  %v8382_v43 = vadd.f32 %v4054_v39, %v3966_v57  ;;  %v3326_v7 = vmul.f32 %v8372_v41, %v3325_v59  ;;  %v3809_v5 = vpack.c.bf16 %v3763_v30, %v3761_v8  ;;  %v8420_v59 = vpop.f32.mrf.mxu0 }
 0x388   : > { %v5971_v54 = vpop.eup %5970  ;;  %v5494_v35 = vmul.f32 -1.442695, %v8380_v3  ;;  %4134 = vadd.xlane.f32.xlu1 %v8382_v43  ;;  %4093 = vmatmul.bf16.gmra.mxu1 %v3809_v5  ;;  %v2398_v37 = vpop.f32.mrf.mxu2  ;;  %v3327_v56 = vadd.f32 %v8372_v41, %v3326_v7 }
 0x389   : > { %v5973_v9 = vpop.eup %5972  ;;  %v8387_v34 = vadd.f32 1.0, %v5971_v54  ;;  %v2399_v4 = vadd.f32 %v2398_v37, %v2310_v46 }
 0x38a   : > { %v3354_v24 = vmul.f32 %v5973_v9, %v2743_v51  ;;  %5974 = vpow2.f32 %v5494_v35  ;;  %vm3359_vm11 = vweird.f32 %v5973_v9  ;;  %v3331_v14 = vsel %vm8399_vm10, %v8372_v41, %v3327_v56 }
 0x38b   : > { %5976 = vrcp.f32 %v8387_v34  ;;  %vm3360_vm14 = vmor %vm3358_vm12, %vm3359_vm11  ;;  %v3336_v20 = vsel %vm3333_vm13, %v3335_v33, %v3331_v14  ;;  %v3971_v51 = vadd.f32 %v8369_v28, %v8086_v47  ;;  %vm3388_vm1 = vweird.f32 %v8387_v34 }
 0x38c   : > { %v3355_v26 = vsub.f32 1.0, %v3354_v24  ;;  %v3765_v39 = vmul.f32 %v3336_v20, %v8326_v19  ;;  %v2315_v19 = vadd.f32 %v8213_v18, %v7923_v16  ;;  %v3392_v55 = vand.u32 2147483647, %v8387_v34 }
 0x38d   : > { %v2487_v12 = vpop.f32.mrf.mxu3  ;;  %v4056_v27 = vpop.f32.mrf.mxu1  ;;  %v2317_v33 = vadd.f32 %v8244_v61, %v7923_v16 }
 0x38e   : > { %v3356_v21 = vmul.f32 %v5973_v9, %v3355_v26  ;;  %v8403_v40 = vadd.f32 %v2487_v12, %v2399_v4  ;;  %v8405_v17 = vadd.f32 %v4056_v27, %v3968_v0  ;;  %v3973_v26 = vadd.f32 %v8369_v28, %v8116_v53 }
 0x38f   : > { %v3394_v4 = vand.u32 2147483648, %v8387_v34  ;;  %vm3393_vm5 = vcmp.eq.f32.partialorder %v3392_v55, 8.507059e+37 }
 0x390   : > { %v5975_v50 = vpop.eup %5974  ;;  %v3357_v10 = vadd.f32 %v5973_v9, %v3356_v21  ;;  %v5496_v44 = vmul.f32 -1.442695, %v8403_v40  ;;  %4136 = vadd.xlane.f32.xlu2 %v8405_v17  ;;  %v2400_v25 = vpop.f32.mrf.mxu2 }
 0x391   : > { %v8414_v31 = vpop.eup %5976  ;;  %v2747_v36 = vadd.f32 1.0, %v5975_v50  ;;  %v2401_v38 = vadd.f32 %v2400_v25, %v2312_v60  ;;  %v8443_v21 = vpop.f32.mrf.mxu0 }
 0x392   : > { %v3361_v57 = vsel %vm3360_vm14, %v5973_v9, %v3357_v10  ;;  %v3384_v41 = vmul.f32 %v8414_v31, %v8387_v34  ;;  %5978 = vpow2.f32 %v5496_v44  ;;  %vm3389_vm0 = vweird.f32 %v8414_v31 }
 0x393   : > { %v3366_v30 = vsel %vm3363_vm15, %v3365_v42, %v3361_v57  ;;  %5980 = vrcp.f32 %v2747_v36  ;;  %v3422_v18 = vand.u32 2147483647, %v2747_v36  ;;  %v3424_v12 = vand.u32 2147483648, %v2747_v36  ;;  %vm8445_vm2 = vmor %vm3388_vm1, %vm3389_vm0 }
 0x394   : > { %v3767_v29 = vmul.f32 %v3366_v30, %v8339_v23  ;;  %v3385_v8 = vsub.f32 1.0, %v3384_v41  ;;  %v3395_v44 = vor.u32 1.1754944e-38, %v3394_v4  ;;  %vm3418_vm4 = vweird.f32 %v2747_v36 }
 0x395   : > { %v2489_v7 = vpop.f32.mrf.mxu3  ;;  %v4059_v5 = vpop.f32.mrf.mxu1  ;;  %vm3423_vm7 = vcmp.eq.f32.partialorder %v3422_v18, 8.507059e+37  ;;  %v3425_v57 = vor.u32 1.1754944e-38, %v3424_v12 }
 0x396   : > { %v8424_v54 = vadd.f32 %v2489_v7, %v2401_v38  ;;  %v8426_v35 = vadd.f32 %v4059_v5, %v3971_v51  ;;  %v3386_v9 = vmul.f32 %v8414_v31, %v3385_v8  ;;  %v3811_v37 = vpack.c.bf16 %v3767_v29, %v3765_v39 }
 0x398   : > { %v5979_v46 = vpop.eup %5978  ;;  %v5498_v47 = vmul.f32 -1.442695, %v8424_v54  ;;  %4138 = vadd.xlane.f32.xlu0 %v8426_v35  ;;  %4098 = vmatmul.bf16.gmra.mxu1 %v3811_v37  ;;  %v2403_v56 = vpop.f32.mrf.mxu2  ;;  %v3387_v1 = vadd.f32 %v8414_v31, %v3386_v9 }
 0x399   : > { %v5981_v24 = vpop.eup %5980  ;;  %v8431_v23 = vadd.f32 1.0, %v5979_v46  ;;  %v2404_v15 = vadd.f32 %v2403_v56, %v2315_v19  ;;  %v8473_v19 = vpop.f32.mrf.mxu0 }
 0x39a   : > { %v3414_v0 = vmul.f32 %v5981_v24, %v2747_v36  ;;  %5982 = vpow2.f32 %v5498_v47  ;;  %vm3419_vm3 = vweird.f32 %v5981_v24  ;;  %v3391_v34 = vsel %vm8445_vm2, %v8414_v31, %v3387_v1 }
 0x39b   : > { %5984 = vrcp.f32 %v8431_v23  ;;  %vm3420_vm6 = vmor %vm3418_vm4, %vm3419_vm3  ;;  %v3396_v30 = vsel %vm3393_vm5, %v3395_v44, %v3391_v34  ;;  %v3976_v36 = vadd.f32 %v8369_v28, %v8138_v2  ;;  %v2320_v1 = vadd.f32 %v8258_v22, %v7923_v16 }
 0x39c   : > { %v3415_v49 = vsub.f32 1.0, %v3414_v0  ;;  %v3769_v7 = vmul.f32 %v3396_v30, %v8359_v32  ;;  %vm3448_vm9 = vweird.f32 %v8431_v23  ;;  %v3452_v12 = vand.u32 2147483647, %v8431_v23 }
 0x39d   : > { %v2492_v27 = vpop.f32.mrf.mxu3  ;;  %v4061_v11 = vpop.f32.mrf.mxu1 }
 0x39e   : > { %v3416_v14 = vmul.f32 %v5981_v24, %v3415_v49  ;;  %v8449_v53 = vadd.f32 %v2492_v27, %v2404_v15  ;;  %v8451_v50 = vadd.f32 %v4061_v11, %v3973_v26  ;;  %v3978_v49 = vadd.f32 %v8369_v28, %v8166_v58 }
 0x39f   : > { %v3454_v15 = vand.u32 2147483648, %v8431_v23  ;;  %vm3453_vm13 = vcmp.eq.f32.partialorder %v3452_v12, 8.507059e+37 }
 0x3a0   : > { %v5983_v10 = vpop.eup %5982  ;;  %v3417_v42 = vadd.f32 %v5981_v24, %v3416_v14  ;;  %v5500_v25 = vmul.f32 -1.442695, %v8449_v53  ;;  %4140 = vadd.xlane.f32.xlu2 %v8451_v50  ;;  %v2405_v61 = vpop.f32.mrf.mxu2 }
 0x3a1   : > { %v8460_v20 = vpop.eup %5984  ;;  %v2751_v41 = vadd.f32 1.0, %v5983_v10  ;;  %v2406_v39 = vadd.f32 %v2405_v61, %v2317_v33  ;;  %v2322_v10 = vadd.f32 %v8278_v62, %v7923_v16 }
 0x3a2   : > { %v3421_v51 = vsel %vm3420_vm6, %v5981_v24, %v3417_v42  ;;  %v3444_v31 = vmul.f32 %v8460_v20, %v8431_v23  ;;  %5986 = vpow2.f32 %v5500_v25  ;;  %vm3449_vm8 = vweird.f32 %v8460_v20 }
 0x3a3   : > { %v3426_v29 = vsel %vm3423_vm7, %v3425_v57, %v3421_v51  ;;  %5988 = vrcp.f32 %v2751_v41  ;;  %v3482_v22 = vand.u32 2147483647, %v2751_v41  ;;  %v3484_v27 = vand.u32 2147483648, %v2751_v41  ;;  %vm8489_vm10 = vmor %vm3448_vm9, %vm3449_vm8 }
 0x3a4   : > { %v3771_v8 = vmul.f32 %v3426_v29, %v8380_v3  ;;  %v3445_v38 = vsub.f32 1.0, %v3444_v31  ;;  %v3455_v42 = vor.u32 1.1754944e-38, %v3454_v15  ;;  %vm3478_vm12 = vweird.f32 %v2751_v41  ;;  %v8506_v31 = vpop.f32.mrf.mxu0 }
 0x3a5   : > { %v2494_v5 = vpop.f32.mrf.mxu3  ;;  %v4064_v9 = vpop.f32.mrf.mxu1  ;;  %vm3483_vm15 = vcmp.eq.f32.partialorder %v3482_v22, 8.507059e+37  ;;  %v3485_v30 = vor.u32 1.1754944e-38, %v3484_v27  ;;  %v3983_v15 = vadd.f32 %v8369_v28, %v8223_v63 }
 0x3a6   : > { %v8468_v37 = vadd.f32 %v2494_v5, %v2406_v39  ;;  %v8470_v46 = vadd.f32 %v4064_v9, %v3976_v36  ;;  %v3446_v47 = vmul.f32 %v8460_v20, %v3445_v38  ;;  %v3813_v24 = vpack.c.bf16 %v3771_v8, %v3769_v7 }
 0x3a7   : > { %v3981_v8 = vadd.f32 %v8369_v28, %v8203_v45 }
 0x3a8   : > { %v5987_v56 = vpop.eup %5986  ;;  %v5502_v2 = vmul.f32 -1.442695, %v8468_v37  ;;  %4142 = vadd.xlane.f32.xlu1 %v8470_v46  ;;  %4103 = vmatmul.bf16.gmra.mxu1 %v3813_v24  ;;  %v2408_v32 = vpop.f32.mrf.mxu2  ;;  %v3447_v4 = vadd.f32 %v8460_v20, %v3446_v47 }
 0x3a9   : > { %v5989_v3 = vpop.eup %5988  ;;  %v8477_v0 = vadd.f32 1.0, %v5987_v56  ;;  %v2409_v18 = vadd.f32 %v2408_v32, %v2320_v1 }
 0x3aa   : > { %v3474_v26 = vmul.f32 %v5989_v3, %v2751_v41  ;;  %5990 = vpow2.f32 %v5502_v2  ;;  %vm3479_vm11 = vweird.f32 %v5989_v3  ;;  %v3451_v23 = vsel %vm8489_vm10, %v8460_v20, %v3447_v4 }
 0x3ab   : > { %5992 = vrcp.f32 %v8477_v0  ;;  %vm3480_vm14 = vmor %vm3478_vm12, %vm3479_vm11  ;;  %v3456_v29 = vsel %vm3453_vm13, %v3455_v42, %v3451_v23  ;;  %vm3508_vm1 = vweird.f32 %v8477_v0 }
 0x3ac   : > { %v3475_v55 = vsub.f32 1.0, %v3474_v26  ;;  %v3773_v5 = vmul.f32 %v3456_v29, %v8403_v40  ;;  %v2325_v40 = vadd.f32 %v8299_v52, %v7923_v16  ;;  %v3512_v52 = vand.u32 2147483647, %v8477_v0 }
 0x3ad   : > { %v2497_v11 = vpop.f32.mrf.mxu3  ;;  %v4066_v60 = vpop.f32.mrf.mxu1 }
 0x3ae   : > { %v3476_v33 = vmul.f32 %v5989_v3, %v3475_v55  ;;  %v8493_v34 = vadd.f32 %v2497_v11, %v2409_v18  ;;  %v8495_v58 = vadd.f32 %v4066_v60, %v3978_v49  ;;  %v8530_v55 = vpop.f32.mrf.mxu0  ;;  %v3514_v18 = vand.u32 2147483648, %v8477_v0 }
 0x3af   : > { %vm3513_vm5 = vcmp.eq.f32.partialorder %v3512_v52, 8.507059e+37 }
 0x3b0   : > { %v5991_v44 = vpop.eup %5990  ;;  %v3477_v25 = vadd.f32 %v5989_v3, %v3476_v33  ;;  %v5504_v57 = vmul.f32 -1.442695, %v8493_v34  ;;  %4144 = vadd.xlane.f32.xlu2 %v8495_v58  ;;  %v2410_v62 = vpop.f32.mrf.mxu2 }
 0x3b1   : > { %v8504_v61 = vpop.eup %5992  ;;  %v2755_v51 = vadd.f32 1.0, %v5991_v44  ;;  %v2411_v7 = vadd.f32 %v2410_v62, %v2322_v10  ;;  %v2327_v44 = vadd.f32 %v8312_v13, %v7923_v16 }
 0x3b2   : > { %v3481_v20 = vsel %vm3480_vm14, %v5989_v3, %v3477_v25  ;;  %v3504_v36 = vmul.f32 %v8504_v61, %v8477_v0  ;;  %5994 = vpow2.f32 %v5504_v57  ;;  %vm3509_vm0 = vweird.f32 %v8504_v61 }
 0x3b3   : > { %v3486_v41 = vsel %vm3483_vm15, %v3485_v30, %v3481_v20  ;;  %5996 = vrcp.f32 %v2755_v51  ;;  %v3542_v27 = vand.u32 2147483647, %v2755_v51  ;;  %v3544_v11 = vand.u32 2147483648, %v2755_v51  ;;  %vm8535_vm2 = vmor %vm3508_vm1, %vm3509_vm0 }
 0x3b4   : > { %v3775_v38 = vmul.f32 %v3486_v41, %v8424_v54  ;;  %v3505_v39 = vsub.f32 1.0, %v3504_v36  ;;  %v3515_v25 = vor.u32 1.1754944e-38, %v3514_v18  ;;  %vm3538_vm4 = vweird.f32 %v2755_v51 }
 0x3b5   : > { %v2499_v9 = vpop.f32.mrf.mxu3  ;;  %v4069_v47 = vpop.f32.mrf.mxu1  ;;  %vm3543_vm7 = vcmp.eq.f32.partialorder %v3542_v27, 8.507059e+37  ;;  %v3545_v29 = vor.u32 1.1754944e-38, %v3544_v11  ;;  %v3988_v18 = vadd.f32 %v8369_v28, %v8443_v21 }
 0x3b6   : > { %v8514_v24 = vadd.f32 %v2499_v9, %v2411_v7  ;;  %v8516_v56 = vadd.f32 %v4069_v47, %v3981_v8  ;;  %v3506_v2 = vmul.f32 %v8504_v61, %v3505_v39  ;;  %v3815_v3 = vpack.c.bf16 %v3775_v38, %v3773_v5 }
 0x3b8   : > { %v5995_v32 = vpop.eup %5994  ;;  %v5506_v1 = vmul.f32 -1.442695, %v8514_v24  ;;  %4146 = vadd.xlane.f32.xlu0 %v8516_v56  ;;  %4108 = vmatmul.bf16.gmra.mxu1 %v3815_v3  ;;  %v2413_v26 = vpop.f32.mrf.mxu2  ;;  %v3507_v49 = vadd.f32 %v8504_v61, %v3506_v2 }
 0x3b9   : > { %v5997_v45 = vpop.eup %5996  ;;  %v8521_v54 = vadd.f32 1.0, %v5995_v32  ;;  %v2414_v22 = vadd.f32 %v2413_v26, %v2325_v40  ;;  %v8558_v2 = vpop.f32.mrf.mxu0 }
 0x3ba   : > { %v3534_v4 = vmul.f32 %v5997_v45, %v2755_v51  ;;  %5998 = vpow2.f32 %v5506_v1  ;;  %vm3539_vm3 = vweird.f32 %v5997_v45  ;;  %v3511_v0 = vsel %vm8535_vm2, %v8504_v61, %v3507_v49 }
 0x3bb   : > { %6000 = vrcp.f32 %v8521_v54  ;;  %vm3540_vm6 = vmor %vm3538_vm4, %vm3539_vm3  ;;  %v3516_v36 = vsel %vm3513_vm5, %v3515_v25, %v3511_v0  ;;  %v3986_v51 = vadd.f32 %v8369_v28, %v8420_v59  ;;  %vm3568_vm9 = vweird.f32 %v8521_v54 }
 0x3bc   : > { %v3535_v12 = vsub.f32 1.0, %v3534_v4  ;;  %v3777_v5 = vmul.f32 %v3516_v36, %v8449_v53  ;;  %v2330_v4 = vadd.f32 %v8335_v48, %v7923_v16  ;;  %v3572_v27 = vand.u32 2147483647, %v8521_v54 }
 0x3bd   : > { %v2502_v60 = vpop.f32.mrf.mxu3  ;;  %v4071_v14 = vpop.f32.mrf.mxu1  ;;  %v2332_v0 = vadd.f32 %v8351_v6, %v7923_v16 }
 0x3be   : > { %v3536_v10 = vmul.f32 %v5997_v45, %v3535_v12  ;;  %v8539_v63 = vadd.f32 %v2502_v60, %v2414_v22  ;;  %v8541_v23 = vadd.f32 %v4071_v14, %v3983_v15  ;;  %v3574_v12 = vand.u32 2147483648, %v8521_v54 }
 0x3bf   : > { %vm3573_vm13 = vcmp.eq.f32.partialorder %v3572_v27, 8.507059e+37 }
 0x3c0   : > { %v5999_v42 = vpop.eup %5998  ;;  %v3537_v57 = vadd.f32 %v5997_v45, %v3536_v10  ;;  %v5508_v30 = vmul.f32 -1.442695, %v8539_v63  ;;  %4148 = vadd.xlane.f32.xlu1 %v8541_v23  ;;  %v2415_v13 = vpop.f32.mrf.mxu2 }
 0x3c1   : > { %v8550_v62 = vpop.eup %6000  ;;  %v2759_v20 = vadd.f32 1.0, %v5999_v42  ;;  %v2416_v7 = vadd.f32 %v2415_v13, %v2327_v44  ;;  %v8592_v25 = vpop.f32.mrf.mxu0 }
 0x3c2   : > { %v3541_v41 = vsel %vm3540_vm6, %v5997_v45, %v3537_v57  ;;  %v3564_v61 = vmul.f32 %v8550_v62, %v8521_v54  ;;  %6002 = vpow2.f32 %v5508_v30  ;;  %vm3569_vm8 = vweird.f32 %v8550_v62 }
 0x3c3   : > { %v3546_v8 = vsel %vm3543_vm7, %v3545_v29, %v3541_v41  ;;  %6004 = vrcp.f32 %v2759_v20  ;;  %v3602_v48 = vand.u32 2147483647, %v2759_v20  ;;  %v3604_v11 = vand.u32 2147483648, %v2759_v20  ;;  %vm8579_vm10 = vmor %vm3568_vm9, %vm3569_vm8 }
 0x3c4   : > { %v3779_v38 = vmul.f32 %v3546_v8, %v8468_v37  ;;  %v3565_v39 = vsub.f32 1.0, %v3564_v61  ;;  %v3575_v57 = vor.u32 1.1754944e-38, %v3574_v12  ;;  %vm3598_vm12 = vweird.f32 %v2759_v20 }
 0x3c5   : > { %v2504_v9 = vpop.f32.mrf.mxu3  ;;  %v4074_v47 = vpop.f32.mrf.mxu1  ;;  %vm3603_vm15 = vcmp.eq.f32.partialorder %v3602_v48, 8.507059e+37  ;;  %v3605_v36 = vor.u32 1.1754944e-38, %v3604_v11 }
 0x3c6   : > { %v8560_v3 = vadd.f32 %v2504_v9, %v2416_v7  ;;  %v8562_v32 = vadd.f32 %v4074_v47, %v3986_v51  ;;  %v3566_v1 = vmul.f32 %v8550_v62, %v3565_v39  ;;  %v3817_v45 = vpack.c.bf16 %v3779_v38, %v3777_v5 }
 0x3c8   : > { %v6003_v26 = vpop.eup %6002  ;;  %v5510_v59 = vmul.f32 -1.442695, %v8560_v3  ;;  %4150 = vadd.xlane.f32.xlu2 %v8562_v32  ;;  %4113 = vmatmul.bf16.gmra.mxu1 %v3817_v45  ;;  %v2418_v53 = vpop.f32.mrf.mxu2  ;;  %v3567_v15 = vadd.f32 %v8550_v62, %v3566_v1 }
 0x3c9   : > { %v6005_v37 = vpop.eup %6004  ;;  %v8567_v40 = vadd.f32 1.0, %v6003_v26  ;;  %v2419_v52 = vadd.f32 %v2418_v53, %v2330_v4 }
 0x3ca   : > { %v3594_v49 = vmul.f32 %v6005_v37, %v2759_v20  ;;  %6006 = vpow2.f32 %v5510_v59  ;;  %vm3599_vm11 = vweird.f32 %v6005_v37  ;;  %v3571_v54 = vsel %vm8579_vm10, %v8550_v62, %v3567_v15 }
 0x3cb   : > { %6008 = vrcp.f32 %v8567_v40  ;;  %vm3600_vm14 = vmor %vm3598_vm12, %vm3599_vm11  ;;  %v3576_v41 = vsel %vm3573_vm13, %v3575_v57, %v3571_v54  ;;  %v3991_v20 = vadd.f32 %v8369_v28, %v8473_v19  ;;  %v3993_v15 = vadd.f32 %v8369_v28, %v8506_v31 }
 0x3cc   : > { %v3595_v22 = vsub.f32 1.0, %v3594_v49  ;;  %v3781_v7 = vmul.f32 %v3576_v41, %v8493_v34  ;;  %v3634_v49 = vand.u32 2147483648, %v8567_v40  ;;  %vm3628_vm1 = vweird.f32 %v8567_v40 }
 0x3cd   : > { %v2507_v60 = vpop.f32.mrf.mxu3  ;;  %v4076_v14 = vpop.f32.mrf.mxu1 }
 0x3ce   : > { %v3596_v10 = vmul.f32 %v6005_v37, %v3595_v22  ;;  %v8583_v44 = vadd.f32 %v2507_v60, %v2419_v52  ;;  %v8585_v21 = vadd.f32 %v4076_v14, %v3988_v18  ;;  %v3632_v18 = vand.u32 2147483647, %v8567_v40 }
 0x3cf   : > { %v3635_v31 = vor.u32 1.1754944e-38, %v3634_v49 }
 0x3d0   : > { %v6007_v42 = vpop.eup %6006  ;;  %v3597_v30 = vadd.f32 %v6005_v37, %v3596_v10  ;;  %v5512_v29 = vmul.f32 -1.442695, %v8583_v44  ;;  %4152 = vadd.xlane.f32.xlu0 %v8585_v21  ;;  %v2420_v6 = vpop.f32.mrf.mxu2  ;;  %vm3633_vm4 = vcmp.eq.f32.partialorder %v3632_v18, 8.507059e+37 }
 0x3d1   : > { %v6009_v13 = vpop.eup %6008  ;;  %v2763_v16 = vadd.f32 1.0, %v6007_v42  ;;  %v2421_v39 = vadd.f32 %v2420_v6, %v2332_v0 }
 0x3d2   : > { %v3601_v61 = vsel %vm3600_vm14, %v6005_v37, %v3597_v30  ;;  %v3624_v62 = vmul.f32 %v6009_v13, %v8567_v40  ;;  %6010 = vpow2.f32 %v5512_v29  ;;  %vm3629_vm0 = vweird.f32 %v6009_v13 }
 0x3d3   : > { %v3606_v8 = vsel %vm3603_vm15, %v3605_v36, %v3601_v61  ;;  %6012 = vrcp.f32 %v2763_v16  ;;  %vm8617_vm2 = vmor %vm3628_vm1, %vm3629_vm0  ;;  %v3662_v52 = vand.u32 2147483647, %v2763_v16  ;;  %v3664_v27 = vand.u32 2147483648, %v2763_v16 }
 0x3d4   : > { %v3783_v51 = vmul.f32 %v3606_v8, %v8514_v24  ;;  %v3625_v38 = vsub.f32 1.0, %v3624_v62  ;;  %v8609_v24 = vpop.f32.mrf.mxu0  ;;  %vm3658_vm5 = vweird.f32 %v2763_v16  ;;  %v6291_v40 = vmov 128.0  }
 0x3d5   : > { %v2509_v5 = vpop.f32.mrf.mxu3  ;;  %v4079_v9 = vpop.f32.mrf.mxu1  ;;  %v3665_v42 = vor.u32 1.1754944e-38, %v3664_v27  ;;  %vm3663_vm7 = vcmp.eq.f32.partialorder %v3662_v52, 8.507059e+37  ;;  %v3996_v36 = vadd.f32 %v8369_v28, %v8530_v55 }
 0x3d6   : > { %v3626_v47 = vmul.f32 %v6009_v13, %v3625_v38  ;;  %v8601_v1 = vadd.f32 %v2509_v5, %v2421_v39  ;;  %v8603_v45 = vadd.f32 %v4079_v9, %v3991_v20  ;;  %v3819_v26 = vpack.c.bf16 %v3783_v51, %v3781_v7 }
 0x3d8   : > { %v6011_v59 = vpop.eup %6010  ;;  %v5514_v37 = vmul.f32 -1.442695, %v8601_v1  ;;  %4154 = vadd.xlane.f32.xlu1 %v8603_v45  ;;  %4118 = vmatmul.bf16.gmra.mxu1 %v3819_v26  ;;  %v3627_v34 = vadd.f32 %v6009_v13, %v3626_v47 }
 0x3d9   : > { %v6013_v19 = vpop.eup %6012  ;;  %v8607_v53 = vadd.f32 1.0, %v6011_v59 }
 0x3da   : > { %v3654_v4 = vmul.f32 %v6013_v19, %v2763_v16  ;;  %6014 = vpow2.f32 %v5514_v37  ;;  %v3631_v11 = vsel %vm8617_vm2, %v6009_v13, %v3627_v34  ;;  %vm3659_vm3 = vweird.f32 %v6013_v19 }
 0x3db   : > { %6016 = vrcp.f32 %v8607_v53  ;;  %v3636_v54 = vsel %vm3633_vm4, %v3635_v31, %v3631_v11  ;;  %vm3660_vm6 = vmor %vm3658_vm5, %vm3659_vm3  ;;  %v3694_v9 = vand.u32 2147483648, %v8607_v53  ;;  %vm3688_vm9 = vweird.f32 %v8607_v53 }
 0x3dc   : > { %v3655_v12 = vsub.f32 1.0, %v3654_v4  ;;  %6018 = vrcp.f32 %v6291_v40  ;;  %v8629_v6 = vpop.f32.mrf.mxu0  ;;  %v3785_v16 = vmul.f32 %v3636_v54, %v8539_v63  ;;  %v3998_v63 = vadd.f32 %v8369_v28, %v8558_v2 }
 0x3dd   : > { %v4081_v48 = vpop.f32.mrf.mxu1  ;;  %v3695_v18 = vor.u32 1.1754944e-38, %v3694_v9  ;;  %v4001_v11 = vadd.f32 %v8369_v28, %v8592_v25  ;;  %v4003_v25 = vadd.f32 %v8369_v28, %v8609_v24  ;;  %v4006_v24 = vadd.f32 %v8369_v28, %v8629_v6 }
 0x3de   : > { %v3656_v60 = vmul.f32 %v6013_v19, %v3655_v12  ;;  %v8623_v14 = vadd.f32 %v4081_v48, %v3993_v15 }
 0x3e0   : > { %v6015_v33 = vpop.eup %6014  ;;  %v3657_v10 = vadd.f32 %v6013_v19, %v3656_v60  ;;  %4156 = vadd.xlane.f32.xlu2 %v8623_v14 }
 0x3e1   : > { %v6017_v0 = vpop.eup %6016  ;;  %v2767_v57 = vadd.f32 1.0, %v6015_v33 }
 0x3e2   : > { %v3661_v30 = vsel %vm3660_vm6, %v6013_v19, %v3657_v10  ;;  %v3684_v29 = vmul.f32 %v6017_v0, %v8607_v53  ;;  %v6019_v8 = vpop.eup %6018  ;;  %vm3689_vm8 = vweird.f32 %v6017_v0 }
 0x3e3   : > { %v3666_v13 = vsel %vm3663_vm7, %v3665_v42, %v3661_v30  ;;  %6020 = vrcp.f32 %v2767_v57  ;;  %v4199_v7 = vmul.f32 128.0, %v6019_v8  ;;  %vm8641_vm10 = vmor %vm3688_vm9, %vm3689_vm8  ;;  %v3722_v59 = vand.u32 2147483647, %v2767_v57 }
 0x3e4   : > { %v3787_v41 = vmul.f32 %v3666_v13, %v8560_v3  ;;  %v3685_v61 = vsub.f32 1.0, %v3684_v29  ;;  %v3692_v3 = vand.u32 2147483647, %v8607_v53  ;;  %v3724_v37 = vand.u32 2147483648, %v2767_v57  ;;  %v4007_v4 = vpop.f32.mrf.mxu0 }
 0x3e5   : > { %v4084_v62 = vpop.f32.mrf.mxu1  ;;  %v4200_v34 = vsub.f32 1.0, %v4199_v7  ;;  %vm3718_vm13 = vweird.f32 %v2767_v57  ;;  %vm3723_vm15 = vcmp.eq.f32.partialorder %v3722_v59, 8.507059e+37  ;;  %vm4203_vm0 = vweird.f32 %v6019_v8 }
 0x3e6   : > { %v3686_v20 = vmul.f32 %v6017_v0, %v3685_v61  ;;  %v8633_v51 = vadd.f32 %v4084_v62, %v3996_v36  ;;  %v3821_v38 = vpack.c.bf16 %v3787_v41, %v3785_v16  ;;  %vm3693_vm12 = vcmp.eq.f32.partialorder %v3692_v3, 8.507059e+37 }
 0x3e7   : > { %v3725_v22 = vor.u32 1.1754944e-38, %v3724_v37  ;;  %v4201_v52 = vmul.f32 %v6019_v8, %v4200_v34  ;;  %v4008_v7 = vadd.f32 %v8369_v28, %v4007_v4 }
 0x3e8   : > { %4158 = vadd.xlane.f32.xlu0 %v8633_v51  ;;  %4123 = vmatmul.bf16.gmra.mxu1 %v3821_v38  ;;  %v3687_v5 = vadd.f32 %v6017_v0, %v3686_v20 }
 0x3e9   : > { %v6021_v39 = vpop.eup %6020  ;;  %v4202_v10 = vadd.f32 %v6019_v8, %v4201_v52 }
 0x3ea   : > { %v3714_v55 = vmul.f32 %v6021_v39, %v2767_v57  ;;  %v3691_v49 = vsel %vm8641_vm10, %v6017_v0, %v3687_v5  ;;  %vm3719_vm11 = vweird.f32 %v6021_v39 }
 0x3eb   : > { %v3696_v12 = vsel %vm3693_vm12, %v3695_v18, %v3691_v49  ;;  %vm3720_vm14 = vmor %vm3718_vm13, %vm3719_vm11  ;;  %v8657_v42 = vsel %vm4203_vm0, %v6019_v8, %v4202_v10 }
 0x3ec   : > { %v3715_v47 = vsub.f32 1.0, %v3714_v55  ;;  %v3789_v60 = vmul.f32 %v3696_v12, %v8583_v44  ;;  %v4010_v54 = vpop.f32.mrf.mxu0 }
 0x3ed   : > { %v4086_v19 = vpop.f32.mrf.mxu1  ;;  %v4011_v3 = vadd.f32 %v8369_v28, %v4010_v54 }
 0x3ee   : > { %v3716_v15 = vmul.f32 %v6021_v39, %v3715_v47  ;;  %v8647_v2 = vadd.f32 %v4086_v19, %v3998_v63 }
 0x3f0   : > { %v3717_v53 = vadd.f32 %v6021_v39, %v3716_v15  ;;  %4160 = vadd.xlane.f32.xlu1 %v8647_v2 }
 0x3f2   : > { %v3721_v27 = vsel %vm3720_vm14, %v6021_v39, %v3717_v53 }
 0x3f3   : > { %v3726_v48 = vsel %vm3723_vm15, %v3725_v22, %v3721_v27 }
 0x3f4   : > { %v3791_v31 = vmul.f32 %v3726_v48, %v8601_v1  ;;  %v4012_v36 = vpop.f32.mrf.mxu0 }
 0x3f5   : > { %v4089_v33 = vpop.f32.mrf.mxu1  ;;  %v4013_v4 = vadd.f32 %v8369_v28, %v4012_v36 }
 0x3f6   : > { %v8654_v40 = vadd.f32 %v4089_v33, %v4001_v11  ;;  %v3823_v0 = vpack.c.bf16 %v3791_v31, %v3789_v60 }
 0x3f8   : > { %4162 = vadd.xlane.f32.xlu2 %v8654_v40  ;;  %4128 = vmatmul.bf16.gmra.mxu1 %v3823_v0 }
 0x3fb   : > { %v4135_v57 = vpop.xlane.xlu1 %4134 }
 0x3fc   : > { %v4205_v44 = vmul.f32 %v8657_v42, %v4135_v57  ;;  %v4015_v38 = vpop.f32.mrf.mxu0 }
 0x3fd   : > { %v4091_v30 = vpop.f32.mrf.mxu1  ;;  %v4016_v52 = vadd.f32 %v8369_v28, %v4015_v38 }
 0x3fe   : > { %v8663_v1 = vsub.f32 %v8382_v43, %v4205_v44  ;;  %v8665_v29 = vadd.f32 %v4091_v30, %v4003_v25 }
 0x400   : > { %4164 = vadd.xlane.f32.xlu0 %v8665_v29  ;;  %v4269_v13 = vmul.f32 %v8663_v1, %v8663_v1 }
 0x402   : > { %4301 = vadd.xlane.f32.xlu2 %v4269_v13 }
 0x403   : > { %v4137_v16 = vpop.xlane.xlu2 %4136 }
 0x404   : > { %v4206_v41 = vmul.f32 %v8657_v42, %v4137_v16  ;;  %v4017_v47 = vpop.f32.mrf.mxu0 }
 0x405   : > { %v4094_v43 = vpop.f32.mrf.mxu1  ;;  %v4018_v10 = vadd.f32 %v8369_v28, %v4017_v47 }
 0x406   : > { %v8674_v61 = vsub.f32 %v8405_v17, %v4206_v41  ;;  %v8676_v62 = vadd.f32 %v4094_v43, %v4006_v24 }
 0x408   : > { %v4270_v8 = vmul.f32 %v8674_v61, %v8674_v61  ;;  %4166 = vadd.xlane.f32.xlu1 %v8676_v62 }
 0x40a   : > { %4303 = vadd.xlane.f32.xlu0 %v4270_v8  ;;  %v8745_v8 = vld [vmem:[%s9179_s8] ss:$0 sm:$0xff] }
 0x40b   : > { %v4139_v20 = vpop.xlane.xlu0 %4138 }
 0x40c   : > { %v4207_v39 = vmul.f32 %v8657_v42, %v4139_v20  ;;  %v4020_v18 = vpop.f32.mrf.mxu0 }
 0x40d   : > { %v4096_v17 = vpop.f32.mrf.mxu1  ;;  %v4021_v13 = vadd.f32 %v8369_v28, %v4020_v18 }
 0x40e   : > { %v8684_v6 = vsub.f32 %v8426_v35, %v4207_v39  ;;  %v8686_v5 = vadd.f32 %v4096_v17, %v4008_v7 }
 0x410   : > { %v4271_v55 = vmul.f32 %v8684_v6, %v8684_v6  ;;  %4168 = vadd.xlane.f32.xlu2 %v8686_v5 }
 0x412   : > { %4305 = vadd.xlane.f32.xlu1 %v4271_v55 }
 0x413   : > { %v4141_v9 = vpop.xlane.xlu2 %4140 }
 0x414   : > { %v4208_v63 = vmul.f32 %v8657_v42, %v4141_v9  ;;  %v4022_v60 = vpop.f32.mrf.mxu0 }
 0x415   : > { %v4099_v35 = vpop.f32.mrf.mxu1  ;;  %v4023_v28 = vadd.f32 %v8745_v8, %v4022_v60 }
 0x416   : > { %v8694_v26 = vsub.f32 %v8451_v50, %v4208_v63  ;;  %v8696_v59 = vadd.f32 %v4099_v35, %v4011_v3 }
 0x418   : > { %v4272_v37 = vmul.f32 %v8694_v26, %v8694_v26  ;;  %4170 = vadd.xlane.f32.xlu0 %v8696_v59 }
 0x41a   : > { %4307 = vadd.xlane.f32.xlu2 %v4272_v37 }
 0x41b   : > { %v4143_v19 = vpop.xlane.xlu1 %4142 }
 0x41c   : > { %v4209_v34 = vmul.f32 %v8657_v42, %v4143_v19  ;;  %v4025_v44 = vpop.f32.mrf.mxu0 }
 0x41d   : > { %v4101_v15 = vpop.f32.mrf.mxu1  ;;  %v4026_v9 = vadd.f32 %v8745_v8, %v4025_v44 }
 0x41e   : > { %v8704_v49 = vsub.f32 %v8470_v46, %v4209_v34  ;;  %v8706_v50 = vadd.f32 %v4101_v15, %v4013_v4 }
 0x420   : > { %v4273_v53 = vmul.f32 %v8704_v49, %v8704_v49  ;;  %4172 = vadd.xlane.f32.xlu1 %v8706_v50 }
 0x422   : > { %4309 = vadd.xlane.f32.xlu0 %v4273_v53 }
 0x423   : > { %v4145_v12 = vpop.xlane.xlu2 %4144 }
 0x424   : > { %v4210_v22 = vmul.f32 %v8657_v42, %v4145_v12 }
 0x425   : > { %v4104_v46 = vpop.f32.mrf.mxu1 }
 0x426   : > { %v8714_v27 = vsub.f32 %v8495_v58, %v4210_v22  ;;  %v8716_v48 = vadd.f32 %v4104_v46, %v4016_v52 }
 0x428   : > { %v4274_v11 = vmul.f32 %v8714_v27, %v8714_v27  ;;  %4174 = vadd.xlane.f32.xlu2 %v8716_v48 }
 0x42a   : > { %4311 = vadd.xlane.f32.xlu1 %v4274_v11 }
 0x42b   : > { %v4147_v31 = vpop.xlane.xlu0 %4146 }
 0x42c   : > { %v4211_v33 = vmul.f32 %v8657_v42, %v4147_v31 }
 0x42d   : > { %v4106_v58 = vpop.f32.mrf.mxu1 }
 0x42e   : > { %v8724_v0 = vsub.f32 %v8516_v56, %v4211_v33  ;;  %v8726_v54 = vadd.f32 %v4106_v58, %v4018_v10 }
 0x430   : > { %v4275_v57 = vmul.f32 %v8724_v0, %v8724_v0  ;;  %4176 = vadd.xlane.f32.xlu0 %v8726_v54 }
 0x432   : > { %4313 = vadd.xlane.f32.xlu2 %v4275_v57 }
 0x433   : > { %v4149_v25 = vpop.xlane.xlu1 %4148 }
 0x434   : > { %v4212_v30 = vmul.f32 %v8657_v42, %v4149_v25 }
 0x435   : > { %v4109_v56 = vpop.f32.mrf.mxu1 }
 0x436   : > { %v8734_v36 = vsub.f32 %v8541_v23, %v4212_v30  ;;  %v8736_v16 = vadd.f32 %v4109_v56, %v4021_v13  ;;  %v4027_v23 = vpop.f32.mrf.mxu0 }
 0x437   : > { %v4028_v34 = vadd.f32 %v8745_v8, %v4027_v23 }
 0x438   : > { %v4276_v41 = vmul.f32 %v8734_v36, %v8734_v36  ;;  %4178 = vadd.xlane.f32.xlu1 %v8736_v16 }
 0x43a   : > { %4315 = vadd.xlane.f32.xlu0 %v4276_v41 }
 0x43b   : > { %v4151_v24 = vpop.xlane.xlu2 %4150 }
 0x43c   : > { %v4213_v43 = vmul.f32 %v8657_v42, %v4151_v24 }
 0x43d   : > { %v4111_v38 = vpop.f32.mrf.mxu1 }
 0x43e   : > { %v8749_v20 = vsub.f32 %v8562_v32, %v4213_v43  ;;  %v8751_v39 = vadd.f32 %v4111_v38, %v4023_v28  ;;  %v4030_v47 = vpop.f32.mrf.mxu0 }
 0x43f   : > { %v4031_v52 = vadd.f32 %v8745_v8, %v4030_v47 }
 0x440   : > { %v4277_v7 = vmul.f32 %v8749_v20, %v8749_v20  ;;  %4180 = vadd.xlane.f32.xlu2 %v8751_v39 }
 0x442   : > { %4317 = vadd.xlane.f32.xlu1 %v4277_v7 }
 0x443   : > { %v4153_v17 = vpop.xlane.xlu0 %4152 }
 0x444   : > { %v4214_v55 = vmul.f32 %v8657_v42, %v4153_v17 }
 0x445   : > { %v4114_v3 = vpop.f32.mrf.mxu1 }
 0x446   : > { %v8759_v63 = vsub.f32 %v8585_v21, %v4214_v55  ;;  %v8761_v32 = vadd.f32 %v4114_v3, %v4026_v9  ;;  %v4032_v53 = vpop.f32.mrf.mxu0 }
 0x447   : > { %v4033_v58 = vadd.f32 %v8745_v8, %v4032_v53 }
 0x448   : > { %v4278_v35 = vmul.f32 %v8759_v63, %v8759_v63  ;;  %4182 = vadd.xlane.f32.xlu0 %v8761_v32 }
 0x44a   : > { %4319 = vadd.xlane.f32.xlu2 %v4278_v35 }
 0x44b   : > { %v4155_v37 = vpop.xlane.xlu1 %4154 }
 0x44c   : > { %v4215_v19 = vmul.f32 %v8657_v42, %v4155_v37 }
 0x44d   : > { %v4116_v21 = vpop.f32.mrf.mxu1 }
 0x44e   : > { %v8769_v4 = vsub.f32 %v8603_v45, %v4215_v19  ;;  %v8771_v15 = vadd.f32 %v4116_v21, %v4028_v34  ;;  %v4035_v33 = vpop.f32.mrf.mxu0 }
 0x44f   : > { %v4036_v56 = vadd.f32 %v8745_v8, %v4035_v33 }
 0x450   : > { %v4279_v18 = vmul.f32 %v8769_v4, %v8769_v4  ;;  %4184 = vadd.xlane.f32.xlu1 %v8771_v15 }
 0x452   : > { %4321 = vadd.xlane.f32.xlu0 %v4279_v18 }
 0x453   : > { %v4157_v12 = vpop.xlane.xlu2 %4156 }
 0x454   : > { %v4216_v22 = vmul.f32 %v8657_v42, %v4157_v12 }
 0x455   : > { %v4119_v45 = vpop.f32.mrf.mxu1 }
 0x456   : > { %v8779_v46 = vsub.f32 %v8623_v14, %v4216_v22  ;;  %v8781_v11 = vadd.f32 %v4119_v45, %v4031_v52  ;;  %v4037_v41 = vpop.f32.mrf.mxu0 }
 0x457   : > { %v4038_v23 = vadd.f32 %v8745_v8, %v4037_v41 }
 0x458   : > { %v4280_v60 = vmul.f32 %v8779_v46, %v8779_v46  ;;  %4186 = vadd.xlane.f32.xlu2 %v8781_v11 }
 0x45a   : > { %4323 = vadd.xlane.f32.xlu1 %v4280_v60 }
 0x45b   : > { %v4159_v31 = vpop.xlane.xlu0 %4158 }
 0x45c   : > { %v4217_v10 = vmul.f32 %v8657_v42, %v4159_v31 }
 0x45d   : > { %v4121_v14 = vpop.f32.mrf.mxu1 }
 0x45e   : > { %v8789_v57 = vsub.f32 %v8633_v51, %v4217_v10  ;;  %v8791_v25 = vadd.f32 %v4121_v14, %v4033_v58  ;;  %v4040_v55 = vpop.f32.mrf.mxu0 }
 0x45f   : > { %v4041_v3 = vadd.f32 %v8745_v8, %v4040_v55 }
 0x460   : > { %v4281_v44 = vmul.f32 %v8789_v57, %v8789_v57  ;;  %4188 = vadd.xlane.f32.xlu0 %v8791_v25 }
 0x462   : > { %4325 = vadd.xlane.f32.xlu2 %v4281_v44 }
 0x463   : > { %v4161_v30 = vpop.xlane.xlu1 %4160 }
 0x464   : > { %v4218_v13 = vmul.f32 %v8657_v42, %v4161_v30 }
 0x465   : > { %v4124_v51 = vpop.f32.mrf.mxu1 }
 0x466   : > { %v8799_v24 = vsub.f32 %v8647_v2, %v4218_v13  ;;  %v8801_v43 = vadd.f32 %v4124_v51, %v4036_v56  ;;  %v4042_v53 = vpop.f32.mrf.mxu0 }
 0x467   : > { %v4043_v22 = vadd.f32 %v8745_v8, %v4042_v53 }
 0x468   : > { %v4282_v28 = vmul.f32 %v8799_v24, %v8799_v24  ;;  %4190 = vadd.xlane.f32.xlu1 %v8801_v43 }
 0x46a   : > { %4327 = vadd.xlane.f32.xlu0 %v4282_v28 }
 0x46b   : > { %v4163_v38 = vpop.xlane.xlu2 %4162 }
 0x46c   : > { %v4219_v31 = vmul.f32 %v8657_v42, %v4163_v38 }
 0x46d   : > { %v4126_v7 = vpop.f32.mrf.mxu1 }
 0x46e   : > { %v8807_v17 = vadd.f32 %v4126_v7, %v4038_v23  ;;  %v8834_v30 = vsub.f32 %v8654_v40, %v4219_v31 }
 0x470   : > { %4192 = vadd.xlane.f32.xlu2 %v8807_v17  ;;  %v4283_v38 = vmul.f32 %v8834_v30, %v8834_v30 }
 0x473   : > { %v4165_v2 = vpop.xlane.xlu0 %4164 }
 0x474   : > { %v4220_v9 = vmul.f32 %v8657_v42, %v4165_v2 }
 0x475   : > { %v4302_v47 = vpop.xlane.xlu2 %4301  ;;  %v4129_v37 = vpop.f32.mrf.mxu1 }
 0x476   : > { %v8813_v35 = vsub.f32 %v8665_v29, %v4220_v9  ;;  %v4365_v19 = vmul.f32 %v4302_v47, %v8657_v42  ;;  %v8816_v34 = vadd.f32 %v4129_v37, %v4041_v3  ;;  %v8843_v9 = vld [vmem:[%s9180_s9] ss:$0 sm:$0xff] }
 0x478   : > { %v4397_v21 = vadd.f32 1e-05, %v4365_v19  ;;  %v4284_v18 = vmul.f32 %v8813_v35, %v8813_v35  ;;  %4194 = vadd.xlane.f32.xlu0 %v8816_v34  ;;  %v8849_v19 = vld [vmem:[#allocation7] ss:$0 sm:$0xff] }
 0x47a   : > { %6022 = vrsqrt.f32 %v4397_v21  ;;  %4331 = vadd.xlane.f32.xlu2 %v4284_v18  ;;  %vm4435_vm2 = vweird.f32 %v4397_v21 }
 0x47b   : > { %v4167_v12 = vpop.xlane.xlu1 %4166 }
 0x47c   : > { %v4221_v29 = vmul.f32 %v8657_v42, %v4167_v12 }
 0x47d   : > { %v4304_v52 = vpop.xlane.xlu0 %4303  ;;  %v4131_v45 = vpop.f32.mrf.mxu1 }
 0x47e   : > { %v4366_v60 = vmul.f32 %v4304_v52, %v8657_v42  ;;  %v8826_v33 = vsub.f32 %v8676_v62, %v4221_v29  ;;  %v8828_v10 = vadd.f32 %v4131_v45, %v4043_v22 }
 0x480   : > { %v6023_v58 = vpop.eup %6022  ;;  %v4398_v14 = vadd.f32 1e-05, %v4366_v60  ;;  %4196 = vadd.xlane.f32.xlu1 %v8828_v10  ;;  %v4285_v8 = vmul.f32 %v8826_v33, %v8826_v33 }
 0x481   : > { %v4430_v44 = vmul.f32 %v6023_v58, %v4397_v21  ;;  %vm4436_vm1 = vweird.f32 %v6023_v58 }
 0x482   : > { %6024 = vrsqrt.f32 %v4398_v14  ;;  %4333 = vadd.xlane.f32.xlu0 %v4285_v8  ;;  %vm4437_vm3 = vmor %vm4435_vm2, %vm4436_vm1  ;;  %vm4445_vm5 = vweird.f32 %v4398_v14 }
 0x483   : > { %v4431_v13 = vmul.f32 %v6023_v58, %v4430_v44  ;;  %v4169_v56 = vpop.xlane.xlu2 %4168 }
 0x484   : > { %v4222_v23 = vmul.f32 %v8657_v42, %v4169_v56  ;;  %v6088_v56 = vld [vmem:[%s6820_s14] sm:$0xff] }
 0x485   : > { %v4432_v41 = vmul.f32 0.5, %v4431_v13  ;;  %v4306_v62 = vpop.xlane.xlu1 %4305 }
 0x486   : > { %v4367_v51 = vmul.f32 %v4306_v62, %v8657_v42  ;;  %v8847_v37 = vsub.f32 %v8686_v5, %v4222_v23 }
 0x487   : > { %v4433_v28 = vsub.f32 1.5, %v4432_v41 }
 0x488   : > { %v6025_v7 = vpop.eup %6024  ;;  %v4399_v55 = vadd.f32 1e-05, %v4367_v51  ;;  %4329 = vadd.xlane.f32.xlu1 %v4283_v38 }
 0x489   : > { %v4434_v2 = vmul.f32 %v6023_v58, %v4433_v28  ;;  %v4440_v40 = vmul.f32 %v6025_v7, %v4398_v14  ;;  %vm4446_vm4 = vweird.f32 %v6025_v7 }
 0x48a   : > { %6026 = vrsqrt.f32 %v4399_v55  ;;  %vm4447_vm6 = vmor %vm4445_vm5, %vm4446_vm4  ;;  %vm4455_vm8 = vweird.f32 %v4399_v55 }
 0x48b   : > { %v4438_v3 = vsel %vm4437_vm3, %v6023_v58, %v4434_v2  ;;  %v4441_v47 = vmul.f32 %v6025_v7, %v4440_v40  ;;  %v4171_v18 = vpop.xlane.xlu0 %4170 }
 0x48c   : > { %v4749_v21 = vmul.f32 %v4438_v3, %v8663_v1  ;;  %v4223_v12 = vmul.f32 %v8657_v42, %v4171_v18  ;;  %v4286_v1 = vmul.f32 %v8847_v37, %v8847_v37 }
 0x48d   : > { %v4442_v53 = vmul.f32 0.5, %v4441_v47  ;;  %v4308_v22 = vpop.xlane.xlu2 %4307 }
 0x48e   : > { %v4785_v29 = vmul.f32 %v8843_v9, %v4749_v21  ;;  %v4368_v52 = vmul.f32 %v4308_v22, %v8657_v42  ;;  %v8858_v5 = vsub.f32 %v8696_v59, %v4223_v12  ;;  %v6089_v22 = vld [vmem:[%s6820_s14 + $0x8] sm:$0xff] }
 0x48f   : > { %v4443_v45 = vsub.f32 1.5, %v4442_v53 }
 0x490   : > { %v6027_v60 = vpop.eup %6026  ;;  %v4821_v31 = vadd.f32 %v8849_v19, %v4785_v29  ;;  %v4400_v58 = vadd.f32 1e-05, %v4368_v52  ;;  %4335 = vadd.xlane.f32.xlu1 %v4286_v1  ;;  %v4287_v13 = vmul.f32 %v8858_v5, %v8858_v5 }
 0x491   : > { %v4444_v44 = vmul.f32 %v6025_v7, %v4443_v45  ;;  %v4450_v8 = vmul.f32 %v6027_v60, %v4399_v55  ;;  %vm4456_vm7 = vweird.f32 %v6027_v60 }
 0x492   : > { %v4853_v41 = vadd.f32 %v6088_v56, %v4821_v31  ;;  %6028 = vrsqrt.f32 %v4400_v58  ;;  %4337 = vadd.xlane.f32.xlu2 %v4287_v13  ;;  %vm4457_vm9 = vmor %vm4455_vm8, %vm4456_vm7  ;;  %vm4465_vm11 = vweird.f32 %v4400_v58 }
 0x493   : > { %v4448_v59 = vsel %vm4447_vm6, %v6025_v7, %v4444_v44  ;;  %v4451_v62 = vmul.f32 %v6027_v60, %v4450_v8  ;;  %v4173_v28 = vpop.xlane.xlu1 %4172 }
 0x494   : > { %4885 = vst [vmem:[%s8866_s25] sm:$0xff] %v4853_v41  ;;  %v4750_v51 = vmul.f32 %v4448_v59, %v8674_v61  ;;  %v4224_v23 = vmul.f32 %v8657_v42, %v4173_v28 }
 0x495   : > { %v4452_v14 = vmul.f32 0.5, %v4451_v62  ;;  %v4310_v38 = vpop.xlane.xlu0 %4309 }
 0x496   : > { %v4786_v2 = vmul.f32 %v8843_v9, %v4750_v51  ;;  %v4369_v40 = vmul.f32 %v4310_v38, %v8657_v42  ;;  %v8874_v7 = vsub.f32 %v8706_v50, %v4224_v23 }
 0x497   : > { %v4453_v3 = vsub.f32 1.5, %v4452_v14  ;;  %v6090_v14 = vld [vmem:[%s6820_s14 + $0x10] sm:$0xff] }
 0x498   : > { %v6029_v47 = vpop.eup %6028  ;;  %v4822_v21 = vadd.f32 %v8849_v19, %v4786_v2  ;;  %v4401_v61 = vadd.f32 1e-05, %v4369_v40  ;;  %v4288_v12 = vmul.f32 %v8874_v7, %v8874_v7 }
 0x499   : > { %v4454_v18 = vmul.f32 %v6027_v60, %v4453_v3  ;;  %v4460_v53 = vmul.f32 %v6029_v47, %v4400_v58  ;;  %vm4466_vm10 = vweird.f32 %v6029_v47 }
 0x49a   : > { %v4854_v29 = vadd.f32 %v6089_v22, %v4822_v21  ;;  %6030 = vrsqrt.f32 %v4401_v61  ;;  %4339 = vadd.xlane.f32.xlu0 %v4288_v12  ;;  %vm4467_vm12 = vmor %vm4465_vm11, %vm4466_vm10  ;;  %vm4475_vm14 = vweird.f32 %v4401_v61 }
 0x49b   : > { %v4458_v52 = vsel %vm4457_vm9, %v6027_v60, %v4454_v18  ;;  %v4461_v45 = vmul.f32 %v6029_v47, %v4460_v53  ;;  %v4175_v1 = vpop.xlane.xlu2 %4174 }
 0x49c   : > { %4886 = vst [vmem:[%s8866_s25 + $0x8] sm:$0xff] %v4854_v29  ;;  %v4751_v50 = vmul.f32 %v4458_v52, %v8684_v6  ;;  %v4225_v44 = vmul.f32 %v8657_v42, %v4175_v1  ;;  %v6091_v1 = vld [vmem:[%s6820_s14 + $0x18] sm:$0xff] }
 0x49d   : > { %v4462_v31 = vmul.f32 0.5, %v4461_v45  ;;  %v4312_v55 = vpop.xlane.xlu1 %4311 }
 0x49e   : > { %v4787_v8 = vmul.f32 %v8843_v9, %v4751_v50  ;;  %v4370_v13 = vmul.f32 %v4312_v55, %v8657_v42  ;;  %v8886_v60 = vsub.f32 %v8716_v48, %v4225_v44 }
 0x49f   : > { %v4463_v56 = vsub.f32 1.5, %v4462_v31 }
 0x4a0   : > { %v6031_v41 = vpop.eup %6030  ;;  %v4823_v59 = vadd.f32 %v8849_v19, %v4787_v8  ;;  %v4402_v6 = vadd.f32 1e-05, %v4370_v13  ;;  %v4289_v28 = vmul.f32 %v8886_v60, %v8886_v60 }
 0x4a1   : > { %v4464_v62 = vmul.f32 %v6029_v47, %v4463_v56  ;;  %v4470_v51 = vmul.f32 %v6031_v41, %v4401_v61  ;;  %vm4476_vm13 = vweird.f32 %v6031_v41 }
 0x4a2   : > { %v4855_v23 = vadd.f32 %v6090_v14, %v4823_v59  ;;  %6032 = vrsqrt.f32 %v4402_v6  ;;  %4341 = vadd.xlane.f32.xlu1 %v4289_v28  ;;  %vm4477_vm15 = vmor %vm4475_vm14, %vm4476_vm13  ;;  %vm4485_vm1 = vweird.f32 %v4402_v6 }
 0x4a3   : > { %v4468_v38 = vsel %vm4467_vm12, %v6029_v47, %v4464_v62  ;;  %v4471_v2 = vmul.f32 %v6031_v41, %v4470_v51  ;;  %v4177_v40 = vpop.xlane.xlu0 %4176 }
 0x4a4   : > { %4887 = vst [vmem:[%s8866_s25 + $0x10] sm:$0xff] %v4855_v23  ;;  %v4752_v48 = vmul.f32 %v4468_v38, %v8694_v26  ;;  %v4226_v21 = vmul.f32 %v8657_v42, %v4177_v40 }
 0x4a5   : > { %v4472_v3 = vmul.f32 0.5, %v4471_v2  ;;  %v4314_v58 = vpop.xlane.xlu2 %4313 }
 0x4a6   : > { %v4788_v18 = vmul.f32 %v8843_v9, %v4752_v48  ;;  %v4371_v53 = vmul.f32 %v4314_v58, %v8657_v42  ;;  %v8898_v47 = vsub.f32 %v8726_v54, %v4226_v21  ;;  %v6092_v48 = vld [vmem:[%s6820_s14 + $0x20] sm:$0xff] }
 0x4a7   : > { %v4473_v12 = vsub.f32 1.5, %v4472_v3 }
 0x4a8   : > { %v6033_v22 = vpop.eup %6032  ;;  %v4824_v29 = vadd.f32 %v8849_v19, %v4788_v18  ;;  %v4403_v26 = vadd.f32 1e-05, %v4371_v53  ;;  %v4290_v50 = vmul.f32 %v8898_v47, %v8898_v47 }
 0x4a9   : > { %v4474_v52 = vmul.f32 %v6031_v41, %v4473_v12  ;;  %v4480_v45 = vmul.f32 %v6033_v22, %v4402_v6  ;;  %vm4486_vm0 = vweird.f32 %v6033_v22 }
 0x4aa   : > { %v4856_v31 = vadd.f32 %v6091_v1, %v4824_v29  ;;  %6034 = vrsqrt.f32 %v4403_v26  ;;  %4343 = vadd.xlane.f32.xlu2 %v4290_v50  ;;  %vm4487_vm2 = vmor %vm4485_vm1, %vm4486_vm0  ;;  %vm4495_vm4 = vweird.f32 %v4403_v26 }
 0x4ab   : > { %v4478_v44 = vsel %vm4477_vm15, %v6031_v41, %v4474_v52  ;;  %v4481_v55 = vmul.f32 %v6033_v22, %v4480_v45  ;;  %v4179_v8 = vpop.xlane.xlu1 %4178 }
 0x4ac   : > { %4888 = vst [vmem:[%s8866_s25 + $0x18] sm:$0xff] %v4856_v31  ;;  %v4753_v54 = vmul.f32 %v4478_v44, %v8704_v49  ;;  %v4227_v56 = vmul.f32 %v8657_v42, %v4179_v8 }
 0x4ad   : > { %v4482_v13 = vmul.f32 0.5, %v4481_v55  ;;  %v4316_v61 = vpop.xlane.xlu0 %4315  ;;  %v6093_v55 = vld [vmem:[%s6820_s14 + $0x28] sm:$0xff] }
 0x4ae   : > { %v4789_v59 = vmul.f32 %v8843_v9, %v4753_v54  ;;  %v4372_v62 = vmul.f32 %v4316_v61, %v8657_v42  ;;  %v8910_v41 = vsub.f32 %v8736_v16, %v4227_v56 }
 0x4af   : > { %v4483_v51 = vsub.f32 1.5, %v4482_v13 }
 0x4b0   : > { %v6035_v28 = vpop.eup %6034  ;;  %v4825_v14 = vadd.f32 %v8849_v19, %v4789_v59  ;;  %v4404_v49 = vadd.f32 1e-05, %v4372_v62  ;;  %v4291_v2 = vmul.f32 %v8910_v41, %v8910_v41 }
 0x4b1   : > { %v4484_v23 = vmul.f32 %v6033_v22, %v4483_v51  ;;  %v4490_v38 = vmul.f32 %v6035_v28, %v4403_v26  ;;  %vm4496_vm3 = vweird.f32 %v6035_v28 }
 0x4b2   : > { %v4857_v40 = vadd.f32 %v6092_v48, %v4825_v14  ;;  %6036 = vrsqrt.f32 %v4404_v49  ;;  %4345 = vadd.xlane.f32.xlu0 %v4291_v2  ;;  %vm4497_vm5 = vmor %vm4495_vm4, %vm4496_vm3  ;;  %vm4505_vm7 = vweird.f32 %v4404_v49 }
 0x4b3   : > { %v4488_v3 = vsel %vm4487_vm2, %v6033_v22, %v4484_v23  ;;  %v4491_v21 = vmul.f32 %v6035_v28, %v4490_v38  ;;  %v4181_v58 = vpop.xlane.xlu2 %4180 }
 0x4b4   : > { %4889 = vst [vmem:[%s8866_s25 + $0x20] sm:$0xff] %v4857_v40  ;;  %v4754_v16 = vmul.f32 %v4488_v3, %v8714_v27  ;;  %v4228_v53 = vmul.f32 %v8657_v42, %v4181_v58  ;;  %v6094_v3 = vld [vmem:[%s6820_s14 + $0x30] sm:$0xff] }
 0x4b5   : > { %v4492_v18 = vmul.f32 0.5, %v4491_v21  ;;  %v4318_v6 = vpop.xlane.xlu1 %4317 }
 0x4b6   : > { %v4790_v12 = vmul.f32 %v8843_v9, %v4754_v16  ;;  %v4373_v29 = vmul.f32 %v4318_v6, %v8657_v42  ;;  %v8922_v22 = vsub.f32 %v8751_v39, %v4228_v53 }
 0x4b7   : > { %v4493_v52 = vsub.f32 1.5, %v4492_v18 }
 0x4b8   : > { %v6037_v45 = vpop.eup %6036  ;;  %v4826_v50 = vadd.f32 %v8849_v19, %v4790_v12  ;;  %v4405_v27 = vadd.f32 1e-05, %v4373_v29  ;;  %v4292_v44 = vmul.f32 %v8922_v22, %v8922_v22 }
 0x4b9   : > { %v4494_v1 = vmul.f32 %v6035_v28, %v4493_v52  ;;  %v4500_v31 = vmul.f32 %v6037_v45, %v4404_v49  ;;  %vm4506_vm6 = vweird.f32 %v6037_v45 }
 0x4ba   : > { %v4858_v54 = vadd.f32 %v6093_v55, %v4826_v50  ;;  %6038 = vrsqrt.f32 %v4405_v27  ;;  %4347 = vadd.xlane.f32.xlu1 %v4292_v44  ;;  %vm4507_vm8 = vmor %vm4505_vm7, %vm4506_vm6  ;;  %vm4515_vm10 = vweird.f32 %v4405_v27 }
 0x4bb   : > { %v4498_v8 = vsel %vm4497_vm5, %v6035_v28, %v4494_v1  ;;  %v4501_v13 = vmul.f32 %v6037_v45, %v4500_v31  ;;  %v4183_v56 = vpop.xlane.xlu0 %4182 }
 0x4bc   : > { %4890 = vst [vmem:[%s8866_s25 + $0x28] sm:$0xff] %v4858_v54  ;;  %v4755_v39 = vmul.f32 %v4498_v8, %v8724_v0  ;;  %v4229_v59 = vmul.f32 %v8657_v42, %v4183_v56  ;;  %v6095_v54 = vld [vmem:[%s6820_s14 + $0x38] sm:$0xff] }
 0x4bd   : > { %v4502_v61 = vmul.f32 0.5, %v4501_v13  ;;  %v4320_v26 = vpop.xlane.xlu2 %4319 }
 0x4be   : > { %v4791_v62 = vmul.f32 %v8843_v9, %v4755_v39  ;;  %v4374_v51 = vmul.f32 %v4320_v26, %v8657_v42  ;;  %v8934_v28 = vsub.f32 %v8761_v32, %v4229_v59 }
 0x4bf   : > { %v4503_v14 = vsub.f32 1.5, %v4502_v61 }
 0x4c0   : > { %v6039_v23 = vpop.eup %6038  ;;  %v4827_v38 = vadd.f32 %v8849_v19, %v4791_v62  ;;  %v4406_v0 = vadd.f32 1e-05, %v4374_v51  ;;  %v4293_v40 = vmul.f32 %v8934_v28, %v8934_v28 }
 0x4c1   : > { %v4504_v2 = vmul.f32 %v6037_v45, %v4503_v14  ;;  %v4510_v48 = vmul.f32 %v6039_v23, %v4405_v27  ;;  %vm4516_vm9 = vweird.f32 %v6039_v23 }
 0x4c2   : > { %v4859_v21 = vadd.f32 %v6094_v3, %v4827_v38  ;;  %6040 = vrsqrt.f32 %v4406_v0  ;;  %4349 = vadd.xlane.f32.xlu2 %v4293_v40  ;;  %vm4517_vm11 = vmor %vm4515_vm10, %vm4516_vm9  ;;  %vm4525_vm13 = vweird.f32 %v4406_v0  ;;  %v6096_v3 = vld [vmem:[%s6820_s14 + $0x40] sm:$0xff] }
 0x4c3   : > { %v4508_v16 = vsel %vm4507_vm8, %v6037_v45, %v4504_v2  ;;  %v4511_v58 = vmul.f32 %v6039_v23, %v4510_v48  ;;  %v4185_v18 = vpop.xlane.xlu1 %4184 }
 0x4c4   : > { %4891 = vst [vmem:[%s8866_s25 + $0x30] sm:$0xff] %v4859_v21  ;;  %v4756_v32 = vmul.f32 %v4508_v16, %v8734_v36  ;;  %v4230_v6 = vmul.f32 %v8657_v42, %v4185_v18 }
 0x4c5   : > { %v4512_v53 = vmul.f32 0.5, %v4511_v58  ;;  %v4322_v49 = vpop.xlane.xlu0 %4321 }
 0x4c6   : > { %v4792_v12 = vmul.f32 %v8843_v9, %v4756_v32  ;;  %v4375_v29 = vmul.f32 %v4322_v49, %v8657_v42  ;;  %v8946_v45 = vsub.f32 %v8771_v15, %v4230_v6 }
 0x4c7   : > { %v4513_v52 = vsub.f32 1.5, %v4512_v53 }
 0x4c8   : > { %v6041_v50 = vpop.eup %6040  ;;  %v4828_v1 = vadd.f32 %v8849_v19, %v4792_v12  ;;  %v4407_v36 = vadd.f32 1e-05, %v4375_v29  ;;  %v4294_v55 = vmul.f32 %v8946_v45, %v8946_v45 }
 0x4c9   : > { %v4514_v31 = vmul.f32 %v6039_v23, %v4513_v52  ;;  %v4520_v44 = vmul.f32 %v6041_v50, %v4406_v0  ;;  %vm4526_vm12 = vweird.f32 %v6041_v50 }
 0x4ca   : > { %v4860_v8 = vadd.f32 %v6095_v54, %v4828_v1  ;;  %6042 = vrsqrt.f32 %v4407_v36  ;;  %4351 = vadd.xlane.f32.xlu0 %v4294_v55  ;;  %vm4527_vm14 = vmor %vm4525_vm13, %vm4526_vm12  ;;  %vm4535_vm0 = vweird.f32 %v4407_v36  ;;  %v6097_v55 = vld [vmem:[%s6820_s14 + $0x48] sm:$0xff] }
 0x4cb   : > { %v4518_v13 = vsel %vm4517_vm11, %v6039_v23, %v4514_v31  ;;  %v4521_v39 = vmul.f32 %v6041_v50, %v4520_v44  ;;  %v4187_v56 = vpop.xlane.xlu2 %4186 }
 0x4cc   : > { %4892 = vst [vmem:[%s8866_s25 + $0x38] sm:$0xff] %v4860_v8  ;;  %v4757_v15 = vmul.f32 %v4518_v13, %v8749_v20  ;;  %v4231_v59 = vmul.f32 %v8657_v42, %v4187_v56 }
 0x4cd   : > { %v4522_v61 = vmul.f32 0.5, %v4521_v39  ;;  %v4324_v27 = vpop.xlane.xlu1 %4323 }
 0x4ce   : > { %v4793_v26 = vmul.f32 %v8843_v9, %v4757_v15  ;;  %v4376_v62 = vmul.f32 %v4324_v27, %v8657_v42  ;;  %v8958_v14 = vsub.f32 %v8781_v11, %v4231_v59 }
 0x4cf   : > { %v4523_v51 = vsub.f32 1.5, %v4522_v61 }
 0x4d0   : > { %v6043_v23 = vpop.eup %6042  ;;  %v4829_v38 = vadd.f32 %v8849_v19, %v4793_v26  ;;  %v4408_v20 = vadd.f32 1e-05, %v4376_v62  ;;  %v4295_v40 = vmul.f32 %v8958_v14, %v8958_v14 }
 0x4d1   : > { %v4524_v2 = vmul.f32 %v6041_v50, %v4523_v51  ;;  %v4530_v48 = vmul.f32 %v6043_v23, %v4407_v36  ;;  %vm4536_vm15 = vweird.f32 %v6043_v23 }
 0x4d2   : > { %v4861_v21 = vadd.f32 %v6096_v3, %v4829_v38  ;;  %6044 = vrsqrt.f32 %v4408_v20  ;;  %4353 = vadd.xlane.f32.xlu1 %v4295_v40  ;;  %vm4537_vm1 = vmor %vm4535_vm0, %vm4536_vm15  ;;  %vm4545_vm3 = vweird.f32 %v4408_v20 }
 0x4d3   : > { %v4528_v16 = vsel %vm4527_vm14, %v6041_v50, %v4524_v2  ;;  %v4531_v58 = vmul.f32 %v6043_v23, %v4530_v48  ;;  %v4189_v32 = vpop.xlane.xlu0 %4188  ;;  %v6098_v48 = vld [vmem:[%s6820_s14 + $0x50] sm:$0xff] }
 0x4d4   : > { %4893 = vst [vmem:[%s8866_s25 + $0x40] sm:$0xff] %v4861_v21  ;;  %v4758_v11 = vmul.f32 %v4528_v16, %v8759_v63  ;;  %v4232_v53 = vmul.f32 %v8657_v42, %v4189_v32 }
 0x4d5   : > { %v4532_v18 = vmul.f32 0.5, %v4531_v58  ;;  %v4326_v0 = vpop.xlane.xlu2 %4325 }
 0x4d6   : > { %v4794_v6 = vmul.f32 %v8843_v9, %v4758_v11  ;;  %v4377_v49 = vmul.f32 %v4326_v0, %v8657_v42  ;;  %v8970_v29 = vsub.f32 %v8791_v25, %v4232_v53 }
 0x4d7   : > { %v4533_v12 = vsub.f32 1.5, %v4532_v18 }
 0x4d8   : > { %v6045_v52 = vpop.eup %6044  ;;  %v4830_v50 = vadd.f32 %v8849_v19, %v4794_v6  ;;  %v4409_v63 = vadd.f32 1e-05, %v4377_v49  ;;  %v4296_v44 = vmul.f32 %v8970_v29, %v8970_v29 }
 0x4d9   : > { %v4534_v1 = vmul.f32 %v6043_v23, %v4533_v12  ;;  %v4540_v31 = vmul.f32 %v6045_v52, %v4408_v20  ;;  %vm4546_vm2 = vweird.f32 %v6045_v52  ;;  %v6099_v12 = vld [vmem:[%s6820_s14 + $0x58] sm:$0xff] }
 0x4da   : > { %v4862_v54 = vadd.f32 %v6097_v55, %v4830_v50  ;;  %6046 = vrsqrt.f32 %v4409_v63  ;;  %4355 = vadd.xlane.f32.xlu2 %v4296_v44  ;;  %vm4547_vm4 = vmor %vm4545_vm3, %vm4546_vm2  ;;  %vm4555_vm6 = vweird.f32 %v4409_v63 }
 0x4db   : > { %v4538_v8 = vsel %vm4537_vm1, %v6043_v23, %v4534_v1  ;;  %v4541_v13 = vmul.f32 %v6045_v52, %v4540_v31  ;;  %v4191_v39 = vpop.xlane.xlu1 %4190 }
 0x4dc   : > { %4894 = vst [vmem:[%s8866_s25 + $0x48] sm:$0xff] %v4862_v54  ;;  %v4759_v25 = vmul.f32 %v4538_v8, %v8769_v4  ;;  %v4233_v56 = vmul.f32 %v8657_v42, %v4191_v39 }
 0x4dd   : > { %v4542_v15 = vmul.f32 0.5, %v4541_v13  ;;  %v4328_v36 = vpop.xlane.xlu0 %4327 }
 0x4de   : > { %v4795_v61 = vmul.f32 %v8843_v9, %v4759_v25  ;;  %v4378_v59 = vmul.f32 %v4328_v36, %v8657_v42  ;;  %v8982_v26 = vsub.f32 %v8801_v43, %v4233_v56  ;;  %v6100_v36 = vld [vmem:[%s6820_s14 + $0x60] sm:$0xff] }
 0x4df   : > { %v4543_v27 = vsub.f32 1.5, %v4542_v15 }
 0x4e0   : > { %v6047_v62 = vpop.eup %6046  ;;  %v4831_v51 = vadd.f32 %v8849_v19, %v4795_v61  ;;  %v4410_v4 = vadd.f32 1e-05, %v4378_v59  ;;  %v4297_v2 = vmul.f32 %v8982_v26, %v8982_v26 }
 0x4e1   : > { %v4544_v23 = vmul.f32 %v6045_v52, %v4543_v27  ;;  %v4550_v38 = vmul.f32 %v6047_v62, %v4409_v63  ;;  %vm4556_vm5 = vweird.f32 %v6047_v62 }
 0x4e2   : > { %v4863_v40 = vadd.f32 %v6098_v48, %v4831_v51  ;;  %6048 = vrsqrt.f32 %v4410_v4  ;;  %4357 = vadd.xlane.f32.xlu0 %v4297_v2  ;;  %vm4557_vm7 = vmor %vm4555_vm6, %vm4556_vm5  ;;  %vm4565_vm9 = vweird.f32 %v4410_v4 }
 0x4e3   : > { %v4548_v3 = vsel %vm4547_vm4, %v6045_v52, %v4544_v23  ;;  %v4551_v21 = vmul.f32 %v6047_v62, %v4550_v38  ;;  %v4193_v16 = vpop.xlane.xlu2 %4192 }
 0x4e4   : > { %4895 = vst [vmem:[%s8866_s25 + $0x50] sm:$0xff] %v4863_v40  ;;  %v4760_v43 = vmul.f32 %v4548_v3, %v8779_v46  ;;  %v4234_v11 = vmul.f32 %v8657_v42, %v4193_v16 }
 0x4e5   : > { %v4552_v58 = vmul.f32 0.5, %v4551_v21  ;;  %v6101_v21 = vld [vmem:[%s6820_s14 + $0x68] sm:$0xff] }
 0x4e6   : > { %v4796_v20 = vmul.f32 %v8843_v9, %v4760_v43  ;;  %v8993_v18 = vsub.f32 %v8807_v17, %v4234_v11 }
 0x4e7   : > { %v4553_v32 = vsub.f32 1.5, %v4552_v58 }
 0x4e8   : > { %v6049_v53 = vpop.eup %6048  ;;  %v4832_v0 = vadd.f32 %v8849_v19, %v4796_v20  ;;  %v4298_v46 = vmul.f32 %v8993_v18, %v8993_v18 }
 0x4e9   : > { %v4554_v6 = vmul.f32 %v6047_v62, %v4553_v32  ;;  %v4560_v49 = vmul.f32 %v6049_v53, %v4410_v4  ;;  %vm4566_vm8 = vweird.f32 %v6049_v53 }
 0x4ea   : > { %v4864_v52 = vadd.f32 %v6099_v12, %v4832_v0  ;;  %4359 = vadd.xlane.f32.xlu1 %v4298_v46  ;;  %vm4567_vm10 = vmor %vm4565_vm9, %vm4566_vm8 }
 0x4eb   : > { %v4558_v50 = vsel %vm4557_vm7, %v6047_v62, %v4554_v6  ;;  %v4561_v1 = vmul.f32 %v6049_v53, %v4560_v49  ;;  %v4195_v31 = vpop.xlane.xlu0 %4194 }
 0x4ec   : > { %4896 = vst [vmem:[%s8866_s25 + $0x58] sm:$0xff] %v4864_v52  ;;  %v4761_v17 = vmul.f32 %v4558_v50, %v8789_v57  ;;  %v4235_v55 = vmul.f32 %v8657_v42, %v4195_v31 }
 0x4ed   : > { %v4562_v44 = vmul.f32 0.5, %v4561_v1  ;;  %v4332_v54 = vpop.xlane.xlu2 %4331 }
 0x4ee   : > { %v4797_v63 = vmul.f32 %v8843_v9, %v4761_v17  ;;  %v4380_v8 = vmul.f32 %v4332_v54, %v8657_v42  ;;  %v9005_v25 = vsub.f32 %v8816_v34, %v4235_v55 }
 0x4ef   : > { %v4563_v13 = vsub.f32 1.5, %v4562_v44 }
 0x4f0   : > { %v4833_v39 = vadd.f32 %v8849_v19, %v4797_v63  ;;  %v4412_v15 = vadd.f32 1e-05, %v4380_v8  ;;  %v4299_v57 = vmul.f32 %v9005_v25, %v9005_v25 }
 0x4f1   : > { %v4564_v56 = vmul.f32 %v6049_v53, %v4563_v13 }
 0x4f2   : > { %v4865_v61 = vadd.f32 %v6100_v36, %v4833_v39  ;;  %6050 = vrsqrt.f32 %v4412_v15  ;;  %4361 = vadd.xlane.f32.xlu2 %v4299_v57  ;;  %vm4585_vm12 = vweird.f32 %v4412_v15  ;;  %v6102_v39 = vld [vmem:[%s6820_s14 + $0x78] sm:$0xff] }
 0x4f3   : > { %v4568_v59 = vsel %vm4567_vm10, %v6049_v53, %v4564_v56  ;;  %v4197_v34 = vpop.xlane.xlu1 %4196 }
 0x4f4   : > { %4897 = vst [vmem:[%s8866_s25 + $0x60] sm:$0xff] %v4865_v61  ;;  %v4762_v27 = vmul.f32 %v4568_v59, %v8799_v24  ;;  %v4236_v62 = vmul.f32 %v8657_v42, %v4197_v34 }
 0x4f5   : > { %v4334_v4 = vpop.xlane.xlu0 %4333 }
 0x4f6   : > { %v4798_v51 = vmul.f32 %v8843_v9, %v4762_v27  ;;  %v9016_v23 = vsub.f32 %v8828_v10, %v4236_v62  ;;  %v4381_v38 = vmul.f32 %v4334_v4, %v8657_v42 }
 0x4f8   : > { %v6051_v2 = vpop.eup %6050  ;;  %v4834_v48 = vadd.f32 %v8849_v19, %v4798_v51  ;;  %v4413_v3 = vadd.f32 1e-05, %v4381_v38  ;;  %v4300_v24 = vmul.f32 %v9016_v23, %v9016_v23 }
 0x4f9   : > { %v4580_v40 = vmul.f32 %v6051_v2, %v4412_v15  ;;  %vm4586_vm11 = vweird.f32 %v6051_v2 }
 0x4fa   : > { %v4866_v43 = vadd.f32 %v6101_v21, %v4834_v48  ;;  %6052 = vrsqrt.f32 %v4413_v3  ;;  %4363 = vadd.xlane.f32.xlu0 %v4300_v24  ;;  %vm4587_vm13 = vmor %vm4585_vm12, %vm4586_vm11  ;;  %vm4595_vm15 = vweird.f32 %v4413_v3 }
 0x4fb   : > { %v4581_v16 = vmul.f32 %v6051_v2, %v4580_v40  ;;  %v4330_v58 = vpop.xlane.xlu1 %4329 }
 0x4fc   : > { %4898 = vst [vmem:[%s8866_s25 + $0x68] sm:$0xff] %v4866_v43  ;;  %v4379_v10 = vmul.f32 %v4330_v58, %v8657_v42  ;;  %v6103_v43 = vld [vmem:[%s6820_s14 + $0x80] sm:$0xff] }
 0x4fd   : > { %v4582_v11 = vmul.f32 0.5, %v4581_v16 }
 0x4fe   : > { %v4411_v32 = vadd.f32 1e-05, %v4379_v10 }
 0x4ff   : > { %v4583_v20 = vsub.f32 1.5, %v4582_v11 }
 0x500   : > { %v6053_v53 = vpop.eup %6052  ;;  %6054 = vrsqrt.f32 %v4411_v32  ;;  %vm4575_vm2 = vweird.f32 %v4411_v32 }
 0x501   : > { %v4584_v0 = vmul.f32 %v6051_v2, %v4583_v20  ;;  %v4590_v6 = vmul.f32 %v6053_v53, %v4413_v3  ;;  %vm4596_vm14 = vweird.f32 %v6053_v53 }
 0x502   : > { %vm4597_vm0 = vmor %vm4595_vm15, %vm4596_vm14 }
 0x503   : > { %v4588_v49 = vsel %vm4587_vm13, %v6051_v2, %v4584_v0  ;;  %v4591_v12 = vmul.f32 %v6053_v53, %v4590_v6  ;;  %v4336_v52 = vpop.xlane.xlu1 %4335 }
 0x504   : > { %v4764_v46 = vmul.f32 %v4588_v49, %v8813_v35  ;;  %v4382_v50 = vmul.f32 %v4336_v52, %v8657_v42  ;;  %v6104_v52 = vld [vmem:[%s6820_s14 + $0x70] sm:$0xff] }
 0x505   : > { %v4592_v17 = vmul.f32 0.5, %v4591_v12  ;;  %v4338_v31 = vpop.xlane.xlu2 %4337 }
 0x506   : > { %v4800_v1 = vmul.f32 %v8843_v9, %v4764_v46  ;;  %v6055_v44 = vpop.eup %6054  ;;  %v4414_v55 = vadd.f32 1e-05, %v4382_v50  ;;  %v4383_v54 = vmul.f32 %v4338_v31, %v8657_v42 }
 0x507   : > { %v4593_v8 = vsub.f32 1.5, %v4592_v17  ;;  %v4570_v13 = vmul.f32 %v6055_v44, %v4411_v32  ;;  %vm4576_vm1 = vweird.f32 %v6055_v44 }
 0x508   : > { %v4836_v63 = vadd.f32 %v8849_v19, %v4800_v1  ;;  %6056 = vrsqrt.f32 %v4414_v55  ;;  %v4415_v35 = vadd.f32 1e-05, %v4383_v54  ;;  %vm4577_vm3 = vmor %vm4575_vm2, %vm4576_vm1  ;;  %vm4605_vm5 = vweird.f32 %v4414_v55 }
 0x509   : > { %v4594_v56 = vmul.f32 %v6053_v53, %v4593_v8  ;;  %v4571_v57 = vmul.f32 %v6055_v44, %v4570_v13 }
 0x50a   : > { %v4868_v15 = vadd.f32 %v6102_v39, %v4836_v63  ;;  %6058 = vrsqrt.f32 %v4415_v35  ;;  %vm4615_vm8 = vweird.f32 %v4415_v35 }
 0x50b   : > { %v4598_v36 = vsel %vm4597_vm0, %v6053_v53, %v4594_v56  ;;  %v4572_v61 = vmul.f32 0.5, %v4571_v57 }
 0x50c   : > { %4900 = vst [vmem:[%s8866_s25 + $0x78] sm:$0xff] %v4868_v15  ;;  %v4765_v59 = vmul.f32 %v4598_v36, %v8826_v33 }
 0x50d   : > { %v4573_v27 = vsub.f32 1.5, %v4572_v61  ;;  %v4340_v34 = vpop.xlane.xlu0 %4339  ;;  %v6105_v61 = vld [vmem:[%s6820_s14 + $0x88] sm:$0xff] }
 0x50e   : > { %v6057_v62 = vpop.eup %6056  ;;  %v4801_v51 = vmul.f32 %v8843_v9, %v4765_v59  ;;  %v4384_v4 = vmul.f32 %v4340_v34, %v8657_v42 }
 0x50f   : > { %v4574_v38 = vmul.f32 %v6055_v44, %v4573_v27  ;;  %v4600_v2 = vmul.f32 %v6057_v62, %v4414_v55  ;;  %vm4606_vm4 = vweird.f32 %v6057_v62 }
 0x510   : > { %v6059_v48 = vpop.eup %6058  ;;  %v4837_v40 = vadd.f32 %v8849_v19, %v4801_v51  ;;  %v4416_v3 = vadd.f32 1e-05, %v4384_v4  ;;  %vm4607_vm7 = vmor %vm4605_vm5, %vm4606_vm4  ;;  %v6106_v51 = vld [vmem:[%s6820_s14 + $0x90] sm:$0xff] }
 0x511   : > { %v4578_v24 = vsel %vm4577_vm3, %v6055_v44, %v4574_v38  ;;  %v4601_v33 = vmul.f32 %v6057_v62, %v4600_v2  ;;  %v4610_v21 = vmul.f32 %v6059_v48, %v4415_v35  ;;  %vm4616_vm6 = vweird.f32 %v6059_v48 }
 0x512   : > { %v4869_v16 = vadd.f32 %v6103_v43, %v4837_v40  ;;  %v4763_v58 = vmul.f32 %v4578_v24, %v8834_v30  ;;  %6060 = vrsqrt.f32 %v4416_v3  ;;  %vm4617_vm9 = vmor %vm4615_vm8, %vm4616_vm6  ;;  %vm4625_vm11 = vweird.f32 %v4416_v3 }
 0x513   : > { %v4602_v11 = vmul.f32 0.5, %v4601_v33  ;;  %v4611_v10 = vmul.f32 %v6059_v48, %v4610_v21 }
 0x514   : > { %4901 = vst [vmem:[%s8866_s25 + $0x80] sm:$0xff] %v4869_v16  ;;  %v4799_v20 = vmul.f32 %v8843_v9, %v4763_v58 }
 0x515   : > { %v4603_v32 = vsub.f32 1.5, %v4602_v11  ;;  %v4612_v53 = vmul.f32 0.5, %v4611_v10  ;;  %v4342_v0 = vpop.xlane.xlu1 %4341 }
 0x516   : > { %v4835_v6 = vadd.f32 %v8849_v19, %v4799_v20  ;;  %v4385_v49 = vmul.f32 %v4342_v0, %v8657_v42  ;;  %v6107_v20 = vld [vmem:[%s6820_s14 + $0x98] sm:$0xff] }
 0x517   : > { %v4604_v46 = vmul.f32 %v6057_v62, %v4603_v32  ;;  %v4613_v12 = vsub.f32 1.5, %v4612_v53 }
 0x518   : > { %v6061_v30 = vpop.eup %6060  ;;  %v4867_v50 = vadd.f32 %v6104_v52, %v4835_v6  ;;  %v4417_v1 = vadd.f32 1e-05, %v4385_v49 }
 0x519   : > { %v4608_v17 = vsel %vm4607_vm7, %v6057_v62, %v4604_v46  ;;  %v4614_v31 = vmul.f32 %v6059_v48, %v4613_v12  ;;  %v4620_v44 = vmul.f32 %v6061_v30, %v4416_v3  ;;  %vm4626_vm10 = vweird.f32 %v6061_v30 }
 0x51a   : > { %4899 = vst [vmem:[%s8866_s25 + $0x70] sm:$0xff] %v4867_v50  ;;  %v4766_v54 = vmul.f32 %v4608_v17, %v8847_v37  ;;  %6062 = vrsqrt.f32 %v4417_v1  ;;  %vm4627_vm12 = vmor %vm4625_vm11, %vm4626_vm10  ;;  %vm4635_vm14 = vweird.f32 %v4417_v1 }
 0x51b   : > { %v4618_v63 = vsel %vm4617_vm9, %v6059_v48, %v4614_v31  ;;  %v4621_v8 = vmul.f32 %v6061_v30, %v4620_v44  ;;  %v6108_v44 = vld [vmem:[%s6820_s14 + $0xa0] sm:$0xff] }
 0x51c   : > { %v4802_v55 = vmul.f32 %v8843_v9, %v4766_v54  ;;  %v4767_v13 = vmul.f32 %v4618_v63, %v8858_v5 }
 0x51d   : > { %v4622_v39 = vmul.f32 0.5, %v4621_v8  ;;  %v4344_v15 = vpop.xlane.xlu2 %4343 }
 0x51e   : > { %v4838_v56 = vadd.f32 %v8849_v19, %v4802_v55  ;;  %v4803_v35 = vmul.f32 %v8843_v9, %v4767_v13  ;;  %v4386_v57 = vmul.f32 %v4344_v15, %v8657_v42 }
 0x51f   : > { %v4623_v36 = vsub.f32 1.5, %v4622_v39 }
 0x520   : > { %v6063_v37 = vpop.eup %6062  ;;  %v4870_v59 = vadd.f32 %v6105_v61, %v4838_v56  ;;  %v4839_v27 = vadd.f32 %v8849_v19, %v4803_v35  ;;  %v4418_v34 = vadd.f32 1e-05, %v4386_v57 }
 0x521   : > { %v4624_v5 = vmul.f32 %v6061_v30, %v4623_v36  ;;  %v4630_v62 = vmul.f32 %v6063_v37, %v4417_v1  ;;  %vm4636_vm13 = vweird.f32 %v6063_v37 }
 0x522   : > { %4902 = vst [vmem:[%s8866_s25 + $0x88] sm:$0xff] %v4870_v59  ;;  %v4871_v4 = vadd.f32 %v6106_v51, %v4839_v27  ;;  %6064 = vrsqrt.f32 %v4418_v34  ;;  %vm4637_vm15 = vmor %vm4635_vm14, %vm4636_vm13  ;;  %vm4645_vm1 = vweird.f32 %v4418_v34  ;;  %v6109_v59 = vld [vmem:[%s6820_s14 + $0xa8] sm:$0xff] }
 0x523   : > { %v4628_v38 = vsel %vm4627_vm12, %v6061_v30, %v4624_v5  ;;  %v4631_v2 = vmul.f32 %v6063_v37, %v4630_v62 }
 0x524   : > { %4903 = vst [vmem:[%s8866_s25 + $0x90] sm:$0xff] %v4871_v4  ;;  %v4768_v48 = vmul.f32 %v4628_v38, %v8874_v7 }
 0x525   : > { %v4632_v40 = vmul.f32 0.5, %v4631_v2  ;;  %v4346_v24 = vpop.xlane.xlu0 %4345 }
 0x526   : > { %v4804_v33 = vmul.f32 %v8843_v9, %v4768_v48  ;;  %v4387_v21 = vmul.f32 %v4346_v24, %v8657_v42 }
 0x527   : > { %v4633_v3 = vsub.f32 1.5, %v4632_v40 }
 0x528   : > { %v6065_v43 = vpop.eup %6064  ;;  %v4840_v16 = vadd.f32 %v8849_v19, %v4804_v33  ;;  %v4419_v58 = vadd.f32 1e-05, %v4387_v21 }
 0x529   : > { %v4634_v11 = vmul.f32 %v6063_v37, %v4633_v3  ;;  %v4640_v10 = vmul.f32 %v6065_v43, %v4418_v34  ;;  %vm4646_vm0 = vweird.f32 %v6065_v43  ;;  %v6110_v3 = vld [vmem:[%s6820_s14 + $0xb0] sm:$0xff] }
 0x52a   : > { %v4872_v32 = vadd.f32 %v6107_v20, %v4840_v16  ;;  %6066 = vrsqrt.f32 %v4419_v58  ;;  %vm4647_vm2 = vmor %vm4645_vm1, %vm4646_vm0  ;;  %vm4655_vm4 = vweird.f32 %v4419_v58 }
 0x52b   : > { %v4638_v7 = vsel %vm4637_vm15, %v6063_v37, %v4634_v11  ;;  %v4641_v53 = vmul.f32 %v6065_v43, %v4640_v10 }
 0x52c   : > { %4904 = vst [vmem:[%s8866_s25 + $0x98] sm:$0xff] %v4872_v32  ;;  %v4769_v0 = vmul.f32 %v4638_v7, %v8886_v60 }
 0x52d   : > { %v4642_v6 = vmul.f32 0.5, %v4641_v53  ;;  %v4348_v49 = vpop.xlane.xlu1 %4347  ;;  %v9087_v53 = vld [vmem:[#allocation7] ss:$0 sm:$0xff] }
 0x52e   : > { %v4805_v46 = vmul.f32 %v8843_v9, %v4769_v0  ;;  %v4388_v12 = vmul.f32 %v4348_v49, %v8657_v42 }
 0x52f   : > { %v4643_v30 = vsub.f32 1.5, %v4642_v6 }
 0x530   : > { %v6067_v52 = vpop.eup %6066  ;;  %v4841_v50 = vadd.f32 %v8849_v19, %v4805_v46  ;;  %v4420_v1 = vadd.f32 1e-05, %v4388_v12  ;;  %v6113_v46 = vld [vmem:[%s6820_s14 + $0xb8] sm:$0xff] }
 0x531   : > { %v4644_v17 = vmul.f32 %v6065_v43, %v4643_v30  ;;  %v4650_v31 = vmul.f32 %v6067_v52, %v4419_v58  ;;  %vm4656_vm3 = vweird.f32 %v6067_v52 }
 0x532   : > { %v4873_v54 = vadd.f32 %v6108_v44, %v4841_v50  ;;  %6068 = vrsqrt.f32 %v4420_v1  ;;  %vm4657_vm5 = vmor %vm4655_vm4, %vm4656_vm3  ;;  %vm4665_vm7 = vweird.f32 %v4420_v1 }
 0x533   : > { %v4648_v60 = vsel %vm4647_vm2, %v6065_v43, %v4644_v17  ;;  %v4651_v63 = vmul.f32 %v6067_v52, %v4650_v31 }
 0x534   : > { %4905 = vst [vmem:[%s8866_s25 + $0xa0] sm:$0xff] %v4873_v54  ;;  %v4770_v8 = vmul.f32 %v4648_v60, %v8898_v47 }
 0x535   : > { %v4652_v55 = vmul.f32 0.5, %v4651_v63  ;;  %v4350_v13 = vpop.xlane.xlu2 %4349 }
 0x536   : > { %v4806_v39 = vmul.f32 %v8843_v9, %v4770_v8  ;;  %v4389_v15 = vmul.f32 %v4350_v13, %v8657_v42 }
 0x537   : > { %v4653_v56 = vsub.f32 1.5, %v4652_v55 }
 0x538   : > { %v6069_v35 = vpop.eup %6068  ;;  %v4842_v57 = vadd.f32 %v8849_v19, %v4806_v39  ;;  %v4421_v36 = vadd.f32 1e-05, %v4389_v15  ;;  %v6114_v39 = vld [vmem:[%s6820_s14 + $0xc0] sm:$0xff] }
 0x539   : > { %v4654_v37 = vmul.f32 %v6067_v52, %v4653_v56  ;;  %v4660_v61 = vmul.f32 %v6069_v35, %v4420_v1  ;;  %vm4666_vm6 = vweird.f32 %v6069_v35 }
 0x53a   : > { %v4874_v27 = vadd.f32 %v6109_v59, %v4842_v57  ;;  %6070 = vrsqrt.f32 %v4421_v36  ;;  %vm4667_vm8 = vmor %vm4665_vm7, %vm4666_vm6  ;;  %vm4675_vm10 = vweird.f32 %v4421_v36 }
 0x53b   : > { %v4658_v47 = vsel %vm4657_vm5, %v6067_v52, %v4654_v37  ;;  %v4661_v34 = vmul.f32 %v6069_v35, %v4660_v61 }
 0x53c   : > { %4906 = vst [vmem:[%s8866_s25 + $0xa8] sm:$0xff] %v4874_v27  ;;  %v4771_v5 = vmul.f32 %v4658_v47, %v8910_v41 }
 0x53d   : > { %v4662_v62 = vmul.f32 0.5, %v4661_v34  ;;  %v4352_v51 = vpop.xlane.xlu0 %4351 }
 0x53e   : > { %v4807_v4 = vmul.f32 %v8843_v9, %v4771_v5  ;;  %v4390_v38 = vmul.f32 %v4352_v51, %v8657_v42  ;;  %v6115_v51 = vld [vmem:[%s6820_s14 + $0xc8] sm:$0xff] }
 0x53f   : > { %v4663_v2 = vsub.f32 1.5, %v4662_v62 }
 0x540   : > { %v6071_v48 = vpop.eup %6070  ;;  %v4843_v40 = vadd.f32 %v8849_v19, %v4807_v4  ;;  %v4422_v24 = vadd.f32 1e-05, %v4390_v38  ;;  %v9083_v19 = vld [vmem:[%s9180_s9] ss:$0 sm:$0xff] }
 0x541   : > { %v4664_v33 = vmul.f32 %v6069_v35, %v4663_v2  ;;  %v4670_v21 = vmul.f32 %v6071_v48, %v4421_v36  ;;  %vm4676_vm9 = vweird.f32 %v6071_v48 }
 0x542   : > { %v4875_v43 = vadd.f32 %v6110_v3, %v4843_v40  ;;  %6072 = vrsqrt.f32 %v4422_v24  ;;  %vm4677_vm11 = vmor %vm4675_vm10, %vm4676_vm9  ;;  %vm4685_vm13 = vweird.f32 %v4422_v24 }
 0x543   : > { %v4668_v41 = vsel %vm4667_vm8, %v6069_v35, %v4664_v33  ;;  %v4671_v16 = vmul.f32 %v6071_v48, %v4670_v21 }
 0x544   : > { %4907 = vst [vmem:[%s8866_s25 + $0xb0] sm:$0xff] %v4875_v43  ;;  %v4772_v9 = vmul.f32 %v4668_v41, %v8922_v22 }
 0x545   : > { %v4672_v58 = vmul.f32 0.5, %v4671_v16  ;;  %v4354_v11 = vpop.xlane.xlu1 %4353 }
 0x546   : > { %v4808_v10 = vmul.f32 %v9083_v19, %v4772_v9  ;;  %v4391_v20 = vmul.f32 %v4354_v11, %v8657_v42 }
 0x547   : > { %v4673_v32 = vsub.f32 1.5, %v4672_v58  ;;  %v6116_v58 = vld [vmem:[%s6820_s14 + $0xd0] sm:$0xff] }
 0x548   : > { %v6073_v7 = vpop.eup %6072  ;;  %v4844_v0 = vadd.f32 %v9087_v53, %v4808_v10  ;;  %v4423_v22 = vadd.f32 1e-05, %v4391_v20 }
 0x549   : > { %v4674_v6 = vmul.f32 %v6071_v48, %v4673_v32  ;;  %v4680_v49 = vmul.f32 %v6073_v7, %v4422_v24  ;;  %vm4686_vm12 = vweird.f32 %v6073_v7 }
 0x54a   : > { %v4876_v12 = vadd.f32 %v6113_v46, %v4844_v0  ;;  %6074 = vrsqrt.f32 %v4423_v22  ;;  %vm4687_vm14 = vmor %vm4685_vm13, %vm4686_vm12  ;;  %vm4695_vm0 = vweird.f32 %v4423_v22 }
 0x54b   : > { %v4678_v30 = vsel %vm4677_vm11, %v6071_v48, %v4674_v6  ;;  %v4681_v52 = vmul.f32 %v6073_v7, %v4680_v49 }
 0x54c   : > { %4908 = vst [vmem:[%s8866_s25 + $0xb8] sm:$0xff] %v4876_v12  ;;  %v4773_v50 = vmul.f32 %v4678_v30, %v8934_v28 }
 0x54d   : > { %v4682_v1 = vmul.f32 0.5, %v4681_v52  ;;  %v4356_v17 = vpop.xlane.xlu2 %4355 }
 0x54e   : > { %v4809_v31 = vmul.f32 %v9083_v19, %v4773_v50  ;;  %v4392_v44 = vmul.f32 %v4356_v17, %v8657_v42  ;;  %v6117_v50 = vld [vmem:[%s6820_s14 + $0xd8] sm:$0xff] }
 0x54f   : > { %v4683_v54 = vsub.f32 1.5, %v4682_v1 }
 0x550   : > { %v6075_v60 = vpop.eup %6074  ;;  %v4845_v63 = vadd.f32 %v9087_v53, %v4809_v31  ;;  %v4424_v8 = vadd.f32 1e-05, %v4392_v44 }
 0x551   : > { %v4684_v55 = vmul.f32 %v6073_v7, %v4683_v54  ;;  %v4690_v13 = vmul.f32 %v6075_v60, %v4423_v22  ;;  %vm4696_vm15 = vweird.f32 %v6075_v60 }
 0x552   : > { %v4877_v15 = vadd.f32 %v6114_v39, %v4845_v63  ;;  %6076 = vrsqrt.f32 %v4424_v8  ;;  %vm4697_vm1 = vmor %vm4695_vm0, %vm4696_vm15  ;;  %vm4705_vm3 = vweird.f32 %v4424_v8 }
 0x553   : > { %v4688_v28 = vsel %vm4687_vm14, %v6073_v7, %v4684_v55  ;;  %v4691_v56 = vmul.f32 %v6075_v60, %v4690_v13 }
 0x554   : > { %4909 = vst [vmem:[%s8866_s25 + $0xc0] sm:$0xff] %v4877_v15  ;;  %v4774_v35 = vmul.f32 %v4688_v28, %v8946_v45 }
 0x555   : > { %v4692_v57 = vmul.f32 0.5, %v4691_v56  ;;  %v4358_v36 = vpop.xlane.xlu0 %4357  ;;  %v6118_v56 = vld [vmem:[%s6820_s14 + $0xe0] sm:$0xff] }
 0x556   : > { %v4810_v37 = vmul.f32 %v9083_v19, %v4774_v35  ;;  %v4393_v61 = vmul.f32 %v4358_v36, %v8657_v42 }
 0x557   : > { %v4693_v59 = vsub.f32 1.5, %v4692_v57 }
 0x558   : > { %v6077_v27 = vpop.eup %6076  ;;  %v4846_v47 = vadd.f32 %v9087_v53, %v4810_v37  ;;  %v4425_v34 = vadd.f32 1e-05, %v4393_v61 }
 0x559   : > { %v4694_v5 = vmul.f32 %v6075_v60, %v4693_v59  ;;  %v4700_v62 = vmul.f32 %v6077_v27, %v4424_v8  ;;  %vm4706_vm2 = vweird.f32 %v6077_v27 }
 0x55a   : > { %v4878_v4 = vadd.f32 %v6115_v51, %v4846_v47  ;;  %6078 = vrsqrt.f32 %v4425_v34  ;;  %vm4707_vm4 = vmor %vm4705_vm3, %vm4706_vm2  ;;  %vm4715_vm6 = vweird.f32 %v4425_v34 }
 0x55b   : > { %v4698_v45 = vsel %vm4697_vm1, %v6075_v60, %v4694_v5  ;;  %v4701_v38 = vmul.f32 %v6077_v27, %v4700_v62  ;;  %v6119_v5 = vld [vmem:[%s6820_s14 + $0xe8] sm:$0xff] }
 0x55c   : > { %4910 = vst [vmem:[%s8866_s25 + $0xc8] sm:$0xff] %v4878_v4  ;;  %v4775_v2 = vmul.f32 %v4698_v45, %v8958_v14 }
 0x55d   : > { %v4702_v48 = vmul.f32 0.5, %v4701_v38  ;;  %v4360_v40 = vpop.xlane.xlu1 %4359 }
 0x55e   : > { %v4811_v24 = vmul.f32 %v9083_v19, %v4775_v2  ;;  %v4394_v33 = vmul.f32 %v4360_v40, %v8657_v42 }
 0x55f   : > { %v4703_v21 = vsub.f32 1.5, %v4702_v48 }
 0x560   : > { %v6079_v3 = vpop.eup %6078  ;;  %v4847_v43 = vadd.f32 %v9087_v53, %v4811_v24  ;;  %v4426_v41 = vadd.f32 1e-05, %v4394_v33  ;;  %v6120_v24 = vld [vmem:[%s6820_s14 + $0xf0] sm:$0xff] }
 0x561   : > { %v4704_v16 = vmul.f32 %v6077_v27, %v4703_v21  ;;  %v4710_v9 = vmul.f32 %v6079_v3, %v4425_v34  ;;  %vm4716_vm5 = vweird.f32 %v6079_v3 }
 0x562   : > { %v4879_v11 = vadd.f32 %v6116_v58, %v4847_v43  ;;  %6080 = vrsqrt.f32 %v4426_v41  ;;  %vm4717_vm7 = vmor %vm4715_vm6, %vm4716_vm5  ;;  %vm4725_vm9 = vweird.f32 %v4426_v41 }
 0x563   : > { %v4708_v14 = vsel %vm4707_vm4, %v6077_v27, %v4704_v16  ;;  %v4711_v10 = vmul.f32 %v6079_v3, %v4710_v9 }
 0x564   : > { %4911 = vst [vmem:[%s8866_s25 + $0xd0] sm:$0xff] %v4879_v11  ;;  %v4776_v20 = vmul.f32 %v4708_v14, %v8970_v29 }
 0x565   : > { %v4712_v32 = vmul.f32 0.5, %v4711_v10  ;;  %v4362_v7 = vpop.xlane.xlu2 %4361 }
 0x566   : > { %v4812_v0 = vmul.f32 %v9083_v19, %v4776_v20  ;;  %v4395_v22 = vmul.f32 %v4362_v7, %v8657_v42 }
 0x567   : > { %v4713_v6 = vsub.f32 1.5, %v4712_v32 }
 0x568   : > { %v6081_v49 = vpop.eup %6080  ;;  %v4848_v46 = vadd.f32 %v9087_v53, %v4812_v0  ;;  %v4427_v12 = vadd.f32 1e-05, %v4395_v22 }
 0x569   : > { %v4714_v30 = vmul.f32 %v6079_v3, %v4713_v6  ;;  %v4720_v52 = vmul.f32 %v6081_v49, %v4426_v41  ;;  %vm4726_vm8 = vweird.f32 %v6081_v49  ;;  %v6121_v41 = vld [vmem:[%s6820_s14 + $0xf8] sm:$0xff] }
 0x56a   : > { %v4880_v1 = vadd.f32 %v6117_v50, %v4848_v46  ;;  %6082 = vrsqrt.f32 %v4427_v12  ;;  %vm4727_vm10 = vmor %vm4725_vm9, %vm4726_vm8  ;;  %vm4735_vm12 = vweird.f32 %v4427_v12 }
 0x56b   : > { %v4718_v29 = vsel %vm4717_vm7, %v6079_v3, %v4714_v30  ;;  %v4721_v17 = vmul.f32 %v6081_v49, %v4720_v52 }
 0x56c   : > { %4912 = vst [vmem:[%s8866_s25 + $0xd8] sm:$0xff] %v4880_v1  ;;  %v4777_v31 = vmul.f32 %v4718_v29, %v8982_v26 }
 0x56d   : > { %v4722_v44 = vmul.f32 0.5, %v4721_v17  ;;  %v4364_v54 = vpop.xlane.xlu0 %4363 }
 0x56e   : > { %v4813_v60 = vmul.f32 %v9083_v19, %v4777_v31  ;;  %v4396_v63 = vmul.f32 %v4364_v54, %v8657_v42 }
 0x56f   : > { %v4723_v8 = vsub.f32 1.5, %v4722_v44 }
 0x570   : > { %v6083_v55 = vpop.eup %6082  ;;  %v4849_v13 = vadd.f32 %v9087_v53, %v4813_v60  ;;  %v4428_v39 = vadd.f32 1e-05, %v4396_v63 }
 0x571   : > { %v4724_v15 = vmul.f32 %v6081_v49, %v4723_v8  ;;  %v4730_v28 = vmul.f32 %v6083_v55, %v4427_v12  ;;  %vm4736_vm11 = vweird.f32 %v6083_v55 }
 0x572   : > { %v4881_v35 = vadd.f32 %v6118_v56, %v4849_v13  ;;  %6084 = vrsqrt.f32 %v4428_v39  ;;  %vm4737_vm13 = vmor %vm4735_vm12, %vm4736_vm11  ;;  %vm4745_vm15 = vweird.f32 %v4428_v39 }
 0x573   : > { %v4728_v26 = vsel %vm4727_vm10, %v6081_v49, %v4724_v15  ;;  %v4731_v57 = vmul.f32 %v6083_v55, %v4730_v28 }
 0x574   : > { %4913 = vst [vmem:[%s8866_s25 + $0xe0] sm:$0xff] %v4881_v35  ;;  %v4778_v42 = vmul.f32 %v4728_v26, %v8993_v18 }
 0x575   : > { %v4732_v36 = vmul.f32 0.5, %v4731_v57 }
 0x576   : > { %v4814_v37 = vmul.f32 %v9083_v19, %v4778_v42 }
 0x577   : > { %v4733_v61 = vsub.f32 1.5, %v4732_v36 }
 0x578   : > { %v6085_v59 = vpop.eup %6084  ;;  %v4850_v27 = vadd.f32 %v9087_v53, %v4814_v37 }
 0x579   : > { %v4734_v47 = vmul.f32 %v6083_v55, %v4733_v61  ;;  %v4740_v34 = vmul.f32 %v6085_v59, %v4428_v39  ;;  %vm4746_vm14 = vweird.f32 %v6085_v59 }
 0x57a   : > { %v4882_v62 = vadd.f32 %v6119_v5, %v4850_v27  ;;  %vm4747_vm0 = vmor %vm4745_vm15, %vm4746_vm14 }
 0x57b   : > { %v4738_v51 = vsel %vm4737_vm13, %v6083_v55, %v4734_v47  ;;  %v4741_v4 = vmul.f32 %v6085_v59, %v4740_v34 }
 0x57c   : > { %4914 = vst [vmem:[%s8866_s25 + $0xe8] sm:$0xff] %v4882_v62  ;;  %v4779_v18 = vmul.f32 %v4738_v51, %v9005_v25 }
 0x57d   : > { %v4742_v45 = vmul.f32 0.5, %v4741_v4 }
 0x57e   : > { %v4815_v38 = vmul.f32 %v9083_v19, %v4779_v18 }
 0x57f   : > { %v4743_v2 = vsub.f32 1.5, %v4742_v45 }
 0x580   : > { %v4851_v48 = vadd.f32 %v9087_v53, %v4815_v38 }
 0x581   : > { %v4744_v40 = vmul.f32 %v6085_v59, %v4743_v2 }
 0x582   : > { %v4883_v33 = vadd.f32 %v6120_v24, %v4851_v48 }
 0x583   : > { %v4748_v21 = vsel %vm4747_vm0, %v6085_v59, %v4744_v40 }
 0x584   : > { %4915 = vst [vmem:[%s8866_s25 + $0xf0] sm:$0xff] %v4883_v33  ;;  %v4780_v25 = vmul.f32 %v4748_v21, %v9016_v23 }
 0x586   : > { %v4816_v3 = vmul.f32 %v9083_v19, %v4780_v25 }
 0x588   : > { %v4852_v43 = vadd.f32 %v9087_v53, %v4816_v3 }
 0x58a   : > { %v4884_v16 = vadd.f32 %v6121_v41, %v4852_v43 }
 0x58c   : > { %4916 = vst [vmem:[%s8866_s25 + $0xf8] sm:$0xff] %v4884_v16 }
 0x58d   : > { %6239 = shalt.err (!%p6236_p8)
}
 0x58e   : > { %s6292_s14 = smov 128   ;;  %s6293_s22 = smov 8  }
 0x58f   : > { %5693 = dma.vmem_to_hbm [thread:$0]  (%p6392_p5), %s4931_s21, 4096, %s4933_s19, %s4918_s3, %s6292_s14, %s6292_s14, %s6293_s22  }
 0x590 PF: > { %p5715_p9 = scmp.ge.s32.totalorder %s6282_s20, 2  ;;  %s4947_s25 = sand.u32 1, %s6270_s17  }
 0x591   : > { %s4948_s26 = scalar_lea.sflag [#allocation4], %s4947_s25 }
 0x592   : > { %p5706_p10 = pnand %p5715_p9, %p6396_p6 }
 0x594   : > { %p5707_p11 = pneg %p5706_p10 }
 0x596   : > { %6265 = dma.done.wait (%p5707_p11), %s4948_s26, 4096  }
 0x597   : > { %6267 = vsyncadd (%p5707_p11), %s4948_s26, 4294963200  ;;  %s9314_s20 = sld [smem:[#allocation13_spill]]  ;;  %s9317_s17 = smov %s6274_s18 }
 0x598   : > { %s9315_s15 = sld [smem:[#allocation12_spill]] }
 0x599   : > { %s9316_s19 = sld [smem:[#allocation14_spill]] }
 0x59d   : > { %p23_p12 = scmp.ge.s32.totalorder %s9314_s20, 4  }
 0x59e   : > { %s9318_s18 = smov %s9315_s15 }
 0x59f   :  { %25 = sbr.rel (!%p23_p12) target bundleno = 8 (0x8), region = 118 }
 0x5a4   :  { %4954 = vsyncpa [#allocation3], 1 }
 0x5a5   :  { %4956 = vsyncpa [#allocation3 + $0x1], 1 }
 0x5a6   :  { %4957 = vsyncpa [#allocation6], 1 }
 0x5a7   :  { %4958 = vsyncpa [#allocation4], 1 }
 0x5a8   :  { %4960 = vsyncpa [#allocation4 + $0x1], 1 }

// kernel: tpu_custom_call.1
= control target key start
LH: loop header
LB: loop body
LE: loop exit
PB: predicated region body
PF: predicated region fallthrough
CT: control target
= control target key end

     0   :  { %s9171_s0 = inlined_call_operand.vmem [shape: s32[512,1], index: 0, kind: input, shape index: {}]   ;;  %s9172_s1 = inlined_call_operand.vmem [shape: s32[512,1], index: 1, kind: input, shape index: {}]   ;;  %s9173_s2 = inlined_call_operand.vmem [shape: f32[512,128], index: 2, kind: input, shape index: {}]   ;;  %s9174_s3 = inlined_call_operand.hbm [shape: bf16[128,128], index: 3, kind: input, shape index: {}]   ;;  %s9175_s4 = inlined_call_operand.hbm [shape: bf16[128,128], index: 4, kind: input, shape index: {}]   ;;  %s9176_s5 = inlined_call_operand.vmem [shape: bf16[384,256], index: 5, kind: input, shape index: {}]   ;;  %s9177_s6 = inlined_call_operand.vmem [shape: f32[1,256], index: 6, kind: input, shape index: {}]   ;;  %s9178_s7 = inlined_call_operand.vmem [shape: bf16[256,128], index: 7, kind: input, shape index: {}]   ;;  %s9179_s8 = inlined_call_operand.vmem [shape: f32[1,128], index: 8, kind: input, shape index: {}]   ;;  %s9180_s9 = inlined_call_operand.vmem [shape: f32[1,128], index: 9, kind: input, shape index: {}]   ;;  %s9181_s10 = inlined_call_operand.hbm [shape: f32[1,128], index: 10, kind: input, shape index: {}]   ;;  %s9182_s11 = inlined_call_operand.hbm [shape: f32[512,128], index: 11, kind: output, shape index: {}]  }
   0x1   :  { %9201 = sst [smem:[#allocation31_spill]] %s9174_s3 }
   0x2   :  { %9202 = sst [smem:[#allocation32_spill]] %s9175_s4 }
   0x3   :  { %16 = vsyncpa [#allocation3], 0 }
   0x4   :  { %17 = vsyncpa [#allocation6], 0 }
   0x5   :  { %18 = vsyncpa [#allocation4], 0 }
   0x6   :  { %20 = vsyncpa [#allocation4 + $0x1], 0  ;;  %s6354_s17 = smov 0   ;;  %s6356_s18 = smov 0  }
   0x7   :  { %s6358_s19 = smov 0   ;;  %s6360_s20 = smov 0  }
   0x8 LB: > { %9203 = sst [smem:[#allocation12_spill]] %s6278_s19  ;;  %s6375_s21 = sadd.s32 4294967295, %s6282_s20   ;;  %s6282_s20 = sphi %s6360_s20, %s9314_s20   ;;  %s6278_s19 = sphi %s6358_s19, %s9316_s19   ;;  %s6274_s18 = sphi %s6356_s18, %s9318_s18   ;;  %s6270_s17 = sphi %s6354_s17, %s9317_s17  }
   0x9   : > { %s5050_s22 = sadd.s32 4294967294, %s6282_s20   ;;  %s6379_s23 = sadd.s32 1, %s6282_s20  }
   0xa   : > { %9204 = sst [smem:[#allocation13_spill]] %s6379_s23  ;;  %s279_s24 = sadd.s32 1, %s6278_s19 }
   0xb   : > { %s276_s25 = ssub.s32 %s6282_s20, %s6379_s23  ;;  %p289_p0 = scmp.ne.s32.totalorder %s6278_s19, %s6274_s18 }
   0xc   : > { %p277_p1 = scmp.eq.s32.totalorder %s276_s25, 0  ;;  %p290_p2 = scmp.eq.s32.totalorder %s6375_s21, 1 }
   0xd   : > { %p295_p3 = scmp.ne.s32.totalorder %s6274_s18, %s6270_s17  ;;  %p296_p4 = scmp.eq.s32.totalorder %s5050_s22, 1 }
   0xe   : > { %s6390_s26 = scalar_select %p277_p1, %s6278_s19, %s279_s24  }
   0xf   : > { %p6392_p5 = por %p290_p2, %p289_p0  ;;  %p6396_p6 = por %p296_p4, %p295_p3 }
  0x10   : > { %9205 = sst [smem:[#allocation14_spill]] %s6390_s26  ;;  %p5051_p7 = scmp.ge.s32.totalorder %s6282_s20, 1 }
  0x11   : > { %p303_p8 = scmp.lt.s32.totalorder %s6282_s20, 3  ;;  %p5709_p9 = scmp.eq.s32.totalorder %s6375_s21, 0 }
  0x12   : > { %s9209_s4 = sld [smem:[#allocation32_spill]]  ;;  %s6284_s24 = smov [#allocation5]  }
  0x13   : > { %p6403_p10 = pnand %p5051_p7, %p303_p8  ;;  %s9210_s3 = sld [smem:[#allocation31_spill]] }
  0x14   : > { %s330_s25 = sshll.u32 %s6284_s24, 4  ;;  %s6285_s30 = smov 64   ;;  %s331_s25 = int_to_ptr.vmem [resolvable:$true] %s330_s25 }
  0x15   : > { %p5695_p11 = pneg %p6403_p10  ;;  %s6286_s12 = smov 4  }
  0x16   : > { %s6288_s19 = smov [#allocation7]  }
  0x17   : > { %p6417_p12 = pnand %p5709_p9, %p5695_p11  ;;  %s360_s23 = sshll.u32 %s6288_s19, 4  ;;  %s361_s23 = int_to_ptr.vmem [resolvable:$true] %s360_s23 }
  0x18   : > { %s328_s13 = sshll.u32 %s9209_s4, 4  ;;  %s6287_s4 = smov [#allocation2]   ;;  %s329_s13 = int_to_ptr.hbm [resolvable:$true] %s328_s13 }
  0x19   : > { %s314_s16 = sshll.u32 %s9210_s3, 4  ;;  %s316_s26 = sshll.u32 %s6287_s4, 4  ;;  %s315_s16 = int_to_ptr.hbm [resolvable:$true] %s314_s16  ;;  %s317_s26 = int_to_ptr.vmem [resolvable:$true] %s316_s26 }
  0x1a   : > { %5701 = dma.hbm_to_vmem [thread:$0]  (!%p6417_p12), %s329_s13, 1024, %s331_s25, [#allocation6], %s6285_s30, %s6285_s30, %s6286_s12  }
  0x1b   : > { %s358_s3 = sshll.u32 %s9181_s10, 4  ;;  %400 = sbr.rel (%p6403_p10) target bundleno = 1424 (0x590), region = 64  ;;  %s359_s3 = int_to_ptr.hbm [resolvable:$true] %s358_s3 }
  0x1c   : > { %5698 = dma.hbm_to_vmem [thread:$0]  (!%p6417_p12), %s315_s16, 1024, %s317_s26, [#allocation3], %s6285_s30, %s6285_s30, %s6286_s12  }
  0x1d   : > { %5704 = dma.hbm_to_vmem [thread:$0]  (!%p6417_p12), %s359_s3, 16, %s361_s23, [#allocation6]  }
  0x20   : > { %6257 = dma.done.wait (%p5709_p9), [#allocation3], 1024  }
  0x21   : > { %6259 = vsyncadd (%p5709_p9), [#allocation3], 4294966272 }
  0x22   : > { %6261 = dma.done.wait (%p5709_p9), [#allocation6], 1040  }
  0x23   : > { %6263 = vsyncadd (%p5709_p9), [#allocation6], 4294966256  ;;  %s5061_s4 = sshll.u32 %s6375_s21, 5  ;;  %v6289_v0 = vmov 0   ;;  %v5591_v22 = vld [vmem:[#allocation2 + $0x38] sm:$0xff]  ;;  %v5590_v23 = vld [vmem:[#allocation2 + $0x30] sm:$0xff]  ;;  %v544_v53 = vlaneseq }
  0x24   : > { %5760 = vset.pattern.permute.xlu2 %v6289_v0  ;;  %5759 = vset.pattern.permute.xlu1 %v6289_v0  ;;  %p462_p13 = scmp.lt.s32.totalorder %s5061_s4, 63  ;;  %v5589_v27 = vld [vmem:[#allocation2 + $0x28] sm:$0xff]  ;;  %v5588_v28 = vld [vmem:[#allocation2 + $0x20] sm:$0xff]  ;;  %v5599_v29 = vld [vmem:[#allocation5 + $0x38] sm:$0xff]  ;;  %v6290_v63 = vmov 1.0|1.0  }
  0x25   : > { %5758 = vset.pattern.permute.xlu0 %v6289_v0  ;;  %5665 = vmatpush.bf16.msra.mxu2 %v5591_v22  ;;  %v5587_v33 = vld [vmem:[#allocation2 + $0x18] sm:$0xff]  ;;  %v5598_v34 = vld [vmem:[#allocation5 + $0x30] sm:$0xff]  ;;  %v5597_v37 = vld [vmem:[#allocation5 + $0x28] sm:$0xff]  ;;  %v6492_v56 = vand.u32 127, %v544_v53  ;;  %s458_s22 = sand.u32 1, %s6274_s18   ;;  %s5664_s12 = sshll.u32 %s6375_s21, 8 }
  0x26   : > { %s9320_s4 = smov (!%p462_p13, %s5061_s4), 63  ;;  %1058 = vmatpush.bf16.msra.mxu0 %v5591_v22  ;;  %1243 = vmatpush.bf16.msra.mxu1 %v5599_v29  ;;  %v5586_v36 = vld [vmem:[#allocation2 + $0x10] sm:$0xff]  ;;  %v5585_v40 = vld [vmem:[#allocation2 + $0x8] sm:$0xff]  ;;  %v5596_v41 = vld [vmem:[#allocation5 + $0x20] sm:$0xff]  ;;  %s5060_s24 = sshll.u32 %s458_s22, 8 }
  0x27   : > { %s6441_s3 = sshll.u32 %s9320_s4, 3  ;;  %5673 = vmatpush.bf16.msra.mxu3 %v5599_v29  ;;  %v5584_v42 = vld [vmem:[#allocation2] sm:$0xff]  ;;  %v5595_v43 = vld [vmem:[#allocation5 + $0x18] sm:$0xff]  ;;  %v5594_v47 = vld [vmem:[#allocation5 + $0x10] sm:$0xff]  ;;  %s8866_s25 = scalar_lea.vmem [#allocation8], %s5060_s24 }
  0x28   : > { %s6447_s26 = scalar_lea.vmem %s9172_s1, %s6441_s3  ;;  %s6454_s16 = scalar_lea.vmem %s9171_s0, %s6441_s3  ;;  %v5593_v48 = vld [vmem:[#allocation5 + $0x8] sm:$0xff]  ;;  %v5592_v52 = vld [vmem:[#allocation5] sm:$0xff] }
  0x29   : > { %v754_v1 = vld [vmem:[%s6447_s26] sm:$0xff]  ;;  %v755_v4 = vld [vmem:[%s6447_s26 + $0x8] sm:$0xff]  ;;  %v514_v8 = vld [vmem:[%s6454_s16 + $0x10] sm:$0xff]  ;;  %5666 = vmatpush.bf16.msra.mxu2 %v5590_v23  ;;  %s6820_s14 = scalar_lea.vmem %s9173_s2, %s6441_s3  ;;  %s4929_s4 = scalar_lea.hbm %s9182_s11, %s5664_s12 }
  0x2a   : > { %787 = vperm.xlu1 %5759, %v754_v1   ;;  %v528_v2 = vld [vmem:[%s6454_s16 + $0x80] sm:$0xff]  ;;  %v529_v5 = vld [vmem:[%s6454_s16 + $0x88] sm:$0xff]  ;;  %v756_v10 = vld [vmem:[%s6447_s26 + $0x10] sm:$0xff]  ;;  %1059 = vmatpush.bf16.msra.mxu0 %v5590_v23  ;;  %s4930_s21 = sshll.u32 %s8866_s25, 4  ;;  %s4932_s19 = sshll.u32 %s4929_s4, 4  ;;  %s4931_s21 = int_to_ptr.vmem [resolvable:$true] %s4930_s21  ;;  %s4933_s19 = int_to_ptr.hbm [resolvable:$true] %s4932_s19 }
  0x2b   : > { %v512_v3 = vld [vmem:[%s6454_s16] sm:$0xff]  ;;  %595 = vperm.xlu2 %5760, %v528_v2   ;;  %v513_v6 = vld [vmem:[%s6454_s16 + $0x8] sm:$0xff]  ;;  %v757_v11 = vld [vmem:[%s6447_s26 + $0x18] sm:$0xff]  ;;  %1244 = vmatpush.bf16.msra.mxu1 %v5598_v34  ;;  %s4918_s3 = scalar_lea.sflag [#allocation4], %s458_s22  ;;  %s6226_s23 = sshra.s32 %s4933_s19, 4  ;;  %s6227_s23 = int_to_ptr.hbm [resolvable:$true] %s6226_s23 }
  0x2c   : > { %547 = vperm.xlu0 %5758, %v512_v3   ;;  %v771_v7 = vld [vmem:[%s6447_s26 + $0x88] sm:$0xff]  ;;  %v770_v9 = vld [vmem:[%s6447_s26 + $0x80] sm:$0xff]  ;;  %v515_v12 = vld [vmem:[%s6454_s16 + $0x18] sm:$0xff]  ;;  %5674 = vmatpush.bf16.msra.mxu3 %v5598_v34  ;;  %s6228_s29 = scalar_lea.hbm %s6227_s23, 256  ;;  %s6232_s30 = scalar_lea.hbm %s9182_s11, 512 }
  0x2d   : > { %v531_v13 = vld [vmem:[%s6454_s16 + $0x98] sm:$0xff]  ;;  %v772_v14 = vld [vmem:[%s6447_s26 + $0x90] sm:$0xff]  ;;  %v516_v16 = vld [vmem:[%s6454_s16 + $0x20] sm:$0xff]  ;;  %5667 = vmatpush.bf16.msra.mxu2 %v5589_v27  ;;  %p6229_p0 = scmp.ne.s32.totalorder %s6227_s23, %s6228_s29  ;;  %p6233_p3 = scmp.lt.s32.totalorder %s6227_s23, %s9182_s11 }
  0x2e   : > { %v530_v15 = vld [vmem:[%s6454_s16 + $0x90] sm:$0xff]  ;;  %v517_v17 = vld [vmem:[%s6454_s16 + $0x28] sm:$0xff]  ;;  %v773_v18 = vld [vmem:[%s6447_s26 + $0x98] sm:$0xff]  ;;  %1060 = vmatpush.bf16.msra.mxu0 %v5589_v27  ;;  %p6234_p4 = scmp.lt.s32.totalorder %s6232_s30, %s6228_s29 }
  0x2f   : > { %v759_v19 = vld [vmem:[%s6447_s26 + $0x28] sm:$0xff]  ;;  %v532_v20 = vld [vmem:[%s6454_s16 + $0xa0] sm:$0xff]  ;;  %v519_v30 = vld [vmem:[%s6454_s16 + $0x38] sm:$0xff]  ;;  %1245 = vmatpush.bf16.msra.mxu1 %v5597_v37  ;;  %p6230_p1 = pnand %p6229_p0, %p6392_p5 }
  0x30   : > { %v758_v21 = vld [vmem:[%s6447_s26 + $0x20] sm:$0xff]  ;;  %v775_v25 = vld [vmem:[%s6447_s26 + $0xa8] sm:$0xff]  ;;  %v760_v31 = vld [vmem:[%s6447_s26 + $0x30] sm:$0xff]  ;;  %5675 = vmatpush.bf16.msra.mxu3 %v5597_v37  ;;  %p6235_p7 = por %p6234_p4, %p6233_p3 }
  0x31   : > { %v774_v24 = vld [vmem:[%s6447_s26 + $0xa0] sm:$0xff]  ;;  %v533_v26 = vld [vmem:[%s6454_s16 + $0xa8] sm:$0xff]  ;;  %v518_v32 = vld [vmem:[%s6454_s16 + $0x30] sm:$0xff]  ;;  %5668 = vmatpush.bf16.msra.mxu2 %v5588_v28  ;;  %p6231_p2 = pneg %p6230_p1 }
  0x32   : > { %790 = vperm.xlu1 %5759, %v755_v4   ;;  %1061 = vmatpush.bf16.msra.mxu0 %v5588_v28  ;;  %v534_v35 = vld [vmem:[%s6454_s16 + $0xb0] sm:$0xff]  ;;  %v535_v38 = vld [vmem:[%s6454_s16 + $0xb8] sm:$0xff]  ;;  %v520_v45 = vld [vmem:[%s6454_s16 + $0x40] sm:$0xff] }
  0x33   : > { %598 = vperm.xlu2 %5760, %v529_v5   ;;  %v761_v39 = vld [vmem:[%s6447_s26 + $0x38] sm:$0xff]  ;;  %1246 = vmatpush.bf16.msra.mxu1 %v5596_v41  ;;  %v776_v46 = vld [vmem:[%s6447_s26 + $0xb0] sm:$0xff]  ;;  %v762_v49 = vld [vmem:[%s6447_s26 + $0x40] sm:$0xff]  ;;  %p6236_p8 = pnand %p6235_p7, %p6231_p2 }
  0x34   : > { %550 = vperm.xlu0 %5758, %v513_v6   ;;  %5676 = vmatpush.bf16.msra.mxu3 %v5596_v41  ;;  %v777_v44 = vld [vmem:[%s6447_s26 + $0xb8] sm:$0xff]  ;;  %v763_v50 = vld [vmem:[%s6447_s26 + $0x48] sm:$0xff]  ;;  %v778_v57 = vld [vmem:[%s6447_s26 + $0xc0] sm:$0xff] }
  0x35   : > { %5669 = vmatpush.bf16.msra.mxu2 %v5587_v33  ;;  %v521_v51 = vld [vmem:[%s6454_s16 + $0x48] sm:$0xff]  ;;  %v536_v58 = vld [vmem:[%s6454_s16 + $0xc0] sm:$0xff]  ;;  %v522_v60 = vld [vmem:[%s6454_s16 + $0x50] sm:$0xff] }
  0x36   : > { %1062 = vmatpush.bf16.msra.mxu0 %v5587_v33  ;;  %v537_v55 = vld [vmem:[%s6454_s16 + $0xc8] sm:$0xff]  ;;  %v523_v61 = vld [vmem:[%s6454_s16 + $0x58] sm:$0xff]  ;;  %v538_v2 = vld [vmem:[%s6454_s16 + $0xd0] sm:$0xff] }
  0x37   : > { %1247 = vmatpush.bf16.msra.mxu1 %v5595_v43  ;;  %v779_v62 = vld [vmem:[%s6447_s26 + $0xc8] sm:$0xff]  ;;  %v765_v1 = vld [vmem:[%s6447_s26 + $0x58] sm:$0xff]  ;;  %v764_v3 = vld [vmem:[%s6447_s26 + $0x50] sm:$0xff] }
  0x38   : > { %5677 = vmatpush.bf16.msra.mxu3 %v5595_v43  ;;  %v5317_v27 = vld [vmem:[%s9176_s5 + $0x70] sm:$0xf]  ;;  %v5615_v28 = vld [vmem:[%s9176_s5 + $0x74] sm:$0xf0]  ;;  %v782_v29 = vld [vmem:[%s6447_s26 + $0xe0] sm:$0xff] }
  0x39   : > { %5670 = vmatpush.bf16.msra.mxu2 %v5586_v36  ;;  %v768_v37 = vld [vmem:[%s6447_s26 + $0x70] sm:$0xff]  ;;  %v543_v43 = vld [vmem:[%s6454_s16 + $0xf8] sm:$0xff] }
  0x3a   : > { %838 = vperm.xlu1 %5759, %v771_v7   ;;  %1063 = vmatpush.bf16.msra.mxu0 %v5586_v36  ;;  %v780_v7 = vld [vmem:[%s6447_s26 + $0xd0] sm:$0xff] }
  0x3b   : > { %553 = vperm.xlu2 %5760, %v514_v8   ;;  %1248 = vmatpush.bf16.msra.mxu1 %v5594_v47  ;;  %v781_v8 = vld [vmem:[%s6447_s26 + $0xd8] sm:$0xff] }
  0x3c   : > { %835 = vperm.xlu0 %5758, %v770_v9   ;;  %5678 = vmatpush.bf16.msra.mxu3 %v5594_v47  ;;  %v539_v9 = vld [vmem:[%s6454_s16 + $0xd8] sm:$0xff]  ;;  %v542_v47 = vld [vmem:[%s6454_s16 + $0xf0] sm:$0xff] }
  0x3d   : > { %5671 = vmatpush.bf16.msra.mxu2 %v5585_v40 }
  0x3e   : > { %1064 = vmatpush.bf16.msra.mxu0 %v5585_v40 }
  0x3f   : > { %1249 = vmatpush.bf16.msra.mxu1 %v5593_v48 }
  0x40   : > { %5679 = vmatpush.bf16.msra.mxu3 %v5593_v48 }
  0x41   : > { %5672 = vmatpush.bf16.msra.mxu2 %v5584_v42 }
  0x42   : > { %793 = vperm.xlu1 %5759, %v756_v10   ;;  %1065 = vmatpush.bf16.msra.mxu0 %v5584_v42 }
  0x43   : > { %796 = vperm.xlu2 %5760, %v757_v11   ;;  %1250 = vmatpush.bf16.msra.mxu1 %v5592_v52 }
  0x44   : > { %556 = vperm.xlu0 %5758, %v515_v12   ;;  %5680 = vmatpush.bf16.msra.mxu3 %v5592_v52 }
  0x4a   : > { %604 = vperm.xlu1 %5759, %v531_v13   ;;  %v525_v13 = vld [vmem:[%s6454_s16 + $0x68] sm:$0xff] }
  0x4b   : > { %841 = vperm.xlu2 %5760, %v772_v14   ;;  %v766_v14 = vld [vmem:[%s6447_s26 + $0x60] sm:$0xff] }
  0x4c   : > { %601 = vperm.xlu0 %5758, %v530_v15   ;;  %v524_v15 = vld [vmem:[%s6454_s16 + $0x60] sm:$0xff] }
  0x52   : > { %559 = vperm.xlu1 %5759, %v516_v16  }
  0x53   : > { %562 = vperm.xlu2 %5760, %v517_v17  }
  0x54   : > { %844 = vperm.xlu0 %5758, %v773_v18  }
  0x5a   : > { %802 = vperm.xlu1 %5759, %v759_v19   ;;  %v540_v19 = vld [vmem:[%s6454_s16 + $0xe0] sm:$0xff] }
  0x5b   : > { %607 = vperm.xlu2 %5760, %v532_v20   ;;  %v541_v20 = vld [vmem:[%s6454_s16 + $0xe8] sm:$0xff] }
  0x5c   : > { %799 = vperm.xlu0 %5758, %v758_v21   ;;  %v767_v21 = vld [vmem:[%s6447_s26 + $0x68] sm:$0xff] }
  0x62   : > { %847 = vperm.xlu1 %5759, %v774_v24  }
  0x63   : > { %850 = vperm.xlu2 %5760, %v775_v25   ;;  %v783_v25 = vld [vmem:[%s6447_s26 + $0xe8] sm:$0xff] }
  0x64   : > { %610 = vperm.xlu0 %5758, %v533_v26   ;;  %v526_v26 = vld [vmem:[%s6454_s16 + $0x70] sm:$0xff] }
  0x6a   : > { %568 = vperm.xlu1 %5759, %v519_v30   ;;  %v5318_v30 = vor.u32 %v5615_v28, %v5317_v27 }
  0x6b   : > { %805 = vperm.xlu2 %5760, %v760_v31   ;;  %v5381_v31 = vld [vmem:[%s9176_s5 + $0xf0] sm:$0xf] }
  0x6c   : > { %565 = vperm.xlu0 %5758, %v518_v32   ;;  %v5631_v32 = vld [vmem:[%s9176_s5 + $0xf4] sm:$0xf0]  ;;  %1978 = vmatpush.bf16.msrb.mxu2 %v5318_v30 }
  0x6d   : > { %v5382_v33 = vor.u32 %v5631_v32, %v5381_v31  ;;  %v5445_v31 = vld [vmem:[%s9176_s5 + $0x170] sm:$0xf]  ;;  %v5647_v32 = vld [vmem:[%s9176_s5 + $0x174] sm:$0xf0] }
  0x6f   : > { %2067 = vmatpush.bf16.msrb.mxu3 %v5382_v33  ;;  %v5277_v33 = vld [vmem:[%s9176_s5 + $0x20] sm:$0xf] }
  0x72   : > { %613 = vperm.xlu1 %5759, %v534_v35  }
  0x73   : > { %616 = vperm.xlu2 %5760, %v535_v38   ;;  %v769_v38 = vld [vmem:[%s6447_s26 + $0x78] sm:$0xff] }
  0x74   : > { %808 = vperm.xlu0 %5758, %v761_v39   ;;  %v527_v39 = vld [vmem:[%s6454_s16 + $0x78] sm:$0xff] }
  0x7a   : > { %856 = vperm.xlu1 %5759, %v777_v44   ;;  %v784_v44 = vld [vmem:[%s6447_s26 + $0xf0] sm:$0xff] }
  0x7b   : > { %571 = vperm.xlu2 %5760, %v520_v45   ;;  %v5309_v45 = vld [vmem:[%s9176_s5 + $0x60] sm:$0xf] }
  0x7c   : > { %853 = vperm.xlu0 %5758, %v776_v46   ;;  %v5613_v46 = vld [vmem:[%s9176_s5 + $0x64] sm:$0xf0] }
  0x7d   : > { %v5310_v48 = vor.u32 %v5613_v46, %v5309_v45  ;;  %v5645_v45 = vld [vmem:[%s9176_s5 + $0x164] sm:$0xf0]  ;;  %v5612_v46 = vld [vmem:[%s9176_s5 + $0x64] sm:$0xf] }
  0x7f   : > { %1979 = vmatpush.bf16.msrb.mxu2 %v5310_v48 }
  0x82   : > { %811 = vperm.xlu1 %5759, %v762_v49   ;;  %v5373_v49 = vld [vmem:[%s9176_s5 + $0xe0] sm:$0xf] }
  0x83   : > { %814 = vperm.xlu2 %5760, %v763_v50   ;;  %v5629_v50 = vld [vmem:[%s9176_s5 + $0xe4] sm:$0xf0] }
  0x84   : > { %574 = vperm.xlu0 %5758, %v521_v51   ;;  %v5374_v51 = vor.u32 %v5629_v50, %v5373_v49  ;;  %v5311_v49 = vld [vmem:[%s9176_s5 + $0x68] sm:$0xf0] }
  0x85   : > { %v596_v54 = vpop.permute.xlu2 %595 }
  0x86   : > { %vm658_vm0 = vcmp.eq.s32.totalorder %v596_v54, %v6492_v56  ;;  %2068 = vmatpush.bf16.msrb.mxu3 %v5374_v51  ;;  %v5314_v51 = vor.u32 %v5612_v46, %v5311_v49  ;;  %v5617_v46 = vld [vmem:[%s9176_s5 + $0x84] sm:$0xf0] }
  0x8a   : > { %622 = vperm.xlu1 %5759, %v537_v55   ;;  %v785_v55 = vld [vmem:[%s6447_s26 + $0xf8] sm:$0xff] }
  0x8b   : > { %859 = vperm.xlu2 %5760, %v778_v57  }
  0x8c   : > { %619 = vperm.xlu0 %5758, %v536_v58  }
  0x8d   : > { %v599_v59 = vpop.permute.xlu2 %598 }
  0x8e   : > { %vm659_vm1 = vcmp.eq.s32.totalorder %v599_v59, %v6492_v56  ;;  %v5301_v59 = vld [vmem:[%s9176_s5 + $0x50] sm:$0xf] }
  0x8f   : > { %vm5179_vm2 = vmpackc.low %vm659_vm1, %vm658_vm0 }
  0x90   : > { %5180 = vmatmul.msk.bf16.vlgmr.msra.gmra.mxu2 %vm5179_vm2, %v6290_v63 }
  0x92   : > { %577 = vperm.xlu1 %5759, %v522_v60   ;;  %v5611_v60 = vld [vmem:[%s9176_s5 + $0x54] sm:$0xf0] }
  0x93   : > { %580 = vperm.xlu2 %5760, %v523_v61  }
  0x94   : > { %862 = vperm.xlu0 %5758, %v779_v62   ;;  %v5302_v62 = vor.u32 %v5611_v60, %v5301_v59  ;;  %v5421_v59 = vld [vmem:[%s9176_s5 + $0x140] sm:$0xf]  ;;  %v5641_v60 = vld [vmem:[%s9176_s5 + $0x144] sm:$0xf0] }
  0x95   : > { %v554_v0 = vpop.permute.xlu2 %553 }
  0x96   : > { %vm644_vm14 = vcmp.eq.s32.totalorder %v554_v0, %v6492_v56  ;;  %v5365_v0 = vld [vmem:[%s9176_s5 + $0xd0] sm:$0xf]  ;;  %1980 = vmatpush.bf16.msrb.mxu2 %v5302_v62 }
  0x9a   : > { %820 = vperm.xlu1 %5759, %v765_v1   ;;  %v5627_v1 = vld [vmem:[%s9176_s5 + $0xd4] sm:$0xf0] }
  0x9b   : > { %625 = vperm.xlu2 %5760, %v538_v2   ;;  %v5366_v2 = vor.u32 %v5627_v1, %v5365_v0  ;;  %v5422_v1 = vor.u32 %v5641_v60, %v5421_v59  ;;  %v481_v60 = vld [vmem:[%s6820_s14 + $0x8] sm:$0xff] }
  0x9c   : > { %817 = vperm.xlu0 %5758, %v764_v3   ;;  %v788_v4 = vpop.permute.xlu1 %787 }
  0x9d   : > { %v797_v5 = vpop.permute.xlu2 %796  ;;  %vm882_vm3 = vcmp.eq.s32.totalorder %v788_v4, %v6492_v56  ;;  %2069 = vmatpush.bf16.msrb.mxu3 %v5366_v2  ;;  %v5295_v2 = vld [vmem:[%s9176_s5 + $0x48] sm:$0xf0] }
  0x9e   : > { %v548_v6 = vpop.permute.xlu0 %547  ;;  %vm885_vm12 = vcmp.eq.s32.totalorder %v797_v5, %v6492_v56 }
  0x9f   : > { %vm642_vm5 = vcmp.eq.s32.totalorder %v548_v6, %v6492_v56 }
  0xa2   : > { %865 = vperm.xlu1 %5759, %v780_v7  }
  0xa3   : > { %868 = vperm.xlu2 %5760, %v781_v8   ;;  %v5293_v8 = vld [vmem:[%s9176_s5 + $0x40] sm:$0xf] }
  0xa4   : > { %628 = vperm.xlu0 %5758, %v539_v9   ;;  %v791_v10 = vpop.permute.xlu1 %790  ;;  %v5609_v9 = vld [vmem:[%s9176_s5 + $0x44] sm:$0xf0] }
  0xa5   : > { %vm883_vm4 = vcmp.eq.s32.totalorder %v791_v10, %v6492_v56  ;;  %v6510_v11 = vpop.permute.xlu2 %841  ;;  %v5294_v10 = vor.u32 %v5609_v9, %v5293_v8  ;;  %v5603_v8 = vld [vmem:[%s9176_s5 + $0x14] sm:$0xf0] }
  0xa6   : > { %v551_v12 = vpop.permute.xlu0 %550  ;;  %vm5227_vm6 = vmpackc.low %vm883_vm4, %vm882_vm3 }
  0xa7   : > { %vm643_vm7 = vcmp.eq.s32.totalorder %v551_v12, %v6492_v56  ;;  %5228 = vmatmul.msk.bf16.vlgmr.msra.gmra.mxu1 %vm5227_vm6, %v6290_v63  ;;  %v5625_v12 = vld [vmem:[%s9176_s5 + $0xc4] sm:$0xf0]  ;;  %1981 = vmatpush.bf16.msrb.mxu2 %v5294_v10  ;;  %v5606_v10 = vld [vmem:[%s9176_s5 + $0x34] sm:$0xf] }
  0xa8   : > { %vm5163_vm8 = vmpackc.low %vm643_vm7, %vm642_vm5  ;;  %vm900_vm7 = vcmp.eq.s32.totalorder %v6510_v11, %v6492_v56  ;;  %v5357_v11 = vld [vmem:[%s9176_s5 + $0xc0] sm:$0xf] }
  0xa9   : > { %5164 = vmatmul.msk.bf16.vlgmr.msra.gmra.mxu0 %vm5163_vm8, %v6290_v63 }
  0xaa   : > { %586 = vperm.xlu1 %5759, %v525_v13   ;;  %v5358_v13 = vor.u32 %v5625_v12, %v5357_v11  ;;  %v5333_v12 = vld [vmem:[%s9176_s5 + $0x90] sm:$0xf] }
  0xab   : > { %823 = vperm.xlu2 %5760, %v766_v14  }
  0xac   : > { %583 = vperm.xlu0 %5758, %v524_v15   ;;  %v839_v16 = vpop.permute.xlu1 %838  ;;  %2070 = vmatpush.bf16.msrb.mxu3 %v5358_v13  ;;  %v5619_v13 = vld [vmem:[%s9176_s5 + $0x94] sm:$0xf0] }
  0xad   : > { %vm899_vm9 = vcmp.eq.s32.totalorder %v839_v16, %v6492_v56  ;;  %v563_v17 = vpop.permute.xlu2 %562 }
  0xae   : > { %v836_v18 = vpop.permute.xlu0 %835  ;;  %vm647_vm5 = vcmp.eq.s32.totalorder %v563_v17, %v6492_v56 }
  0xaf   : > { %vm898_vm10 = vcmp.eq.s32.totalorder %v836_v18, %v6492_v56 }
  0xb0   : > { %vm5243_vm11 = vmpackc.low %vm899_vm9, %vm898_vm10 }
  0xb1   : > { %5244 = vmatmul.msk.bf16.vlgmr.msra.gmra.mxu3 %vm5243_vm11, %v6290_v63 }
  0xb2   : > { %631 = vperm.xlu1 %5759, %v540_v19  }
  0xb3   : > { %634 = vperm.xlu2 %5760, %v541_v20   ;;  %v5285_v20 = vld [vmem:[%s9176_s5 + $0x30] sm:$0xf] }
  0xb4   : > { %826 = vperm.xlu0 %5758, %v767_v21   ;;  %v794_v22 = vpop.permute.xlu1 %793  ;;  %v5607_v21 = vld [vmem:[%s9176_s5 + $0x34] sm:$0xf0] }
  0xb5   : > { %vm884_vm13 = vcmp.eq.s32.totalorder %v794_v22, %v6492_v56  ;;  %v6527_v23 = vpop.permute.xlu2 %607  ;;  %v5286_v22 = vor.u32 %v5607_v21, %v5285_v20 }
  0xb6   : > { %v557_v24 = vpop.permute.xlu0 %556  ;;  %vm5229_vm15 = vmpackc.low %vm885_vm12, %vm884_vm13 }
  0xb7   : > { %vm645_vm0 = vcmp.eq.s32.totalorder %v557_v24, %v6492_v56  ;;  %5230 = vmatmul.msk.bf16.gmra.mxu1 %vm5229_vm15, %v6290_v63  ;;  %v5623_v24 = vld [vmem:[%s9176_s5 + $0xb4] sm:$0xf0]  ;;  %1982 = vmatpush.bf16.msrb.mxu2 %v5286_v22  ;;  %v5279_v22 = vld [vmem:[%s9176_s5 + $0x28] sm:$0xf0] }
  0xb8   : > { %vm5165_vm1 = vmpackc.low %vm645_vm0, %vm644_vm14  ;;  %vm662_vm0 = vcmp.eq.s32.totalorder %v6527_v23, %v6492_v56  ;;  %v5349_v23 = vld [vmem:[%s9176_s5 + $0xb0] sm:$0xf] }
  0xb9   : > { %5166 = vmatmul.msk.bf16.gmra.mxu0 %vm5165_vm1, %v6290_v63 }
  0xba   : > { %874 = vperm.xlu1 %5759, %v783_v25   ;;  %v5350_v25 = vor.u32 %v5623_v24, %v5349_v23 }
  0xbb   : > { %589 = vperm.xlu2 %5760, %v526_v26  }
  0xbc   : > { %871 = vperm.xlu0 %5758, %v782_v29   ;;  %v605_v34 = vpop.permute.xlu1 %604  ;;  %2071 = vmatpush.bf16.msrb.mxu3 %v5350_v25 }
  0xbd   : > { %vm661_vm2 = vcmp.eq.s32.totalorder %v605_v34, %v6492_v56  ;;  %v851_v35 = vpop.permute.xlu2 %850  ;;  %v5605_v34 = vld [vmem:[%s9176_s5 + $0x24] sm:$0xf0] }
  0xbe   : > { %v602_v36 = vpop.permute.xlu0 %601  ;;  %vm903_vm14 = vcmp.eq.s32.totalorder %v851_v35, %v6492_v56  ;;  %v5446_v35 = vor.u32 %v5647_v32, %v5445_v31  ;;  %v5389_v32 = vld [vmem:[%s9176_s5 + $0x100] sm:$0xf] }
  0xbf   : > { %vm660_vm3 = vcmp.eq.s32.totalorder %v602_v36, %v6492_v56  ;;  %v5614_v36 = vld [vmem:[%s9176_s5 + $0x74] sm:$0xf] }
  0xc0   : > { %vm5181_vm4 = vmpackc.low %vm661_vm2, %vm660_vm3  ;;  %2156 = vmatpush.bf16.msrb.mxu0 %v5446_v35 }
  0xc1   : > { %5182 = vmatmul.msk.bf16.gmra.mxu2 %vm5181_vm4, %v6290_v63 }
  0xc2   : > { %829 = vperm.xlu1 %5759, %v768_v37   ;;  %v5278_v37 = vor.u32 %v5605_v34, %v5277_v33  ;;  %v5633_v33 = vld [vmem:[%s9176_s5 + $0x104] sm:$0xf0]  ;;  %v5600_v34 = vld [vmem:[%s9176_s5 + $0x4] sm:$0xf] }
  0xc3   : > { %832 = vperm.xlu2 %5760, %v769_v38   ;;  %v5341_v38 = vld [vmem:[%s9176_s5 + $0xa0] sm:$0xf] }
  0xc4   : > { %592 = vperm.xlu0 %5758, %v527_v39   ;;  %v560_v40 = vpop.permute.xlu1 %559  ;;  %v5621_v39 = vld [vmem:[%s9176_s5 + $0xa4] sm:$0xf0]  ;;  %1983 = vmatpush.bf16.msrb.mxu2 %v5278_v37  ;;  %v5263_v37 = vld [vmem:[%s9176_s5 + $0x8] sm:$0xf0] }
  0xc5   : > { %vm646_vm6 = vcmp.eq.s32.totalorder %v560_v40, %v6492_v56  ;;  %v6556_v41 = vpop.permute.xlu2 %805  ;;  %v5319_v40 = vld [vmem:[%s9176_s5 + $0x78] sm:$0xf0] }
  0xc6   : > { %v845_v42 = vpop.permute.xlu0 %844  ;;  %vm5167_vm8 = vmpackc.low %vm647_vm5, %vm646_vm6 }
  0xc7   : > { %vm901_vm9 = vcmp.eq.s32.totalorder %v845_v42, %v6492_v56  ;;  %v5342_v42 = vor.u32 %v5621_v39, %v5341_v38  ;;  %v5266_v39 = vor.u32 %v5600_v34, %v5263_v37 }
  0xc8   : > { %vm5245_vm10 = vmpackc.low %vm901_vm9, %vm900_vm7  ;;  %vm888_vm9 = vcmp.eq.s32.totalorder %v6556_v41, %v6492_v56 }
  0xc9   : > { %5168 = vmatmul.msk.bf16.gmra.mxu0 %vm5167_vm8, %v6290_v63  ;;  %5246 = vmatmul.msk.bf16.gmra.mxu3 %vm5245_vm10, %v6290_v63 }
  0xca   : > { %640 = vperm.xlu1 %5759, %v543_v43   ;;  %v5322_v43 = vor.u32 %v5614_v36, %v5319_v40  ;;  %2072 = vmatpush.bf16.msrb.mxu3 %v5342_v42  ;;  %v5390_v36 = vor.u32 %v5633_v33, %v5389_v32  ;;  %v5601_v42 = vld [vmem:[%s9176_s5 + $0x4] sm:$0xf0] }
  0xcb   : > { %877 = vperm.xlu2 %5760, %v784_v44   ;;  %v5437_v44 = vld [vmem:[%s9176_s5 + $0x160] sm:$0xf] }
  0xcc   : > { %637 = vperm.xlu0 %5758, %v542_v47   ;;  %v803_v52 = vpop.permute.xlu1 %802  ;;  %2245 = vmatpush.bf16.msrb.mxu1 %v5322_v43  ;;  %v5438_v48 = vor.u32 %v5645_v45, %v5437_v44  ;;  %v5325_v45 = vld [vmem:[%s9176_s5 + $0x80] sm:$0xf] }
  0xcd   : > { %vm887_vm11 = vcmp.eq.s32.totalorder %v803_v52, %v6492_v56  ;;  %v617_v54 = vpop.permute.xlu2 %616  ;;  %v5429_v52 = vld [vmem:[%s9176_s5 + $0x150] sm:$0xf] }
  0xce   : > { %v800_v53 = vpop.permute.xlu0 %799  ;;  %vm665_vm7 = vcmp.eq.s32.totalorder %v617_v54, %v6492_v56  ;;  %2157 = vmatpush.bf16.msrb.mxu0 %v5438_v48 }
  0xcf   : > { %vm886_vm12 = vcmp.eq.s32.totalorder %v800_v53, %v6492_v56  ;;  %v5643_v53 = vld [vmem:[%s9176_s5 + $0x154] sm:$0xf0] }
  0xd0   : > { %vm5231_vm13 = vmpackc.low %vm887_vm11, %vm886_vm12  ;;  %v5430_v54 = vor.u32 %v5643_v53, %v5429_v52  ;;  %2246 = vmatpush.bf16.msrb.mxu1 %v5314_v51 }
  0xd1   : > { %5232 = vmatmul.msk.bf16.gmra.mxu1 %vm5231_vm13, %v6290_v63 }
  0xd2   : > { %2158 = vmatpush.bf16.msrb.mxu0 %v5430_v54 }
  0xd4   : > { %880 = vperm.xlu0 %5758, %v785_v55   ;;  %v848_v57 = vpop.permute.xlu1 %847  ;;  %v5610_v55 = vld [vmem:[%s9176_s5 + $0x54] sm:$0xf] }
  0xd5   : > { %vm902_vm15 = vcmp.eq.s32.totalorder %v848_v57, %v6492_v56  ;;  %v572_v61 = vpop.permute.xlu2 %571  ;;  %v5303_v57 = vld [vmem:[%s9176_s5 + $0x58] sm:$0xf0] }
  0xd6   : > { %v611_v58 = vpop.permute.xlu0 %610  ;;  %vm5247_vm1 = vmpackc.low %vm903_vm14, %vm902_vm15  ;;  %2159 = vmatpush.bf16.msrb.mxu0 %v5422_v1 }
  0xd7   : > { %vm663_vm2 = vcmp.eq.s32.totalorder %v611_v58, %v6492_v56  ;;  %v5306_v58 = vor.u32 %v5610_v55, %v5303_v57  ;;  %v5630_v55 = vld [vmem:[%s9176_s5 + $0xf4] sm:$0xf]  ;;  %v5383_v57 = vld [vmem:[%s9176_s5 + $0xf8] sm:$0xf0] }
  0xd8   : > { %vm5183_vm3 = vmpackc.low %vm663_vm2, %vm662_vm0  ;;  %vm650_vm2 = vcmp.eq.s32.totalorder %v572_v61, %v6492_v56  ;;  %v5608_v61 = vld [vmem:[%s9176_s5 + $0x44] sm:$0xf]  ;;  %v5386_v59 = vor.u32 %v5630_v55, %v5383_v57 }
  0xd9   : > { %5184 = vmatmul.msk.bf16.gmra.mxu2 %vm5183_vm3, %v6290_v63  ;;  %5248 = vmatmul.msk.bf16.gmra.mxu3 %vm5247_vm1, %v6290_v63 }
  0xda   : > { %2247 = vmatpush.bf16.msrb.mxu1 %v5306_v58  ;;  %v480_v58 = vld [vmem:[%s6820_s14] sm:$0xff] }
  0xdc   : > { %v569_v3 = vpop.permute.xlu1 %568 }
  0xdd   : > { %vm649_vm4 = vcmp.eq.s32.totalorder %v569_v3, %v6492_v56  ;;  %v815_v5 = vpop.permute.xlu2 %814 }
  0xde   : > { %v566_v4 = vpop.permute.xlu0 %565  ;;  %vm891_vm0 = vcmp.eq.s32.totalorder %v815_v5, %v6492_v56  ;;  %v5413_v5 = vld [vmem:[%s9176_s5 + $0x130] sm:$0xf] }
  0xdf   : > { %vm648_vm5 = vcmp.eq.s32.totalorder %v566_v4, %v6492_v56  ;;  %v5298_v4 = vor.u32 %v5608_v61, %v5295_v2  ;;  %v5646_v61 = vld [vmem:[%s9176_s5 + $0x174] sm:$0xf] }
  0xe0   : > { %vm5169_vm6 = vmpackc.low %vm649_vm4, %vm648_vm5 }
  0xe1   : > { %5170 = vmatmul.msk.bf16.gmra.mxu0 %vm5169_vm6, %v6290_v63  ;;  %2248 = vmatpush.bf16.msrb.mxu1 %v5298_v4  ;;  %v1365_v4 = vpack.c.bf16 %v481_v60, %v481_v60 }
  0xe4   : > { %v614_v6 = vpop.permute.xlu1 %613 }
  0xe5   : > { %vm664_vm8 = vcmp.eq.s32.totalorder %v614_v6, %v6492_v56  ;;  %v860_v14 = vpop.permute.xlu2 %859  ;;  %v5639_v6 = vld [vmem:[%s9176_s5 + $0x134] sm:$0xf0] }
  0xe6   : > { %v809_v7 = vpop.permute.xlu0 %808  ;;  %vm5185_vm10 = vmpackc.low %vm665_vm7, %vm664_vm8  ;;  %v5414_v9 = vor.u32 %v5639_v6, %v5413_v5 }
  0xe7   : > { %vm889_vm11 = vcmp.eq.s32.totalorder %v809_v7, %v6492_v56  ;;  %v5269_v7 = vld [vmem:[%s9176_s5 + $0x10] sm:$0xf] }
  0xe8   : > { %vm5233_vm12 = vmpackc.low %vm889_vm11, %vm888_vm9  ;;  %vm906_vm11 = vcmp.eq.s32.totalorder %v860_v14, %v6492_v56  ;;  %v5270_v11 = vor.u32 %v5603_v8, %v5269_v7  ;;  %v5287_v14 = vld [vmem:[%s9176_s5 + $0x38] sm:$0xf0]  ;;  %2160 = vmatpush.bf16.msrb.mxu0 %v5414_v9  ;;  %v1621_v9 = vunpack.c.l.b16 %v1365_v4 }
  0xe9   : > { %5186 = vmatmul.msk.bf16.gmra.mxu2 %vm5185_vm10, %v6290_v63  ;;  %5234 = vmatmul.msk.bf16.gmra.mxu1 %vm5233_vm12, %v6290_v63 }
  0xea   : > { %1984 = vmatpush.bf16.msrb.mxu2 %v5270_v11 }
  0xec   : > { %v857_v15 = vpop.permute.xlu1 %856 }
  0xed   : > { %vm905_vm13 = vcmp.eq.s32.totalorder %v857_v15, %v6492_v56  ;;  %v581_v19 = vpop.permute.xlu2 %580  ;;  %v5334_v15 = vor.u32 %v5619_v13, %v5333_v12 }
  0xee   : > { %v854_v16 = vpop.permute.xlu0 %853  ;;  %vm653_vm9 = vcmp.eq.s32.totalorder %v581_v19, %v6492_v56  ;;  %v5604_v19 = vld [vmem:[%s9176_s5 + $0x24] sm:$0xf] }
  0xef   : > { %vm904_vm14 = vcmp.eq.s32.totalorder %v854_v16, %v6492_v56  ;;  %v5290_v16 = vor.u32 %v5606_v10, %v5287_v14  ;;  %2073 = vmatpush.bf16.msrb.mxu3 %v5334_v15  ;;  %v5282_v24 = vor.u32 %v5604_v19, %v5279_v22  ;;  %v483_v22 = vld [vmem:[%s6820_s14 + $0x18] sm:$0xff] }
  0xf0   : > { %vm5249_vm15 = vmpackc.low %vm905_vm13, %vm904_vm14 }
  0xf1   : > { %5250 = vmatmul.msk.bf16.gmra.mxu3 %vm5249_vm15, %v6290_v63  ;;  %2249 = vmatpush.bf16.msrb.mxu1 %v5290_v16 }
  0xf4   : > { %v812_v17 = vpop.permute.xlu1 %811 }
  0xf5   : > { %vm890_vm1 = vcmp.eq.s32.totalorder %v812_v17, %v6492_v56  ;;  %v6646_v28 = vpop.permute.xlu2 %625  ;;  %v5405_v17 = vld [vmem:[%s9176_s5 + $0x120] sm:$0xf]  ;;  %2250 = vmatpush.bf16.msrb.mxu1 %v5282_v24 }
  0xf6   : > { %v575_v18 = vpop.permute.xlu0 %574  ;;  %vm5235_vm3 = vmpackc.low %vm891_vm0, %vm890_vm1 }
  0xf7   : > { %vm651_vm4 = vcmp.eq.s32.totalorder %v575_v18, %v6492_v56  ;;  %v5637_v18 = vld [vmem:[%s9176_s5 + $0x124] sm:$0xf0] }
  0xf8   : > { %vm5171_vm5 = vmpackc.low %vm651_vm4, %vm650_vm2  ;;  %vm668_vm4 = vcmp.eq.s32.totalorder %v6646_v28, %v6492_v56  ;;  %v5406_v21 = vor.u32 %v5637_v18, %v5405_v17 }
  0xf9   : > { %5172 = vmatmul.msk.bf16.gmra.mxu0 %vm5171_vm5, %v6290_v63  ;;  %5236 = vmatmul.msk.bf16.gmra.mxu1 %vm5235_vm3, %v6290_v63 }
  0xfa   : > { %2161 = vmatpush.bf16.msrb.mxu0 %v5406_v21  ;;  %v482_v21 = vld [vmem:[%s6820_s14 + $0x10] sm:$0xff] }
  0xfb   : > { %v1366_v24 = vpack.c.bf16 %v482_v21, %v482_v21 }
  0xfc   : > { %v623_v26 = vpop.permute.xlu1 %622 }
  0xfd   : > { %vm667_vm6 = vcmp.eq.s32.totalorder %v623_v26, %v6492_v56  ;;  %v869_v41 = vpop.permute.xlu2 %868  ;;  %v5397_v26 = vld [vmem:[%s9176_s5 + $0x110] sm:$0xf] }
  0xfe   : > { %v620_v27 = vpop.permute.xlu0 %619  ;;  %vm909_vm2 = vcmp.eq.s32.totalorder %v869_v41, %v6492_v56  ;;  %v5261_v41 = vld [vmem:[%s9176_s5] sm:$0xf] }
  0xff   : > { %vm666_vm7 = vcmp.eq.s32.totalorder %v620_v27, %v6492_v56  ;;  %v5635_v27 = vld [vmem:[%s9176_s5 + $0x114] sm:$0xf0]  ;;  %v5262_v44 = vor.u32 %v5601_v42, %v5261_v41  ;;  %v5628_v42 = vld [vmem:[%s9176_s5 + $0xe4] sm:$0xf] }
 0x100   : > { %vm5187_vm8 = vmpackc.low %vm667_vm6, %vm666_vm7  ;;  %v5398_v28 = vor.u32 %v5635_v27, %v5397_v26 }
 0x101   : > { %5188 = vmatmul.msk.bf16.gmra.mxu2 %vm5187_vm8, %v6290_v63 }
 0x102   : > { %2162 = vmatpush.bf16.msrb.mxu0 %v5398_v28  ;;  %1985 = vmatpush.bf16.msrb.mxu2 %v5262_v44  ;;  %v484_v44 = vld [vmem:[%s6820_s14 + $0x20] sm:$0xff] }
 0x104   : > { %v578_v29 = vpop.permute.xlu1 %577 }
 0x105   : > { %vm652_vm10 = vcmp.eq.s32.totalorder %v578_v29, %v6492_v56  ;;  %v6715_v62 = vpop.permute.xlu2 %823  ;;  %v5602_v29 = vld [vmem:[%s9176_s5 + $0x14] sm:$0xf] }
 0x106   : > { %v863_v30 = vpop.permute.xlu0 %862  ;;  %vm5173_vm12 = vmpackc.low %vm653_vm9, %vm652_vm10  ;;  %2163 = vmatpush.bf16.msrb.mxu0 %v5390_v36  ;;  %2334 = vmatpush.bf16.msra.mxu2 %v5386_v59 }
 0x107   : > { %vm907_vm13 = vcmp.eq.s32.totalorder %v863_v30, %v6492_v56  ;;  %v5271_v30 = vld [vmem:[%s9176_s5 + $0x18] sm:$0xf0] }
 0x108   : > { %vm5251_vm14 = vmpackc.low %vm907_vm13, %vm906_vm11  ;;  %v5274_v31 = vor.u32 %v5602_v29, %v5271_v30  ;;  %v1622_v30 = vunpack.c.l.b16 %v1366_v24 }
 0x109   : > { %5174 = vmatmul.msk.bf16.gmra.mxu0 %vm5173_vm12, %v6290_v63  ;;  %5252 = vmatmul.msk.bf16.gmra.mxu3 %vm5251_vm14, %v6290_v63  ;;  %vm894_vm14 = vcmp.eq.s32.totalorder %v6715_v62, %v6492_v56  ;;  %v5447_v62 = vld [vmem:[%s9176_s5 + $0x178] sm:$0xf0] }
 0x10a   : > { %2251 = vmatpush.bf16.msrb.mxu1 %v5274_v31 }
 0x10c   : > { %v821_v47 = vpop.permute.xlu1 %820 }
 0x10d   : > { %vm893_vm15 = vcmp.eq.s32.totalorder %v821_v47, %v6492_v56  ;;  %v635_v25 = vpop.permute.xlu2 %634  ;;  %v5326_v47 = vor.u32 %v5617_v46, %v5325_v45 }
 0x10e   : > { %v818_v50 = vpop.permute.xlu0 %817  ;;  %vm671_vm11 = vcmp.eq.s32.totalorder %v635_v25, %v6492_v56  ;;  %2252 = vmatpush.bf16.msrb.mxu1 %v5266_v39  ;;  %v1367_v25 = vpack.c.bf16 %v483_v22, %v483_v22 }
 0x10f   : > { %vm892_vm0 = vcmp.eq.s32.totalorder %v818_v50, %v6492_v56  ;;  %2074 = vmatpush.bf16.msrb.mxu3 %v5326_v47  ;;  %v485_v47 = vld [vmem:[%s6820_s14 + $0x28] sm:$0xff] }
 0x110   : > { %vm5237_vm1 = vmpackc.low %vm893_vm15, %vm892_vm0 }
 0x111   : > { %5238 = vmatmul.msk.bf16.gmra.mxu1 %vm5237_vm1, %v6290_v63 }
 0x113   : > { %v6843_v10 = vpop.f32.mrf.mxu2 }
 0x114   : > { %v866_v0 = vpop.permute.xlu1 %865 }
 0x115   : > { %vm908_vm3 = vcmp.eq.s32.totalorder %v866_v0, %v6492_v56  ;;  %v590_v40 = vpop.permute.xlu2 %589  ;;  %v5450_v0 = vor.u32 %v5646_v61, %v5447_v62 }
 0x116   : > { %v629_v3 = vpop.permute.xlu0 %628  ;;  %vm5253_vm5 = vmpackc.low %vm909_vm2, %vm908_vm3 }
 0x117   : > { %vm669_vm6 = vcmp.eq.s32.totalorder %v629_v3, %v6492_v56  ;;  %v1364_v3 = vpack.c.bf16 %v480_v58, %v480_v58  ;;  %2423 = vmatpush.bf16.msra.mxu3 %v5450_v0 }
 0x118   : > { %vm5189_vm7 = vmpackc.low %vm669_vm6, %vm668_vm4 }
 0x119   : > { %5190 = vmatmul.msk.bf16.gmra.mxu2 %vm5189_vm7, %v6290_v63  ;;  %5254 = vmatmul.msk.bf16.gmra.mxu3 %vm5253_vm5, %v6290_v63  ;;  %vm656_vm7 = vcmp.eq.s32.totalorder %v590_v40, %v6492_v56  ;;  %v1620_v8 = vunpack.c.l.b16 %v1364_v3 }
 0x11b   : > { %v6847_v15 = vpack.c.b16 %v1621_v9, %v1620_v8 }
 0x11c   : > { %v587_v20 = vpop.permute.xlu1 %586 }
 0x11d   : > { %vm655_vm8 = vcmp.eq.s32.totalorder %v587_v20, %v6492_v56  ;;  %v833_v50 = vpop.permute.xlu2 %832 }
 0x11e   : > { %v584_v23 = vpop.permute.xlu0 %583  ;;  %vm897_vm4 = vcmp.eq.s32.totalorder %v833_v50, %v6492_v56 }
 0x11f   : > { %vm654_vm9 = vcmp.eq.s32.totalorder %v584_v23, %v6492_v56  ;;  %v6855_v23 = vpop.f32.mrf.mxu2 }
 0x120   : > { %vm5175_vm10 = vmpackc.low %vm655_vm8, %vm654_vm9 }
 0x121   : > { %5176 = vmatmul.msk.bf16.gmra.mxu0 %vm5175_vm10, %v6290_v63 }
 0x124   : > { %v632_v35 = vpop.permute.xlu1 %631  ;;  %v6812_v52 = vpop.f32.mrf.mxu1 }
 0x125   : > { %vm670_vm12 = vcmp.eq.s32.totalorder %v632_v35, %v6492_v56  ;;  %v878_v12 = vpop.permute.xlu2 %877 }
 0x126   : > { %vm5191_vm13 = vmpackc.low %vm671_vm11, %vm670_vm12  ;;  %v827_v38 = vpop.permute.xlu0 %826  ;;  %v1067_v43 = vpop.f32.mrf.mxu0 }
 0x127   : > { %vm895_vm15 = vcmp.eq.s32.totalorder %v827_v38, %v6492_v56  ;;  %v1147_v11 = vpack.c.bf16 %v1067_v43, %v1067_v43  ;;  %v5375_v43 = vld [vmem:[%s9176_s5 + $0xe8] sm:$0xf0] }
 0x128   : > { %vm5239_vm0 = vmpackc.low %vm895_vm15, %vm894_vm14  ;;  %v5378_v45 = vor.u32 %v5628_v42, %v5375_v43  ;;  %v5367_v42 = vld [vmem:[%s9176_s5 + $0xd8] sm:$0xf0]  ;;  %v488_v43 = vld [vmem:[%s6820_s14 + $0x40] sm:$0xff] }
 0x129   : > { %5192 = vmatmul.msk.bf16.gmra.mxu2 %vm5191_vm13, %v6290_v63  ;;  %5240 = vmatmul.msk.bf16.gmra.mxu1 %vm5239_vm0, %v6290_v63  ;;  %v1428_v16 = vunpack.c.l.b16 %v1147_v11  ;;  %vm912_vm13 = vcmp.eq.s32.totalorder %v878_v12, %v6492_v56  ;;  %v486_v12 = vld [vmem:[%s6820_s14 + $0x30] sm:$0xff] }
 0x12a   : > { %2335 = vmatpush.bf16.msra.mxu2 %v5378_v45 }
 0x12c   : > { %v875_v48 = vpop.permute.xlu1 %874  ;;  %v1254_v5 = vpop.f32.mrf.mxu1 }
 0x12d   : > { %vm911_vm1 = vcmp.eq.s32.totalorder %v875_v48, %v6492_v56  ;;  %v1333_v27 = vpack.c.bf16 %v1254_v5, %v1254_v5  ;;  %v5644_v48 = vld [vmem:[%s9176_s5 + $0x164] sm:$0xf] }
 0x12e   : > { %v872_v49 = vpop.permute.xlu0 %871  ;;  %v1069_v51 = vpop.f32.mrf.mxu0 }
 0x12f   : > { %vm910_vm2 = vcmp.eq.s32.totalorder %v872_v49, %v6492_v56  ;;  %v1148_v7 = vpack.c.bf16 %v1069_v51, %v1069_v51  ;;  %v1525_v33 = vunpack.c.l.b16 %v1333_v27  ;;  %v5439_v49 = vld [vmem:[%s9176_s5 + $0x168] sm:$0xf0] }
 0x130   : > { %vm5255_vm3 = vmpackc.low %vm911_vm1, %vm910_vm2  ;;  %v5442_v51 = vor.u32 %v5644_v48, %v5439_v49  ;;  %v5431_v48 = vld [vmem:[%s9176_s5 + $0x158] sm:$0xf0] }
 0x131   : > { %5256 = vmatmul.msk.bf16.gmra.mxu3 %vm5255_vm3, %v6290_v63  ;;  %v1429_v13 = vunpack.c.l.b16 %v1148_v7 }
 0x132   : > { %2424 = vmatpush.bf16.msra.mxu3 %v5442_v51 }
 0x133   : > { %v1460_v20 = vpack.c.b16 %v1429_v13, %v1428_v16  ;;  %v487_v13 = vld [vmem:[%s6820_s14 + $0x38] sm:$0xff] }
 0x134   : > { %v830_v53 = vpop.permute.xlu1 %829  ;;  %v6845_v14 = vpop.f32.mrf.mxu3 }
 0x135   : > { %vm896_vm5 = vcmp.eq.s32.totalorder %v830_v53, %v6492_v56  ;;  %v1257_v19 = vpop.f32.mrf.mxu1  ;;  %v1369_v53 = vpack.c.bf16 %v485_v47, %v485_v47  ;;  %v5642_v47 = vld [vmem:[%s9176_s5 + $0x154] sm:$0xf] }
 0x136   : > { %vm5241_vm6 = vmpackc.low %vm897_vm4, %vm896_vm5  ;;  %v593_v54 = vpop.permute.xlu0 %592  ;;  %v1072_v2 = vpop.f32.mrf.mxu0  ;;  %v1334_v59 = vpack.c.bf16 %v1257_v19, %v1257_v19  ;;  %v1371_v19 = vpack.c.bf16 %v487_v13, %v487_v13  ;;  %v5434_v49 = vor.u32 %v5642_v47, %v5431_v48 }
 0x137   : > { %vm657_vm8 = vcmp.eq.s32.totalorder %v593_v54, %v6492_v56  ;;  %v1149_v31 = vpack.c.bf16 %v1072_v2, %v1072_v2  ;;  %v1625_v61 = vunpack.c.l.b16 %v1369_v53 }
 0x138   : > { %vm5177_vm9 = vmpackc.low %vm657_vm8, %vm656_vm7  ;;  %v1526_v4 = vunpack.c.l.b16 %v1334_v59  ;;  %v1627_v27 = vunpack.c.l.b16 %v1371_v19  ;;  %2425 = vmatpush.bf16.msra.mxu3 %v5434_v49  ;;  %v490_v19 = vld [vmem:[%s6820_s14 + $0x50] sm:$0xff] }
 0x139   : > { %5178 = vmatmul.msk.bf16.gmra.mxu0 %vm5177_vm9, %v6290_v63  ;;  %5242 = vmatmul.msk.bf16.gmra.mxu1 %vm5241_vm6, %v6290_v63  ;;  %v1430_v38 = vunpack.c.l.b16 %v1149_v31 }
 0x13c   : > { %v641_v1 = vpop.permute.xlu1 %640  ;;  %v6857_v26 = vpop.f32.mrf.mxu3 }
 0x13d   : > { %vm673_vm10 = vcmp.eq.s32.totalorder %v641_v1, %v6492_v56  ;;  %v1259_v32 = vpop.f32.mrf.mxu1 }
 0x13e   : > { %v638_v6 = vpop.permute.xlu0 %637  ;;  %v1074_v18 = vpop.f32.mrf.mxu0  ;;  %v1335_v55 = vpack.c.bf16 %v1259_v32, %v1259_v32 }
 0x13f   : > { %vm672_vm11 = vcmp.eq.s32.totalorder %v638_v6, %v6492_v56  ;;  %v1150_v28 = vpack.c.bf16 %v1074_v18, %v1074_v18  ;;  %v1370_v18 = vpack.c.bf16 %v486_v12, %v486_v12 }
 0x140   : > { %vm5193_vm12 = vmpackc.low %vm673_vm10, %vm672_vm11  ;;  %v1527_v0 = vunpack.c.l.b16 %v1335_v55 }
 0x141   : > { %5194 = vmatmul.msk.bf16.gmra.mxu2 %vm5193_vm12, %v6290_v63  ;;  %v1431_v34 = vunpack.c.l.b16 %v1150_v28 }
 0x142   : > { %v6893_v8 = vpack.c.b16 %v1527_v0, %v1526_v4 }
 0x143   : > { %v1461_v41 = vpack.c.b16 %v1431_v34, %v1430_v38 }
 0x144   : > { %v6861_v35 = vpop.f32.mrf.mxu2 }
 0x146   : > { %v881_v17 = vpop.permute.xlu0 %880  ;;  %v1077_v29 = vpop.f32.mrf.mxu0 }
 0x147   : > { %vm913_vm14 = vcmp.eq.s32.totalorder %v881_v17, %v6492_v56  ;;  %v1332_v56 = vpack.c.bf16 %v6812_v52, %v6812_v52  ;;  %v1368_v52 = vpack.c.bf16 %v484_v44, %v484_v44  ;;  %v1151_v62 = vpack.c.bf16 %v1077_v29, %v1077_v29 }
 0x148   : > { %vm5257_vm15 = vmpackc.low %vm913_vm14, %vm912_vm13 }
 0x149   : > { %5258 = vmatmul.msk.bf16.gmra.mxu3 %vm5257_vm15, %v6290_v63  ;;  %2164 = vmatmul.bf16.vlgmr.msrb.gmra.mxu0 %v6847_v15  ;;  %v1623_v63 = vunpack.c.l.b16 %v1367_v25  ;;  %v1524_v36 = vunpack.c.l.b16 %v1332_v56  ;;  %v1624_v60 = vunpack.c.l.b16 %v1368_v52  ;;  %v1432_v6 = vunpack.c.l.b16 %v1151_v62 }
 0x14a   : > { %2253 = vmatmul.bf16.vlgmr.msrb.gmra.mxu1 %v1460_v20  ;;  %v1626_v25 = vunpack.c.l.b16 %v1370_v18  ;;  %v1372_v52 = vpack.c.bf16 %v488_v43, %v488_v43 }
 0x14b   : > { %v6863_v37 = vpack.c.b16 %v1623_v63, %v1622_v30  ;;  %v6867_v40 = vpack.c.b16 %v1525_v33, %v1524_v36  ;;  %v6889_v5 = vpack.c.b16 %v1625_v61, %v1624_v60 }
 0x14c   : > { %v6865_v39 = vpop.f32.mrf.mxu3  ;;  %v6885_v54 = vpop.f32.mrf.mxu2  ;;  %v6905_v32 = vpack.c.b16 %v1627_v27, %v1626_v25  ;;  %v1628_v61 = vunpack.c.l.b16 %v1372_v52  ;;  %v1374_v25 = vpack.c.bf16 %v490_v19, %v490_v19  ;;  %v5624_v52 = vld [vmem:[%s9176_s5 + $0xc4] sm:$0xf] }
 0x14e   : > { %v1262_v46 = vpop.f32.mrf.mxu1  ;;  %v1079_v50 = vpop.f32.mrf.mxu0 }
 0x14f   : > { %v1152_v57 = vpack.c.bf16 %v1079_v50, %v1079_v50  ;;  %v1336_v24 = vpack.c.bf16 %v1262_v46, %v1262_v46  ;;  %v489_v46 = vld [vmem:[%s6820_s14 + $0x48] sm:$0xff] }
 0x150   : > { %v1373_v53 = vpack.c.bf16 %v489_v46, %v489_v46 }
 0x151   : > { %1986 = vmatmul.bf16.vlgmr.msrb.gmra.mxu2 %v1460_v20  ;;  %v1433_v2 = vunpack.c.l.b16 %v1152_v57  ;;  %v1528_v63 = vunpack.c.l.b16 %v1336_v24 }
 0x152   : > { %v1629_v62 = vunpack.c.l.b16 %v1373_v53  ;;  %v5359_v53 = vld [vmem:[%s9176_s5 + $0xc8] sm:$0xf0] }
 0x153   : > { %v1462_v9 = vpack.c.b16 %v1433_v2, %v1432_v6 }
 0x154   : > { %v6887_v58 = vpop.f32.mrf.mxu3 }
 0x156   : > { %v1264_v3 = vpop.f32.mrf.mxu1 }
 0x157   : > { %v1337_v20 = vpack.c.bf16 %v1264_v3, %v1264_v3 }
 0x159   : > { %2075 = vmatmul.bf16.vlgmr.msrb.gmra.mxu3 %v6867_v40  ;;  %2169 = vmatmul.bf16.gmra.mxu0 %v6863_v37  ;;  %v1529_v56 = vunpack.c.l.b16 %v1337_v20  ;;  %v491_v20 = vld [vmem:[%s6820_s14 + $0x58] sm:$0xff] }
 0x15a   : > { %2258 = vmatmul.bf16.gmra.mxu1 %v1461_v41  ;;  %v1375_v27 = vpack.c.bf16 %v491_v20, %v491_v20 }
 0x15b   : > { %v6907_v36 = vpack.c.b16 %v1529_v56, %v1528_v63 }
 0x15c   : > { %v6891_v7 = vpop.f32.mrf.mxu2  ;;  %v6897_v11 = vpop.f32.mrf.mxu3 }
 0x15e   : > { %v1082_v1 = vpop.f32.mrf.mxu0 }
 0x15f   : > { %v1153_v28 = vpack.c.bf16 %v1082_v1, %v1082_v1 }
 0x161   : > { %1991 = vmatmul.bf16.gmra.mxu2 %v1461_v41  ;;  %v1434_v33 = vunpack.c.l.b16 %v1153_v28  ;;  %v5626_v41 = vld [vmem:[%s9176_s5 + $0xd4] sm:$0xf] }
 0x162   : > { %v5370_v44 = vor.u32 %v5626_v41, %v5367_v42 }
 0x164   : > { %v6901_v21 = vpop.f32.mrf.mxu2  ;;  %v6903_v29 = vpop.f32.mrf.mxu3  ;;  %2336 = vmatpush.bf16.msra.mxu2 %v5370_v44 }
 0x166   : > { %v1267_v16 = vpop.f32.mrf.mxu1  ;;  %v1084_v17 = vpop.f32.mrf.mxu0 }
 0x167   : > { %v1154_v22 = vpack.c.bf16 %v1084_v17, %v1084_v17  ;;  %v1338_v60 = vpack.c.bf16 %v1267_v16, %v1267_v16 }
 0x169   : > { %2080 = vmatmul.bf16.gmra.mxu3 %v6893_v8  ;;  %2174 = vmatmul.bf16.gmra.mxu0 %v6889_v5  ;;  %v1435_v30 = vunpack.c.l.b16 %v1154_v22  ;;  %v1530_v4 = vunpack.c.l.b16 %v1338_v60  ;;  %v5362_v60 = vor.u32 %v5624_v52, %v5359_v53 }
 0x16a   : > { %2263 = vmatmul.bf16.gmra.mxu1 %v1462_v9 }
 0x16b   : > { %v1463_v38 = vpack.c.b16 %v1435_v30, %v1434_v33  ;;  %v1631_v33 = vunpack.c.l.b16 %v1375_v27  ;;  %2337 = vmatpush.bf16.msra.mxu2 %v5362_v60 }
 0x16c   : > { %v6918_v45 = vpop.f32.mrf.mxu2 }
 0x16e   : > { %v1269_v34 = vpop.f32.mrf.mxu1 }
 0x16f   : > { %v1339_v55 = vpack.c.bf16 %v1269_v34, %v1269_v34 }
 0x171   : > { %1996 = vmatmul.bf16.gmra.mxu2 %v1462_v9  ;;  %v1531_v1 = vunpack.c.l.b16 %v1339_v55  ;;  %v6931_v9 = vpack.c.b16 %v1629_v62, %v1628_v61  ;;  %v5640_v55 = vld [vmem:[%s9176_s5 + $0x144] sm:$0xf]  ;;  %v5423_v61 = vld [vmem:[%s9176_s5 + $0x148] sm:$0xf0] }
 0x172   : > { %v5426_v62 = vor.u32 %v5640_v55, %v5423_v61 }
 0x173   : > { %v6935_v17 = vpack.c.b16 %v1531_v1, %v1530_v4 }
 0x174   : > { %v6927_v50 = vpop.f32.mrf.mxu3  ;;  %v6929_v2 = vpop.f32.mrf.mxu2  ;;  %2426 = vmatpush.bf16.msra.mxu3 %v5426_v62 }
 0x176   : > { %v1087_v31 = vpop.f32.mrf.mxu0  ;;  %v1272_v57 = vpop.f32.mrf.mxu1 }
 0x177   : > { %v1155_v0 = vpack.c.bf16 %v1087_v31, %v1087_v31  ;;  %v1340_v63 = vpack.c.bf16 %v1272_v57, %v1272_v57  ;;  %v1630_v31 = vunpack.c.l.b16 %v1374_v25  ;;  %v492_v57 = vld [vmem:[%s6820_s14 + $0x60] sm:$0xff] }
 0x179   : > { %2085 = vmatmul.bf16.gmra.mxu3 %v6907_v36  ;;  %2179 = vmatmul.bf16.gmra.mxu0 %v6905_v32  ;;  %v1436_v12 = vunpack.c.l.b16 %v1155_v0  ;;  %v1532_v43 = vunpack.c.l.b16 %v1340_v63  ;;  %v6945_v44 = vpack.c.b16 %v1631_v33, %v1630_v31 }
 0x17a   : > { %2268 = vmatmul.bf16.gmra.mxu1 %v1463_v38 }
 0x17c   : > { %v6933_v13 = vpop.f32.mrf.mxu3 }
 0x17e   : > { %v1089_v51 = vpop.f32.mrf.mxu0  ;;  %v1274_v18 = vpop.f32.mrf.mxu1 }
 0x17f   : > { %v1156_v59 = vpack.c.bf16 %v1089_v51, %v1089_v51  ;;  %v1341_v56 = vpack.c.bf16 %v1274_v18, %v1274_v18 }
 0x181   : > { %2001 = vmatmul.bf16.gmra.mxu2 %v1463_v38  ;;  %v1437_v3 = vunpack.c.l.b16 %v1156_v59  ;;  %v1533_v41 = vunpack.c.l.b16 %v1341_v56  ;;  %v493_v59 = vld [vmem:[%s6820_s14 + $0x68] sm:$0xff] }
 0x182   : > { %v1377_v4 = vpack.c.bf16 %v493_v59, %v493_v59 }
 0x183   : > { %v1464_v16 = vpack.c.b16 %v1437_v3, %v1436_v12  ;;  %v6949_v48 = vpack.c.b16 %v1533_v41, %v1532_v43  ;;  %v1376_v3 = vpack.c.bf16 %v492_v57, %v492_v57  ;;  %v494_v43 = vld [vmem:[%s6820_s14 + $0x70] sm:$0xff] }
 0x184   : > { %v6941_v22 = vpop.f32.mrf.mxu2  ;;  %v1633_v19 = vunpack.c.l.b16 %v1377_v4  ;;  %v1378_v52 = vpack.c.bf16 %v494_v43, %v494_v43 }
 0x185   : > { %v1632_v18 = vunpack.c.l.b16 %v1376_v3 }
 0x186   : > { %v1092_v6 = vpop.f32.mrf.mxu0  ;;  %v1634_v60 = vunpack.c.l.b16 %v1378_v52 }
 0x187   : > { %v1157_v34 = vpack.c.bf16 %v1092_v6, %v1092_v6 }
 0x189   : > { %2090 = vmatmul.bf16.gmra.mxu3 %v6935_v17  ;;  %2184 = vmatmul.bf16.gmra.mxu0 %v6931_v9  ;;  %v1438_v46 = vunpack.c.l.b16 %v1157_v34 }
 0x18a   : > { %2273 = vmatmul.bf16.gmra.mxu1 %v1464_v16 }
 0x18c   : > { %v6943_v28 = vpop.f32.mrf.mxu3  ;;  %v6947_v47 = vpop.f32.mrf.mxu2 }
 0x18e   : > { %v1094_v24 = vpop.f32.mrf.mxu0  ;;  %v1277_v38 = vpop.f32.mrf.mxu1 }
 0x18f   : > { %v1158_v30 = vpack.c.bf16 %v1094_v24, %v1094_v24 }
 0x191   : > { %2006 = vmatmul.bf16.gmra.mxu2 %v1464_v16  ;;  %v1439_v42 = vunpack.c.l.b16 %v1158_v30  ;;  %v1342_v16 = vpack.c.bf16 %v1277_v38, %v1277_v38  ;;  %v6973_v30 = vpack.c.b16 %v1633_v19, %v1632_v18  ;;  %v496_v19 = vld [vmem:[%s6820_s14 + $0x80] sm:$0xff] }
 0x193   : > { %v1465_v51 = vpack.c.b16 %v1439_v42, %v1438_v46  ;;  %v1534_v27 = vunpack.c.l.b16 %v1342_v16  ;;  %9212 = vst [vmem:[#allocation15_spill] sm:$0xff] %v6973_v30  ;;  %v495_v46 = vld [vmem:[%s6820_s14 + $0x78] sm:$0xff] }
 0x194   : > { %v6951_v49 = vpop.f32.mrf.mxu3  ;;  %v1379_v53 = vpack.c.bf16 %v495_v46, %v495_v46  ;;  %v1380_v46 = vpack.c.bf16 %v496_v19, %v496_v19 }
 0x196   : > { %v1279_v0 = vpop.f32.mrf.mxu1  ;;  %v1635_v61 = vunpack.c.l.b16 %v1379_v53 }
 0x197   : > { %v1343_v12 = vpack.c.bf16 %v1279_v0, %v1279_v0 }
 0x198   : > { %v6987_v4 = vpack.c.b16 %v1635_v61, %v1634_v60 }
 0x199   : > { %2095 = vmatmul.bf16.gmra.mxu3 %v6949_v48  ;;  %2189 = vmatmul.bf16.gmra.mxu0 %v6945_v44  ;;  %v1535_v24 = vunpack.c.l.b16 %v1343_v12 }
 0x19a   : > { %2278 = vmatmul.bf16.gmra.mxu1 %v1465_v51  ;;  %9213 = vst [vmem:[#allocation16_spill] sm:$0xff] %v6987_v4 }
 0x19b   : > { %v6975_v33 = vpack.c.b16 %v1535_v24, %v1534_v27  ;;  %v5622_v24 = vld [vmem:[%s9176_s5 + $0xb4] sm:$0xf]  ;;  %v497_v27 = vld [vmem:[%s6820_s14 + $0x88] sm:$0xff] }
 0x19c   : > { %v6969_v6 = vpop.f32.mrf.mxu2  ;;  %v6971_v20 = vpop.f32.mrf.mxu3  ;;  %v1381_v52 = vpack.c.bf16 %v497_v27, %v497_v27 }
 0x19e   : > { %v1097_v1 = vpop.f32.mrf.mxu0 }
 0x19f   : > { %v1159_v25 = vpack.c.bf16 %v1097_v1, %v1097_v1 }
 0x1a1   : > { %2011 = vmatmul.bf16.gmra.mxu2 %v1465_v51  ;;  %v1440_v34 = vunpack.c.l.b16 %v1159_v25  ;;  %v5351_v25 = vld [vmem:[%s9176_s5 + $0xb8] sm:$0xf0] }
 0x1a4   : > { %v6977_v41 = vpop.f32.mrf.mxu2  ;;  %v6983_v51 = vpop.f32.mrf.mxu3 }
 0x1a6   : > { %v1099_v56 = vpop.f32.mrf.mxu0  ;;  %v1282_v31 = vpop.f32.mrf.mxu1 }
 0x1a7   : > { %v1160_v63 = vpack.c.bf16 %v1099_v56, %v1099_v56  ;;  %v1344_v59 = vpack.c.bf16 %v1282_v31, %v1282_v31  ;;  %v5354_v56 = vor.u32 %v5622_v24, %v5351_v25  ;;  %v5415_v31 = vld [vmem:[%s9176_s5 + $0x138] sm:$0xf0]  ;;  %v1636_v24 = vunpack.c.l.b16 %v1380_v46  ;;  %v498_v46 = vld [vmem:[%s6820_s14 + $0x90] sm:$0xff] }
 0x1a8   : > { %v1637_v25 = vunpack.c.l.b16 %v1381_v52  ;;  %v499_v52 = vld [vmem:[%s6820_s14 + $0x98] sm:$0xff] }
 0x1a9   : > { %v1441_v38 = vunpack.c.l.b16 %v1160_v63  ;;  %2100 = vmatmul.bf16.gmra.mxu3 %v6975_v33  ;;  %2194 = vmatmul.bf16.gmra.mxu0 %v6973_v30  ;;  %v1536_v3 = vunpack.c.l.b16 %v1344_v59  ;;  %v5638_v63 = vld [vmem:[%s9176_s5 + $0x134] sm:$0xf] }
 0x1aa   : > { %2338 = vmatpush.bf16.msra.mxu2 %v5354_v56 }
 0x1ab   : > { %v1466_v42 = vpack.c.b16 %v1441_v38, %v1440_v34  ;;  %v5418_v34 = vor.u32 %v5638_v63, %v5415_v31 }
 0x1ac   : > { %v6985_v62 = vpop.f32.mrf.mxu2 }
 0x1ad   : > { %2283 = vmatmul.bf16.gmra.mxu1 %v1466_v42  ;;  %2427 = vmatpush.bf16.msra.mxu3 %v5418_v34  ;;  %v7011_v34 = vpack.c.b16 %v1637_v25, %v1636_v24  ;;  %v1349_v25 = vpack.c.bf16 %v6857_v26, %v6857_v26 }
 0x1ae   : > { %v1284_v55 = vpop.f32.mrf.mxu1 }
 0x1af   : > { %v1345_v57 = vpack.c.bf16 %v1284_v55, %v1284_v55  ;;  %9214 = vst [vmem:[#allocation17_spill] sm:$0xff] %v7011_v34 }
 0x1b1   : > { %2016 = vmatmul.bf16.gmra.mxu2 %v1466_v42  ;;  %v1537_v0 = vunpack.c.l.b16 %v1345_v57 }
 0x1b3   : > { %v6989_v18 = vpack.c.b16 %v1537_v0, %v1536_v3 }
 0x1b4   : > { %v1322_v1 = vpop.f32.mrf.mxu3  ;;  %v7007_v42 = vpop.f32.mrf.mxu2 }
 0x1b5   : > { %v1360_v38 = vpack.c.bf16 %v1322_v1, %v1322_v1 }
 0x1b6   : > { %v1102_v12 = vpop.f32.mrf.mxu0  ;;  %v1287_v16 = vpop.f32.mrf.mxu1 }
 0x1b7   : > { %v1161_v53 = vpack.c.bf16 %v1102_v12, %v1102_v12  ;;  %v1552_v60 = vunpack.c.l.b16 %v1360_v38  ;;  %v1346_v1 = vpack.c.bf16 %v1287_v16, %v1287_v16  ;;  %v1163_v16 = vpack.c.bf16 %v6843_v10, %v6843_v10 }
 0x1b8   : > { %v1348_v10 = vpack.c.bf16 %v6845_v14, %v6845_v14  ;;  %v1732_v14 = vld [vmem:[%s9177_s6] sm:$0x3] }
 0x1b9   : > { %2105 = vmatmul.bf16.gmra.mxu3 %v6989_v18  ;;  %2199 = vmatmul.bf16.gmra.mxu0 %v6987_v4  ;;  %v1442_v4 = vunpack.c.l.b16 %v1161_v53  ;;  %v1538_v12 = vunpack.c.l.b16 %v1346_v1 }
 0x1bc   : > { %v1324_v43 = vpop.f32.mrf.mxu3 }
 0x1bd   : > { %v1361_v55 = vpack.c.bf16 %v1324_v43, %v1324_v43 }
 0x1be   : > { %v1104_v57 = vpop.f32.mrf.mxu0  ;;  %v1289_v59 = vpop.f32.mrf.mxu1 }
 0x1bf   : > { %v1553_v61 = vunpack.c.l.b16 %v1361_v55  ;;  %v1162_v0 = vpack.c.bf16 %v1104_v57, %v1104_v57  ;;  %v1347_v3 = vpack.c.bf16 %v1289_v59, %v1289_v59 }
 0x1c1   : > { %v1443_v56 = vunpack.c.l.b16 %v1162_v0  ;;  %v7009_v63 = vpack.c.b16 %v1553_v61, %v1552_v60  ;;  %v1539_v19 = vunpack.c.l.b16 %v1347_v3  ;;  %v1382_v60 = vpack.c.bf16 %v498_v46, %v498_v46 }
 0x1c2   : > { %v1383_v61 = vpack.c.bf16 %v499_v52, %v499_v52  ;;  %v1444_v0 = vunpack.c.l.b16 %v1163_v16  ;;  %v1540_v52 = vunpack.c.l.b16 %v1348_v10  ;;  %v1165_v10 = vpack.c.bf16 %v6861_v35, %v6861_v35 }
 0x1c3   : > { %v1467_v27 = vpack.c.b16 %v1443_v56, %v1442_v4  ;;  %v7013_v43 = vpack.c.b16 %v1539_v19, %v1538_v12  ;;  %v1164_v4 = vpack.c.bf16 %v6855_v23, %v6855_v23  ;;  %v1638_v19 = vunpack.c.l.b16 %v1382_v60 }
 0x1c4   : > { %v1142_v31 = vpop.f32.mrf.mxu2 }
 0x1c5   : > { %2021 = vmatmul.bf16.gmra.mxu2 %v1467_v27  ;;  %2288 = vmatmul.bf16.gmra.mxu1 %v1467_v27  ;;  %9215 = vst [vmem:[#allocation18_spill] sm:$0xff] %v7013_v43  ;;  %v1177_v53 = vpack.c.bf16 %v1142_v31, %v1142_v31  ;;  %v1445_v24 = vunpack.c.l.b16 %v1164_v4  ;;  %v1639_v27 = vunpack.c.l.b16 %v1383_v61  ;;  %v1541_v31 = vunpack.c.l.b16 %v1349_v25  ;;  %v501_v25 = vld [vmem:[%s6820_s14 + $0xa8] sm:$0xff] }
 0x1c6   : > { %v2165_v38 = vpop.f32.mrf.mxu0  ;;  %v7034_v61 = vperm.slane %v1732_v14, 0 }
 0x1c7   : > { %v1458_v1 = vunpack.c.l.b16 %v1177_v53  ;;  %v7029_v26 = vpack.c.b16 %v1639_v27, %v1638_v19 }
 0x1c9   : > { %2110 = vmatmul.bf16.gmra.mxu3 %v7013_v43  ;;  %2204 = vmatmul.bf16.gmra.mxu0 %v7011_v34  ;;  %9216 = vst [vmem:[#allocation19_spill] sm:$0xff] %v7029_v26 }
 0x1cc   : > { %v1144_v55 = vpop.f32.mrf.mxu2  ;;  %v1327_v57 = vpop.f32.mrf.mxu3 }
 0x1cd   : > { %v1178_v59 = vpack.c.bf16 %v1144_v55, %v1144_v55  ;;  %v1362_v12 = vpack.c.bf16 %v1327_v57, %v1327_v57  ;;  %v1468_v55 = vpack.c.b16 %v1445_v24, %v1444_v0  ;;  %v7036_v57 = vpack.c.b16 %v1541_v31, %v1540_v52  ;;  %v500_v24 = vld [vmem:[%s6820_s14 + $0xa0] sm:$0xff] }
 0x1ce   : > { %v2167_v3 = vpop.f32.mrf.mxu0 }
 0x1cf   : > { %v1459_v56 = vunpack.c.l.b16 %v1178_v59  ;;  %v1554_v59 = vunpack.c.l.b16 %v1362_v12  ;;  %9217 = vst [vmem:[#allocation20_spill] sm:$0xff] %v7036_v57  ;;  %v1384_v12 = vpack.c.bf16 %v500_v24, %v500_v24 }
 0x1d1   : > { %v7027_v23 = vpack.c.b16 %v1459_v56, %v1458_v1  ;;  %v1166_v1 = vpack.c.bf16 %v6885_v54, %v6885_v54  ;;  %v1350_v54 = vpack.c.bf16 %v6865_v39, %v6865_v39  ;;  %v1640_v35 = vunpack.c.l.b16 %v1384_v12 }
 0x1d3   : > { %v1447_v52 = vunpack.c.l.b16 %v1166_v1 }
 0x1d4   : > { %v1329_v46 = vpop.f32.mrf.mxu3  ;;  %v1987_v16 = vpop.f32.mrf.mxu2 }
 0x1d5   : > { %v1363_v4 = vpack.c.bf16 %v1329_v46, %v1329_v46  ;;  %2026 = vmatmul.bf16.gmra.mxu2 %v1468_v55  ;;  %2293 = vmatmul.bf16.gmra.mxu1 %v1468_v55  ;;  %v1988_v56 = vadd.f32 %v1987_v16, %v7034_v61  ;;  %v1385_v55 = vpack.c.bf16 %v501_v25, %v501_v25 }
 0x1d6   : > { %v2170_v53 = vpop.f32.mrf.mxu0 }
 0x1d7   : > { %v1555_v60 = vunpack.c.l.b16 %v1363_v4  ;;  %v1351_v4 = vpack.c.bf16 %v6887_v58, %v6887_v58  ;;  %v1542_v58 = vunpack.c.l.b16 %v1350_v54 }
 0x1d9   : > { %2115 = vmatmul.bf16.gmra.mxu3 %v7036_v57  ;;  %2209 = vmatmul.bf16.gmra.mxu0 %v7029_v26  ;;  %v7040_v0 = vpack.c.b16 %v1555_v60, %v1554_v59  ;;  %v1446_v59 = vunpack.c.l.b16 %v1165_v10  ;;  %v1641_v60 = vunpack.c.l.b16 %v1385_v55  ;;  %v1543_v26 = vunpack.c.l.b16 %v1351_v4  ;;  %v503_v4 = vld [vmem:[%s6820_s14 + $0xb8] sm:$0xff] }
 0x1db   : > { %v1469_v25 = vpack.c.b16 %v1447_v52, %v1446_v59  ;;  %v7059_v10 = vpack.c.b16 %v1641_v60, %v1640_v35  ;;  %v502_v52 = vld [vmem:[%s6820_s14 + $0xb0] sm:$0xff]  ;;  %v1168_v59 = vpack.c.bf16 %v6901_v21, %v6901_v21 }
 0x1dc   : > { %v1989_v19 = vpop.f32.mrf.mxu2  ;;  %v2076_v27 = vpop.f32.mrf.mxu3  ;;  %v1386_v60 = vpack.c.bf16 %v502_v52, %v502_v52 }
 0x1dd   : > { %v2077_v31 = vadd.f32 %v2076_v27, %v1988_v56  ;;  %v1990_v24 = vadd.f32 %v1989_v19, %v7034_v61  ;;  %9218 = vst [vmem:[#allocation21_spill] sm:$0xff] %v7059_v10 }
 0x1de   : > { %v7049_v46 = vpop.f32.mrf.mxu0 }
 0x1df   : > { %v7053_v14 = vadd.f32 %v2165_v38, %v2077_v31  ;;  %v7065_v31 = vpack.c.b16 %v1543_v26, %v1542_v58  ;;  %v1449_v58 = vunpack.c.l.b16 %v1168_v59 }
 0x1e1   : > { %v5451_v16 = vmul.f32 -1.442695, %v7053_v14  ;;  %9219 = vst [vmem:[#allocation22_spill] sm:$0xff] %v7065_v31 }
 0x1e3   : > { %5764 = vpow2.f32 %v5451_v16  ;;  %v1167_v16 = vpack.c.bf16 %v6891_v7, %v6891_v7 }
 0x1e4   : > { %v1992_v1 = vpop.f32.mrf.mxu2  ;;  %v2078_v56 = vpop.f32.mrf.mxu3 }
 0x1e5   : > { %v2079_v38 = vadd.f32 %v2078_v56, %v1990_v24  ;;  %2031 = vmatmul.bf16.gmra.mxu2 %v1469_v25  ;;  %2298 = vmatmul.bf16.gmra.mxu1 %v1469_v25  ;;  %v1993_v54 = vadd.f32 %v1992_v1, %v7034_v61  ;;  %v1387_v24 = vpack.c.bf16 %v503_v4, %v503_v4 }
 0x1e6   : > { %v7061_v39 = vpop.f32.mrf.mxu0  ;;  %v1353_v25 = vpack.c.bf16 %v6903_v29, %v6903_v29  ;;  %v1352_v1 = vpack.c.bf16 %v6897_v11, %v6897_v11 }
 0x1e7   : > { %v7063_v27 = vadd.f32 %v2167_v3, %v2079_v38  ;;  %v1643_v7 = vunpack.c.l.b16 %v1387_v24  ;;  %v5620_v24 = vld [vmem:[%s9176_s5 + $0xa4] sm:$0xf] }
 0x1e8   : > { %v1545_v52 = vunpack.c.l.b16 %v1353_v25  ;;  %v5343_v25 = vld [vmem:[%s9176_s5 + $0xa8] sm:$0xf0] }
 0x1e9   : > { %v5765_v12 = vpop.eup %5764  ;;  %v5453_v19 = vmul.f32 -1.442695, %v7063_v27  ;;  %2120 = vmatmul.bf16.gmra.mxu3 %v7065_v31  ;;  %2214 = vmatmul.bf16.gmra.mxu0 %v7059_v10  ;;  %v1642_v10 = vunpack.c.l.b16 %v1386_v60 }
 0x1ea   : > { %v7070_v55 = vadd.f32 1.0, %v5765_v12  ;;  %v1448_v12 = vunpack.c.l.b16 %v1167_v16  ;;  %v1544_v16 = vunpack.c.l.b16 %v1352_v1  ;;  %v1170_v1 = vpack.c.bf16 %v6929_v2, %v6929_v2 }
 0x1eb   : > { %5766 = vpow2.f32 %v5453_v19 }
 0x1ec   : > { %5768 = vrcp.f32 %v7070_v55  ;;  %v1994_v3 = vpop.f32.mrf.mxu2  ;;  %v2081_v26 = vpop.f32.mrf.mxu3  ;;  %v1470_v59 = vpack.c.b16 %v1449_v58, %v1448_v12  ;;  %v1169_v58 = vpack.c.bf16 %v6918_v45, %v6918_v45  ;;  %v5346_v12 = vor.u32 %v5620_v24, %v5343_v25 }
 0x1ed   : > { %v2082_v35 = vadd.f32 %v2081_v26, %v1993_v54  ;;  %v7121_v45 = vpack.c.b16 %v1545_v52, %v1544_v16  ;;  %v1451_v31 = vunpack.c.l.b16 %v1170_v1  ;;  %vm2773_vm1 = vweird.f32 %v7070_v55 }
 0x1ee   : > { %v7082_v56 = vpop.f32.mrf.mxu0  ;;  %2339 = vmatpush.bf16.msra.mxu2 %v5346_v12  ;;  %v1450_v25 = vunpack.c.l.b16 %v1169_v58 }
 0x1ef   : > { %v7084_v21 = vadd.f32 %v2170_v53, %v2082_v35  ;;  %v1995_v53 = vadd.f32 %v1994_v3, %v7034_v61  ;;  %v7103_v3 = vpack.c.b16 %v1643_v7, %v1642_v10  ;;  %9221 = vst [vmem:[#allocation24_spill] sm:$0xff] %v7121_v45 }
 0x1f0   : > { %v1471_v57 = vpack.c.b16 %v1451_v31, %v1450_v25 }
 0x1f1   : > { %v5767_v38 = vpop.eup %5766  ;;  %v5455_v19 = vmul.f32 -1.442695, %v7084_v21  ;;  %9220 = vst [vmem:[#allocation23_spill] sm:$0xff] %v7103_v3 }
 0x1f2   : > { %v7089_v54 = vpop.eup %5768  ;;  %v7091_v4 = vadd.f32 1.0, %v5767_v38 }
 0x1f3   : > { %v2769_v29 = vmul.f32 %v7089_v54, %v7070_v55  ;;  %5770 = vpow2.f32 %v5455_v19  ;;  %v5636_v19 = vld [vmem:[%s9176_s5 + $0x124] sm:$0xf]  ;;  %vm2774_vm0 = vweird.f32 %v7089_v54 }
 0x1f4   : > { %5772 = vrcp.f32 %v7091_v4  ;;  %v1997_v11 = vpop.f32.mrf.mxu2  ;;  %v2083_v26 = vpop.f32.mrf.mxu3  ;;  %vm7144_vm2 = vmor %vm2773_vm1, %vm2774_vm0  ;;  %vm2803_vm5 = vweird.f32 %v7091_v4 }
 0x1f5   : > { %v2770_v35 = vsub.f32 1.0, %v2769_v29  ;;  %v2084_v60 = vadd.f32 %v2083_v26, %v1995_v53  ;;  %2036 = vmatmul.bf16.gmra.mxu2 %v1470_v59  ;;  %2303 = vmatmul.bf16.gmra.mxu1 %v1470_v59  ;;  %v5407_v29 = vld [vmem:[%s9176_s5 + $0x128] sm:$0xf0]  ;;  %v504_v26 = vld [vmem:[%s6820_s14 + $0xc0] sm:$0xff] }
 0x1f6   : > { %v7109_v38 = vpop.f32.mrf.mxu0  ;;  %v5410_v2 = vor.u32 %v5636_v19, %v5407_v29  ;;  %v1388_v1 = vpack.c.bf16 %v504_v26, %v504_v26  ;;  %v2777_v19 = vand.u32 2147483647, %v7070_v55 }
 0x1f7   : > { %v2771_v10 = vmul.f32 %v7089_v54, %v2770_v35  ;;  %v7119_v7 = vadd.f32 %v7049_v46, %v2084_v60  ;;  %v505_v46 = vld [vmem:[%s6820_s14 + $0xc8] sm:$0xff]  ;;  %v2779_v35 = vand.u32 2147483648, %v7070_v55  ;;  %v1998_v60 = vadd.f32 %v1997_v11, %v7034_v61  ;;  %v7151_v55 = vpop.f32.mrf.mxu1 }
 0x1f8   : > { %2428 = vmatpush.bf16.msra.mxu3 %v5410_v2  ;;  %v1354_v2 = vpack.c.bf16 %v6927_v50, %v6927_v50  ;;  %v2809_v11 = vand.u32 2147483648, %v7091_v4  ;;  %9224 = vst [vmem:[#allocation25_spill] sm:$0xff] %v7151_v55  ;;  %v1644_v43 = vunpack.c.l.b16 %v1388_v1  ;;  %vm2778_vm4 = vcmp.eq.f32.partialorder %v2777_v19, 8.507059e+37 }
 0x1f9   : > { %v5771_v53 = vpop.eup %5770  ;;  %v5457_v59 = vmul.f32 -1.442695, %v7119_v7  ;;  %2125 = vmatmul.bf16.gmra.mxu3 %v7121_v45  ;;  %2219 = vmatmul.bf16.gmra.mxu0 %v7103_v3  ;;  %v2772_v52 = vadd.f32 %v7089_v54, %v2771_v10  ;;  %v1389_v10 = vpack.c.bf16 %v505_v46, %v505_v46 }
 0x1fa   : > { %v5773_v24 = vpop.eup %5772  ;;  %v7127_v34 = vadd.f32 1.0, %v5771_v53  ;;  %v1355_v53 = vpack.c.bf16 %v6933_v13, %v6933_v13  ;;  %v2807_v13 = vand.u32 2147483647, %v7091_v4  ;;  %v1546_v25 = vunpack.c.l.b16 %v1354_v2 }
 0x1fb   : > { %v2799_v16 = vmul.f32 %v5773_v24, %v7091_v4  ;;  %5774 = vpow2.f32 %v5457_v59  ;;  %v2776_v50 = vsel %vm7144_vm2, %v7089_v54, %v2772_v52  ;;  %vm2804_vm3 = vweird.f32 %v5773_v24 }
 0x1fc   : > { %5776 = vrcp.f32 %v7127_v34  ;;  %v1999_v12 = vpop.f32.mrf.mxu2  ;;  %v2086_v58 = vpop.f32.mrf.mxu3  ;;  %vm2805_vm6 = vmor %vm2803_vm5, %vm2804_vm3  ;;  %v2810_v54 = vor.u32 1.1754944e-38, %v2809_v11  ;;  %vm2808_vm7 = vcmp.eq.f32.partialorder %v2807_v13, 8.507059e+37  ;;  %v1171_v2 = vpack.c.bf16 %v6941_v22, %v6941_v22  ;;  %v506_v13 = vld [vmem:[%s6820_s14 + $0xd0] sm:$0xff] }
 0x1fd   : > { %v2800_v29 = vsub.f32 1.0, %v2799_v16  ;;  %v2087_v26 = vadd.f32 %v2086_v58, %v1998_v60  ;;  %v2780_v16 = vor.u32 1.1754944e-38, %v2779_v35  ;;  %v1645_v58 = vunpack.c.l.b16 %v1389_v10 }
 0x1fe   : > { %v7149_v3 = vpop.f32.mrf.mxu0  ;;  %v2000_v4 = vadd.f32 %v1999_v12, %v7034_v61  ;;  %vm2833_vm10 = vweird.f32 %v7127_v34 }
 0x1ff   : > { %v2801_v46 = vmul.f32 %v5773_v24, %v2800_v29  ;;  %v7158_v45 = vadd.f32 %v7061_v39, %v2087_v26  ;;  %v2781_v59 = vsel %vm2778_vm4, %v2780_v16, %v2776_v50  ;;  %v1547_v29 = vunpack.c.l.b16 %v1355_v53  ;;  %v507_v16 = vld [vmem:[%s6820_s14 + $0xd8] sm:$0xff] }
 0x200   : > { %v7171_v11 = vmul.f32 %v2781_v59, %v7053_v14  ;;  %v5655_v14 = vld [vmem:[%s9178_s7 + $0x38] sm:$0xff] }
 0x201   : > { %v5775_v30 = vpop.eup %5774  ;;  %v2802_v60 = vadd.f32 %v5773_v24, %v2801_v46  ;;  %v5459_v35 = vmul.f32 -1.442695, %v7158_v45  ;;  %v7192_v22 = vpack.c.b16 %v1547_v29, %v1546_v25  ;;  %3956 = vmatpush.bf16.msra.mxu0 %v5655_v14  ;;  %v7197_v46 = vpop.f32.mrf.mxu1 }
 0x202   : > { %v7161_v55 = vpop.eup %5776  ;;  %v7163_v52 = vadd.f32 1.0, %v5775_v30 }
 0x203   : > { %v2806_v39 = vsel %vm2805_vm6, %v5773_v24, %v2802_v60  ;;  %v2829_v31 = vmul.f32 %v7161_v55, %v7127_v34  ;;  %v7176_v24 = vpack.c.b16 %v1645_v58, %v1644_v43  ;;  %v1172_v43 = vpack.c.bf16 %v6947_v47, %v6947_v47  ;;  %9226 = vst [vmem:[#allocation27_spill] sm:$0xff] %v7192_v22 }
 0x204   : > { %v2811_v1 = vsel %vm2808_vm7, %v2810_v54, %v2806_v39  ;;  %5778 = vrcp.f32 %v7163_v52  ;;  %v2002_v19 = vpop.f32.mrf.mxu2  ;;  %v2088_v10 = vpop.f32.mrf.mxu3  ;;  %v1452_v47 = vunpack.c.l.b16 %v1171_v2  ;;  %v1357_v2 = vpack.c.bf16 %v6951_v49, %v6951_v49 }
 0x205   : > { %v7174_v30 = vmul.f32 %v2811_v1, %v7063_v27  ;;  %5780 = vpow2.f32 %v5459_v35  ;;  %2041 = vmatmul.bf16.gmra.mxu2 %v1471_v57  ;;  %2308 = vmatmul.bf16.gmra.mxu1 %v1471_v57  ;;  %9225 = vst [vmem:[#allocation26_spill] sm:$0xff] %v7176_v24  ;;  %v2830_v53 = vsub.f32 1.0, %v2829_v31  ;;  %v2089_v12 = vadd.f32 %v2088_v10, %v2000_v4  ;;  %v5663_v27 = vld [vmem:[%s9178_s7 + $0x78] sm:$0xff] }
 0x206   : > { %v7183_v26 = vpop.f32.mrf.mxu0  ;;  %4045 = vmatpush.bf16.msra.mxu1 %v5663_v27  ;;  %v1453_v35 = vunpack.c.l.b16 %v1172_v43  ;;  %v2003_v39 = vadd.f32 %v2002_v19, %v7034_v61  ;;  %v1390_v4 = vpack.c.bf16 %v506_v13, %v506_v13  ;;  %v1391_v10 = vpack.c.bf16 %v507_v16, %v507_v16  ;;  %v5654_v16 = vld [vmem:[%s9178_s7 + $0x30] sm:$0xff] }
 0x207   : > { %v7195_v50 = vadd.f32 %v7082_v56, %v2089_v12  ;;  %v2831_v58 = vmul.f32 %v7161_v55, %v2830_v53  ;;  %v1356_v56 = vpack.c.bf16 %v6943_v28, %v6943_v28  ;;  %v2839_v53 = vand.u32 2147483648, %v7127_v34  ;;  %3957 = vmatpush.bf16.msra.mxu0 %v5654_v16 }
 0x208   : > { %vm2834_vm8 = vweird.f32 %v7161_v55  ;;  %v2869_v19 = vand.u32 2147483648, %v7163_v52  ;;  %v2867_v13 = vand.u32 2147483647, %v7163_v52  ;;  %vm2863_vm12 = vweird.f32 %v7163_v52 }
 0x209   : > { %2130 = vmatmul.bf16.gmra.mxu3 %v7192_v22  ;;  %2224 = vmatmul.bf16.gmra.mxu0 %v7176_v24  ;;  %v5461_v59 = vmul.f32 -1.442695, %v7195_v50  ;;  %v2832_v28 = vadd.f32 %v7161_v55, %v2831_v58  ;;  %v2837_v58 = vand.u32 2147483647, %v7127_v34  ;;  %vm7229_vm11 = vmor %vm2833_vm10, %vm2834_vm8  ;;  %v2840_v34 = vor.u32 1.1754944e-38, %v2839_v53 }
 0x20a   : > { %v5779_v60 = vpop.eup %5778  ;;  %vm2868_vm14 = vcmp.eq.f32.partialorder %v2867_v13, 8.507059e+37  ;;  %v1173_v16 = vpack.c.bf16 %v6969_v6, %v6969_v6 }
 0x20b   : > { %v5781_v54 = vpop.eup %5780  ;;  %v2859_v29 = vmul.f32 %v5779_v60, %v7163_v52  ;;  %5782 = vpow2.f32 %v5461_v59  ;;  %vm2864_vm9 = vweird.f32 %v5779_v60  ;;  %v1646_v59 = vunpack.c.l.b16 %v1390_v4  ;;  %v5653_v52 = vld [vmem:[%s9178_s7 + $0x28] sm:$0xff] }
 0x20c   : > { %v7209_v31 = vadd.f32 1.0, %v5781_v54  ;;  %v2004_v25 = vpop.f32.mrf.mxu2  ;;  %v2091_v1 = vpop.f32.mrf.mxu3  ;;  %v1647_v54 = vunpack.c.l.b16 %v1391_v10  ;;  %v2836_v57 = vsel %vm7229_vm11, %v7161_v55, %v2832_v28  ;;  %vm2865_vm13 = vmor %vm2863_vm12, %vm2864_vm9  ;;  %v2870_v4 = vor.u32 1.1754944e-38, %v2869_v19  ;;  %3958 = vmatpush.bf16.msra.mxu0 %v5653_v52 }
 0x20d   : > { %v2860_v12 = vsub.f32 1.0, %v2859_v29  ;;  %v2092_v14 = vadd.f32 %v2091_v1, %v2003_v39  ;;  %v1472_v1 = vpack.c.b16 %v1453_v35, %v1452_v47  ;;  %v7239_v10 = vpop.f32.mrf.mxu1  ;;  %v1548_v35 = vunpack.c.l.b16 %v1356_v56 }
 0x20e   : > { %5784 = vrcp.f32 %v7209_v31  ;;  %v7218_v27 = vpop.f32.mrf.mxu0  ;;  %vm2838_vm15 = vcmp.eq.f32.partialorder %v2837_v58, 8.507059e+37  ;;  %v7248_v28 = vpack.c.b16 %v1647_v54, %v1646_v59  ;;  %v2005_v13 = vadd.f32 %v2004_v25, %v7034_v61  ;;  %v5618_v25 = vld [vmem:[%s9176_s5 + $0x94] sm:$0xf]  ;;  %v5335_v54 = vld [vmem:[%s9176_s5 + $0x98] sm:$0xf0] }
 0x20f   : > { %v2861_v43 = vmul.f32 %v5779_v60, %v2860_v12  ;;  %v7222_v49 = vadd.f32 %v7109_v38, %v2092_v14  ;;  %v1549_v14 = vunpack.c.l.b16 %v1357_v2  ;;  %v2841_v19 = vsel %vm2838_vm15, %v2840_v34, %v2836_v57 }
 0x210   : > { %9229 = vst [vmem:[#allocation28_spill] sm:$0xff] %v7248_v28  ;;  %v1174_v57 = vpack.c.bf16 %v6977_v41, %v6977_v41  ;;  %v7275_v41 = vmul.f32 %v2841_v19, %v7084_v21  ;;  %v5338_v29 = vor.u32 %v5618_v25, %v5335_v54  ;;  %v1454_v34 = vunpack.c.l.b16 %v1173_v16 }
 0x211   : > { %v2862_v39 = vadd.f32 %v5779_v60, %v2861_v43  ;;  %v5463_v38 = vmul.f32 -1.442695, %v7222_v49  ;;  %v5783_v12 = vpop.eup %5782  ;;  %v7269_v6 = vpack.c.b16 %v1549_v14, %v1548_v35  ;;  %v508_v35 = vld [vmem:[%s6820_s14 + $0xe0] sm:$0xff]  ;;  %v2899_v54 = vand.u32 2147483648, %v7209_v31 }
 0x212   : > { %v7241_v43 = vadd.f32 1.0, %v5783_v12  ;;  %2340 = vmatpush.bf16.msra.mxu2 %v5338_v29  ;;  %v1455_v19 = vunpack.c.l.b16 %v1174_v57  ;;  %vm2893_vm1 = vweird.f32 %v7209_v31 }
 0x213   : > { %v2866_v24 = vsel %vm2865_vm13, %v5779_v60, %v2862_v39  ;;  %5786 = vpow2.f32 %v5463_v38  ;;  %9230 = vst [vmem:[#allocation29_spill] sm:$0xff] %v7269_v6  ;;  %v5634_v39 = vld [vmem:[%s9176_s5 + $0x114] sm:$0xf]  ;;  %v5399_v38 = vld [vmem:[%s9176_s5 + $0x118] sm:$0xf0] }
 0x214   : > { %v7246_v47 = vpop.eup %5784  ;;  %v2871_v55 = vsel %vm2868_vm14, %v2870_v4, %v2866_v24  ;;  %v2007_v2 = vpop.f32.mrf.mxu2  ;;  %5788 = vrcp.f32 %v7241_v43  ;;  %v5402_v21 = vor.u32 %v5634_v39, %v5399_v38  ;;  %v1358_v4 = vpack.c.bf16 %v6971_v20, %v6971_v20  ;;  %v5651_v20 = vld [vmem:[%s9178_s7 + $0x18] sm:$0xff] }
 0x215   : > { %v2093_v53 = vpop.f32.mrf.mxu3  ;;  %v2889_v60 = vmul.f32 %v7246_v47, %v7209_v31  ;;  %2046 = vmatmul.bf16.gmra.mxu2 %v1472_v1  ;;  %2313 = vmatmul.bf16.gmra.mxu1 %v1472_v1  ;;  %v7257_v56 = vmul.f32 %v2871_v55, %v7119_v7  ;;  %v5652_v7 = vld [vmem:[%s9178_s7 + $0x20] sm:$0xff]  ;;  %v509_v55 = vld [vmem:[%s6820_s14 + $0xe8] sm:$0xff]  ;;  %vm2894_vm0 = vweird.f32 %v7246_v47  ;;  %v2008_v57 = vadd.f32 %v2007_v2, %v7034_v61 }
 0x216   : > { %v7259_v24 = vpop.f32.mrf.mxu0  ;;  %v2094_v59 = vadd.f32 %v2093_v53, %v2005_v13  ;;  %3959 = vmatpush.bf16.msra.mxu0 %v5652_v7  ;;  %2429 = vmatpush.bf16.msra.mxu3 %v5402_v21  ;;  %v1392_v7 = vpack.c.bf16 %v508_v35, %v508_v35  ;;  %v1393_v29 = vpack.c.bf16 %v509_v55, %v509_v55  ;;  %v2897_v39 = vand.u32 2147483647, %v7209_v31  ;;  %vm7317_vm2 = vmor %vm2893_vm1, %vm2894_vm0  ;;  %v5650_v31 = vld [vmem:[%s9178_s7 + $0x10] sm:$0xff] }
 0x217   : > { %v2890_v58 = vsub.f32 1.0, %v2889_v60  ;;  %v1359_v60 = vpack.c.bf16 %v6983_v51, %v6983_v51  ;;  %v7308_v51 = vpop.f32.mrf.mxu1  ;;  %v1550_v21 = vunpack.c.l.b16 %v1358_v4  ;;  %v2927_v35 = vand.u32 2147483647, %v7241_v43 }
 0x218   : > { %v7285_v14 = vadd.f32 %v7149_v3, %v2094_v59  ;;  %v2929_v55 = vand.u32 2147483648, %v7241_v43  ;;  %vm2898_vm4 = vcmp.eq.f32.partialorder %v2897_v39, 8.507059e+37  ;;  %vm2923_vm5 = vweird.f32 %v7241_v43 }
 0x219   : > { %v5787_v1 = vpop.eup %5786  ;;  %v2891_v12 = vmul.f32 %v7246_v47, %v2890_v58  ;;  %2135 = vmatmul.bf16.gmra.mxu3 %v7269_v6  ;;  %2229 = vmatmul.bf16.gmra.mxu0 %v7248_v28  ;;  %v1551_v2 = vunpack.c.l.b16 %v1359_v60  ;;  %vm2928_vm7 = vcmp.eq.f32.partialorder %v2927_v35, 8.507059e+37 }
 0x21a   : > { %v7291_v52 = vadd.f32 1.0, %v5787_v1  ;;  %v5789_v3 = vpop.eup %5788  ;;  %v5465_v13 = vmul.f32 -1.442695, %v7285_v14  ;;  %3960 = vmatpush.bf16.msra.mxu0 %v5651_v20  ;;  %v2900_v20 = vor.u32 1.1754944e-38, %v2899_v54 }
 0x21b   : > { %v2892_v16 = vadd.f32 %v7246_v47, %v2891_v12  ;;  %v2919_v58 = vmul.f32 %v5789_v3, %v7241_v43  ;;  %vm2924_vm3 = vweird.f32 %v5789_v3 }
 0x21c   : > { %5790 = vrcp.f32 %v7291_v52  ;;  %v2009_v59 = vpop.f32.mrf.mxu2  ;;  %vm2925_vm6 = vmor %vm2923_vm5, %vm2924_vm3  ;;  %vm2953_vm9 = vweird.f32 %v7291_v52 }
 0x21d   : > { %v2096_v25 = vpop.f32.mrf.mxu3  ;;  %5792 = vpow2.f32 %v5465_v13  ;;  %v2920_v38 = vsub.f32 1.0, %v2919_v58  ;;  %v2896_v13 = vsel %vm7317_vm2, %v7246_v47, %v2892_v16  ;;  %v1473_v58 = vpack.c.b16 %v1455_v19, %v1454_v34  ;;  %v5649_v19 = vld [vmem:[%s9178_s7 + $0x8] sm:$0xff] }
 0x21e   : > { %v2097_v1 = vadd.f32 %v2096_v25, %v2008_v57  ;;  %v7313_v12 = vpop.f32.mrf.mxu0  ;;  %v1648_v57 = vunpack.c.l.b16 %v1392_v7  ;;  %v1649_v25 = vunpack.c.l.b16 %v1393_v29  ;;  %3961 = vmatpush.bf16.msra.mxu0 %v5650_v31  ;;  %v2901_v47 = vsel %vm2898_vm4, %v2900_v20, %v2896_v13 }
 0x21f   : > { %v2921_v4 = vmul.f32 %v5789_v3, %v2920_v38  ;;  %v2930_v16 = vor.u32 1.1754944e-38, %v2929_v55  ;;  %v2010_v34 = vadd.f32 %v2009_v59, %v7034_v61  ;;  %v5662_v59 = vld [vmem:[%s9178_s7 + $0x70] sm:$0xff]  ;;  %v7358_v35 = vpop.f32.mrf.mxu1  ;;  %v7363_v13 = vpack.c.b16 %v1551_v2, %v1550_v21 }
 0x220   : > { %v7330_v60 = vadd.f32 %v7183_v26, %v2097_v1  ;;  %v7347_v55 = vpack.c.b16 %v1649_v25, %v1648_v57  ;;  %4046 = vmatpush.bf16.msra.mxu1 %v5662_v59  ;;  %v1175_v21 = vpack.c.bf16 %v6985_v62, %v6985_v62  ;;  %v1176_v2 = vpack.c.bf16 %v7007_v42, %v7007_v42 }
 0x221   : > { %v2922_v6 = vadd.f32 %v5789_v3, %v2921_v4 }
 0x222   : > { %v7332_v28 = vpop.eup %5790  ;;  %v5467_v22 = vmul.f32 -1.442695, %v7330_v60  ;;  %3962 = vmatpush.bf16.msra.mxu0 %v5649_v19 }
 0x223   : > { %v5793_v53 = vpop.eup %5792  ;;  %v2949_v26 = vmul.f32 %v7332_v28, %v7291_v52  ;;  %v2926_v54 = vsel %vm2925_vm6, %v5789_v3, %v2922_v6  ;;  %v7350_v6 = vmul.f32 %v2901_v47, %v7158_v45  ;;  %v5648_v45 = vld [vmem:[%s9178_s7] sm:$0xff]  ;;  %vm2954_vm8 = vweird.f32 %v7332_v28 }
 0x224   : > { %v7342_v7 = vadd.f32 1.0, %v5793_v53  ;;  %5794 = vpow2.f32 %v5467_v22  ;;  %v2012_v43 = vpop.f32.mrf.mxu2  ;;  %v2931_v39 = vsel %vm2928_vm7, %v2930_v16, %v2926_v54  ;;  %v2957_v47 = vand.u32 2147483647, %v7291_v52  ;;  %vm7395_vm10 = vmor %vm2953_vm9, %vm2954_vm8 }
 0x225   : > { %v2098_v29 = vpop.f32.mrf.mxu3  ;;  %v2950_v38 = vsub.f32 1.0, %v2949_v26  ;;  %2051 = vmatmul.bf16.gmra.mxu2 %v1473_v58  ;;  %2318 = vmatmul.bf16.gmra.mxu1 %v1473_v58  ;;  %v7353_v22 = vmul.f32 %v2931_v39, %v7195_v50  ;;  %v511_v58 = vld [vmem:[%s6820_s14 + $0xf8] sm:$0xff]  ;;  %v2013_v42 = vadd.f32 %v2012_v43, %v7034_v61  ;;  %v1457_v39 = vunpack.c.l.b16 %v1176_v2 }
 0x226   : > { %v2099_v1 = vadd.f32 %v2098_v29, %v2010_v34  ;;  %5796 = vrcp.f32 %v7342_v7  ;;  %v7356_v3 = vpop.f32.mrf.mxu0  ;;  %3963 = vmatpush.bf16.msra.mxu0 %v5648_v45  ;;  %v1395_v19 = vpack.c.bf16 %v511_v58, %v511_v58  ;;  %v1456_v29 = vunpack.c.l.b16 %v1175_v21 }
 0x227   : > { %v2951_v4 = vmul.f32 %v7332_v28, %v2950_v38  ;;  %v2959_v38 = vand.u32 2147483648, %v7291_v52  ;;  %v2989_v45 = vand.u32 2147483648, %v7342_v7  ;;  %vm7399_vm11 = vcmp.eq.f32.partialorder %v2957_v47, 8.507059e+37  ;;  %v7404_v52 = vpop.f32.mrf.mxu1 }
 0x228   : > { %v7361_v31 = vadd.f32 %v7218_v27, %v2099_v1  ;;  %v510_v27 = vld [vmem:[%s6820_s14 + $0xf0] sm:$0xff]  ;;  %vm2983_vm13 = vweird.f32 %v7342_v7  ;;  %v1474_v50 = vpack.c.b16 %v1457_v39, %v1456_v29 }
 0x229   : > { %2140 = vmatmul.bf16.gmra.mxu3 %v7363_v13  ;;  %2234 = vmatmul.bf16.gmra.mxu0 %v7347_v55  ;;  %v1394_v34 = vpack.c.bf16 %v510_v27, %v510_v27  ;;  %v2952_v54 = vadd.f32 %v7332_v28, %v2951_v4  ;;  %v2987_v27 = vand.u32 2147483647, %v7342_v7  ;;  %v2960_v47 = vor.u32 1.1754944e-38, %v2959_v38 }
 0x22a   : > { %v5469_v20 = vmul.f32 -1.442695, %v7361_v31  ;;  %v5795_v57 = vpop.eup %5794 }
 0x22b   : > { %v7380_v25 = vadd.f32 1.0, %v5795_v57  ;;  %v1650_v58 = vunpack.c.l.b16 %v1394_v34  ;;  %v1651_v57 = vunpack.c.l.b16 %v1395_v19  ;;  %v2956_v2 = vsel %vm7395_vm10, %v7332_v28, %v2952_v54  ;;  %v5616_v34 = vld [vmem:[%s9176_s5 + $0x84] sm:$0xf]  ;;  %v5327_v19 = vld [vmem:[%s9176_s5 + $0x88] sm:$0xf0] }
 0x22c   : > { %5798 = vpow2.f32 %v5469_v20  ;;  %v5797_v53 = vpop.eup %5796  ;;  %v2014_v16 = vpop.f32.mrf.mxu2  ;;  %v5330_v38 = vor.u32 %v5616_v34, %v5327_v19  ;;  %vm2988_vm15 = vcmp.eq.f32.partialorder %v2987_v27, 8.507059e+37  ;;  %v5632_v34 = vld [vmem:[%s9176_s5 + $0x104] sm:$0xf] }
 0x22d   : > { %v2101_v26 = vpop.f32.mrf.mxu3  ;;  %v2979_v62 = vmul.f32 %v5797_v53, %v7342_v7  ;;  %5800 = vrcp.f32 %v7380_v25  ;;  %vm2984_vm12 = vweird.f32 %v5797_v53  ;;  %v2961_v7 = vsel %vm7399_vm11, %v2960_v47, %v2956_v2 }
 0x22e   : > { %v7389_v1 = vpop.f32.mrf.mxu0  ;;  %v2102_v20 = vadd.f32 %v2101_v26, %v2013_v42  ;;  %vm2985_vm14 = vmor %vm2983_vm13, %vm2984_vm12  ;;  %v2015_v39 = vadd.f32 %v2014_v16, %v7034_v61  ;;  %2341 = vmatpush.bf16.msra.mxu2 %v5330_v38  ;;  %v7441_v16 = vmul.f32 %v2961_v7, %v7222_v49  ;;  %v3019_v7 = vand.u32 2147483648, %v7380_v25 }
 0x22f   : > { %v2980_v59 = vsub.f32 1.0, %v2979_v62  ;;  %vm3013_vm1 = vweird.f32 %v7380_v25 }
 0x230   : > { %v7410_v62 = vadd.f32 %v7259_v24, %v2102_v20 }
 0x231   : > { %v2981_v26 = vmul.f32 %v5797_v53, %v2980_v59  ;;  %v2990_v59 = vor.u32 1.1754944e-38, %v2989_v45  ;;  %v7430_v45 = vpack.c.b16 %v1651_v57, %v1650_v58 }
 0x232   : > { %v5799_v21 = vpop.eup %5798  ;;  %v5471_v24 = vmul.f32 -1.442695, %v7410_v62 }
 0x233   : > { %v7413_v42 = vadd.f32 1.0, %v5799_v21  ;;  %v7421_v28 = vpop.eup %5800  ;;  %v2982_v54 = vadd.f32 %v5797_v53, %v2981_v26  ;;  %9237 = vst [vmem:[#allocation30_spill] sm:$0xff] %v7430_v45 }
 0x234   : > { %v3009_v29 = vmul.f32 %v7421_v28, %v7380_v25  ;;  %v2017_v43 = vpop.f32.mrf.mxu2  ;;  %vm3014_vm0 = vweird.f32 %v7421_v28 }
 0x235   : > { %5802 = vrcp.f32 %v7413_v42  ;;  %v2103_v20 = vpop.f32.mrf.mxu3  ;;  %v2986_v4 = vsel %vm2985_vm14, %v5797_v53, %v2982_v54  ;;  %2056 = vmatmul.bf16.gmra.mxu2 %v1474_v50  ;;  %2323 = vmatmul.bf16.gmra.mxu1 %v1474_v50  ;;  %v5391_v53 = vld [vmem:[%s9176_s5 + $0x108] sm:$0xf0]  ;;  %v2018_v38 = vadd.f32 %v2017_v43, %v7034_v61  ;;  %vm7466_vm2 = vmor %vm3013_vm1, %vm3014_vm0  ;;  %v3049_v43 = vand.u32 2147483648, %v7413_v42 }
 0x236   : > { %5804 = vpow2.f32 %v5471_v24  ;;  %v2991_v21 = vsel %vm2988_vm15, %v2990_v59, %v2986_v4  ;;  %v3010_v26 = vsub.f32 1.0, %v3009_v29  ;;  %v2104_v2 = vadd.f32 %v2103_v20, %v2015_v39  ;;  %v7432_v47 = vpop.f32.mrf.mxu0 }
 0x237   : > { %v7444_v50 = vmul.f32 %v2991_v21, %v7285_v14  ;;  %v5394_v27 = vor.u32 %v5632_v34, %v5391_v53  ;;  %v7455_v14 = vpop.f32.mrf.mxu1  ;;  %v3017_v20 = vand.u32 2147483647, %v7380_v25  ;;  %vm3043_vm5 = vweird.f32 %v7413_v42 }
 0x238   : > { %v3011_v58 = vmul.f32 %v7421_v28, %v3010_v26  ;;  %v7448_v57 = vadd.f32 %v7313_v12, %v2104_v2  ;;  %v3047_v2 = vand.u32 2147483647, %v7413_v42  ;;  %v3050_v19 = vor.u32 1.1754944e-38, %v3049_v43 }
 0x239   : > { %2145 = vmatmul.bf16.gmra.mxu3 %v7009_v63  ;;  %2239 = vmatmul.bf16.gmra.mxu0 %v7430_v45  ;;  %vm3018_vm4 = vcmp.eq.f32.partialorder %v3017_v20, 8.507059e+37 }
 0x23a   : > { %v5473_v49 = vmul.f32 -1.442695, %v7448_v57  ;;  %2430 = vmatpush.bf16.msra.mxu3 %v5394_v27  ;;  %v3012_v24 = vadd.f32 %v7421_v28, %v3011_v58  ;;  %v3020_v58 = vor.u32 1.1754944e-38, %v3019_v7  ;;  %vm3048_vm7 = vcmp.eq.f32.partialorder %v3047_v2, 8.507059e+37 }
 0x23b   : > { %v5803_v54 = vpop.eup %5802 }
 0x23c   : > { %v5805_v59 = vpop.eup %5804  ;;  %v3039_v12 = vmul.f32 %v5803_v54, %v7413_v42  ;;  %5806 = vpow2.f32 %v5473_v49  ;;  %v3016_v53 = vsel %vm7466_vm2, %v7421_v28, %v3012_v24  ;;  %vm3044_vm3 = vweird.f32 %v5803_v54  ;;  %v2019_v49 = vpop.f32.mrf.mxu2 }
 0x23d   : > { %v7462_v29 = vadd.f32 1.0, %v5805_v59  ;;  %v2106_v39 = vpop.f32.mrf.mxu3  ;;  %vm3045_vm6 = vmor %vm3043_vm5, %vm3044_vm3  ;;  %v2020_v7 = vadd.f32 %v2019_v49, %v7034_v61  ;;  %v9240_v49 = vpack.c.bf16 %v7174_v30, %v7171_v11 }
 0x23e   : > { %v3040_v4 = vsub.f32 1.0, %v3039_v12  ;;  %v2107_v21 = vadd.f32 %v2106_v39, %v2018_v38  ;;  %v7473_v34 = vpop.f32.mrf.mxu0  ;;  %v3021_v39 = vsel %vm3018_vm4, %v3020_v58, %v3016_v53 }
 0x23f   : > { %5808 = vrcp.f32 %v7462_v29  ;;  %v7486_v20 = vpop.f32.mrf.mxu1  ;;  %v7489_v42 = vmul.f32 %v3021_v39, %v7330_v60  ;;  %v5661_v60 = vld [vmem:[%s9178_s7 + $0x68] sm:$0xff]  ;;  %vm3073_vm9 = vweird.f32 %v7462_v29 }
 0x240   : > { %v3041_v27 = vmul.f32 %v5803_v54, %v3040_v4  ;;  %v7479_v25 = vadd.f32 %v7356_v3, %v2107_v21  ;;  %4047 = vmatpush.bf16.msra.mxu1 %v5661_v60 }
 0x242   : > { %v3042_v59 = vadd.f32 %v5803_v54, %v3041_v27  ;;  %v5475_v12 = vmul.f32 -1.442695, %v7479_v25  ;;  %v5807_v38 = vpop.eup %5806 }
 0x243   : > { %v7483_v28 = vadd.f32 1.0, %v5807_v38 }
 0x244   : > { %v3046_v45 = vsel %vm3045_vm6, %v5803_v54, %v3042_v59  ;;  %5810 = vpow2.f32 %v5475_v12 }
 0x245   : > { %v5809_v24 = vpop.eup %5808  ;;  %v3051_v3 = vsel %vm3048_vm7, %v3050_v19, %v3046_v45  ;;  %v2108_v4 = vpop.f32.mrf.mxu3  ;;  %5812 = vrcp.f32 %v7483_v28  ;;  %2061 = vmatmul.bf16.gmra.mxu2 %v7027_v23  ;;  %2328 = vmatmul.bf16.gmra.mxu1 %v7027_v23  ;;  %vm3103_vm13 = vweird.f32 %v7483_v28 }
 0x246   : > { %v7492_v21 = vmul.f32 %v3051_v3, %v7361_v31  ;;  %v3069_v26 = vmul.f32 %v5809_v24, %v7462_v29  ;;  %v2109_v45 = vadd.f32 %v2108_v4, %v2020_v7  ;;  %v7498_v19 = vpop.f32.mrf.mxu0  ;;  %vm3074_vm8 = vweird.f32 %v5809_v24 }
 0x247   : > { %v3079_v3 = vand.u32 2147483648, %v7462_v29  ;;  %v3077_v7 = vand.u32 2147483647, %v7462_v29  ;;  %vm7523_vm10 = vmor %vm3073_vm9, %vm3074_vm8 }
 0x248   : > { %v3070_v54 = vsub.f32 1.0, %v3069_v26  ;;  %v3800_v31 = vpack.c.bf16 %v7492_v21, %v7489_v42  ;;  %v7506_v2 = vadd.f32 %v7389_v1, %v2109_v45  ;;  %v2022_v43 = vpop.f32.mrf.mxu2  ;;  %v3107_v45 = vand.u32 2147483647, %v7483_v28 }
 0x249   : > { %2150 = vmatmul.bf16.gmra.mxu3 %v7040_v0  ;;  %3964 = vmatmul.bf16.vlgmr.msra.gmra.mxu0 %v9240_v49  ;;  %v2023_v38 = vadd.f32 %v2022_v43, %v7034_v61  ;;  %vm3078_vm12 = vcmp.eq.f32.partialorder %v3077_v7, 8.507059e+37 }
 0x24a   : > { %v5811_v53 = vpop.eup %5810  ;;  %v3071_v27 = vmul.f32 %v5809_v24, %v3070_v54  ;;  %v5477_v58 = vmul.f32 -1.442695, %v7506_v2  ;;  %v3109_v54 = vand.u32 2147483648, %v7483_v28  ;;  %vm3108_vm15 = vcmp.eq.f32.partialorder %v3107_v45, 8.507059e+37 }
 0x24b   : > { %v7509_v23 = vadd.f32 1.0, %v5811_v53  ;;  %v5813_v59 = vpop.eup %5812 }
 0x24c   : > { %v3072_v12 = vadd.f32 %v5809_v24, %v3071_v27  ;;  %v3099_v1 = vmul.f32 %v5813_v59, %v7483_v28  ;;  %vm3104_vm11 = vweird.f32 %v5813_v59  ;;  %v3080_v27 = vor.u32 1.1754944e-38, %v3079_v3 }
 0x24d   : > { %5814 = vrcp.f32 %v7509_v23  ;;  %v2111_v39 = vpop.f32.mrf.mxu3  ;;  %vm3105_vm14 = vmor %vm3103_vm13, %vm3104_vm11  ;;  %v3110_v26 = vor.u32 1.1754944e-38, %v3109_v54  ;;  %vm3133_vm1 = vweird.f32 %v7509_v23 }
 0x24e   : > { %5816 = vpow2.f32 %v5477_v58  ;;  %v3100_v4 = vsub.f32 1.0, %v3099_v1  ;;  %v2112_v11 = vadd.f32 %v2111_v39, %v2023_v38  ;;  %v7521_v30 = vpop.f32.mrf.mxu0  ;;  %v3076_v60 = vsel %vm7523_vm10, %v5809_v24, %v3072_v12 }
 0x24f   : > { %v3081_v39 = vsel %vm3078_vm12, %v3080_v27, %v3076_v60 }
 0x250   : > { %v3101_v43 = vmul.f32 %v5813_v59, %v3100_v4  ;;  %v7532_v53 = vadd.f32 %v7432_v47, %v2112_v11  ;;  %v2024_v29 = vpop.f32.mrf.mxu2  ;;  %v7543_v28 = vmul.f32 %v3081_v39, %v7410_v62 }
 0x251   : > { %v2025_v47 = vadd.f32 %v2024_v29, %v7034_v61 }
 0x252   : > { %v3102_v49 = vadd.f32 %v5813_v59, %v3101_v43  ;;  %v5479_v1 = vmul.f32 -1.442695, %v7532_v53 }
 0x253   : > { %v7534_v58 = vpop.eup %5814 }
 0x254   : > { %v5817_v38 = vpop.eup %5816  ;;  %v3129_v24 = vmul.f32 %v7534_v58, %v7509_v23  ;;  %v3106_v12 = vsel %vm3105_vm14, %v5813_v59, %v3102_v49  ;;  %5818 = vpow2.f32 %v5479_v1  ;;  %vm3134_vm0 = vweird.f32 %v7534_v58 }
 0x255   : > { %v2730_v3 = vadd.f32 1.0, %v5817_v38  ;;  %v2113_v4 = vpop.f32.mrf.mxu3  ;;  %v3111_v7 = vsel %vm3108_vm15, %v3110_v26, %v3106_v12  ;;  %2342 = vmatmul.bf16.vlgmr.msra.gmra.mxu2 %v6867_v40  ;;  %vm7572_vm2 = vmor %vm3133_vm1, %vm3134_vm0 }
 0x256   : > { %v3130_v11 = vsub.f32 1.0, %v3129_v24  ;;  %v2114_v43 = vadd.f32 %v2113_v4, %v2025_v47  ;;  %v7546_v54 = vmul.f32 %v3111_v7, %v7448_v57  ;;  %v7548_v60 = vpop.f32.mrf.mxu0  ;;  %v9243_v57 = vpack.c.bf16 %v7257_v56, %v7275_v41 }
 0x257   : > { %5820 = vrcp.f32 %v2730_v3  ;;  %v3137_v56 = vand.u32 2147483647, %v7509_v23  ;;  %v3169_v47 = vand.u32 2147483648, %v2730_v3  ;;  %vm3163_vm5 = vweird.f32 %v2730_v3 }
 0x258   : > { %v7551_v59 = vadd.f32 %v7473_v34, %v2114_v43  ;;  %v2027_v45 = vpop.f32.mrf.mxu2  ;;  %v3802_v29 = vpack.c.bf16 %v7546_v54, %v7543_v28  ;;  %v3131_v27 = vmul.f32 %v7534_v58, %v3130_v11 }
 0x259   : > { %2431 = vmatmul.bf16.vlgmr.msra.gmra.mxu3 %v6847_v15  ;;  %3969 = vmatmul.bf16.gmra.mxu0 %v9243_v57  ;;  %v2028_v1 = vadd.f32 %v2027_v45, %v7034_v61  ;;  %v3139_v15 = vand.u32 2147483648, %v7509_v23  ;;  %v3167_v23 = vand.u32 2147483647, %v2730_v3  ;;  %vm3138_vm4 = vcmp.eq.f32.partialorder %v3137_v56, 8.507059e+37 }
 0x25a   : > { %v5481_v40 = vmul.f32 -1.442695, %v7551_v59  ;;  %v5819_v62 = vpop.eup %5818  ;;  %v3132_v39 = vadd.f32 %v7534_v58, %v3131_v27 }
 0x25b   : > { %v7561_v49 = vadd.f32 1.0, %v5819_v62  ;;  %vm3168_vm7 = vcmp.eq.f32.partialorder %v3167_v23, 8.507059e+37 }
 0x25c   : > { %5822 = vpow2.f32 %v5481_v40  ;;  %v3136_v45 = vsel %vm7572_vm2, %v7534_v58, %v3132_v39  ;;  %v3140_v40 = vor.u32 1.1754944e-38, %v3139_v15 }
 0x25d   : > { %v5821_v34 = vpop.eup %5820  ;;  %v2116_v38 = vpop.f32.mrf.mxu3  ;;  %5824 = vrcp.f32 %v7561_v49  ;;  %vm3193_vm9 = vweird.f32 %v7561_v49 }
 0x25e   : > { %v3159_v26 = vmul.f32 %v5821_v34, %v2730_v3  ;;  %v2117_v24 = vadd.f32 %v2116_v38, %v2028_v1  ;;  %v7570_v12 = vpop.f32.mrf.mxu0  ;;  %vm3164_vm3 = vweird.f32 %v5821_v34  ;;  %v5660_v3 = vld [vmem:[%s9178_s7 + $0x60] sm:$0xff] }
 0x25f   : > { %vm3165_vm6 = vmor %vm3163_vm5, %vm3164_vm3  ;;  %4048 = vmatpush.bf16.msra.mxu1 %v5660_v3 }
 0x260   : > { %v3160_v41 = vsub.f32 1.0, %v3159_v26  ;;  %v7577_v7 = vadd.f32 %v7498_v19, %v2117_v24  ;;  %v2029_v11 = vpop.f32.mrf.mxu2  ;;  %v3170_v19 = vor.u32 1.1754944e-38, %v3169_v47  ;;  %v3141_v26 = vsel %vm3138_vm4, %v3140_v40, %v3136_v45 }
 0x261   : > { %v2030_v58 = vadd.f32 %v2029_v11, %v7034_v61  ;;  %v7593_v47 = vmul.f32 %v3141_v26, %v7479_v25 }
 0x262   : > { %v5823_v43 = vpop.eup %5822  ;;  %v3161_v27 = vmul.f32 %v5821_v34, %v3160_v41  ;;  %v5483_v57 = vmul.f32 -1.442695, %v7577_v7 }
 0x263   : > { %v7582_v62 = vadd.f32 1.0, %v5823_v43  ;;  %v5825_v1 = vpop.eup %5824 }
 0x264   : > { %v3162_v38 = vadd.f32 %v5821_v34, %v3161_v27  ;;  %v3189_v24 = vmul.f32 %v5825_v1, %v7561_v49  ;;  %vm3194_vm8 = vweird.f32 %v5825_v1 }
 0x265   : > { %5826 = vrcp.f32 %v7582_v62  ;;  %v2118_v39 = vpop.f32.mrf.mxu3  ;;  %2347 = vmatmul.bf16.gmra.mxu2 %v6893_v8  ;;  %vm7617_vm10 = vmor %vm3193_vm9, %vm3194_vm8  ;;  %vm3223_vm13 = vweird.f32 %v7582_v62 }
 0x266   : > { %v3166_v41 = vsel %vm3165_vm6, %v5821_v34, %v3162_v38  ;;  %5828 = vpow2.f32 %v5483_v57  ;;  %v3190_v4 = vsub.f32 1.0, %v3189_v24  ;;  %v2119_v56 = vadd.f32 %v2118_v39, %v2030_v58  ;;  %v7601_v8 = vpop.f32.mrf.mxu0 }
 0x267   : > { %v3171_v15 = vsel %vm3168_vm7, %v3170_v19, %v3166_v41  ;;  %v3199_v19 = vand.u32 2147483648, %v7561_v49  ;;  %v3197_v24 = vand.u32 2147483647, %v7561_v49  ;;  %v3227_v39 = vand.u32 2147483647, %v7582_v62 }
 0x268   : > { %v7596_v43 = vmul.f32 %v3171_v15, %v7506_v2  ;;  %v3191_v11 = vmul.f32 %v5825_v1, %v3190_v4  ;;  %v7599_v34 = vadd.f32 %v7521_v30, %v2119_v56  ;;  %v2032_v45 = vpop.f32.mrf.mxu2  ;;  %v9246_v2 = vpack.c.bf16 %v7353_v22, %v7350_v6 }
 0x269   : > { %2436 = vmatmul.bf16.gmra.mxu3 %v6863_v37  ;;  %v2033_v38 = vadd.f32 %v2032_v45, %v7034_v61  ;;  %v3229_v41 = vand.u32 2147483648, %v7582_v62  ;;  %v3200_v49 = vor.u32 1.1754944e-38, %v3199_v19  ;;  %vm3198_vm12 = vcmp.eq.f32.partialorder %v3197_v24, 8.507059e+37 }
 0x26a   : > { %v3804_v27 = vpack.c.bf16 %v7596_v43, %v7593_v47  ;;  %v5485_v25 = vmul.f32 -1.442695, %v7599_v34  ;;  %3974 = vmatmul.bf16.gmra.mxu0 %v9246_v2  ;;  %v3192_v57 = vadd.f32 %v5825_v1, %v3191_v11  ;;  %vm3228_vm15 = vcmp.eq.f32.partialorder %v3227_v39, 8.507059e+37 }
 0x26b   : > { %v5827_v23 = vpop.eup %5826 }
 0x26c   : > { %v5829_v40 = vpop.eup %5828  ;;  %v3219_v30 = vmul.f32 %v5827_v23, %v7582_v62  ;;  %5830 = vpow2.f32 %v5485_v25  ;;  %v3196_v15 = vsel %vm7617_vm10, %v5825_v1, %v3192_v57  ;;  %vm3224_vm11 = vweird.f32 %v5827_v23 }
 0x26d   : > { %v7613_v37 = vadd.f32 1.0, %v5829_v40  ;;  %v2121_v26 = vpop.f32.mrf.mxu3  ;;  %v3201_v2 = vsel %vm3198_vm12, %v3200_v49, %v3196_v15  ;;  %vm3225_vm14 = vmor %vm3223_vm13, %vm3224_vm11  ;;  %v3230_v40 = vor.u32 1.1754944e-38, %v3229_v41 }
 0x26e   : > { %v3220_v58 = vsub.f32 1.0, %v3219_v30  ;;  %v2122_v6 = vadd.f32 %v2121_v26, %v2033_v38  ;;  %v7631_v57 = vpop.f32.mrf.mxu0  ;;  %v7635_v24 = vmul.f32 %v3201_v2, %v7532_v53 }
 0x26f   : > { %5832 = vrcp.f32 %v7613_v37  ;;  %vm3253_vm1 = vweird.f32 %v7613_v37  ;;  %v3257_v2 = vand.u32 2147483647, %v7613_v37 }
 0x270   : > { %v3221_v4 = vmul.f32 %v5827_v23, %v3220_v58  ;;  %v7627_v56 = vadd.f32 %v7548_v60, %v2122_v6  ;;  %v2034_v3 = vpop.f32.mrf.mxu2 }
 0x271   : > { %v2035_v19 = vadd.f32 %v2034_v3, %v7034_v61  ;;  %vm3258_vm4 = vcmp.eq.f32.partialorder %v3257_v2, 8.507059e+37 }
 0x272   : > { %v3222_v11 = vadd.f32 %v5827_v23, %v3221_v4  ;;  %v5487_v45 = vmul.f32 -1.442695, %v7627_v56  ;;  %v5831_v25 = vpop.eup %5830 }
 0x273   : > { %v2738_v1 = vadd.f32 1.0, %v5831_v25  ;;  %v3259_v25 = vand.u32 2147483648, %v7613_v37 }
 0x274   : > { %v3226_v30 = vsel %vm3225_vm14, %v5827_v23, %v3222_v11  ;;  %5834 = vpow2.f32 %v5487_v45 }
 0x275   : > { %v5833_v60 = vpop.eup %5832  ;;  %v3231_v38 = vsel %vm3228_vm15, %v3230_v40, %v3226_v30  ;;  %v2123_v26 = vpop.f32.mrf.mxu3  ;;  %5836 = vrcp.f32 %v2738_v1  ;;  %2352 = vmatmul.bf16.gmra.mxu2 %v6907_v36  ;;  %v9249_v36 = vpack.c.bf16 %v7444_v50, %v7441_v16  ;;  %v3287_v30 = vand.u32 2147483647, %v2738_v1 }
 0x276   : > { %v7638_v62 = vmul.f32 %v3231_v38, %v7551_v59  ;;  %v3249_v58 = vmul.f32 %v5833_v60, %v7613_v37  ;;  %v2124_v23 = vadd.f32 %v2123_v26, %v2035_v19  ;;  %vm3254_vm0 = vweird.f32 %v5833_v60 }
 0x277   : > { %vm7661_vm2 = vmor %vm3253_vm1, %vm3254_vm0  ;;  %v3289_v38 = vand.u32 2147483648, %v2738_v1  ;;  %vm3283_vm5 = vweird.f32 %v2738_v1  ;;  %vm3288_vm7 = vcmp.eq.f32.partialorder %v3287_v30, 8.507059e+37 }
 0x278   : > { %v3250_v6 = vsub.f32 1.0, %v3249_v58  ;;  %v3806_v22 = vpack.c.bf16 %v7638_v62, %v7635_v24  ;;  %v7645_v39 = vadd.f32 %v7570_v12, %v2124_v23  ;;  %v2037_v41 = vpop.f32.mrf.mxu2 }
 0x279   : > { %2441 = vmatmul.bf16.gmra.mxu3 %v6889_v5  ;;  %v2038_v12 = vadd.f32 %v2037_v41, %v7034_v61  ;;  %v7657_v5 = vpop.f32.mrf.mxu0 }
 0x27a   : > { %v5835_v15 = vpop.eup %5834  ;;  %v3251_v53 = vmul.f32 %v5833_v60, %v3250_v6  ;;  %v5489_v4 = vmul.f32 -1.442695, %v7645_v39  ;;  %3979 = vmatmul.bf16.gmra.mxu0 %v9249_v36  ;;  %v3260_v6 = vor.u32 1.1754944e-38, %v3259_v25  ;;  %v3290_v36 = vor.u32 1.1754944e-38, %v3289_v38 }
 0x27b   : > { %v7648_v59 = vadd.f32 1.0, %v5835_v15  ;;  %v5837_v49 = vpop.eup %5836 }
 0x27c   : > { %v3252_v3 = vadd.f32 %v5833_v60, %v3251_v53  ;;  %v3279_v11 = vmul.f32 %v5837_v49, %v2738_v1  ;;  %vm3284_vm3 = vweird.f32 %v5837_v49  ;;  %v5659_v1 = vld [vmem:[%s9178_s7 + $0x58] sm:$0xff] }
 0x27d   : > { %5838 = vrcp.f32 %v7648_v59  ;;  %v2126_v45 = vpop.f32.mrf.mxu3  ;;  %vm3285_vm6 = vmor %vm3283_vm5, %vm3284_vm3  ;;  %4049 = vmatpush.bf16.msra.mxu1 %v5659_v1  ;;  %vm3313_vm9 = vweird.f32 %v7648_v59  ;;  %v3317_v42 = vand.u32 2147483647, %v7648_v59 }
 0x27e   : > { %5840 = vpow2.f32 %v5489_v4  ;;  %v3280_v16 = vsub.f32 1.0, %v3279_v11  ;;  %v2127_v50 = vadd.f32 %v2126_v45, %v2038_v12  ;;  %v3256_v19 = vsel %vm7661_vm2, %v5833_v60, %v3252_v3 }
 0x27f   : > { %v3261_v4 = vsel %vm3258_vm4, %v3260_v6, %v3256_v19  ;;  %vm3318_vm12 = vcmp.eq.f32.partialorder %v3317_v42, 8.507059e+37 }
 0x280   : > { %v3281_v26 = vmul.f32 %v5837_v49, %v3280_v16  ;;  %v7668_v58 = vadd.f32 %v7601_v8, %v2127_v50  ;;  %v2039_v23 = vpop.f32.mrf.mxu2  ;;  %v7681_v16 = vmul.f32 %v3261_v4, %v7577_v7 }
 0x281   : > { %v2040_v3 = vadd.f32 %v2039_v23, %v7034_v61 }
 0x282   : > { %v3282_v37 = vadd.f32 %v5837_v49, %v3281_v26  ;;  %v5491_v15 = vmul.f32 -1.442695, %v7668_v58 }
 0x283   : > { %v7670_v41 = vpop.eup %5838 }
 0x284   : > { %v5841_v53 = vpop.eup %5840  ;;  %v3309_v60 = vmul.f32 %v7670_v41, %v7648_v59  ;;  %v3286_v8 = vsel %vm3285_vm6, %v5837_v49, %v3282_v37  ;;  %5842 = vpow2.f32 %v5491_v15  ;;  %v2222_v49 = vpop.f32.mrf.mxu0  ;;  %vm3314_vm8 = vweird.f32 %v7670_v41 }
 0x285   : > { %v2742_v11 = vadd.f32 1.0, %v5841_v53  ;;  %v2128_v12 = vpop.f32.mrf.mxu3  ;;  %v3291_v45 = vsel %vm3288_vm7, %v3290_v36, %v3286_v8  ;;  %2357 = vmatmul.bf16.gmra.mxu2 %v6935_v17  ;;  %vm7706_vm10 = vmor %vm3313_vm9, %vm3314_vm8 }
 0x286   : > { %v3310_v25 = vsub.f32 1.0, %v3309_v60  ;;  %v2129_v2 = vadd.f32 %v2128_v12, %v2040_v3  ;;  %v7684_v50 = vmul.f32 %v3291_v45, %v7599_v34 }
 0x287   : > { %5844 = vrcp.f32 %v2742_v11  ;;  %v3347_v12 = vand.u32 2147483647, %v2742_v11  ;;  %vm3343_vm13 = vweird.f32 %v2742_v11 }
 0x288   : > { %v7687_v40 = vadd.f32 %v7631_v57, %v2129_v2  ;;  %v2042_v30 = vpop.f32.mrf.mxu2  ;;  %v3808_v17 = vpack.c.bf16 %v7684_v50, %v7681_v16  ;;  %v3311_v38 = vmul.f32 %v7670_v41, %v3310_v25 }
 0x289   : > { %2446 = vmatmul.bf16.gmra.mxu3 %v6905_v32  ;;  %v2043_v26 = vadd.f32 %v2042_v30, %v7034_v61  ;;  %v3319_v32 = vand.u32 2147483648, %v7648_v59  ;;  %vm3348_vm15 = vcmp.eq.f32.partialorder %v3347_v12, 8.507059e+37 }
 0x28a   : > { %v5493_v19 = vmul.f32 -1.442695, %v7687_v40  ;;  %v5843_v7 = vpop.eup %5842  ;;  %3984 = vmatmul.bf16.gmra.mxu0 %v3800_v31  ;;  %v3312_v6 = vadd.f32 %v7670_v41, %v3311_v38  ;;  %v3349_v31 = vand.u32 2147483648, %v2742_v11 }
 0x28b   : > { %v7697_v34 = vadd.f32 1.0, %v5843_v7  ;;  %v3320_v59 = vor.u32 1.1754944e-38, %v3319_v32 }
 0x28c   : > { %5846 = vpow2.f32 %v5493_v19  ;;  %v3316_v3 = vsel %vm7706_vm10, %v7670_v41, %v3312_v6  ;;  %v2225_v45 = vpop.f32.mrf.mxu0 }
 0x28d   : > { %v5845_v57 = vpop.eup %5844  ;;  %v2131_v23 = vpop.f32.mrf.mxu3  ;;  %5848 = vrcp.f32 %v7697_v34  ;;  %v3321_v38 = vsel %vm3318_vm12, %v3320_v59, %v3316_v3  ;;  %vm3373_vm1 = vweird.f32 %v7697_v34  ;;  %v3377_v12 = vand.u32 2147483647, %v7697_v34 }
 0x28e   : > { %v3339_v37 = vmul.f32 %v5845_v57, %v2742_v11  ;;  %v2132_v15 = vadd.f32 %v2131_v23, %v2043_v26  ;;  %vm3344_vm11 = vweird.f32 %v5845_v57  ;;  %v7724_v11 = vmul.f32 %v3321_v38, %v7627_v56 }
 0x28f   : > { %vm3345_vm14 = vmor %vm3343_vm13, %vm3344_vm11  ;;  %vm3378_vm4 = vcmp.eq.f32.partialorder %v3377_v12, 8.507059e+37 }
 0x290   : > { %v3340_v21 = vsub.f32 1.0, %v3339_v37  ;;  %v7711_v4 = vadd.f32 %v7657_v5, %v2132_v15  ;;  %v2044_v36 = vpop.f32.mrf.mxu2  ;;  %v3350_v5 = vor.u32 1.1754944e-38, %v3349_v31 }
 0x291   : > { %v2045_v41 = vadd.f32 %v2044_v36, %v7034_v61 }
 0x292   : > { %v5847_v60 = vpop.eup %5846  ;;  %v3341_v8 = vmul.f32 %v5845_v57, %v3340_v21  ;;  %v5495_v2 = vmul.f32 -1.442695, %v7711_v4 }
 0x293   : > { %v7716_v25 = vadd.f32 1.0, %v5847_v60  ;;  %v5849_v1 = vpop.eup %5848  ;;  %v3379_v60 = vand.u32 2147483648, %v7697_v34 }
 0x294   : > { %v3342_v30 = vadd.f32 %v5845_v57, %v3341_v8  ;;  %v3369_v19 = vmul.f32 %v5849_v1, %v7697_v34  ;;  %vm3374_vm0 = vweird.f32 %v5849_v1  ;;  %v2227_v36 = vpop.f32.mrf.mxu0 }
 0x295   : > { %5850 = vrcp.f32 %v7716_v25  ;;  %v2133_v7 = vpop.f32.mrf.mxu3  ;;  %2362 = vmatmul.bf16.gmra.mxu2 %v6949_v48  ;;  %v7734_v48 = vpop.f32.mrf.mxu1  ;;  %vm7747_vm2 = vmor %vm3373_vm1, %vm3374_vm0  ;;  %v3407_v59 = vand.u32 2147483647, %v7716_v25  ;;  %v3380_v34 = vor.u32 1.1754944e-38, %v3379_v60  ;;  %vm3403_vm5 = vweird.f32 %v7716_v25 }
 0x296   : > { %v3346_v26 = vsel %vm3345_vm14, %v5845_v57, %v3342_v30  ;;  %5852 = vpow2.f32 %v5495_v2  ;;  %v3370_v6 = vsub.f32 1.0, %v3369_v19  ;;  %v2134_v37 = vadd.f32 %v2133_v7, %v2045_v41 }
 0x297   : > { %v3351_v23 = vsel %vm3348_vm15, %v3350_v5, %v3346_v26  ;;  %v3409_v2 = vand.u32 2147483648, %v7716_v25  ;;  %vm3408_vm7 = vcmp.eq.f32.partialorder %v3407_v59, 8.507059e+37 }
 0x298   : > { %v7727_v32 = vmul.f32 %v3351_v23, %v7645_v39  ;;  %v3371_v15 = vmul.f32 %v5849_v1, %v3370_v6  ;;  %v7729_v42 = vadd.f32 %v2222_v49, %v2134_v37  ;;  %v2047_v21 = vpop.f32.mrf.mxu2 }
 0x299   : > { %2451 = vmatmul.bf16.gmra.mxu3 %v6931_v9  ;;  %v2048_v9 = vadd.f32 %v2047_v21, %v7034_v61  ;;  %v3410_v6 = vor.u32 1.1754944e-38, %v3409_v2 }
 0x29a   : > { %v3810_v57 = vpack.c.bf16 %v7727_v32, %v7724_v11  ;;  %v5497_v53 = vmul.f32 -1.442695, %v7729_v42  ;;  %3989 = vmatmul.bf16.gmra.mxu0 %v3802_v29  ;;  %v3372_v39 = vadd.f32 %v5849_v1, %v3371_v15 }
 0x29b   : > { %v5851_v31 = vpop.eup %5850 }
 0x29c   : > { %v5853_v56 = vpop.eup %5852  ;;  %v3399_v49 = vmul.f32 %v5851_v31, %v7716_v25  ;;  %5854 = vpow2.f32 %v5497_v53  ;;  %v3376_v30 = vsel %vm7747_vm2, %v5849_v1, %v3372_v39  ;;  %vm3404_vm3 = vweird.f32 %v5851_v31 }
 0x29d   : > { %v7743_v3 = vadd.f32 1.0, %v5853_v56  ;;  %v2136_v8 = vpop.f32.mrf.mxu3  ;;  %v3381_v23 = vsel %vm3378_vm4, %v3380_v34, %v3376_v30  ;;  %vm3405_vm6 = vmor %vm3403_vm5, %vm3404_vm3 }
 0x29e   : > { %v3400_v28 = vsub.f32 1.0, %v3399_v49  ;;  %v2137_v54 = vadd.f32 %v2136_v8, %v2048_v9  ;;  %v7766_v25 = vmul.f32 %v3381_v23, %v7668_v58  ;;  %v5658_v8 = vld [vmem:[%s9178_s7 + $0x50] sm:$0xff] }
 0x29f   : > { %5856 = vrcp.f32 %v7743_v3  ;;  %4050 = vmatpush.bf16.msra.mxu1 %v5658_v8  ;;  %vm3433_vm9 = vweird.f32 %v7743_v3  ;;  %v3437_v47 = vand.u32 2147483647, %v7743_v3 }
 0x2a0   : > { %v3401_v5 = vmul.f32 %v5851_v31, %v3400_v28  ;;  %v7756_v38 = vadd.f32 %v2225_v45, %v2137_v54  ;;  %v2049_v19 = vpop.f32.mrf.mxu2  ;;  %v7762_v45 = vpop.f32.mrf.mxu1 }
 0x2a1   : > { %v2050_v53 = vadd.f32 %v2049_v19, %v7034_v61  ;;  %vm3438_vm12 = vcmp.eq.f32.partialorder %v3437_v47, 8.507059e+37  ;;  %v9258_v19 = vld [vmem:[#allocation15_spill] sm:$0xff] }
 0x2a2   : > { %v3402_v41 = vadd.f32 %v5851_v31, %v3401_v5  ;;  %v5499_v7 = vmul.f32 -1.442695, %v7756_v38  ;;  %v5855_v26 = vpop.eup %5854 }
 0x2a3   : > { %v7760_v15 = vadd.f32 1.0, %v5855_v26 }
 0x2a4   : > { %v3406_v37 = vsel %vm3405_vm6, %v5851_v31, %v3402_v41  ;;  %5858 = vpow2.f32 %v5499_v7  ;;  %v2230_v31 = vpop.f32.mrf.mxu0 }
 0x2a5   : > { %v5857_v1 = vpop.eup %5856  ;;  %v3411_v21 = vsel %vm3408_vm7, %v3410_v6, %v3406_v37  ;;  %v2138_v56 = vpop.f32.mrf.mxu3  ;;  %5860 = vrcp.f32 %v7760_v15  ;;  %2367 = vmatmul.bf16.gmra.mxu2 %v6975_v33  ;;  %v3467_v41 = vand.u32 2147483647, %v7760_v15  ;;  %v3469_v7 = vand.u32 2147483648, %v7760_v15 }
 0x2a6   : > { %v7769_v39 = vmul.f32 %v3411_v21, %v7687_v40  ;;  %v3429_v49 = vmul.f32 %v5857_v1, %v7743_v3  ;;  %v2139_v9 = vadd.f32 %v2138_v56, %v2050_v53  ;;  %vm3434_vm8 = vweird.f32 %v5857_v1 }
 0x2a7   : > { %vm7796_vm10 = vmor %vm3433_vm9, %vm3434_vm8  ;;  %vm3463_vm13 = vweird.f32 %v7760_v15  ;;  %v3470_v8 = vor.u32 1.1754944e-38, %v3469_v7  ;;  %vm3468_vm15 = vcmp.eq.f32.partialorder %v3467_v41, 8.507059e+37 }
 0x2a8   : > { %v3430_v60 = vsub.f32 1.0, %v3429_v49  ;;  %v3812_v58 = vpack.c.bf16 %v7769_v39, %v7766_v25  ;;  %v7779_v12 = vadd.f32 %v2227_v36, %v2139_v9  ;;  %v2052_v40 = vpop.f32.mrf.mxu2  ;;  %v7792_v34 = vpop.f32.mrf.mxu1 }
 0x2a9   : > { %2456 = vmatmul.bf16.gmra.mxu3 %v6945_v44  ;;  %v2053_v30 = vadd.f32 %v2052_v40, %v7034_v61  ;;  %v3439_v44 = vand.u32 2147483648, %v7743_v3 }
 0x2aa   : > { %v5859_v28 = vpop.eup %5858  ;;  %v3431_v54 = vmul.f32 %v5857_v1, %v3430_v60  ;;  %v5501_v33 = vmul.f32 -1.442695, %v7779_v12  ;;  %3994 = vmatmul.bf16.gmra.mxu0 %v3804_v27 }
 0x2ab   : > { %v7782_v29 = vadd.f32 1.0, %v5859_v28  ;;  %v5861_v59 = vpop.eup %5860  ;;  %v3440_v3 = vor.u32 1.1754944e-38, %v3439_v44 }
 0x2ac   : > { %v3432_v2 = vadd.f32 %v5857_v1, %v3431_v54  ;;  %v3459_v36 = vmul.f32 %v5861_v59, %v7760_v15  ;;  %v2232_v26 = vpop.f32.mrf.mxu0  ;;  %vm3464_vm11 = vweird.f32 %v5861_v59 }
 0x2ad   : > { %5862 = vrcp.f32 %v7782_v29  ;;  %v2141_v5 = vpop.f32.mrf.mxu3  ;;  %vm3465_vm14 = vmor %vm3463_vm13, %vm3464_vm11  ;;  %vm3493_vm1 = vweird.f32 %v7782_v29  ;;  %v3497_v24 = vand.u32 2147483647, %v7782_v29 }
 0x2ae   : > { %5864 = vpow2.f32 %v5501_v33  ;;  %v3460_v43 = vsub.f32 1.0, %v3459_v36  ;;  %v2142_v27 = vadd.f32 %v2141_v5, %v2053_v30  ;;  %v3436_v23 = vsel %vm7796_vm10, %v5857_v1, %v3432_v2 }
 0x2af   : > { %v3441_v60 = vsel %vm3438_vm12, %v3440_v3, %v3436_v23  ;;  %vm3498_vm4 = vcmp.eq.f32.partialorder %v3497_v24, 8.507059e+37 }
 0x2b0   : > { %v3461_v6 = vmul.f32 %v5861_v59, %v3460_v43  ;;  %v7804_v37 = vadd.f32 %v2230_v31, %v2142_v27  ;;  %v2054_v21 = vpop.f32.mrf.mxu2  ;;  %v7815_v15 = vmul.f32 %v3441_v60, %v7711_v4  ;;  %v7822_v44 = vpop.f32.mrf.mxu1 }
 0x2b1   : > { %v2055_v31 = vadd.f32 %v2054_v21, %v7034_v61  ;;  %v3499_v21 = vand.u32 2147483648, %v7782_v29 }
 0x2b2   : > { %v3462_v56 = vadd.f32 %v5861_v59, %v3461_v6  ;;  %v5503_v49 = vmul.f32 -1.442695, %v7804_v37 }
 0x2b3   : > { %v7806_v53 = vpop.eup %5862 }
 0x2b4   : > { %v5865_v9 = vpop.eup %5864  ;;  %v3489_v1 = vmul.f32 %v7806_v53, %v7782_v29  ;;  %v3466_v40 = vsel %vm3465_vm14, %v5861_v59, %v3462_v56  ;;  %5866 = vpow2.f32 %v5503_v49  ;;  %v2235_v27 = vpop.f32.mrf.mxu0  ;;  %vm3494_vm0 = vweird.f32 %v7806_v53 }
 0x2b5   : > { %v2754_v28 = vadd.f32 1.0, %v5865_v9  ;;  %v2143_v54 = vpop.f32.mrf.mxu3  ;;  %v3471_v33 = vsel %vm3468_vm15, %v3470_v8, %v3466_v40  ;;  %2372 = vmatmul.bf16.gmra.mxu2 %v6989_v18  ;;  %vm7843_vm2 = vmor %vm3493_vm1, %vm3494_vm0  ;;  %v3500_v29 = vor.u32 1.1754944e-38, %v3499_v21 }
 0x2b6   : > { %v3490_v2 = vsub.f32 1.0, %v3489_v1  ;;  %v2144_v36 = vadd.f32 %v2143_v54, %v2055_v31  ;;  %v7818_v30 = vmul.f32 %v3471_v33, %v7729_v42 }
 0x2b7   : > { %5868 = vrcp.f32 %v2754_v28  ;;  %v3527_v40 = vand.u32 2147483647, %v2754_v28  ;;  %vm3523_vm5 = vweird.f32 %v2754_v28 }
 0x2b8   : > { %v7820_v5 = vadd.f32 %v2232_v26, %v2144_v36  ;;  %v2057_v59 = vpop.f32.mrf.mxu2  ;;  %v3814_v47 = vpack.c.bf16 %v7818_v30, %v7815_v15  ;;  %v3491_v43 = vmul.f32 %v7806_v53, %v3490_v2  ;;  %v7841_v56 = vpop.f32.mrf.mxu1 }
 0x2b9   : > { %2461 = vmatmul.bf16.gmra.mxu3 %v9258_v19  ;;  %v2058_v7 = vadd.f32 %v2057_v59, %v7034_v61  ;;  %vm3528_vm7 = vcmp.eq.f32.partialorder %v3527_v40, 8.507059e+37 }
 0x2ba   : > { %v5505_v18 = vmul.f32 -1.442695, %v7820_v5  ;;  %v5867_v4 = vpop.eup %5866  ;;  %3999 = vmatmul.bf16.gmra.mxu0 %v3806_v22  ;;  %v3492_v23 = vadd.f32 %v7806_v53, %v3491_v43  ;;  %v3529_v22 = vand.u32 2147483648, %v2754_v28 }
 0x2bb   : > { %v7832_v42 = vadd.f32 1.0, %v5867_v4 }
 0x2bc   : > { %5870 = vpow2.f32 %v5505_v18  ;;  %v3496_v1 = vsel %vm7843_vm2, %v7806_v53, %v3492_v23  ;;  %v3530_v59 = vor.u32 1.1754944e-38, %v3529_v22  ;;  %v2237_v43 = vpop.f32.mrf.mxu0  ;;  %v9262_v22 = vld [vmem:[#allocation16_spill] sm:$0xff] }
 0x2bd   : > { %v5869_v41 = vpop.eup %5868  ;;  %v2146_v26 = vpop.f32.mrf.mxu3  ;;  %5872 = vrcp.f32 %v7832_v42  ;;  %vm3553_vm9 = vweird.f32 %v7832_v42  ;;  %v3557_v16 = vand.u32 2147483647, %v7832_v42 }
 0x2be   : > { %v3519_v6 = vmul.f32 %v5869_v41, %v2754_v28  ;;  %v2147_v3 = vadd.f32 %v2146_v26, %v2058_v7  ;;  %vm3524_vm3 = vweird.f32 %v5869_v41  ;;  %v9261_v7 = vld [vmem:[#allocation18_spill] sm:$0xff] }
 0x2bf   : > { %vm3525_vm6 = vmor %vm3523_vm5, %vm3524_vm3  ;;  %vm3558_vm12 = vcmp.eq.f32.partialorder %v3557_v16, 8.507059e+37 }
 0x2c0   : > { %v3520_v62 = vsub.f32 1.0, %v3519_v6  ;;  %v7847_v9 = vadd.f32 %v2235_v27, %v2147_v3  ;;  %v2059_v60 = vpop.f32.mrf.mxu2  ;;  %v3501_v27 = vsel %vm3498_vm4, %v3500_v29, %v3496_v1  ;;  %v5657_v6 = vld [vmem:[%s9178_s7 + $0x48] sm:$0xff]  ;;  %v3559_v29 = vand.u32 2147483648, %v7832_v42 }
 0x2c1   : > { %v2060_v18 = vadd.f32 %v2059_v60, %v7034_v61  ;;  %v7866_v21 = vmul.f32 %v3501_v27, %v7756_v38  ;;  %4051 = vmatpush.bf16.msra.mxu1 %v5657_v6 }
 0x2c2   : > { %v5871_v8 = vpop.eup %5870  ;;  %v3521_v31 = vmul.f32 %v5869_v41, %v3520_v62  ;;  %v5507_v33 = vmul.f32 -1.442695, %v7847_v9 }
 0x2c3   : > { %v7852_v54 = vadd.f32 1.0, %v5871_v8  ;;  %v7855_v2 = vpop.eup %5872  ;;  %v7877_v8 = vpop.f32.mrf.mxu1 }
 0x2c4   : > { %v3522_v36 = vadd.f32 %v5869_v41, %v3521_v31  ;;  %v3549_v53 = vmul.f32 %v7855_v2, %v7832_v42  ;;  %vm3554_vm8 = vweird.f32 %v7855_v2 }
 0x2c5   : > { %5874 = vrcp.f32 %v7852_v54  ;;  %v2148_v19 = vpop.f32.mrf.mxu3  ;;  %2377 = vmatmul.bf16.gmra.mxu2 %v9261_v7  ;;  %vm7892_vm10 = vmor %vm3553_vm9, %vm3554_vm8  ;;  %v3587_v27 = vand.u32 2147483647, %v7852_v54  ;;  %vm3583_vm13 = vweird.f32 %v7852_v54 }
 0x2c6   : > { %v3526_v4 = vsel %vm3525_vm6, %v5869_v41, %v3522_v36  ;;  %5876 = vpow2.f32 %v5507_v33  ;;  %v3550_v23 = vsub.f32 1.0, %v3549_v53  ;;  %v2149_v28 = vadd.f32 %v2148_v19, %v2060_v18 }
 0x2c7   : > { %v3531_v26 = vsel %vm3528_vm7, %v3530_v59, %v3526_v4  ;;  %v3589_v53 = vand.u32 2147483648, %v7852_v54  ;;  %v3560_v4 = vor.u32 1.1754944e-38, %v3559_v29  ;;  %vm3588_vm15 = vcmp.eq.f32.partialorder %v3587_v27, 8.507059e+37 }
 0x2c8   : > { %v7869_v3 = vmul.f32 %v3531_v26, %v7779_v12  ;;  %v3551_v24 = vmul.f32 %v7855_v2, %v3550_v23  ;;  %v7872_v41 = vadd.f32 %v2237_v43, %v2149_v28  ;;  %v2062_v62 = vpop.f32.mrf.mxu2 }
 0x2c9   : > { %2466 = vmatmul.bf16.gmra.mxu3 %v9262_v22  ;;  %v2063_v40 = vadd.f32 %v2062_v62, %v7034_v61  ;;  %v3590_v62 = vor.u32 1.1754944e-38, %v3589_v53  ;;  %v9266_v53 = vld [vmem:[#allocation17_spill] sm:$0xff] }
 0x2ca   : > { %v3816_v49 = vpack.c.bf16 %v7869_v3, %v7866_v21  ;;  %v5509_v38 = vmul.f32 -1.442695, %v7872_v41  ;;  %4004 = vmatmul.bf16.gmra.mxu0 %v3808_v17  ;;  %v3552_v1 = vadd.f32 %v7855_v2, %v3551_v24  ;;  %v2240_v17 = vpop.f32.mrf.mxu0 }
 0x2cb   : > { %v5875_v60 = vpop.eup %5874  ;;  %v7906_v6 = vpop.f32.mrf.mxu1 }
 0x2cc   : > { %v5877_v12 = vpop.eup %5876  ;;  %v3579_v31 = vmul.f32 %v5875_v60, %v7852_v54  ;;  %5878 = vpow2.f32 %v5509_v38  ;;  %v3556_v18 = vsel %vm7892_vm10, %v7855_v2, %v3552_v1  ;;  %vm3584_vm11 = vweird.f32 %v5875_v60 }
 0x2cd   : > { %v7888_v33 = vadd.f32 1.0, %v5877_v12  ;;  %v2151_v36 = vpop.f32.mrf.mxu3  ;;  %v3561_v24 = vsel %vm3558_vm12, %v3560_v4, %v3556_v18  ;;  %vm3585_vm14 = vmor %vm3583_vm13, %vm3584_vm11  ;;  %v9267_v18 = vld [vmem:[#allocation25_spill] sm:$0xff] }
 0x2ce   : > { %v3580_v50 = vsub.f32 1.0, %v3579_v31  ;;  %v2152_v59 = vadd.f32 %v2151_v36, %v2063_v40  ;;  %v7912_v54 = vmul.f32 %v3561_v24, %v7804_v37  ;;  %v6086_v36 = vld [vmem:[%s9177_s6] sm:$0x3] }
 0x2cf   : > { %5880 = vrcp.f32 %v7888_v33  ;;  %v7923_v16 = vperm.slane %v6086_v36, 1  ;;  %vm3613_vm1 = vweird.f32 %v7888_v33 }
 0x2d0   : > { %v3581_v19 = vmul.f32 %v5875_v60, %v3580_v50  ;;  %v7902_v42 = vadd.f32 %v2240_v17, %v2152_v59  ;;  %v2064_v7 = vpop.f32.mrf.mxu2 }
 0x2d1   : > { %v2065_v1 = vadd.f32 %v2064_v7, %v7034_v61 }
 0x2d2   : > { %v3582_v26 = vadd.f32 %v5875_v60, %v3581_v19  ;;  %v5511_v23 = vmul.f32 -1.442695, %v7902_v42  ;;  %v5879_v28 = vpop.eup %5878  ;;  %v2242_v17 = vpop.f32.mrf.mxu0  ;;  %v2255_v19 = vadd.f32 %v9267_v18, %v7923_v16 }
 0x2d3   : > { %v7908_v2 = vadd.f32 1.0, %v5879_v28 }
 0x2d4   : > { %v3586_v22 = vsel %vm3585_vm14, %v5875_v60, %v3582_v26  ;;  %5882 = vpow2.f32 %v5511_v23  ;;  %v9265_v60 = vld [vmem:[#allocation20_spill] sm:$0xff]  ;;  %v7938_v23 = vpop.f32.mrf.mxu1 }
 0x2d5   : > { %v5881_v38 = vpop.eup %5880  ;;  %v3591_v12 = vsel %vm3588_vm15, %v3590_v62, %v3586_v22  ;;  %v2153_v31 = vpop.f32.mrf.mxu3  ;;  %5884 = vrcp.f32 %v7908_v2  ;;  %2382 = vmatmul.bf16.gmra.mxu2 %v9265_v60  ;;  %vm3643_vm5 = vweird.f32 %v7908_v2 }
 0x2d6   : > { %v7915_v40 = vmul.f32 %v3591_v12, %v7820_v5  ;;  %v3609_v29 = vmul.f32 %v5881_v38, %v7888_v33  ;;  %v2154_v61 = vadd.f32 %v2153_v31, %v2065_v1  ;;  %vm3614_vm0 = vweird.f32 %v5881_v38 }
 0x2d7   : > { %v3619_v12 = vand.u32 2147483648, %v7888_v33  ;;  %v3617_v1 = vand.u32 2147483647, %v7888_v33  ;;  %vm7947_vm2 = vmor %vm3613_vm1, %vm3614_vm0  ;;  %v3647_v31 = vand.u32 2147483647, %v7908_v2  ;;  %v2257_v33 = vadd.f32 %v7197_v46, %v7923_v16 }
 0x2d8   : > { %v3610_v50 = vsub.f32 1.0, %v3609_v29  ;;  %v3818_v37 = vpack.c.bf16 %v7915_v40, %v7912_v54  ;;  %v7927_v5 = vadd.f32 %v2242_v17, %v2154_v61  ;;  %v2343_v59 = vpop.f32.mrf.mxu2  ;;  %v3649_v29 = vand.u32 2147483648, %v7908_v2 }
 0x2d9   : > { %2471 = vmatmul.bf16.gmra.mxu3 %v9266_v53  ;;  %v2344_v62 = vadd.f32 %v2343_v59, %v2255_v19  ;;  %v3620_v17 = vor.u32 1.1754944e-38, %v3619_v12  ;;  %vm3618_vm4 = vcmp.eq.f32.partialorder %v3617_v1, 8.507059e+37  ;;  %vm3648_vm7 = vcmp.eq.f32.partialorder %v3647_v31, 8.507059e+37 }
 0x2da   : > { %v5883_v43 = vpop.eup %5882  ;;  %v3611_v27 = vmul.f32 %v5881_v38, %v3610_v50  ;;  %v5513_v7 = vmul.f32 -1.442695, %v7927_v5  ;;  %4009 = vmatmul.bf16.gmra.mxu0 %v3810_v57 }
 0x2db   : > { %v7932_v4 = vadd.f32 1.0, %v5883_v43  ;;  %v5885_v26 = vpop.eup %5884 }
 0x2dc   : > { %v3612_v28 = vadd.f32 %v5881_v38, %v3611_v27  ;;  %v3639_v24 = vmul.f32 %v5885_v26, %v7908_v2  ;;  %vm3644_vm3 = vweird.f32 %v5885_v26  ;;  %v5656_v2 = vld [vmem:[%s9178_s7 + $0x40] sm:$0xff]  ;;  %v7971_v12 = vpop.f32.mrf.mxu1 }
 0x2dd   : > { %5886 = vrcp.f32 %v7932_v4  ;;  %v2432_v22 = vpop.f32.mrf.mxu3  ;;  %vm3645_vm6 = vmor %vm3643_vm5, %vm3644_vm3  ;;  %4052 = vmatpush.bf16.msra.mxu1 %v5656_v2  ;;  %vm3673_vm9 = vweird.f32 %v7932_v4 }
 0x2de   : > { %5888 = vpow2.f32 %v5513_v7  ;;  %v3640_v11 = vsub.f32 1.0, %v3639_v24  ;;  %v7945_v32 = vadd.f32 %v2432_v22, %v2344_v62  ;;  %v3616_v60 = vsel %vm7947_vm2, %v5881_v38, %v3612_v28  ;;  %v9270_v22 = vld [vmem:[#allocation22_spill] sm:$0xff] }
 0x2df   : > { %v3621_v53 = vsel %vm3618_vm4, %v3620_v17, %v3616_v60  ;;  %v3650_v38 = vor.u32 1.1754944e-38, %v3649_v29 }
 0x2e0   : > { %v3641_v36 = vmul.f32 %v5885_v26, %v3640_v11  ;;  %v5452_v61 = vmul.f32 -1.442695, %v7945_v32  ;;  %v2345_v50 = vpop.f32.mrf.mxu2  ;;  %v7974_v1 = vmul.f32 %v3621_v53, %v7847_v9  ;;  %v2260_v9 = vadd.f32 %v7239_v10, %v7923_v16 }
 0x2e1   : > { %v2346_v19 = vadd.f32 %v2345_v50, %v2257_v33  ;;  %v3679_v53 = vand.u32 2147483648, %v7932_v4 }
 0x2e2   : > { %v3642_v43 = vadd.f32 %v5885_v26, %v3641_v36  ;;  %5890 = vpow2.f32 %v5452_v61  ;;  %v9271_v61 = vld [vmem:[#allocation19_spill] sm:$0xff] }
 0x2e3   : > { %v7958_v59 = vpop.eup %5886 }
 0x2e4   : > { %v5889_v27 = vpop.eup %5888  ;;  %v3669_v18 = vmul.f32 %v7958_v59, %v7932_v4  ;;  %v3646_v7 = vsel %vm3645_vm6, %v5885_v26, %v3642_v43  ;;  %vm3674_vm8 = vweird.f32 %v7958_v59  ;;  %v8000_v39 = vpop.f32.mrf.mxu1 }
 0x2e5   : > { %v7963_v28 = vadd.f32 1.0, %v5889_v27  ;;  %v2434_v46 = vpop.f32.mrf.mxu3  ;;  %v3651_v24 = vsel %vm3648_vm7, %v3650_v38, %v3646_v7  ;;  %2387 = vmatmul.bf16.gmra.mxu2 %v9270_v22  ;;  %v2262_v22 = vadd.f32 %v7308_v51, %v7923_v16  ;;  %vm8011_vm10 = vmor %vm3673_vm9, %vm3674_vm8 }
 0x2e6   : > { %v7965_v62 = vadd.f32 %v2434_v46, %v2346_v19  ;;  %v7977_v26 = vmul.f32 %v3651_v24, %v7872_v41  ;;  %v3670_v11 = vsub.f32 1.0, %v3669_v18 }
 0x2e7   : > { %5892 = vrcp.f32 %v7963_v28  ;;  %v3709_v18 = vand.u32 2147483648, %v7963_v28  ;;  %vm3703_vm12 = vweird.f32 %v7963_v28 }
 0x2e8   : > { %v5454_v57 = vmul.f32 -1.442695, %v7965_v62  ;;  %v5891_v31 = vpop.eup %5890  ;;  %v2348_v29 = vpop.f32.mrf.mxu2  ;;  %v3820_v60 = vpack.c.bf16 %v7977_v26, %v7974_v1  ;;  %v3671_v41 = vmul.f32 %v7958_v59, %v3670_v11 }
 0x2e9   : > { %v7983_v36 = vadd.f32 1.0, %v5891_v31  ;;  %2476 = vmatmul.bf16.gmra.mxu3 %v9271_v61  ;;  %v2349_v33 = vadd.f32 %v2348_v29, %v2260_v9  ;;  %v3680_v31 = vor.u32 1.1754944e-38, %v3679_v53  ;;  %v8023_v9 = vpop.f32.mrf.mxu0  ;;  %v9274_v53 = vld [vmem:[#allocation24_spill] sm:$0xff] }
 0x2ea   : > { %5894 = vpow2.f32 %v5454_v57  ;;  %4014 = vmatmul.bf16.gmra.mxu0 %v3812_v58  ;;  %v3672_v27 = vadd.f32 %v7958_v59, %v3671_v41  ;;  %v3677_v58 = vand.u32 2147483647, %v7932_v4  ;;  %v3707_v4 = vand.u32 2147483647, %v7963_v28 }
 0x2eb   : > { %5896 = vrcp.f32 %v7983_v36  ;;  %v3710_v41 = vor.u32 1.1754944e-38, %v3709_v18  ;;  %v2265_v18 = vadd.f32 %v7358_v35, %v7923_v16  ;;  %vm2788_vm1 = vweird.f32 %v7983_v36 }
 0x2ec   : > { %v3676_v57 = vsel %vm8011_vm10, %v7958_v59, %v3672_v27  ;;  %vm3678_vm13 = vcmp.eq.f32.partialorder %v3677_v58, 8.507059e+37  ;;  %vm3708_vm15 = vcmp.eq.f32.partialorder %v3707_v4, 8.507059e+37  ;;  %v8042_v4 = vpop.f32.mrf.mxu1 }
 0x2ed   : > { %v5893_v50 = vpop.eup %5892  ;;  %v2437_v17 = vpop.f32.mrf.mxu3 }
 0x2ee   : > { %v3699_v43 = vmul.f32 %v5893_v50, %v7963_v28  ;;  %v7997_v10 = vadd.f32 %v2437_v17, %v2349_v33  ;;  %vm3704_vm11 = vweird.f32 %v5893_v50 }
 0x2ef   : > { %vm3705_vm14 = vmor %vm3703_vm12, %vm3704_vm11 }
 0x2f0   : > { %v5895_v38 = vpop.eup %5894  ;;  %v3700_v25 = vsub.f32 1.0, %v3699_v43  ;;  %v5456_v7 = vmul.f32 -1.442695, %v7997_v10  ;;  %v2350_v46 = vpop.f32.mrf.mxu2  ;;  %v3681_v43 = vsel %vm3678_vm13, %v3680_v31, %v3676_v57  ;;  %v2794_v57 = vand.u32 2147483648, %v7983_v36 }
 0x2f1   : > { %v8004_v19 = vadd.f32 1.0, %v5895_v38  ;;  %v8007_v24 = vpop.eup %5896  ;;  %v2351_v51 = vadd.f32 %v2350_v46, %v2262_v22  ;;  %v8036_v46 = vmul.f32 %v3681_v43, %v7902_v42  ;;  %v2792_v42 = vand.u32 2147483647, %v7983_v36 }
 0x2f2   : > { %v3701_v11 = vmul.f32 %v5893_v50, %v3700_v25  ;;  %v2784_v29 = vmul.f32 %v8007_v24, %v7983_v36  ;;  %vm2789_vm0 = vweird.f32 %v8007_v24  ;;  %v2795_v43 = vor.u32 1.1754944e-38, %v2794_v57 }
 0x2f3   : > { %5898 = vrcp.f32 %v8004_v19  ;;  %vm8054_vm2 = vmor %vm2788_vm1, %vm2789_vm0  ;;  %vm2793_vm4 = vcmp.eq.f32.partialorder %v2792_v42, 8.507059e+37  ;;  %vm2818_vm5 = vweird.f32 %v8004_v19 }
 0x2f4   : > { %v3702_v61 = vadd.f32 %v5893_v50, %v3701_v11  ;;  %5900 = vpow2.f32 %v5456_v7  ;;  %v2785_v33 = vsub.f32 1.0, %v2784_v29 }
 0x2f5   : > { %v2439_v17 = vpop.f32.mrf.mxu3  ;;  %2392 = vmatmul.bf16.gmra.mxu2 %v9274_v53 }
 0x2f6   : > { %v3706_v59 = vsel %vm3705_vm14, %v5893_v50, %v3702_v61  ;;  %v8025_v27 = vadd.f32 %v2439_v17, %v2351_v51  ;;  %v2786_v25 = vmul.f32 %v8007_v24, %v2785_v33  ;;  %v2824_v33 = vand.u32 2147483648, %v8004_v19  ;;  %v8066_v17 = vpop.f32.mrf.mxu0 }
 0x2f7   : > { %v3711_v38 = vsel %vm3708_vm15, %v3710_v41, %v3706_v59  ;;  %v2822_v41 = vand.u32 2147483647, %v8004_v19 }
 0x2f8   : > { %v8030_v28 = vmul.f32 %v3711_v38, %v7927_v5  ;;  %v5458_v7 = vmul.f32 -1.442695, %v8025_v27  ;;  %v2353_v50 = vpop.f32.mrf.mxu2  ;;  %v2787_v2 = vadd.f32 %v8007_v24, %v2786_v25  ;;  %v9275_v5 = vld [vmem:[#allocation21_spill] sm:$0xff] }
 0x2f9   : > { %v5899_v58 = vpop.eup %5898  ;;  %2481 = vmatmul.bf16.gmra.mxu3 %v9275_v5  ;;  %v2354_v61 = vadd.f32 %v2353_v50, %v2265_v18  ;;  %v2267_v50 = vadd.f32 %v7404_v52, %v7923_v16  ;;  %vm2823_vm7 = vcmp.eq.f32.partialorder %v2822_v41, 8.507059e+37 }
 0x2fa   : > { %v5901_v22 = vpop.eup %5900  ;;  %v2814_v11 = vmul.f32 %v5899_v58, %v8004_v19  ;;  %5902 = vpow2.f32 %v5458_v7  ;;  %4019 = vmatmul.bf16.gmra.mxu0 %v3814_v47  ;;  %v3822_v35 = vpack.c.bf16 %v8030_v28, %v8036_v46  ;;  %v2791_v30 = vsel %vm8054_vm2, %v8007_v24, %v2787_v2 }
 0x2fb   : > { %v8045_v31 = vadd.f32 1.0, %v5901_v22  ;;  %vm2819_vm3 = vweird.f32 %v5899_v58  ;;  %v2796_v25 = vsel %vm2793_vm4, %v2795_v43, %v2791_v30  ;;  %v2825_v7 = vor.u32 1.1754944e-38, %v2824_v33 }
 0x2fc   : > { %v2815_v29 = vsub.f32 1.0, %v2814_v11  ;;  %vm2820_vm6 = vmor %vm2818_vm5, %vm2819_vm3  ;;  %v3729_v19 = vmul.f32 %v2796_v25, %v7945_v32  ;;  %v9279_v25 = vld [vmem:[#allocation23_spill] sm:$0xff] }
 0x2fd   : > { %5904 = vrcp.f32 %v8045_v31  ;;  %v2442_v15 = vpop.f32.mrf.mxu3  ;;  %vm2848_vm9 = vweird.f32 %v8045_v31 }
 0x2fe   : > { %v2816_v47 = vmul.f32 %v5899_v58, %v2815_v29  ;;  %v8064_v36 = vadd.f32 %v2442_v15, %v2354_v61  ;;  %v8078_v29 = vpop.f32.mrf.mxu1 }
 0x300   : > { %v5903_v59 = vpop.eup %5902  ;;  %v2817_v53 = vadd.f32 %v5899_v58, %v2816_v47  ;;  %v5460_v38 = vmul.f32 -1.442695, %v8064_v36  ;;  %v2355_v24 = vpop.f32.mrf.mxu2 }
 0x301   : > { %v8070_v18 = vadd.f32 1.0, %v5903_v59  ;;  %v2356_v42 = vadd.f32 %v2355_v24, %v2267_v50  ;;  %v8086_v47 = vpop.f32.mrf.mxu0 }
 0x302   : > { %v2821_v22 = vsel %vm2820_vm6, %v5899_v58, %v2817_v53  ;;  %5906 = vpow2.f32 %v5460_v38  ;;  %v9278_v58 = vld [vmem:[#allocation27_spill] sm:$0xff] }
 0x303   : > { %v5905_v2 = vpop.eup %5904  ;;  %v2826_v11 = vsel %vm2823_vm7, %v2825_v7, %v2821_v22  ;;  %5908 = vrcp.f32 %v8070_v18  ;;  %v2854_v7 = vand.u32 2147483648, %v8045_v31  ;;  %vm2878_vm13 = vweird.f32 %v8070_v18  ;;  %v9282_v22 = vld [vmem:[#allocation29_spill] sm:$0xff] }
 0x304   : > { %v3731_v5 = vmul.f32 %v2826_v11, %v7965_v62  ;;  %v2844_v57 = vmul.f32 %v5905_v2, %v8045_v31  ;;  %v2270_v62 = vadd.f32 %v7455_v14, %v7923_v16  ;;  %vm2849_vm8 = vweird.f32 %v5905_v2 }
 0x305   : > { %v2444_v61 = vpop.f32.mrf.mxu3  ;;  %2397 = vmatmul.bf16.gmra.mxu2 %v9278_v58  ;;  %v2852_v14 = vand.u32 2147483647, %v8045_v31  ;;  %vm8099_vm10 = vmor %vm2848_vm9, %vm2849_vm8  ;;  %v2882_v11 = vand.u32 2147483647, %v8070_v18  ;;  %v2855_v31 = vor.u32 1.1754944e-38, %v2854_v7  ;;  %v2272_v58 = vadd.f32 %v7486_v20, %v7923_v16 }
 0x306   : > { %v3793_v51 = vpack.c.bf16 %v3731_v5, %v3729_v19  ;;  %v2845_v33 = vsub.f32 1.0, %v2844_v57  ;;  %v8080_v52 = vadd.f32 %v2444_v61, %v2356_v42  ;;  %v2884_v19 = vand.u32 2147483648, %v8070_v18 }
 0x307   : > { %vm2853_vm12 = vcmp.eq.f32.partialorder %v2852_v14, 8.507059e+37  ;;  %vm2883_vm15 = vcmp.eq.f32.partialorder %v2882_v11, 8.507059e+37 }
 0x308   : > { %v5907_v41 = vpop.eup %5906  ;;  %v2846_v15 = vmul.f32 %v5905_v2, %v2845_v33  ;;  %v5462_v30 = vmul.f32 -1.442695, %v8080_v52  ;;  %4053 = vmatmul.bf16.vlgmr.msra.gmra.mxu1 %v3793_v51  ;;  %v2358_v59 = vpop.f32.mrf.mxu2 }
 0x309   : > { %v5909_v32 = vpop.eup %5908  ;;  %v8088_v43 = vadd.f32 1.0, %v5907_v41  ;;  %2486 = vmatmul.bf16.gmra.mxu3 %v9279_v25  ;;  %v2359_v50 = vadd.f32 %v2358_v59, %v2270_v62 }
 0x30a   : > { %v2847_v53 = vadd.f32 %v5905_v2, %v2846_v15  ;;  %v2874_v38 = vmul.f32 %v5909_v32, %v8070_v18  ;;  %5910 = vpow2.f32 %v5462_v30  ;;  %4024 = vmatmul.bf16.gmra.mxu0 %v3816_v49  ;;  %vm2879_vm11 = vweird.f32 %v5909_v32  ;;  %v8109_v49 = vpop.f32.mrf.mxu1 }
 0x30b   : > { %5912 = vrcp.f32 %v8088_v43  ;;  %vm2880_vm14 = vmor %vm2878_vm13, %vm2879_vm11  ;;  %vm2908_vm1 = vweird.f32 %v8088_v43 }
 0x30c   : > { %v2875_v24 = vsub.f32 1.0, %v2874_v38  ;;  %v2851_v57 = vsel %vm8099_vm10, %v5905_v2, %v2847_v53  ;;  %v2885_v2 = vor.u32 1.1754944e-38, %v2884_v19  ;;  %v8116_v53 = vpop.f32.mrf.mxu0 }
 0x30d   : > { %v2447_v5 = vpop.f32.mrf.mxu3  ;;  %v2856_v41 = vsel %vm2853_vm12, %v2855_v31, %v2851_v57  ;;  %v2275_v57 = vadd.f32 %v7734_v48, %v7923_v16  ;;  %v2912_v48 = vand.u32 2147483647, %v8088_v43 }
 0x30e   : > { %v2876_v21 = vmul.f32 %v5909_v32, %v2875_v24  ;;  %v8107_v3 = vadd.f32 %v2447_v5, %v2359_v50  ;;  %v3733_v18 = vmul.f32 %v2856_v41, %v7997_v10 }
 0x30f   : > { %vm2913_vm4 = vcmp.eq.f32.partialorder %v2912_v48, 8.507059e+37 }
 0x310   : > { %v5911_v42 = vpop.eup %5910  ;;  %v2877_v61 = vadd.f32 %v5909_v32, %v2876_v21  ;;  %v5464_v51 = vmul.f32 -1.442695, %v8107_v3  ;;  %v2360_v30 = vpop.f32.mrf.mxu2 }
 0x311   : > { %v5913_v33 = vpop.eup %5912  ;;  %v2715_v15 = vadd.f32 1.0, %v5911_v42  ;;  %v2361_v20 = vadd.f32 %v2360_v30, %v2272_v58 }
 0x312   : > { %v2881_v62 = vsel %vm2880_vm14, %v5909_v32, %v2877_v61  ;;  %v2904_v59 = vmul.f32 %v5913_v33, %v8088_v43  ;;  %5914 = vpow2.f32 %v5464_v51  ;;  %v8126_v10 = vpop.f32.mrf.mxu1  ;;  %vm2909_vm0 = vweird.f32 %v5913_v33  ;;  %v9283_v61 = vld [vmem:[#allocation26_spill] sm:$0xff] }
 0x313   : > { %v2886_v38 = vsel %vm2883_vm15, %v2885_v2, %v2881_v62  ;;  %5916 = vrcp.f32 %v2715_v15  ;;  %v2914_v51 = vand.u32 2147483648, %v8088_v43  ;;  %vm8140_vm2 = vmor %vm2908_vm1, %vm2909_vm0  ;;  %v2942_v62 = vand.u32 2147483647, %v2715_v15 }
 0x314   : > { %v3735_v25 = vmul.f32 %v2886_v38, %v8025_v27  ;;  %v2905_v7 = vsub.f32 1.0, %v2904_v59  ;;  %v8138_v2 = vpop.f32.mrf.mxu0  ;;  %v2944_v59 = vand.u32 2147483648, %v2715_v15  ;;  %vm2938_vm5 = vweird.f32 %v2715_v15 }
 0x315   : > { %v2449_v14 = vpop.f32.mrf.mxu3  ;;  %2402 = vmatmul.bf16.gmra.mxu2 %v9282_v22  ;;  %vm2943_vm7 = vcmp.eq.f32.partialorder %v2942_v62, 8.507059e+37 }
 0x316   : > { %v2906_v24 = vmul.f32 %v5913_v33, %v2905_v7  ;;  %v8120_v50 = vadd.f32 %v2449_v14, %v2361_v20  ;;  %v3795_v32 = vpack.c.bf16 %v3735_v25, %v3733_v18  ;;  %v2277_v14 = vadd.f32 %v7762_v45, %v7923_v16 }
 0x317   : > { %v2945_v22 = vor.u32 1.1754944e-38, %v2944_v59 }
 0x318   : > { %v5915_v11 = vpop.eup %5914  ;;  %v5466_v19 = vmul.f32 -1.442695, %v8120_v50  ;;  %4058 = vmatmul.bf16.gmra.mxu1 %v3795_v32  ;;  %v2363_v21 = vpop.f32.mrf.mxu2  ;;  %v2907_v31 = vadd.f32 %v5913_v33, %v2906_v24 }
 0x319   : > { %v5917_v5 = vpop.eup %5916  ;;  %v8128_v27 = vadd.f32 1.0, %v5915_v11  ;;  %2491 = vmatmul.bf16.gmra.mxu3 %v9283_v61  ;;  %v2364_v41 = vadd.f32 %v2363_v21, %v2275_v57 }
 0x31a   : > { %v2934_v42 = vmul.f32 %v5917_v5, %v2715_v15  ;;  %5918 = vpow2.f32 %v5466_v19  ;;  %4029 = vmatmul.bf16.gmra.mxu0 %v3818_v37  ;;  %v2911_v18 = vsel %vm8140_vm2, %v5913_v33, %v2907_v31  ;;  %vm2939_vm3 = vweird.f32 %v5917_v5  ;;  %v8157_v15 = vpop.f32.mrf.mxu1 }
 0x31b   : > { %5920 = vrcp.f32 %v8128_v27  ;;  %v2915_v37 = vor.u32 1.1754944e-38, %v2914_v51  ;;  %vm2940_vm6 = vmor %vm2938_vm5, %vm2939_vm3  ;;  %vm2968_vm9 = vweird.f32 %v8128_v27 }
 0x31c   : > { %v2935_v58 = vsub.f32 1.0, %v2934_v42 }
 0x31d   : > { %v2452_v38 = vpop.f32.mrf.mxu3  ;;  %v2916_v24 = vsel %vm2913_vm4, %v2915_v37, %v2911_v18  ;;  %v9286_v18 = vld [vmem:[#allocation28_spill] sm:$0xff] }
 0x31e   : > { %v2936_v54 = vmul.f32 %v5917_v5, %v2935_v58  ;;  %v8146_v40 = vadd.f32 %v2452_v38, %v2364_v41  ;;  %v3737_v21 = vmul.f32 %v2916_v24, %v8064_v36  ;;  %v8166_v58 = vpop.f32.mrf.mxu0  ;;  %v2280_v36 = vadd.f32 %v7792_v34, %v7923_v16 }
 0x31f   : > { %v2972_v34 = vand.u32 2147483647, %v8128_v27 }
 0x320   : > { %v5919_v43 = vpop.eup %5918  ;;  %v2937_v25 = vadd.f32 %v5917_v5, %v2936_v54  ;;  %v5468_v7 = vmul.f32 -1.442695, %v8146_v40  ;;  %v2365_v32 = vpop.f32.mrf.mxu2  ;;  %v2974_v54 = vand.u32 2147483648, %v8128_v27 }
 0x321   : > { %v8149_v20 = vpop.eup %5920  ;;  %v8153_v33 = vadd.f32 1.0, %v5919_v43  ;;  %v2366_v42 = vadd.f32 %v2365_v32, %v2277_v14  ;;  %vm2973_vm12 = vcmp.eq.f32.partialorder %v2972_v34, 8.507059e+37 }
 0x322   : > { %v2941_v11 = vsel %vm2940_vm6, %v5917_v5, %v2937_v25  ;;  %v2964_v19 = vmul.f32 %v8149_v20, %v8128_v27  ;;  %5922 = vpow2.f32 %v5468_v7  ;;  %vm2969_vm8 = vweird.f32 %v8149_v20  ;;  %v8184_v25 = vpop.f32.mrf.mxu1 }
 0x323   : > { %v2946_v57 = vsel %vm2943_vm7, %v2945_v22, %v2941_v11  ;;  %5924 = vrcp.f32 %v8153_v33  ;;  %vm8186_vm10 = vmor %vm2968_vm9, %vm2969_vm8  ;;  %v3002_v14 = vand.u32 2147483647, %v8153_v33  ;;  %v3004_v24 = vand.u32 2147483648, %v8153_v33 }
 0x324   : > { %v3739_v45 = vmul.f32 %v2946_v57, %v8080_v52  ;;  %v2965_v31 = vsub.f32 1.0, %v2964_v19  ;;  %v2975_v27 = vor.u32 1.1754944e-38, %v2974_v54  ;;  %vm2998_vm13 = vweird.f32 %v8153_v33 }
 0x325   : > { %v2454_v61 = vpop.f32.mrf.mxu3  ;;  %2407 = vmatmul.bf16.gmra.mxu2 %v7363_v13  ;;  %vm3003_vm15 = vcmp.eq.f32.partialorder %v3002_v14, 8.507059e+37 }
 0x326   : > { %v2966_v51 = vmul.f32 %v8149_v20, %v2965_v31  ;;  %v8163_v5 = vadd.f32 %v2454_v61, %v2366_v42  ;;  %v3797_v48 = vpack.c.bf16 %v3739_v45, %v3737_v21  ;;  %v2282_v21 = vadd.f32 %v7822_v44, %v7923_v16  ;;  %v8203_v45 = vpop.f32.mrf.mxu0 }
 0x327   : > { %v3005_v31 = vor.u32 1.1754944e-38, %v3004_v24 }
 0x328   : > { %v5923_v41 = vpop.eup %5922  ;;  %v5470_v30 = vmul.f32 -1.442695, %v8163_v5  ;;  %4063 = vmatmul.bf16.gmra.mxu1 %v3797_v48  ;;  %v2368_v59 = vpop.f32.mrf.mxu2  ;;  %v2967_v38 = vadd.f32 %v8149_v20, %v2966_v51 }
 0x329   : > { %v5925_v62 = vpop.eup %5924  ;;  %v8171_v52 = vadd.f32 1.0, %v5923_v41  ;;  %2496 = vmatmul.bf16.gmra.mxu3 %v9286_v18  ;;  %v2369_v43 = vadd.f32 %v2368_v59, %v2280_v36 }
 0x32a   : > { %v2994_v13 = vmul.f32 %v5925_v62, %v8153_v33  ;;  %5926 = vpow2.f32 %v5470_v30  ;;  %4034 = vmatmul.bf16.gmra.mxu0 %v3820_v60  ;;  %v2971_v1 = vsel %vm8186_vm10, %v8149_v20, %v2967_v38  ;;  %vm2999_vm11 = vweird.f32 %v5925_v62  ;;  %v8213_v18 = vpop.f32.mrf.mxu1 }
 0x32b   : > { %5928 = vrcp.f32 %v8171_v52  ;;  %v2976_v20 = vsel %vm2973_vm12, %v2975_v27, %v2971_v1  ;;  %vm3000_vm14 = vmor %vm2998_vm13, %vm2999_vm11  ;;  %v3034_v24 = vand.u32 2147483648, %v8171_v52  ;;  %vm3028_vm1 = vweird.f32 %v8171_v52 }
 0x32c   : > { %v2995_v37 = vsub.f32 1.0, %v2994_v13  ;;  %v3741_v41 = vmul.f32 %v2976_v20, %v8107_v3  ;;  %v2285_v3 = vadd.f32 %v7841_v56, %v7923_v16  ;;  %v3032_v56 = vand.u32 2147483647, %v8171_v52 }
 0x32d   : > { %v2457_v22 = vpop.f32.mrf.mxu3  ;;  %v3035_v46 = vor.u32 1.1754944e-38, %v3034_v24 }
 0x32e   : > { %v2996_v26 = vmul.f32 %v5925_v62, %v2995_v37  ;;  %v8195_v60 = vadd.f32 %v2457_v22, %v2369_v43  ;;  %vm3033_vm4 = vcmp.eq.f32.partialorder %v3032_v56, 8.507059e+37  ;;  %v9291_v56 = vld [vmem:[#allocation30_spill] sm:$0xff] }
 0x330   : > { %v5927_v32 = vpop.eup %5926  ;;  %v2997_v11 = vadd.f32 %v5925_v62, %v2996_v26  ;;  %v5472_v19 = vmul.f32 -1.442695, %v8195_v60  ;;  %v2370_v61 = vpop.f32.mrf.mxu2 }
 0x331   : > { %v8199_v57 = vpop.eup %5928  ;;  %v2723_v42 = vadd.f32 1.0, %v5927_v32  ;;  %v2371_v36 = vadd.f32 %v2370_v61, %v2282_v21 }
 0x332   : > { %v3001_v51 = vsel %vm3000_vm14, %v5925_v62, %v2997_v11  ;;  %v3024_v48 = vmul.f32 %v8199_v57, %v8171_v52  ;;  %5930 = vpow2.f32 %v5472_v19  ;;  %vm3029_vm0 = vweird.f32 %v8199_v57  ;;  %v8244_v61 = vpop.f32.mrf.mxu1 }
 0x333   : > { %v3006_v33 = vsel %vm3003_vm15, %v3005_v31, %v3001_v51  ;;  %5932 = vrcp.f32 %v2723_v42  ;;  %vm8232_vm2 = vmor %vm3028_vm1, %vm3029_vm0  ;;  %v3064_v27 = vand.u32 2147483648, %v2723_v42  ;;  %vm3058_vm5 = vweird.f32 %v2723_v42 }
 0x334   : > { %v3743_v30 = vmul.f32 %v3006_v33, %v8120_v50  ;;  %v3025_v44 = vsub.f32 1.0, %v3024_v48  ;;  %v2287_v31 = vadd.f32 %v7877_v8, %v7923_v16 }
 0x335   : > { %v2459_v59 = vpop.f32.mrf.mxu3  ;;  %2412 = vmatmul.bf16.gmra.mxu2 %v7009_v63  ;;  %v8223_v63 = vpop.f32.mrf.mxu0 }
 0x336   : > { %v3026_v38 = vmul.f32 %v8199_v57, %v3025_v44  ;;  %v8210_v13 = vadd.f32 %v2459_v59, %v2371_v36  ;;  %v3799_v62 = vpack.c.bf16 %v3743_v30, %v3741_v41 }
 0x338   : > { %v5931_v54 = vpop.eup %5930  ;;  %v5474_v34 = vmul.f32 -1.442695, %v8210_v13  ;;  %4068 = vmatmul.bf16.gmra.mxu1 %v3799_v62  ;;  %v2373_v43 = vpop.f32.mrf.mxu2  ;;  %v3027_v7 = vadd.f32 %v8199_v57, %v3026_v38 }
 0x339   : > { %v5933_v37 = vpop.eup %5932  ;;  %v8218_v50 = vadd.f32 1.0, %v5931_v54  ;;  %2501 = vmatmul.bf16.gmra.mxu3 %v7347_v55  ;;  %v2374_v1 = vadd.f32 %v2373_v43, %v2285_v3  ;;  %v3062_v55 = vand.u32 2147483647, %v2723_v42 }
 0x33a   : > { %v3054_v14 = vmul.f32 %v5933_v37, %v2723_v42  ;;  %5934 = vpow2.f32 %v5474_v34  ;;  %4039 = vmatmul.bf16.gmra.mxu0 %v3822_v35  ;;  %v3031_v11 = vsel %vm8232_vm2, %v8199_v57, %v3027_v7  ;;  %vm3059_vm3 = vweird.f32 %v5933_v37 }
 0x33b   : > { %5936 = vrcp.f32 %v8218_v50  ;;  %v3036_v51 = vsel %vm3033_vm4, %v3035_v46, %v3031_v11  ;;  %vm3060_vm6 = vmor %vm3058_vm5, %vm3059_vm3  ;;  %v3065_v57 = vor.u32 1.1754944e-38, %v3064_v27  ;;  %vm3063_vm7 = vcmp.eq.f32.partialorder %v3062_v55, 8.507059e+37 }
 0x33c   : > { %v3055_v22 = vsub.f32 1.0, %v3054_v14  ;;  %v3745_v42 = vmul.f32 %v3036_v51, %v8146_v40  ;;  %v2290_v7 = vadd.f32 %v7906_v6, %v7923_v16  ;;  %vm3088_vm9 = vweird.f32 %v8218_v50 }
 0x33d   : > { %v2462_v32 = vpop.f32.mrf.mxu3 }
 0x33e   : > { %v3056_v19 = vmul.f32 %v5933_v37, %v3055_v22  ;;  %v8239_v28 = vadd.f32 %v2462_v32, %v2374_v1  ;;  %v8258_v22 = vpop.f32.mrf.mxu1  ;;  %v3092_v1 = vand.u32 2147483647, %v8218_v50 }
 0x340   : > { %v5935_v35 = vpop.eup %5934  ;;  %v3057_v52 = vadd.f32 %v5933_v37, %v3056_v19  ;;  %v5476_v21 = vmul.f32 -1.442695, %v8239_v28  ;;  %v2375_v33 = vpop.f32.mrf.mxu2  ;;  %vm3093_vm12 = vcmp.eq.f32.partialorder %v3092_v1, 8.507059e+37 }
 0x341   : > { %v5937_v20 = vpop.eup %5936  ;;  %v2727_v48 = vadd.f32 1.0, %v5935_v35  ;;  %v2376_v8 = vadd.f32 %v2375_v33, %v2287_v31 }
 0x342   : > { %v3061_v41 = vsel %vm3060_vm6, %v5933_v37, %v3057_v52  ;;  %v3084_v30 = vmul.f32 %v5937_v20, %v8218_v50  ;;  %5938 = vpow2.f32 %v5476_v21  ;;  %vm3089_vm8 = vweird.f32 %v5937_v20 }
 0x343   : > { %v3066_v44 = vsel %vm3063_vm7, %v3065_v57, %v3061_v41  ;;  %5940 = vrcp.f32 %v2727_v48  ;;  %vm8264_vm10 = vmor %vm3088_vm9, %vm3089_vm8  ;;  %v3122_v27 = vand.u32 2147483647, %v2727_v48  ;;  %v3124_v32 = vand.u32 2147483648, %v2727_v48 }
 0x344   : > { %v3747_v36 = vmul.f32 %v3066_v44, %v8163_v5  ;;  %v3085_v59 = vsub.f32 1.0, %v3084_v30  ;;  %vm3118_vm13 = vweird.f32 %v2727_v48  ;;  %v2292_v57 = vadd.f32 %v7938_v23, %v7923_v16 }
 0x345   : > { %v2464_v38 = vpop.f32.mrf.mxu3  ;;  %2417 = vmatmul.bf16.gmra.mxu2 %v7040_v0  ;;  %v3094_v0 = vand.u32 2147483648, %v8218_v50  ;;  %v3125_v41 = vor.u32 1.1754944e-38, %v3124_v32  ;;  %vm3123_vm15 = vcmp.eq.f32.partialorder %v3122_v27, 8.507059e+37 }
 0x346   : > { %v3086_v62 = vmul.f32 %v5937_v20, %v3085_v59  ;;  %v8249_v54 = vadd.f32 %v2464_v38, %v2376_v8  ;;  %v3801_v34 = vpack.c.bf16 %v3747_v36, %v3745_v42 }
 0x347   : > { %v3095_v52 = vor.u32 1.1754944e-38, %v3094_v0 }
 0x348   : > { %v5939_v37 = vpop.eup %5938  ;;  %v5478_v3 = vmul.f32 -1.442695, %v8249_v54  ;;  %4073 = vmatmul.bf16.gmra.mxu1 %v3801_v34  ;;  %v2378_v5 = vpop.f32.mrf.mxu2  ;;  %v3087_v14 = vadd.f32 %v5937_v20, %v3086_v62 }
 0x349   : > { %v5941_v43 = vpop.eup %5940  ;;  %v8255_v40 = vadd.f32 1.0, %v5939_v37  ;;  %2506 = vmatmul.bf16.gmra.mxu3 %v9291_v56  ;;  %v2379_v26 = vadd.f32 %v2378_v5, %v2290_v7  ;;  %v8278_v62 = vpop.f32.mrf.mxu1 }
 0x34a   : > { %v3114_v24 = vmul.f32 %v5941_v43, %v2727_v48  ;;  %5942 = vpow2.f32 %v5478_v3  ;;  %v3091_v19 = vsel %vm8264_vm10, %v5937_v20, %v3087_v14  ;;  %vm3119_vm11 = vweird.f32 %v5941_v43 }
 0x34b   : > { %5944 = vrcp.f32 %v8255_v40  ;;  %v3096_v33 = vsel %vm3093_vm12, %v3095_v52, %v3091_v19  ;;  %vm3120_vm14 = vmor %vm3118_vm13, %vm3119_vm11  ;;  %v2295_v14 = vadd.f32 %v7971_v12, %v7923_v16  ;;  %v3154_v0 = vand.u32 2147483648, %v8255_v40 }
 0x34c   : > { %v3115_v6 = vsub.f32 1.0, %v3114_v24  ;;  %v3749_v48 = vmul.f32 %v3096_v33, %v8195_v60  ;;  %vm3148_vm1 = vweird.f32 %v8255_v40  ;;  %v3152_v1 = vand.u32 2147483647, %v8255_v40 }
 0x34d   : > { %v2467_v11 = vpop.f32.mrf.mxu3  ;;  %v2297_v33 = vadd.f32 %v8000_v39, %v7923_v16 }
 0x34e   : > { %v3116_v46 = vmul.f32 %v5941_v43, %v3115_v6  ;;  %v8270_v35 = vadd.f32 %v2467_v11, %v2379_v26  ;;  %vm3153_vm4 = vcmp.eq.f32.partialorder %v3152_v1, 8.507059e+37 }
 0x350   : > { %v5943_v21 = vpop.eup %5942  ;;  %v3117_v50 = vadd.f32 %v5941_v43, %v3116_v46  ;;  %v5480_v31 = vmul.f32 -1.442695, %v8270_v35  ;;  %v2380_v20 = vpop.f32.mrf.mxu2 }
 0x351   : > { %v5945_v51 = vpop.eup %5944  ;;  %v2731_v30 = vadd.f32 1.0, %v5943_v21  ;;  %v2381_v38 = vadd.f32 %v2380_v20, %v2292_v57  ;;  %v8299_v52 = vpop.f32.mrf.mxu1  ;;  %v3155_v21 = vor.u32 1.1754944e-38, %v3154_v0 }
 0x352   : > { %v3121_v44 = vsel %vm3120_vm14, %v5941_v43, %v3117_v50  ;;  %v3144_v42 = vmul.f32 %v5945_v51, %v8255_v40  ;;  %5946 = vpow2.f32 %v5480_v31  ;;  %vm3149_vm0 = vweird.f32 %v5945_v51 }
 0x353   : > { %v3126_v36 = vsel %vm3123_vm15, %v3125_v41, %v3121_v44  ;;  %5948 = vrcp.f32 %v2731_v30  ;;  %vm8291_vm2 = vmor %vm3148_vm1, %vm3149_vm0  ;;  %v3182_v12 = vand.u32 2147483647, %v2731_v30  ;;  %v3184_v27 = vand.u32 2147483648, %v2731_v30 }
 0x354   : > { %v3751_v59 = vmul.f32 %v3126_v36, %v8210_v13  ;;  %v3145_v8 = vsub.f32 1.0, %v3144_v42  ;;  %vm3178_vm5 = vweird.f32 %v2731_v30 }
 0x355   : > { %v2469_v23 = vpop.f32.mrf.mxu3  ;;  %vm3183_vm7 = vcmp.eq.f32.partialorder %v3182_v12, 8.507059e+37 }
 0x356   : > { %v3146_v34 = vmul.f32 %v5945_v51, %v3145_v8  ;;  %v8280_v37 = vadd.f32 %v2469_v23, %v2381_v38  ;;  %v3803_v3 = vpack.c.bf16 %v3751_v59, %v3749_v48 }
 0x358   : > { %v5947_v43 = vpop.eup %5946  ;;  %v5482_v7 = vmul.f32 -1.442695, %v8280_v37  ;;  %4078 = vmatmul.bf16.gmra.mxu1 %v3803_v3  ;;  %v2383_v13 = vpop.f32.mrf.mxu2  ;;  %v3147_v24 = vadd.f32 %v5945_v51, %v3146_v34 }
 0x359   : > { %v5949_v5 = vpop.eup %5948  ;;  %v8285_v60 = vadd.f32 1.0, %v5947_v43  ;;  %v2384_v26 = vadd.f32 %v2383_v13, %v2295_v14  ;;  %v2300_v14 = vadd.f32 %v8042_v4, %v7923_v16  ;;  %v8312_v13 = vpop.f32.mrf.mxu1 }
 0x35a   : > { %v3174_v56 = vmul.f32 %v5949_v5, %v2731_v30  ;;  %5950 = vpow2.f32 %v5482_v7  ;;  %v3151_v11 = vsel %vm8291_vm2, %v5945_v51, %v3147_v24  ;;  %vm3179_vm3 = vweird.f32 %v5949_v5 }
 0x35b   : > { %5952 = vrcp.f32 %v8285_v60  ;;  %v3156_v41 = vsel %vm3153_vm4, %v3155_v21, %v3151_v11  ;;  %vm3180_vm6 = vmor %vm3178_vm5, %vm3179_vm3  ;;  %v3185_v51 = vor.u32 1.1754944e-38, %v3184_v27  ;;  %v3214_v0 = vand.u32 2147483648, %v8285_v60 }
 0x35c   : > { %v3175_v6 = vsub.f32 1.0, %v3174_v56  ;;  %v3753_v30 = vmul.f32 %v3156_v41, %v8239_v28  ;;  %vm3208_vm9 = vweird.f32 %v8285_v60  ;;  %v3212_v1 = vand.u32 2147483647, %v8285_v60 }
 0x35d   : > { %v2472_v32 = vpop.f32.mrf.mxu3  ;;  %v3215_v21 = vor.u32 1.1754944e-38, %v3214_v0 }
 0x35e   : > { %v3176_v19 = vmul.f32 %v5949_v5, %v3175_v6  ;;  %v8297_v46 = vadd.f32 %v2472_v32, %v2384_v26  ;;  %vm3213_vm12 = vcmp.eq.f32.partialorder %v3212_v1, 8.507059e+37 }
 0x360   : > { %v5951_v40 = vpop.eup %5950  ;;  %v3177_v50 = vadd.f32 %v5949_v5, %v3176_v19  ;;  %v5484_v31 = vmul.f32 -1.442695, %v8297_v46  ;;  %v2385_v44 = vpop.f32.mrf.mxu2 }
 0x361   : > { %v5953_v57 = vpop.eup %5952  ;;  %v2735_v20 = vadd.f32 1.0, %v5951_v40  ;;  %v2386_v38 = vadd.f32 %v2385_v44, %v2297_v33  ;;  %v2302_v33 = vadd.f32 %v8078_v29, %v7923_v16 }
 0x362   : > { %v3181_v42 = vsel %vm3180_vm6, %v5949_v5, %v3177_v50  ;;  %v3204_v36 = vmul.f32 %v5953_v57, %v8285_v60  ;;  %5954 = vpow2.f32 %v5484_v31  ;;  %vm3209_vm8 = vweird.f32 %v5953_v57 }
 0x363   : > { %v3186_v48 = vsel %vm3183_vm7, %v3185_v51, %v3181_v42  ;;  %5956 = vrcp.f32 %v2735_v20  ;;  %vm8320_vm10 = vmor %vm3208_vm9, %vm3209_vm8  ;;  %v3242_v55 = vand.u32 2147483647, %v2735_v20  ;;  %v3244_v12 = vand.u32 2147483648, %v2735_v20 }
 0x364   : > { %v3755_v59 = vmul.f32 %v3186_v48, %v8249_v54  ;;  %v3205_v8 = vsub.f32 1.0, %v3204_v36  ;;  %vm3238_vm13 = vweird.f32 %v2735_v20  ;;  %v8335_v48 = vpop.f32.mrf.mxu1 }
 0x365   : > { %v2474_v23 = vpop.f32.mrf.mxu3  ;;  %v3245_v51 = vor.u32 1.1754944e-38, %v3244_v12  ;;  %vm3243_vm15 = vcmp.eq.f32.partialorder %v3242_v55, 8.507059e+37 }
 0x366   : > { %v3206_v39 = vmul.f32 %v5953_v57, %v3205_v8  ;;  %v8307_v34 = vadd.f32 %v2474_v23, %v2386_v38  ;;  %v3805_v3 = vpack.c.bf16 %v3755_v59, %v3753_v30 }
 0x368   : > { %v5955_v43 = vpop.eup %5954  ;;  %v5486_v7 = vmul.f32 -1.442695, %v8307_v34  ;;  %4083 = vmatmul.bf16.gmra.mxu1 %v3805_v3  ;;  %v2388_v54 = vpop.f32.mrf.mxu2  ;;  %v3207_v24 = vadd.f32 %v5953_v57, %v3206_v39 }
 0x369   : > { %v5957_v5 = vpop.eup %5956  ;;  %v8314_v28 = vadd.f32 1.0, %v5955_v43  ;;  %v2389_v26 = vadd.f32 %v2388_v54, %v2300_v14 }
 0x36a   : > { %v3234_v56 = vmul.f32 %v5957_v5, %v2735_v20  ;;  %5958 = vpow2.f32 %v5486_v7  ;;  %v3211_v32 = vsel %vm8320_vm10, %v5953_v57, %v3207_v24  ;;  %vm3239_vm11 = vweird.f32 %v5957_v5 }
 0x36b   : > { %5960 = vrcp.f32 %v8314_v28  ;;  %v3216_v41 = vsel %vm3213_vm12, %v3215_v21, %v3211_v32  ;;  %vm3240_vm14 = vmor %vm3238_vm13, %vm3239_vm11  ;;  %vm3268_vm1 = vweird.f32 %v8314_v28 }
 0x36c   : > { %v3235_v6 = vsub.f32 1.0, %v3234_v56  ;;  %v3757_v30 = vmul.f32 %v3216_v41, %v8270_v35  ;;  %v2305_v35 = vadd.f32 %v8109_v49, %v7923_v16  ;;  %v3274_v56 = vand.u32 2147483648, %v8314_v28 }
 0x36d   : > { %v2477_v27 = vpop.f32.mrf.mxu3 }
 0x36e   : > { %v3236_v11 = vmul.f32 %v5957_v5, %v3235_v6  ;;  %v8326_v19 = vadd.f32 %v2477_v27, %v2389_v26  ;;  %v8351_v6 = vpop.f32.mrf.mxu1  ;;  %v3272_v26 = vand.u32 2147483647, %v8314_v28 }
 0x370   : > { %v5959_v40 = vpop.eup %5958  ;;  %v3237_v60 = vadd.f32 %v5957_v5, %v3236_v11  ;;  %v5488_v50 = vmul.f32 -1.442695, %v8326_v19  ;;  %v2390_v44 = vpop.f32.mrf.mxu2  ;;  %v2307_v11 = vadd.f32 %v8126_v10, %v7923_v16  ;;  %vm3273_vm5 = vcmp.eq.f32.partialorder %v3272_v26, 8.507059e+37 }
 0x371   : > { %v8329_v31 = vpop.eup %5960  ;;  %v2739_v57 = vadd.f32 1.0, %v5959_v40  ;;  %v2391_v8 = vadd.f32 %v2390_v44, %v2302_v33 }
 0x372   : > { %v3241_v42 = vsel %vm3240_vm14, %v5957_v5, %v3237_v60  ;;  %v3264_v36 = vmul.f32 %v8329_v31, %v8314_v28  ;;  %5962 = vpow2.f32 %v5488_v50  ;;  %vm3269_vm0 = vweird.f32 %v8329_v31  ;;  %v8369_v28 = vld [vmem:[%s9179_s8] ss:$0 sm:$0xff] }
 0x373   : > { %v3246_v20 = vsel %vm3243_vm15, %v3245_v51, %v3241_v42  ;;  %5964 = vrcp.f32 %v2739_v57  ;;  %v3302_v4 = vand.u32 2147483647, %v2739_v57  ;;  %v3304_v49 = vand.u32 2147483648, %v2739_v57  ;;  %vm8355_vm2 = vmor %vm3268_vm1, %vm3269_vm0 }
 0x374   : > { %v3759_v59 = vmul.f32 %v3246_v20, %v8280_v37  ;;  %v3265_v29 = vsub.f32 1.0, %v3264_v36  ;;  %v3275_v60 = vor.u32 1.1754944e-38, %v3274_v56  ;;  %vm3298_vm4 = vweird.f32 %v2739_v57 }
 0x375   : > { %v2479_v38 = vpop.f32.mrf.mxu3  ;;  %vm3303_vm7 = vcmp.eq.f32.partialorder %v3302_v4, 8.507059e+37  ;;  %v3305_v10 = vor.u32 1.1754944e-38, %v3304_v49 }
 0x376   : > { %v8339_v23 = vadd.f32 %v2479_v38, %v2391_v8  ;;  %v3807_v39 = vpack.c.bf16 %v3759_v59, %v3757_v30  ;;  %v3266_v3 = vmul.f32 %v8329_v31, %v3265_v29 }
 0x378   : > { %v5963_v43 = vpop.eup %5962  ;;  %v5490_v7 = vmul.f32 -1.442695, %v8339_v23  ;;  %4088 = vmatmul.bf16.gmra.mxu1 %v3807_v39  ;;  %v2393_v54 = vpop.f32.mrf.mxu2  ;;  %v3267_v24 = vadd.f32 %v8329_v31, %v3266_v3 }
 0x379   : > { %v5965_v5 = vpop.eup %5964  ;;  %v8343_v14 = vadd.f32 1.0, %v5963_v43  ;;  %v2394_v1 = vadd.f32 %v2393_v54, %v2305_v35 }
 0x37a   : > { %v3294_v37 = vmul.f32 %v5965_v5, %v2739_v57  ;;  %5966 = vpow2.f32 %v5490_v7  ;;  %vm3299_vm3 = vweird.f32 %v5965_v5  ;;  %v3271_v21 = vsel %vm8355_vm2, %v8329_v31, %v3267_v24 }
 0x37b   : > { %5968 = vrcp.f32 %v8343_v14  ;;  %vm3300_vm6 = vmor %vm3298_vm4, %vm3299_vm3  ;;  %v3276_v31 = vsel %vm3273_vm5, %v3275_v60, %v3271_v21  ;;  %v3966_v57 = vadd.f32 %v8369_v28, %v8023_v9  ;;  %vm3328_vm9 = vweird.f32 %v8343_v14 }
 0x37c   : > { %v3295_v0 = vsub.f32 1.0, %v3294_v37  ;;  %v3761_v8 = vmul.f32 %v3276_v31, %v8297_v46  ;;  %v2310_v46 = vadd.f32 %v8157_v15, %v7923_v16  ;;  %v3332_v49 = vand.u32 2147483647, %v8343_v14 }
 0x37d   : > { %v2482_v55 = vpop.f32.mrf.mxu3  ;;  %v2312_v60 = vadd.f32 %v8184_v25, %v7923_v16 }
 0x37e   : > { %v3296_v27 = vmul.f32 %v5965_v5, %v3295_v0  ;;  %v8359_v32 = vadd.f32 %v2482_v55, %v2394_v1  ;;  %v3968_v0 = vadd.f32 %v8369_v28, %v8066_v17  ;;  %v3334_v1 = vand.u32 2147483648, %v8343_v14 }
 0x37f   : > { %vm3333_vm13 = vcmp.eq.f32.partialorder %v3332_v49, 8.507059e+37 }
 0x380   : > { %v5967_v40 = vpop.eup %5966  ;;  %v3297_v50 = vadd.f32 %v5965_v5, %v3296_v27  ;;  %v5492_v33 = vmul.f32 -1.442695, %v8359_v32  ;;  %v2395_v44 = vpop.f32.mrf.mxu2 }
 0x381   : > { %v8372_v41 = vpop.eup %5968  ;;  %v2743_v51 = vadd.f32 1.0, %v5967_v40  ;;  %v2396_v29 = vadd.f32 %v2395_v44, %v2307_v11 }
 0x382   : > { %v3301_v42 = vsel %vm3300_vm6, %v5965_v5, %v3297_v50  ;;  %v3324_v36 = vmul.f32 %v8372_v41, %v8343_v14  ;;  %5970 = vpow2.f32 %v5492_v33  ;;  %vm3329_vm8 = vweird.f32 %v8372_v41 }
 0x383   : > { %v3306_v20 = vsel %vm3303_vm7, %v3305_v10, %v3301_v42  ;;  %5972 = vrcp.f32 %v2743_v51  ;;  %v3362_v15 = vand.u32 2147483647, %v2743_v51  ;;  %v3364_v55 = vand.u32 2147483648, %v2743_v51  ;;  %vm8399_vm10 = vmor %vm3328_vm9, %vm3329_vm8 }
 0x384   : > { %v3763_v30 = vmul.f32 %v3306_v20, %v8307_v34  ;;  %v3325_v59 = vsub.f32 1.0, %v3324_v36  ;;  %v3335_v33 = vor.u32 1.1754944e-38, %v3334_v1  ;;  %vm3358_vm12 = vweird.f32 %v2743_v51 }
 0x385   : > { %v2484_v38 = vpop.f32.mrf.mxu3  ;;  %v4054_v39 = vpop.f32.mrf.mxu1  ;;  %vm3363_vm15 = vcmp.eq.f32.partialorder %v3362_v15, 8.507059e+37  ;;  %v3365_v42 = vor.u32 1.1754944e-38, %v3364_v55 }
 0x386   : > { %v8380_v3 = vadd.f32 %v2484_v38, %v2396_v29  ;;  %v8382_v43 = vadd.f32 %v4054_v39, %v3966_v57  ;;  %v3326_v7 = vmul.f32 %v8372_v41, %v3325_v59  ;;  %v3809_v5 = vpack.c.bf16 %v3763_v30, %v3761_v8  ;;  %v8420_v59 = vpop.f32.mrf.mxu0 }
 0x388   : > { %v5971_v54 = vpop.eup %5970  ;;  %v5494_v35 = vmul.f32 -1.442695, %v8380_v3  ;;  %4134 = vadd.xlane.f32.xlu1 %v8382_v43  ;;  %4093 = vmatmul.bf16.gmra.mxu1 %v3809_v5  ;;  %v2398_v37 = vpop.f32.mrf.mxu2  ;;  %v3327_v56 = vadd.f32 %v8372_v41, %v3326_v7 }
 0x389   : > { %v5973_v9 = vpop.eup %5972  ;;  %v8387_v34 = vadd.f32 1.0, %v5971_v54  ;;  %v2399_v4 = vadd.f32 %v2398_v37, %v2310_v46 }
 0x38a   : > { %v3354_v24 = vmul.f32 %v5973_v9, %v2743_v51  ;;  %5974 = vpow2.f32 %v5494_v35  ;;  %vm3359_vm11 = vweird.f32 %v5973_v9  ;;  %v3331_v14 = vsel %vm8399_vm10, %v8372_v41, %v3327_v56 }
 0x38b   : > { %5976 = vrcp.f32 %v8387_v34  ;;  %vm3360_vm14 = vmor %vm3358_vm12, %vm3359_vm11  ;;  %v3336_v20 = vsel %vm3333_vm13, %v3335_v33, %v3331_v14  ;;  %v3971_v51 = vadd.f32 %v8369_v28, %v8086_v47  ;;  %vm3388_vm1 = vweird.f32 %v8387_v34 }
 0x38c   : > { %v3355_v26 = vsub.f32 1.0, %v3354_v24  ;;  %v3765_v39 = vmul.f32 %v3336_v20, %v8326_v19  ;;  %v2315_v19 = vadd.f32 %v8213_v18, %v7923_v16  ;;  %v3392_v55 = vand.u32 2147483647, %v8387_v34 }
 0x38d   : > { %v2487_v12 = vpop.f32.mrf.mxu3  ;;  %v4056_v27 = vpop.f32.mrf.mxu1  ;;  %v2317_v33 = vadd.f32 %v8244_v61, %v7923_v16 }
 0x38e   : > { %v3356_v21 = vmul.f32 %v5973_v9, %v3355_v26  ;;  %v8403_v40 = vadd.f32 %v2487_v12, %v2399_v4  ;;  %v8405_v17 = vadd.f32 %v4056_v27, %v3968_v0  ;;  %v3973_v26 = vadd.f32 %v8369_v28, %v8116_v53 }
 0x38f   : > { %v3394_v4 = vand.u32 2147483648, %v8387_v34  ;;  %vm3393_vm5 = vcmp.eq.f32.partialorder %v3392_v55, 8.507059e+37 }
 0x390   : > { %v5975_v50 = vpop.eup %5974  ;;  %v3357_v10 = vadd.f32 %v5973_v9, %v3356_v21  ;;  %v5496_v44 = vmul.f32 -1.442695, %v8403_v40  ;;  %4136 = vadd.xlane.f32.xlu2 %v8405_v17  ;;  %v2400_v25 = vpop.f32.mrf.mxu2 }
 0x391   : > { %v8414_v31 = vpop.eup %5976  ;;  %v2747_v36 = vadd.f32 1.0, %v5975_v50  ;;  %v2401_v38 = vadd.f32 %v2400_v25, %v2312_v60  ;;  %v8443_v21 = vpop.f32.mrf.mxu0 }
 0x392   : > { %v3361_v57 = vsel %vm3360_vm14, %v5973_v9, %v3357_v10  ;;  %v3384_v41 = vmul.f32 %v8414_v31, %v8387_v34  ;;  %5978 = vpow2.f32 %v5496_v44  ;;  %vm3389_vm0 = vweird.f32 %v8414_v31 }
 0x393   : > { %v3366_v30 = vsel %vm3363_vm15, %v3365_v42, %v3361_v57  ;;  %5980 = vrcp.f32 %v2747_v36  ;;  %v3422_v18 = vand.u32 2147483647, %v2747_v36  ;;  %v3424_v12 = vand.u32 2147483648, %v2747_v36  ;;  %vm8445_vm2 = vmor %vm3388_vm1, %vm3389_vm0 }
 0x394   : > { %v3767_v29 = vmul.f32 %v3366_v30, %v8339_v23  ;;  %v3385_v8 = vsub.f32 1.0, %v3384_v41  ;;  %v3395_v44 = vor.u32 1.1754944e-38, %v3394_v4  ;;  %vm3418_vm4 = vweird.f32 %v2747_v36 }
 0x395   : > { %v2489_v7 = vpop.f32.mrf.mxu3  ;;  %v4059_v5 = vpop.f32.mrf.mxu1  ;;  %vm3423_vm7 = vcmp.eq.f32.partialorder %v3422_v18, 8.507059e+37  ;;  %v3425_v57 = vor.u32 1.1754944e-38, %v3424_v12 }
 0x396   : > { %v8424_v54 = vadd.f32 %v2489_v7, %v2401_v38  ;;  %v8426_v35 = vadd.f32 %v4059_v5, %v3971_v51  ;;  %v3386_v9 = vmul.f32 %v8414_v31, %v3385_v8  ;;  %v3811_v37 = vpack.c.bf16 %v3767_v29, %v3765_v39 }
 0x398   : > { %v5979_v46 = vpop.eup %5978  ;;  %v5498_v47 = vmul.f32 -1.442695, %v8424_v54  ;;  %4138 = vadd.xlane.f32.xlu0 %v8426_v35  ;;  %4098 = vmatmul.bf16.gmra.mxu1 %v3811_v37  ;;  %v2403_v56 = vpop.f32.mrf.mxu2  ;;  %v3387_v1 = vadd.f32 %v8414_v31, %v3386_v9 }
 0x399   : > { %v5981_v24 = vpop.eup %5980  ;;  %v8431_v23 = vadd.f32 1.0, %v5979_v46  ;;  %v2404_v15 = vadd.f32 %v2403_v56, %v2315_v19  ;;  %v8473_v19 = vpop.f32.mrf.mxu0 }
 0x39a   : > { %v3414_v0 = vmul.f32 %v5981_v24, %v2747_v36  ;;  %5982 = vpow2.f32 %v5498_v47  ;;  %vm3419_vm3 = vweird.f32 %v5981_v24  ;;  %v3391_v34 = vsel %vm8445_vm2, %v8414_v31, %v3387_v1 }
 0x39b   : > { %5984 = vrcp.f32 %v8431_v23  ;;  %vm3420_vm6 = vmor %vm3418_vm4, %vm3419_vm3  ;;  %v3396_v30 = vsel %vm3393_vm5, %v3395_v44, %v3391_v34  ;;  %v3976_v36 = vadd.f32 %v8369_v28, %v8138_v2  ;;  %v2320_v1 = vadd.f32 %v8258_v22, %v7923_v16 }
 0x39c   : > { %v3415_v49 = vsub.f32 1.0, %v3414_v0  ;;  %v3769_v7 = vmul.f32 %v3396_v30, %v8359_v32  ;;  %vm3448_vm9 = vweird.f32 %v8431_v23  ;;  %v3452_v12 = vand.u32 2147483647, %v8431_v23 }
 0x39d   : > { %v2492_v27 = vpop.f32.mrf.mxu3  ;;  %v4061_v11 = vpop.f32.mrf.mxu1 }
 0x39e   : > { %v3416_v14 = vmul.f32 %v5981_v24, %v3415_v49  ;;  %v8449_v53 = vadd.f32 %v2492_v27, %v2404_v15  ;;  %v8451_v50 = vadd.f32 %v4061_v11, %v3973_v26  ;;  %v3978_v49 = vadd.f32 %v8369_v28, %v8166_v58 }
 0x39f   : > { %v3454_v15 = vand.u32 2147483648, %v8431_v23  ;;  %vm3453_vm13 = vcmp.eq.f32.partialorder %v3452_v12, 8.507059e+37 }
 0x3a0   : > { %v5983_v10 = vpop.eup %5982  ;;  %v3417_v42 = vadd.f32 %v5981_v24, %v3416_v14  ;;  %v5500_v25 = vmul.f32 -1.442695, %v8449_v53  ;;  %4140 = vadd.xlane.f32.xlu2 %v8451_v50  ;;  %v2405_v61 = vpop.f32.mrf.mxu2 }
 0x3a1   : > { %v8460_v20 = vpop.eup %5984  ;;  %v2751_v41 = vadd.f32 1.0, %v5983_v10  ;;  %v2406_v39 = vadd.f32 %v2405_v61, %v2317_v33  ;;  %v2322_v10 = vadd.f32 %v8278_v62, %v7923_v16 }
 0x3a2   : > { %v3421_v51 = vsel %vm3420_vm6, %v5981_v24, %v3417_v42  ;;  %v3444_v31 = vmul.f32 %v8460_v20, %v8431_v23  ;;  %5986 = vpow2.f32 %v5500_v25  ;;  %vm3449_vm8 = vweird.f32 %v8460_v20 }
 0x3a3   : > { %v3426_v29 = vsel %vm3423_vm7, %v3425_v57, %v3421_v51  ;;  %5988 = vrcp.f32 %v2751_v41  ;;  %v3482_v22 = vand.u32 2147483647, %v2751_v41  ;;  %v3484_v27 = vand.u32 2147483648, %v2751_v41  ;;  %vm8489_vm10 = vmor %vm3448_vm9, %vm3449_vm8 }
 0x3a4   : > { %v3771_v8 = vmul.f32 %v3426_v29, %v8380_v3  ;;  %v3445_v38 = vsub.f32 1.0, %v3444_v31  ;;  %v3455_v42 = vor.u32 1.1754944e-38, %v3454_v15  ;;  %vm3478_vm12 = vweird.f32 %v2751_v41  ;;  %v8506_v31 = vpop.f32.mrf.mxu0 }
 0x3a5   : > { %v2494_v5 = vpop.f32.mrf.mxu3  ;;  %v4064_v9 = vpop.f32.mrf.mxu1  ;;  %vm3483_vm15 = vcmp.eq.f32.partialorder %v3482_v22, 8.507059e+37  ;;  %v3485_v30 = vor.u32 1.1754944e-38, %v3484_v27  ;;  %v3983_v15 = vadd.f32 %v8369_v28, %v8223_v63 }
 0x3a6   : > { %v8468_v37 = vadd.f32 %v2494_v5, %v2406_v39  ;;  %v8470_v46 = vadd.f32 %v4064_v9, %v3976_v36  ;;  %v3446_v47 = vmul.f32 %v8460_v20, %v3445_v38  ;;  %v3813_v24 = vpack.c.bf16 %v3771_v8, %v3769_v7 }
 0x3a7   : > { %v3981_v8 = vadd.f32 %v8369_v28, %v8203_v45 }
 0x3a8   : > { %v5987_v56 = vpop.eup %5986  ;;  %v5502_v2 = vmul.f32 -1.442695, %v8468_v37  ;;  %4142 = vadd.xlane.f32.xlu1 %v8470_v46  ;;  %4103 = vmatmul.bf16.gmra.mxu1 %v3813_v24  ;;  %v2408_v32 = vpop.f32.mrf.mxu2  ;;  %v3447_v4 = vadd.f32 %v8460_v20, %v3446_v47 }
 0x3a9   : > { %v5989_v3 = vpop.eup %5988  ;;  %v8477_v0 = vadd.f32 1.0, %v5987_v56  ;;  %v2409_v18 = vadd.f32 %v2408_v32, %v2320_v1 }
 0x3aa   : > { %v3474_v26 = vmul.f32 %v5989_v3, %v2751_v41  ;;  %5990 = vpow2.f32 %v5502_v2  ;;  %vm3479_vm11 = vweird.f32 %v5989_v3  ;;  %v3451_v23 = vsel %vm8489_vm10, %v8460_v20, %v3447_v4 }
 0x3ab   : > { %5992 = vrcp.f32 %v8477_v0  ;;  %vm3480_vm14 = vmor %vm3478_vm12, %vm3479_vm11  ;;  %v3456_v29 = vsel %vm3453_vm13, %v3455_v42, %v3451_v23  ;;  %vm3508_vm1 = vweird.f32 %v8477_v0 }
 0x3ac   : > { %v3475_v55 = vsub.f32 1.0, %v3474_v26  ;;  %v3773_v5 = vmul.f32 %v3456_v29, %v8403_v40  ;;  %v2325_v40 = vadd.f32 %v8299_v52, %v7923_v16  ;;  %v3512_v52 = vand.u32 2147483647, %v8477_v0 }
 0x3ad   : > { %v2497_v11 = vpop.f32.mrf.mxu3  ;;  %v4066_v60 = vpop.f32.mrf.mxu1 }
 0x3ae   : > { %v3476_v33 = vmul.f32 %v5989_v3, %v3475_v55  ;;  %v8493_v34 = vadd.f32 %v2497_v11, %v2409_v18  ;;  %v8495_v58 = vadd.f32 %v4066_v60, %v3978_v49  ;;  %v8530_v55 = vpop.f32.mrf.mxu0  ;;  %v3514_v18 = vand.u32 2147483648, %v8477_v0 }
 0x3af   : > { %vm3513_vm5 = vcmp.eq.f32.partialorder %v3512_v52, 8.507059e+37 }
 0x3b0   : > { %v5991_v44 = vpop.eup %5990  ;;  %v3477_v25 = vadd.f32 %v5989_v3, %v3476_v33  ;;  %v5504_v57 = vmul.f32 -1.442695, %v8493_v34  ;;  %4144 = vadd.xlane.f32.xlu2 %v8495_v58  ;;  %v2410_v62 = vpop.f32.mrf.mxu2 }
 0x3b1   : > { %v8504_v61 = vpop.eup %5992  ;;  %v2755_v51 = vadd.f32 1.0, %v5991_v44  ;;  %v2411_v7 = vadd.f32 %v2410_v62, %v2322_v10  ;;  %v2327_v44 = vadd.f32 %v8312_v13, %v7923_v16 }
 0x3b2   : > { %v3481_v20 = vsel %vm3480_vm14, %v5989_v3, %v3477_v25  ;;  %v3504_v36 = vmul.f32 %v8504_v61, %v8477_v0  ;;  %5994 = vpow2.f32 %v5504_v57  ;;  %vm3509_vm0 = vweird.f32 %v8504_v61 }
 0x3b3   : > { %v3486_v41 = vsel %vm3483_vm15, %v3485_v30, %v3481_v20  ;;  %5996 = vrcp.f32 %v2755_v51  ;;  %v3542_v27 = vand.u32 2147483647, %v2755_v51  ;;  %v3544_v11 = vand.u32 2147483648, %v2755_v51  ;;  %vm8535_vm2 = vmor %vm3508_vm1, %vm3509_vm0 }
 0x3b4   : > { %v3775_v38 = vmul.f32 %v3486_v41, %v8424_v54  ;;  %v3505_v39 = vsub.f32 1.0, %v3504_v36  ;;  %v3515_v25 = vor.u32 1.1754944e-38, %v3514_v18  ;;  %vm3538_vm4 = vweird.f32 %v2755_v51 }
 0x3b5   : > { %v2499_v9 = vpop.f32.mrf.mxu3  ;;  %v4069_v47 = vpop.f32.mrf.mxu1  ;;  %vm3543_vm7 = vcmp.eq.f32.partialorder %v3542_v27, 8.507059e+37  ;;  %v3545_v29 = vor.u32 1.1754944e-38, %v3544_v11  ;;  %v3988_v18 = vadd.f32 %v8369_v28, %v8443_v21 }
 0x3b6   : > { %v8514_v24 = vadd.f32 %v2499_v9, %v2411_v7  ;;  %v8516_v56 = vadd.f32 %v4069_v47, %v3981_v8  ;;  %v3506_v2 = vmul.f32 %v8504_v61, %v3505_v39  ;;  %v3815_v3 = vpack.c.bf16 %v3775_v38, %v3773_v5 }
 0x3b8   : > { %v5995_v32 = vpop.eup %5994  ;;  %v5506_v1 = vmul.f32 -1.442695, %v8514_v24  ;;  %4146 = vadd.xlane.f32.xlu0 %v8516_v56  ;;  %4108 = vmatmul.bf16.gmra.mxu1 %v3815_v3  ;;  %v2413_v26 = vpop.f32.mrf.mxu2  ;;  %v3507_v49 = vadd.f32 %v8504_v61, %v3506_v2 }
 0x3b9   : > { %v5997_v45 = vpop.eup %5996  ;;  %v8521_v54 = vadd.f32 1.0, %v5995_v32  ;;  %v2414_v22 = vadd.f32 %v2413_v26, %v2325_v40  ;;  %v8558_v2 = vpop.f32.mrf.mxu0 }
 0x3ba   : > { %v3534_v4 = vmul.f32 %v5997_v45, %v2755_v51  ;;  %5998 = vpow2.f32 %v5506_v1  ;;  %vm3539_vm3 = vweird.f32 %v5997_v45  ;;  %v3511_v0 = vsel %vm8535_vm2, %v8504_v61, %v3507_v49 }
 0x3bb   : > { %6000 = vrcp.f32 %v8521_v54  ;;  %vm3540_vm6 = vmor %vm3538_vm4, %vm3539_vm3  ;;  %v3516_v36 = vsel %vm3513_vm5, %v3515_v25, %v3511_v0  ;;  %v3986_v51 = vadd.f32 %v8369_v28, %v8420_v59  ;;  %vm3568_vm9 = vweird.f32 %v8521_v54 }
 0x3bc   : > { %v3535_v12 = vsub.f32 1.0, %v3534_v4  ;;  %v3777_v5 = vmul.f32 %v3516_v36, %v8449_v53  ;;  %v2330_v4 = vadd.f32 %v8335_v48, %v7923_v16  ;;  %v3572_v27 = vand.u32 2147483647, %v8521_v54 }
 0x3bd   : > { %v2502_v60 = vpop.f32.mrf.mxu3  ;;  %v4071_v14 = vpop.f32.mrf.mxu1  ;;  %v2332_v0 = vadd.f32 %v8351_v6, %v7923_v16 }
 0x3be   : > { %v3536_v10 = vmul.f32 %v5997_v45, %v3535_v12  ;;  %v8539_v63 = vadd.f32 %v2502_v60, %v2414_v22  ;;  %v8541_v23 = vadd.f32 %v4071_v14, %v3983_v15  ;;  %v3574_v12 = vand.u32 2147483648, %v8521_v54 }
 0x3bf   : > { %vm3573_vm13 = vcmp.eq.f32.partialorder %v3572_v27, 8.507059e+37 }
 0x3c0   : > { %v5999_v42 = vpop.eup %5998  ;;  %v3537_v57 = vadd.f32 %v5997_v45, %v3536_v10  ;;  %v5508_v30 = vmul.f32 -1.442695, %v8539_v63  ;;  %4148 = vadd.xlane.f32.xlu1 %v8541_v23  ;;  %v2415_v13 = vpop.f32.mrf.mxu2 }
 0x3c1   : > { %v8550_v62 = vpop.eup %6000  ;;  %v2759_v20 = vadd.f32 1.0, %v5999_v42  ;;  %v2416_v7 = vadd.f32 %v2415_v13, %v2327_v44  ;;  %v8592_v25 = vpop.f32.mrf.mxu0 }
 0x3c2   : > { %v3541_v41 = vsel %vm3540_vm6, %v5997_v45, %v3537_v57  ;;  %v3564_v61 = vmul.f32 %v8550_v62, %v8521_v54  ;;  %6002 = vpow2.f32 %v5508_v30  ;;  %vm3569_vm8 = vweird.f32 %v8550_v62 }
 0x3c3   : > { %v3546_v8 = vsel %vm3543_vm7, %v3545_v29, %v3541_v41  ;;  %6004 = vrcp.f32 %v2759_v20  ;;  %v3602_v48 = vand.u32 2147483647, %v2759_v20  ;;  %v3604_v11 = vand.u32 2147483648, %v2759_v20  ;;  %vm8579_vm10 = vmor %vm3568_vm9, %vm3569_vm8 }
 0x3c4   : > { %v3779_v38 = vmul.f32 %v3546_v8, %v8468_v37  ;;  %v3565_v39 = vsub.f32 1.0, %v3564_v61  ;;  %v3575_v57 = vor.u32 1.1754944e-38, %v3574_v12  ;;  %vm3598_vm12 = vweird.f32 %v2759_v20 }
 0x3c5   : > { %v2504_v9 = vpop.f32.mrf.mxu3  ;;  %v4074_v47 = vpop.f32.mrf.mxu1  ;;  %vm3603_vm15 = vcmp.eq.f32.partialorder %v3602_v48, 8.507059e+37  ;;  %v3605_v36 = vor.u32 1.1754944e-38, %v3604_v11 }
 0x3c6   : > { %v8560_v3 = vadd.f32 %v2504_v9, %v2416_v7  ;;  %v8562_v32 = vadd.f32 %v4074_v47, %v3986_v51  ;;  %v3566_v1 = vmul.f32 %v8550_v62, %v3565_v39  ;;  %v3817_v45 = vpack.c.bf16 %v3779_v38, %v3777_v5 }
 0x3c8   : > { %v6003_v26 = vpop.eup %6002  ;;  %v5510_v59 = vmul.f32 -1.442695, %v8560_v3  ;;  %4150 = vadd.xlane.f32.xlu2 %v8562_v32  ;;  %4113 = vmatmul.bf16.gmra.mxu1 %v3817_v45  ;;  %v2418_v53 = vpop.f32.mrf.mxu2  ;;  %v3567_v15 = vadd.f32 %v8550_v62, %v3566_v1 }
 0x3c9   : > { %v6005_v37 = vpop.eup %6004  ;;  %v8567_v40 = vadd.f32 1.0, %v6003_v26  ;;  %v2419_v52 = vadd.f32 %v2418_v53, %v2330_v4 }
 0x3ca   : > { %v3594_v49 = vmul.f32 %v6005_v37, %v2759_v20  ;;  %6006 = vpow2.f32 %v5510_v59  ;;  %vm3599_vm11 = vweird.f32 %v6005_v37  ;;  %v3571_v54 = vsel %vm8579_vm10, %v8550_v62, %v3567_v15 }
 0x3cb   : > { %6008 = vrcp.f32 %v8567_v40  ;;  %vm3600_vm14 = vmor %vm3598_vm12, %vm3599_vm11  ;;  %v3576_v41 = vsel %vm3573_vm13, %v3575_v57, %v3571_v54  ;;  %v3991_v20 = vadd.f32 %v8369_v28, %v8473_v19  ;;  %v3993_v15 = vadd.f32 %v8369_v28, %v8506_v31 }
 0x3cc   : > { %v3595_v22 = vsub.f32 1.0, %v3594_v49  ;;  %v3781_v7 = vmul.f32 %v3576_v41, %v8493_v34  ;;  %v3634_v49 = vand.u32 2147483648, %v8567_v40  ;;  %vm3628_vm1 = vweird.f32 %v8567_v40 }
 0x3cd   : > { %v2507_v60 = vpop.f32.mrf.mxu3  ;;  %v4076_v14 = vpop.f32.mrf.mxu1 }
 0x3ce   : > { %v3596_v10 = vmul.f32 %v6005_v37, %v3595_v22  ;;  %v8583_v44 = vadd.f32 %v2507_v60, %v2419_v52  ;;  %v8585_v21 = vadd.f32 %v4076_v14, %v3988_v18  ;;  %v3632_v18 = vand.u32 2147483647, %v8567_v40 }
 0x3cf   : > { %v3635_v31 = vor.u32 1.1754944e-38, %v3634_v49 }
 0x3d0   : > { %v6007_v42 = vpop.eup %6006  ;;  %v3597_v30 = vadd.f32 %v6005_v37, %v3596_v10  ;;  %v5512_v29 = vmul.f32 -1.442695, %v8583_v44  ;;  %4152 = vadd.xlane.f32.xlu0 %v8585_v21  ;;  %v2420_v6 = vpop.f32.mrf.mxu2  ;;  %vm3633_vm4 = vcmp.eq.f32.partialorder %v3632_v18, 8.507059e+37 }
 0x3d1   : > { %v6009_v13 = vpop.eup %6008  ;;  %v2763_v16 = vadd.f32 1.0, %v6007_v42  ;;  %v2421_v39 = vadd.f32 %v2420_v6, %v2332_v0 }
 0x3d2   : > { %v3601_v61 = vsel %vm3600_vm14, %v6005_v37, %v3597_v30  ;;  %v3624_v62 = vmul.f32 %v6009_v13, %v8567_v40  ;;  %6010 = vpow2.f32 %v5512_v29  ;;  %vm3629_vm0 = vweird.f32 %v6009_v13 }
 0x3d3   : > { %v3606_v8 = vsel %vm3603_vm15, %v3605_v36, %v3601_v61  ;;  %6012 = vrcp.f32 %v2763_v16  ;;  %vm8617_vm2 = vmor %vm3628_vm1, %vm3629_vm0  ;;  %v3662_v52 = vand.u32 2147483647, %v2763_v16  ;;  %v3664_v27 = vand.u32 2147483648, %v2763_v16 }
 0x3d4   : > { %v3783_v51 = vmul.f32 %v3606_v8, %v8514_v24  ;;  %v3625_v38 = vsub.f32 1.0, %v3624_v62  ;;  %v8609_v24 = vpop.f32.mrf.mxu0  ;;  %vm3658_vm5 = vweird.f32 %v2763_v16  ;;  %v6291_v40 = vmov 128.0  }
 0x3d5   : > { %v2509_v5 = vpop.f32.mrf.mxu3  ;;  %v4079_v9 = vpop.f32.mrf.mxu1  ;;  %v3665_v42 = vor.u32 1.1754944e-38, %v3664_v27  ;;  %vm3663_vm7 = vcmp.eq.f32.partialorder %v3662_v52, 8.507059e+37  ;;  %v3996_v36 = vadd.f32 %v8369_v28, %v8530_v55 }
 0x3d6   : > { %v3626_v47 = vmul.f32 %v6009_v13, %v3625_v38  ;;  %v8601_v1 = vadd.f32 %v2509_v5, %v2421_v39  ;;  %v8603_v45 = vadd.f32 %v4079_v9, %v3991_v20  ;;  %v3819_v26 = vpack.c.bf16 %v3783_v51, %v3781_v7 }
 0x3d8   : > { %v6011_v59 = vpop.eup %6010  ;;  %v5514_v37 = vmul.f32 -1.442695, %v8601_v1  ;;  %4154 = vadd.xlane.f32.xlu1 %v8603_v45  ;;  %4118 = vmatmul.bf16.gmra.mxu1 %v3819_v26  ;;  %v3627_v34 = vadd.f32 %v6009_v13, %v3626_v47 }
 0x3d9   : > { %v6013_v19 = vpop.eup %6012  ;;  %v8607_v53 = vadd.f32 1.0, %v6011_v59 }
 0x3da   : > { %v3654_v4 = vmul.f32 %v6013_v19, %v2763_v16  ;;  %6014 = vpow2.f32 %v5514_v37  ;;  %v3631_v11 = vsel %vm8617_vm2, %v6009_v13, %v3627_v34  ;;  %vm3659_vm3 = vweird.f32 %v6013_v19 }
 0x3db   : > { %6016 = vrcp.f32 %v8607_v53  ;;  %v3636_v54 = vsel %vm3633_vm4, %v3635_v31, %v3631_v11  ;;  %vm3660_vm6 = vmor %vm3658_vm5, %vm3659_vm3  ;;  %v3694_v9 = vand.u32 2147483648, %v8607_v53  ;;  %vm3688_vm9 = vweird.f32 %v8607_v53 }
 0x3dc   : > { %v3655_v12 = vsub.f32 1.0, %v3654_v4  ;;  %6018 = vrcp.f32 %v6291_v40  ;;  %v8629_v6 = vpop.f32.mrf.mxu0  ;;  %v3785_v16 = vmul.f32 %v3636_v54, %v8539_v63  ;;  %v3998_v63 = vadd.f32 %v8369_v28, %v8558_v2 }
 0x3dd   : > { %v4081_v48 = vpop.f32.mrf.mxu1  ;;  %v3695_v18 = vor.u32 1.1754944e-38, %v3694_v9  ;;  %v4001_v11 = vadd.f32 %v8369_v28, %v8592_v25  ;;  %v4003_v25 = vadd.f32 %v8369_v28, %v8609_v24  ;;  %v4006_v24 = vadd.f32 %v8369_v28, %v8629_v6 }
 0x3de   : > { %v3656_v60 = vmul.f32 %v6013_v19, %v3655_v12  ;;  %v8623_v14 = vadd.f32 %v4081_v48, %v3993_v15 }
 0x3e0   : > { %v6015_v33 = vpop.eup %6014  ;;  %v3657_v10 = vadd.f32 %v6013_v19, %v3656_v60  ;;  %4156 = vadd.xlane.f32.xlu2 %v8623_v14 }
 0x3e1   : > { %v6017_v0 = vpop.eup %6016  ;;  %v2767_v57 = vadd.f32 1.0, %v6015_v33 }
 0x3e2   : > { %v3661_v30 = vsel %vm3660_vm6, %v6013_v19, %v3657_v10  ;;  %v3684_v29 = vmul.f32 %v6017_v0, %v8607_v53  ;;  %v6019_v8 = vpop.eup %6018  ;;  %vm3689_vm8 = vweird.f32 %v6017_v0 }
 0x3e3   : > { %v3666_v13 = vsel %vm3663_vm7, %v3665_v42, %v3661_v30  ;;  %6020 = vrcp.f32 %v2767_v57  ;;  %v4199_v7 = vmul.f32 128.0, %v6019_v8  ;;  %vm8641_vm10 = vmor %vm3688_vm9, %vm3689_vm8  ;;  %v3722_v59 = vand.u32 2147483647, %v2767_v57 }
 0x3e4   : > { %v3787_v41 = vmul.f32 %v3666_v13, %v8560_v3  ;;  %v3685_v61 = vsub.f32 1.0, %v3684_v29  ;;  %v3692_v3 = vand.u32 2147483647, %v8607_v53  ;;  %v3724_v37 = vand.u32 2147483648, %v2767_v57  ;;  %v4007_v4 = vpop.f32.mrf.mxu0 }
 0x3e5   : > { %v4084_v62 = vpop.f32.mrf.mxu1  ;;  %v4200_v34 = vsub.f32 1.0, %v4199_v7  ;;  %vm3718_vm13 = vweird.f32 %v2767_v57  ;;  %vm3723_vm15 = vcmp.eq.f32.partialorder %v3722_v59, 8.507059e+37  ;;  %vm4203_vm0 = vweird.f32 %v6019_v8 }
 0x3e6   : > { %v3686_v20 = vmul.f32 %v6017_v0, %v3685_v61  ;;  %v8633_v51 = vadd.f32 %v4084_v62, %v3996_v36  ;;  %v3821_v38 = vpack.c.bf16 %v3787_v41, %v3785_v16  ;;  %vm3693_vm12 = vcmp.eq.f32.partialorder %v3692_v3, 8.507059e+37 }
 0x3e7   : > { %v3725_v22 = vor.u32 1.1754944e-38, %v3724_v37  ;;  %v4201_v52 = vmul.f32 %v6019_v8, %v4200_v34  ;;  %v4008_v7 = vadd.f32 %v8369_v28, %v4007_v4 }
 0x3e8   : > { %4158 = vadd.xlane.f32.xlu0 %v8633_v51  ;;  %4123 = vmatmul.bf16.gmra.mxu1 %v3821_v38  ;;  %v3687_v5 = vadd.f32 %v6017_v0, %v3686_v20 }
 0x3e9   : > { %v6021_v39 = vpop.eup %6020  ;;  %v4202_v10 = vadd.f32 %v6019_v8, %v4201_v52 }
 0x3ea   : > { %v3714_v55 = vmul.f32 %v6021_v39, %v2767_v57  ;;  %v3691_v49 = vsel %vm8641_vm10, %v6017_v0, %v3687_v5  ;;  %vm3719_vm11 = vweird.f32 %v6021_v39 }
 0x3eb   : > { %v3696_v12 = vsel %vm3693_vm12, %v3695_v18, %v3691_v49  ;;  %vm3720_vm14 = vmor %vm3718_vm13, %vm3719_vm11  ;;  %v8657_v42 = vsel %vm4203_vm0, %v6019_v8, %v4202_v10 }
 0x3ec   : > { %v3715_v47 = vsub.f32 1.0, %v3714_v55  ;;  %v3789_v60 = vmul.f32 %v3696_v12, %v8583_v44  ;;  %v4010_v54 = vpop.f32.mrf.mxu0 }
 0x3ed   : > { %v4086_v19 = vpop.f32.mrf.mxu1  ;;  %v4011_v3 = vadd.f32 %v8369_v28, %v4010_v54 }
 0x3ee   : > { %v3716_v15 = vmul.f32 %v6021_v39, %v3715_v47  ;;  %v8647_v2 = vadd.f32 %v4086_v19, %v3998_v63 }
 0x3f0   : > { %v3717_v53 = vadd.f32 %v6021_v39, %v3716_v15  ;;  %4160 = vadd.xlane.f32.xlu1 %v8647_v2 }
 0x3f2   : > { %v3721_v27 = vsel %vm3720_vm14, %v6021_v39, %v3717_v53 }
 0x3f3   : > { %v3726_v48 = vsel %vm3723_vm15, %v3725_v22, %v3721_v27 }
 0x3f4   : > { %v3791_v31 = vmul.f32 %v3726_v48, %v8601_v1  ;;  %v4012_v36 = vpop.f32.mrf.mxu0 }
 0x3f5   : > { %v4089_v33 = vpop.f32.mrf.mxu1  ;;  %v4013_v4 = vadd.f32 %v8369_v28, %v4012_v36 }
 0x3f6   : > { %v8654_v40 = vadd.f32 %v4089_v33, %v4001_v11  ;;  %v3823_v0 = vpack.c.bf16 %v3791_v31, %v3789_v60 }
 0x3f8   : > { %4162 = vadd.xlane.f32.xlu2 %v8654_v40  ;;  %4128 = vmatmul.bf16.gmra.mxu1 %v3823_v0 }
 0x3fb   : > { %v4135_v57 = vpop.xlane.xlu1 %4134 }
 0x3fc   : > { %v4205_v44 = vmul.f32 %v8657_v42, %v4135_v57  ;;  %v4015_v38 = vpop.f32.mrf.mxu0 }
 0x3fd   : > { %v4091_v30 = vpop.f32.mrf.mxu1  ;;  %v4016_v52 = vadd.f32 %v8369_v28, %v4015_v38 }
 0x3fe   : > { %v8663_v1 = vsub.f32 %v8382_v43, %v4205_v44  ;;  %v8665_v29 = vadd.f32 %v4091_v30, %v4003_v25 }
 0x400   : > { %4164 = vadd.xlane.f32.xlu0 %v8665_v29  ;;  %v4269_v13 = vmul.f32 %v8663_v1, %v8663_v1 }
 0x402   : > { %4301 = vadd.xlane.f32.xlu2 %v4269_v13 }
 0x403   : > { %v4137_v16 = vpop.xlane.xlu2 %4136 }
 0x404   : > { %v4206_v41 = vmul.f32 %v8657_v42, %v4137_v16  ;;  %v4017_v47 = vpop.f32.mrf.mxu0 }
 0x405   : > { %v4094_v43 = vpop.f32.mrf.mxu1  ;;  %v4018_v10 = vadd.f32 %v8369_v28, %v4017_v47 }
 0x406   : > { %v8674_v61 = vsub.f32 %v8405_v17, %v4206_v41  ;;  %v8676_v62 = vadd.f32 %v4094_v43, %v4006_v24 }
 0x408   : > { %v4270_v8 = vmul.f32 %v8674_v61, %v8674_v61  ;;  %4166 = vadd.xlane.f32.xlu1 %v8676_v62 }
 0x40a   : > { %4303 = vadd.xlane.f32.xlu0 %v4270_v8  ;;  %v8745_v8 = vld [vmem:[%s9179_s8] ss:$0 sm:$0xff] }
 0x40b   : > { %v4139_v20 = vpop.xlane.xlu0 %4138 }
 0x40c   : > { %v4207_v39 = vmul.f32 %v8657_v42, %v4139_v20  ;;  %v4020_v18 = vpop.f32.mrf.mxu0 }
 0x40d   : > { %v4096_v17 = vpop.f32.mrf.mxu1  ;;  %v4021_v13 = vadd.f32 %v8369_v28, %v4020_v18 }
 0x40e   : > { %v8684_v6 = vsub.f32 %v8426_v35, %v4207_v39  ;;  %v8686_v5 = vadd.f32 %v4096_v17, %v4008_v7 }
 0x410   : > { %v4271_v55 = vmul.f32 %v8684_v6, %v8684_v6  ;;  %4168 = vadd.xlane.f32.xlu2 %v8686_v5 }
 0x412   : > { %4305 = vadd.xlane.f32.xlu1 %v4271_v55 }
 0x413   : > { %v4141_v9 = vpop.xlane.xlu2 %4140 }
 0x414   : > { %v4208_v63 = vmul.f32 %v8657_v42, %v4141_v9  ;;  %v4022_v60 = vpop.f32.mrf.mxu0 }
 0x415   : > { %v4099_v35 = vpop.f32.mrf.mxu1  ;;  %v4023_v28 = vadd.f32 %v8745_v8, %v4022_v60 }
 0x416   : > { %v8694_v26 = vsub.f32 %v8451_v50, %v4208_v63  ;;  %v8696_v59 = vadd.f32 %v4099_v35, %v4011_v3 }
 0x418   : > { %v4272_v37 = vmul.f32 %v8694_v26, %v8694_v26  ;;  %4170 = vadd.xlane.f32.xlu0 %v8696_v59 }
 0x41a   : > { %4307 = vadd.xlane.f32.xlu2 %v4272_v37 }
 0x41b   : > { %v4143_v19 = vpop.xlane.xlu1 %4142 }
 0x41c   : > { %v4209_v34 = vmul.f32 %v8657_v42, %v4143_v19  ;;  %v4025_v44 = vpop.f32.mrf.mxu0 }
 0x41d   : > { %v4101_v15 = vpop.f32.mrf.mxu1  ;;  %v4026_v9 = vadd.f32 %v8745_v8, %v4025_v44 }
 0x41e   : > { %v8704_v49 = vsub.f32 %v8470_v46, %v4209_v34  ;;  %v8706_v50 = vadd.f32 %v4101_v15, %v4013_v4 }
 0x420   : > { %v4273_v53 = vmul.f32 %v8704_v49, %v8704_v49  ;;  %4172 = vadd.xlane.f32.xlu1 %v8706_v50 }
 0x422   : > { %4309 = vadd.xlane.f32.xlu0 %v4273_v53 }
 0x423   : > { %v4145_v12 = vpop.xlane.xlu2 %4144 }
 0x424   : > { %v4210_v22 = vmul.f32 %v8657_v42, %v4145_v12 }
 0x425   : > { %v4104_v46 = vpop.f32.mrf.mxu1 }
 0x426   : > { %v8714_v27 = vsub.f32 %v8495_v58, %v4210_v22  ;;  %v8716_v48 = vadd.f32 %v4104_v46, %v4016_v52 }
 0x428   : > { %v4274_v11 = vmul.f32 %v8714_v27, %v8714_v27  ;;  %4174 = vadd.xlane.f32.xlu2 %v8716_v48 }
 0x42a   : > { %4311 = vadd.xlane.f32.xlu1 %v4274_v11 }
 0x42b   : > { %v4147_v31 = vpop.xlane.xlu0 %4146 }
 0x42c   : > { %v4211_v33 = vmul.f32 %v8657_v42, %v4147_v31 }
 0x42d   : > { %v4106_v58 = vpop.f32.mrf.mxu1 }
 0x42e   : > { %v8724_v0 = vsub.f32 %v8516_v56, %v4211_v33  ;;  %v8726_v54 = vadd.f32 %v4106_v58, %v4018_v10 }
 0x430   : > { %v4275_v57 = vmul.f32 %v8724_v0, %v8724_v0  ;;  %4176 = vadd.xlane.f32.xlu0 %v8726_v54 }
 0x432   : > { %4313 = vadd.xlane.f32.xlu2 %v4275_v57 }
 0x433   : > { %v4149_v25 = vpop.xlane.xlu1 %4148 }
 0x434   : > { %v4212_v30 = vmul.f32 %v8657_v42, %v4149_v25 }
 0x435   : > { %v4109_v56 = vpop.f32.mrf.mxu1 }
 0x436   : > { %v8734_v36 = vsub.f32 %v8541_v23, %v4212_v30  ;;  %v8736_v16 = vadd.f32 %v4109_v56, %v4021_v13  ;;  %v4027_v23 = vpop.f32.mrf.mxu0 }
 0x437   : > { %v4028_v34 = vadd.f32 %v8745_v8, %v4027_v23 }
 0x438   : > { %v4276_v41 = vmul.f32 %v8734_v36, %v8734_v36  ;;  %4178 = vadd.xlane.f32.xlu1 %v8736_v16 }
 0x43a   : > { %4315 = vadd.xlane.f32.xlu0 %v4276_v41 }
 0x43b   : > { %v4151_v24 = vpop.xlane.xlu2 %4150 }
 0x43c   : > { %v4213_v43 = vmul.f32 %v8657_v42, %v4151_v24 }
 0x43d   : > { %v4111_v38 = vpop.f32.mrf.mxu1 }
 0x43e   : > { %v8749_v20 = vsub.f32 %v8562_v32, %v4213_v43  ;;  %v8751_v39 = vadd.f32 %v4111_v38, %v4023_v28  ;;  %v4030_v47 = vpop.f32.mrf.mxu0 }
 0x43f   : > { %v4031_v52 = vadd.f32 %v8745_v8, %v4030_v47 }
 0x440   : > { %v4277_v7 = vmul.f32 %v8749_v20, %v8749_v20  ;;  %4180 = vadd.xlane.f32.xlu2 %v8751_v39 }
 0x442   : > { %4317 = vadd.xlane.f32.xlu1 %v4277_v7 }
 0x443   : > { %v4153_v17 = vpop.xlane.xlu0 %4152 }
 0x444   : > { %v4214_v55 = vmul.f32 %v8657_v42, %v4153_v17 }
 0x445   : > { %v4114_v3 = vpop.f32.mrf.mxu1 }
 0x446   : > { %v8759_v63 = vsub.f32 %v8585_v21, %v4214_v55  ;;  %v8761_v32 = vadd.f32 %v4114_v3, %v4026_v9  ;;  %v4032_v53 = vpop.f32.mrf.mxu0 }
 0x447   : > { %v4033_v58 = vadd.f32 %v8745_v8, %v4032_v53 }
 0x448   : > { %v4278_v35 = vmul.f32 %v8759_v63, %v8759_v63  ;;  %4182 = vadd.xlane.f32.xlu0 %v8761_v32 }
 0x44a   : > { %4319 = vadd.xlane.f32.xlu2 %v4278_v35 }
 0x44b   : > { %v4155_v37 = vpop.xlane.xlu1 %4154 }
 0x44c   : > { %v4215_v19 = vmul.f32 %v8657_v42, %v4155_v37 }
 0x44d   : > { %v4116_v21 = vpop.f32.mrf.mxu1 }
 0x44e   : > { %v8769_v4 = vsub.f32 %v8603_v45, %v4215_v19  ;;  %v8771_v15 = vadd.f32 %v4116_v21, %v4028_v34  ;;  %v4035_v33 = vpop.f32.mrf.mxu0 }
 0x44f   : > { %v4036_v56 = vadd.f32 %v8745_v8, %v4035_v33 }
 0x450   : > { %v4279_v18 = vmul.f32 %v8769_v4, %v8769_v4  ;;  %4184 = vadd.xlane.f32.xlu1 %v8771_v15 }
 0x452   : > { %4321 = vadd.xlane.f32.xlu0 %v4279_v18 }
 0x453   : > { %v4157_v12 = vpop.xlane.xlu2 %4156 }
 0x454   : > { %v4216_v22 = vmul.f32 %v8657_v42, %v4157_v12 }
 0x455   : > { %v4119_v45 = vpop.f32.mrf.mxu1 }
 0x456   : > { %v8779_v46 = vsub.f32 %v8623_v14, %v4216_v22  ;;  %v8781_v11 = vadd.f32 %v4119_v45, %v4031_v52  ;;  %v4037_v41 = vpop.f32.mrf.mxu0 }
 0x457   : > { %v4038_v23 = vadd.f32 %v8745_v8, %v4037_v41 }
 0x458   : > { %v4280_v60 = vmul.f32 %v8779_v46, %v8779_v46  ;;  %4186 = vadd.xlane.f32.xlu2 %v8781_v11 }
 0x45a   : > { %4323 = vadd.xlane.f32.xlu1 %v4280_v60 }
 0x45b   : > { %v4159_v31 = vpop.xlane.xlu0 %4158 }
 0x45c   : > { %v4217_v10 = vmul.f32 %v8657_v42, %v4159_v31 }
 0x45d   : > { %v4121_v14 = vpop.f32.mrf.mxu1 }
 0x45e   : > { %v8789_v57 = vsub.f32 %v8633_v51, %v4217_v10  ;;  %v8791_v25 = vadd.f32 %v4121_v14, %v4033_v58  ;;  %v4040_v55 = vpop.f32.mrf.mxu0 }
 0x45f   : > { %v4041_v3 = vadd.f32 %v8745_v8, %v4040_v55 }
 0x460   : > { %v4281_v44 = vmul.f32 %v8789_v57, %v8789_v57  ;;  %4188 = vadd.xlane.f32.xlu0 %v8791_v25 }
 0x462   : > { %4325 = vadd.xlane.f32.xlu2 %v4281_v44 }
 0x463   : > { %v4161_v30 = vpop.xlane.xlu1 %4160 }
 0x464   : > { %v4218_v13 = vmul.f32 %v8657_v42, %v4161_v30 }
 0x465   : > { %v4124_v51 = vpop.f32.mrf.mxu1 }
 0x466   : > { %v8799_v24 = vsub.f32 %v8647_v2, %v4218_v13  ;;  %v8801_v43 = vadd.f32 %v4124_v51, %v4036_v56  ;;  %v4042_v53 = vpop.f32.mrf.mxu0 }
 0x467   : > { %v4043_v22 = vadd.f32 %v8745_v8, %v4042_v53 }
 0x468   : > { %v4282_v28 = vmul.f32 %v8799_v24, %v8799_v24  ;;  %4190 = vadd.xlane.f32.xlu1 %v8801_v43 }
 0x46a   : > { %4327 = vadd.xlane.f32.xlu0 %v4282_v28 }
 0x46b   : > { %v4163_v38 = vpop.xlane.xlu2 %4162 }
 0x46c   : > { %v4219_v31 = vmul.f32 %v8657_v42, %v4163_v38 }
 0x46d   : > { %v4126_v7 = vpop.f32.mrf.mxu1 }
 0x46e   : > { %v8807_v17 = vadd.f32 %v4126_v7, %v4038_v23  ;;  %v8834_v30 = vsub.f32 %v8654_v40, %v4219_v31 }
 0x470   : > { %4192 = vadd.xlane.f32.xlu2 %v8807_v17  ;;  %v4283_v38 = vmul.f32 %v8834_v30, %v8834_v30 }
 0x473   : > { %v4165_v2 = vpop.xlane.xlu0 %4164 }
 0x474   : > { %v4220_v9 = vmul.f32 %v8657_v42, %v4165_v2 }
 0x475   : > { %v4302_v47 = vpop.xlane.xlu2 %4301  ;;  %v4129_v37 = vpop.f32.mrf.mxu1 }
 0x476   : > { %v8813_v35 = vsub.f32 %v8665_v29, %v4220_v9  ;;  %v4365_v19 = vmul.f32 %v4302_v47, %v8657_v42  ;;  %v8816_v34 = vadd.f32 %v4129_v37, %v4041_v3  ;;  %v8843_v9 = vld [vmem:[%s9180_s9] ss:$0 sm:$0xff] }
 0x478   : > { %v4397_v21 = vadd.f32 1e-05, %v4365_v19  ;;  %v4284_v18 = vmul.f32 %v8813_v35, %v8813_v35  ;;  %4194 = vadd.xlane.f32.xlu0 %v8816_v34  ;;  %v8849_v19 = vld [vmem:[#allocation7] ss:$0 sm:$0xff] }
 0x47a   : > { %6022 = vrsqrt.f32 %v4397_v21  ;;  %4331 = vadd.xlane.f32.xlu2 %v4284_v18  ;;  %vm4435_vm2 = vweird.f32 %v4397_v21 }
 0x47b   : > { %v4167_v12 = vpop.xlane.xlu1 %4166 }
 0x47c   : > { %v4221_v29 = vmul.f32 %v8657_v42, %v4167_v12 }
 0x47d   : > { %v4304_v52 = vpop.xlane.xlu0 %4303  ;;  %v4131_v45 = vpop.f32.mrf.mxu1 }
 0x47e   : > { %v4366_v60 = vmul.f32 %v4304_v52, %v8657_v42  ;;  %v8826_v33 = vsub.f32 %v8676_v62, %v4221_v29  ;;  %v8828_v10 = vadd.f32 %v4131_v45, %v4043_v22 }
 0x480   : > { %v6023_v58 = vpop.eup %6022  ;;  %v4398_v14 = vadd.f32 1e-05, %v4366_v60  ;;  %4196 = vadd.xlane.f32.xlu1 %v8828_v10  ;;  %v4285_v8 = vmul.f32 %v8826_v33, %v8826_v33 }
 0x481   : > { %v4430_v44 = vmul.f32 %v6023_v58, %v4397_v21  ;;  %vm4436_vm1 = vweird.f32 %v6023_v58 }
 0x482   : > { %6024 = vrsqrt.f32 %v4398_v14  ;;  %4333 = vadd.xlane.f32.xlu0 %v4285_v8  ;;  %vm4437_vm3 = vmor %vm4435_vm2, %vm4436_vm1  ;;  %vm4445_vm5 = vweird.f32 %v4398_v14 }
 0x483   : > { %v4431_v13 = vmul.f32 %v6023_v58, %v4430_v44  ;;  %v4169_v56 = vpop.xlane.xlu2 %4168 }
 0x484   : > { %v4222_v23 = vmul.f32 %v8657_v42, %v4169_v56  ;;  %v6088_v56 = vld [vmem:[%s6820_s14] sm:$0xff] }
 0x485   : > { %v4432_v41 = vmul.f32 0.5, %v4431_v13  ;;  %v4306_v62 = vpop.xlane.xlu1 %4305 }
 0x486   : > { %v4367_v51 = vmul.f32 %v4306_v62, %v8657_v42  ;;  %v8847_v37 = vsub.f32 %v8686_v5, %v4222_v23 }
 0x487   : > { %v4433_v28 = vsub.f32 1.5, %v4432_v41 }
 0x488   : > { %v6025_v7 = vpop.eup %6024  ;;  %v4399_v55 = vadd.f32 1e-05, %v4367_v51  ;;  %4329 = vadd.xlane.f32.xlu1 %v4283_v38 }
 0x489   : > { %v4434_v2 = vmul.f32 %v6023_v58, %v4433_v28  ;;  %v4440_v40 = vmul.f32 %v6025_v7, %v4398_v14  ;;  %vm4446_vm4 = vweird.f32 %v6025_v7 }
 0x48a   : > { %6026 = vrsqrt.f32 %v4399_v55  ;;  %vm4447_vm6 = vmor %vm4445_vm5, %vm4446_vm4  ;;  %vm4455_vm8 = vweird.f32 %v4399_v55 }
 0x48b   : > { %v4438_v3 = vsel %vm4437_vm3, %v6023_v58, %v4434_v2  ;;  %v4441_v47 = vmul.f32 %v6025_v7, %v4440_v40  ;;  %v4171_v18 = vpop.xlane.xlu0 %4170 }
 0x48c   : > { %v4749_v21 = vmul.f32 %v4438_v3, %v8663_v1  ;;  %v4223_v12 = vmul.f32 %v8657_v42, %v4171_v18  ;;  %v4286_v1 = vmul.f32 %v8847_v37, %v8847_v37 }
 0x48d   : > { %v4442_v53 = vmul.f32 0.5, %v4441_v47  ;;  %v4308_v22 = vpop.xlane.xlu2 %4307 }
 0x48e   : > { %v4785_v29 = vmul.f32 %v8843_v9, %v4749_v21  ;;  %v4368_v52 = vmul.f32 %v4308_v22, %v8657_v42  ;;  %v8858_v5 = vsub.f32 %v8696_v59, %v4223_v12  ;;  %v6089_v22 = vld [vmem:[%s6820_s14 + $0x8] sm:$0xff] }
 0x48f   : > { %v4443_v45 = vsub.f32 1.5, %v4442_v53 }
 0x490   : > { %v6027_v60 = vpop.eup %6026  ;;  %v4821_v31 = vadd.f32 %v8849_v19, %v4785_v29  ;;  %v4400_v58 = vadd.f32 1e-05, %v4368_v52  ;;  %4335 = vadd.xlane.f32.xlu1 %v4286_v1  ;;  %v4287_v13 = vmul.f32 %v8858_v5, %v8858_v5 }
 0x491   : > { %v4444_v44 = vmul.f32 %v6025_v7, %v4443_v45  ;;  %v4450_v8 = vmul.f32 %v6027_v60, %v4399_v55  ;;  %vm4456_vm7 = vweird.f32 %v6027_v60 }
 0x492   : > { %v4853_v41 = vadd.f32 %v6088_v56, %v4821_v31  ;;  %6028 = vrsqrt.f32 %v4400_v58  ;;  %4337 = vadd.xlane.f32.xlu2 %v4287_v13  ;;  %vm4457_vm9 = vmor %vm4455_vm8, %vm4456_vm7  ;;  %vm4465_vm11 = vweird.f32 %v4400_v58 }
 0x493   : > { %v4448_v59 = vsel %vm4447_vm6, %v6025_v7, %v4444_v44  ;;  %v4451_v62 = vmul.f32 %v6027_v60, %v4450_v8  ;;  %v4173_v28 = vpop.xlane.xlu1 %4172 }
 0x494   : > { %4885 = vst [vmem:[%s8866_s25] sm:$0xff] %v4853_v41  ;;  %v4750_v51 = vmul.f32 %v4448_v59, %v8674_v61  ;;  %v4224_v23 = vmul.f32 %v8657_v42, %v4173_v28 }
 0x495   : > { %v4452_v14 = vmul.f32 0.5, %v4451_v62  ;;  %v4310_v38 = vpop.xlane.xlu0 %4309 }
 0x496   : > { %v4786_v2 = vmul.f32 %v8843_v9, %v4750_v51  ;;  %v4369_v40 = vmul.f32 %v4310_v38, %v8657_v42  ;;  %v8874_v7 = vsub.f32 %v8706_v50, %v4224_v23 }
 0x497   : > { %v4453_v3 = vsub.f32 1.5, %v4452_v14  ;;  %v6090_v14 = vld [vmem:[%s6820_s14 + $0x10] sm:$0xff] }
 0x498   : > { %v6029_v47 = vpop.eup %6028  ;;  %v4822_v21 = vadd.f32 %v8849_v19, %v4786_v2  ;;  %v4401_v61 = vadd.f32 1e-05, %v4369_v40  ;;  %v4288_v12 = vmul.f32 %v8874_v7, %v8874_v7 }
 0x499   : > { %v4454_v18 = vmul.f32 %v6027_v60, %v4453_v3  ;;  %v4460_v53 = vmul.f32 %v6029_v47, %v4400_v58  ;;  %vm4466_vm10 = vweird.f32 %v6029_v47 }
 0x49a   : > { %v4854_v29 = vadd.f32 %v6089_v22, %v4822_v21  ;;  %6030 = vrsqrt.f32 %v4401_v61  ;;  %4339 = vadd.xlane.f32.xlu0 %v4288_v12  ;;  %vm4467_vm12 = vmor %vm4465_vm11, %vm4466_vm10  ;;  %vm4475_vm14 = vweird.f32 %v4401_v61 }
 0x49b   : > { %v4458_v52 = vsel %vm4457_vm9, %v6027_v60, %v4454_v18  ;;  %v4461_v45 = vmul.f32 %v6029_v47, %v4460_v53  ;;  %v4175_v1 = vpop.xlane.xlu2 %4174 }
 0x49c   : > { %4886 = vst [vmem:[%s8866_s25 + $0x8] sm:$0xff] %v4854_v29  ;;  %v4751_v50 = vmul.f32 %v4458_v52, %v8684_v6  ;;  %v4225_v44 = vmul.f32 %v8657_v42, %v4175_v1  ;;  %v6091_v1 = vld [vmem:[%s6820_s14 + $0x18] sm:$0xff] }
 0x49d   : > { %v4462_v31 = vmul.f32 0.5, %v4461_v45  ;;  %v4312_v55 = vpop.xlane.xlu1 %4311 }
 0x49e   : > { %v4787_v8 = vmul.f32 %v8843_v9, %v4751_v50  ;;  %v4370_v13 = vmul.f32 %v4312_v55, %v8657_v42  ;;  %v8886_v60 = vsub.f32 %v8716_v48, %v4225_v44 }
 0x49f   : > { %v4463_v56 = vsub.f32 1.5, %v4462_v31 }
 0x4a0   : > { %v6031_v41 = vpop.eup %6030  ;;  %v4823_v59 = vadd.f32 %v8849_v19, %v4787_v8  ;;  %v4402_v6 = vadd.f32 1e-05, %v4370_v13  ;;  %v4289_v28 = vmul.f32 %v8886_v60, %v8886_v60 }
 0x4a1   : > { %v4464_v62 = vmul.f32 %v6029_v47, %v4463_v56  ;;  %v4470_v51 = vmul.f32 %v6031_v41, %v4401_v61  ;;  %vm4476_vm13 = vweird.f32 %v6031_v41 }
 0x4a2   : > { %v4855_v23 = vadd.f32 %v6090_v14, %v4823_v59  ;;  %6032 = vrsqrt.f32 %v4402_v6  ;;  %4341 = vadd.xlane.f32.xlu1 %v4289_v28  ;;  %vm4477_vm15 = vmor %vm4475_vm14, %vm4476_vm13  ;;  %vm4485_vm1 = vweird.f32 %v4402_v6 }
 0x4a3   : > { %v4468_v38 = vsel %vm4467_vm12, %v6029_v47, %v4464_v62  ;;  %v4471_v2 = vmul.f32 %v6031_v41, %v4470_v51  ;;  %v4177_v40 = vpop.xlane.xlu0 %4176 }
 0x4a4   : > { %4887 = vst [vmem:[%s8866_s25 + $0x10] sm:$0xff] %v4855_v23  ;;  %v4752_v48 = vmul.f32 %v4468_v38, %v8694_v26  ;;  %v4226_v21 = vmul.f32 %v8657_v42, %v4177_v40 }
 0x4a5   : > { %v4472_v3 = vmul.f32 0.5, %v4471_v2  ;;  %v4314_v58 = vpop.xlane.xlu2 %4313 }
 0x4a6   : > { %v4788_v18 = vmul.f32 %v8843_v9, %v4752_v48  ;;  %v4371_v53 = vmul.f32 %v4314_v58, %v8657_v42  ;;  %v8898_v47 = vsub.f32 %v8726_v54, %v4226_v21  ;;  %v6092_v48 = vld [vmem:[%s6820_s14 + $0x20] sm:$0xff] }
 0x4a7   : > { %v4473_v12 = vsub.f32 1.5, %v4472_v3 }
 0x4a8   : > { %v6033_v22 = vpop.eup %6032  ;;  %v4824_v29 = vadd.f32 %v8849_v19, %v4788_v18  ;;  %v4403_v26 = vadd.f32 1e-05, %v4371_v53  ;;  %v4290_v50 = vmul.f32 %v8898_v47, %v8898_v47 }
 0x4a9   : > { %v4474_v52 = vmul.f32 %v6031_v41, %v4473_v12  ;;  %v4480_v45 = vmul.f32 %v6033_v22, %v4402_v6  ;;  %vm4486_vm0 = vweird.f32 %v6033_v22 }
 0x4aa   : > { %v4856_v31 = vadd.f32 %v6091_v1, %v4824_v29  ;;  %6034 = vrsqrt.f32 %v4403_v26  ;;  %4343 = vadd.xlane.f32.xlu2 %v4290_v50  ;;  %vm4487_vm2 = vmor %vm4485_vm1, %vm4486_vm0  ;;  %vm4495_vm4 = vweird.f32 %v4403_v26 }
 0x4ab   : > { %v4478_v44 = vsel %vm4477_vm15, %v6031_v41, %v4474_v52  ;;  %v4481_v55 = vmul.f32 %v6033_v22, %v4480_v45  ;;  %v4179_v8 = vpop.xlane.xlu1 %4178 }
 0x4ac   : > { %4888 = vst [vmem:[%s8866_s25 + $0x18] sm:$0xff] %v4856_v31  ;;  %v4753_v54 = vmul.f32 %v4478_v44, %v8704_v49  ;;  %v4227_v56 = vmul.f32 %v8657_v42, %v4179_v8 }
 0x4ad   : > { %v4482_v13 = vmul.f32 0.5, %v4481_v55  ;;  %v4316_v61 = vpop.xlane.xlu0 %4315  ;;  %v6093_v55 = vld [vmem:[%s6820_s14 + $0x28] sm:$0xff] }
 0x4ae   : > { %v4789_v59 = vmul.f32 %v8843_v9, %v4753_v54  ;;  %v4372_v62 = vmul.f32 %v4316_v61, %v8657_v42  ;;  %v8910_v41 = vsub.f32 %v8736_v16, %v4227_v56 }
 0x4af   : > { %v4483_v51 = vsub.f32 1.5, %v4482_v13 }
 0x4b0   : > { %v6035_v28 = vpop.eup %6034  ;;  %v4825_v14 = vadd.f32 %v8849_v19, %v4789_v59  ;;  %v4404_v49 = vadd.f32 1e-05, %v4372_v62  ;;  %v4291_v2 = vmul.f32 %v8910_v41, %v8910_v41 }
 0x4b1   : > { %v4484_v23 = vmul.f32 %v6033_v22, %v4483_v51  ;;  %v4490_v38 = vmul.f32 %v6035_v28, %v4403_v26  ;;  %vm4496_vm3 = vweird.f32 %v6035_v28 }
 0x4b2   : > { %v4857_v40 = vadd.f32 %v6092_v48, %v4825_v14  ;;  %6036 = vrsqrt.f32 %v4404_v49  ;;  %4345 = vadd.xlane.f32.xlu0 %v4291_v2  ;;  %vm4497_vm5 = vmor %vm4495_vm4, %vm4496_vm3  ;;  %vm4505_vm7 = vweird.f32 %v4404_v49 }
 0x4b3   : > { %v4488_v3 = vsel %vm4487_vm2, %v6033_v22, %v4484_v23  ;;  %v4491_v21 = vmul.f32 %v6035_v28, %v4490_v38  ;;  %v4181_v58 = vpop.xlane.xlu2 %4180 }
 0x4b4   : > { %4889 = vst [vmem:[%s8866_s25 + $0x20] sm:$0xff] %v4857_v40  ;;  %v4754_v16 = vmul.f32 %v4488_v3, %v8714_v27  ;;  %v4228_v53 = vmul.f32 %v8657_v42, %v4181_v58  ;;  %v6094_v3 = vld [vmem:[%s6820_s14 + $0x30] sm:$0xff] }
 0x4b5   : > { %v4492_v18 = vmul.f32 0.5, %v4491_v21  ;;  %v4318_v6 = vpop.xlane.xlu1 %4317 }
 0x4b6   : > { %v4790_v12 = vmul.f32 %v8843_v9, %v4754_v16  ;;  %v4373_v29 = vmul.f32 %v4318_v6, %v8657_v42  ;;  %v8922_v22 = vsub.f32 %v8751_v39, %v4228_v53 }
 0x4b7   : > { %v4493_v52 = vsub.f32 1.5, %v4492_v18 }
 0x4b8   : > { %v6037_v45 = vpop.eup %6036  ;;  %v4826_v50 = vadd.f32 %v8849_v19, %v4790_v12  ;;  %v4405_v27 = vadd.f32 1e-05, %v4373_v29  ;;  %v4292_v44 = vmul.f32 %v8922_v22, %v8922_v22 }
 0x4b9   : > { %v4494_v1 = vmul.f32 %v6035_v28, %v4493_v52  ;;  %v4500_v31 = vmul.f32 %v6037_v45, %v4404_v49  ;;  %vm4506_vm6 = vweird.f32 %v6037_v45 }
 0x4ba   : > { %v4858_v54 = vadd.f32 %v6093_v55, %v4826_v50  ;;  %6038 = vrsqrt.f32 %v4405_v27  ;;  %4347 = vadd.xlane.f32.xlu1 %v4292_v44  ;;  %vm4507_vm8 = vmor %vm4505_vm7, %vm4506_vm6  ;;  %vm4515_vm10 = vweird.f32 %v4405_v27 }
 0x4bb   : > { %v4498_v8 = vsel %vm4497_vm5, %v6035_v28, %v4494_v1  ;;  %v4501_v13 = vmul.f32 %v6037_v45, %v4500_v31  ;;  %v4183_v56 = vpop.xlane.xlu0 %4182 }
 0x4bc   : > { %4890 = vst [vmem:[%s8866_s25 + $0x28] sm:$0xff] %v4858_v54  ;;  %v4755_v39 = vmul.f32 %v4498_v8, %v8724_v0  ;;  %v4229_v59 = vmul.f32 %v8657_v42, %v4183_v56  ;;  %v6095_v54 = vld [vmem:[%s6820_s14 + $0x38] sm:$0xff] }
 0x4bd   : > { %v4502_v61 = vmul.f32 0.5, %v4501_v13  ;;  %v4320_v26 = vpop.xlane.xlu2 %4319 }
 0x4be   : > { %v4791_v62 = vmul.f32 %v8843_v9, %v4755_v39  ;;  %v4374_v51 = vmul.f32 %v4320_v26, %v8657_v42  ;;  %v8934_v28 = vsub.f32 %v8761_v32, %v4229_v59 }
 0x4bf   : > { %v4503_v14 = vsub.f32 1.5, %v4502_v61 }
 0x4c0   : > { %v6039_v23 = vpop.eup %6038  ;;  %v4827_v38 = vadd.f32 %v8849_v19, %v4791_v62  ;;  %v4406_v0 = vadd.f32 1e-05, %v4374_v51  ;;  %v4293_v40 = vmul.f32 %v8934_v28, %v8934_v28 }
 0x4c1   : > { %v4504_v2 = vmul.f32 %v6037_v45, %v4503_v14  ;;  %v4510_v48 = vmul.f32 %v6039_v23, %v4405_v27  ;;  %vm4516_vm9 = vweird.f32 %v6039_v23 }
 0x4c2   : > { %v4859_v21 = vadd.f32 %v6094_v3, %v4827_v38  ;;  %6040 = vrsqrt.f32 %v4406_v0  ;;  %4349 = vadd.xlane.f32.xlu2 %v4293_v40  ;;  %vm4517_vm11 = vmor %vm4515_vm10, %vm4516_vm9  ;;  %vm4525_vm13 = vweird.f32 %v4406_v0  ;;  %v6096_v3 = vld [vmem:[%s6820_s14 + $0x40] sm:$0xff] }
 0x4c3   : > { %v4508_v16 = vsel %vm4507_vm8, %v6037_v45, %v4504_v2  ;;  %v4511_v58 = vmul.f32 %v6039_v23, %v4510_v48  ;;  %v4185_v18 = vpop.xlane.xlu1 %4184 }
 0x4c4   : > { %4891 = vst [vmem:[%s8866_s25 + $0x30] sm:$0xff] %v4859_v21  ;;  %v4756_v32 = vmul.f32 %v4508_v16, %v8734_v36  ;;  %v4230_v6 = vmul.f32 %v8657_v42, %v4185_v18 }
 0x4c5   : > { %v4512_v53 = vmul.f32 0.5, %v4511_v58  ;;  %v4322_v49 = vpop.xlane.xlu0 %4321 }
 0x4c6   : > { %v4792_v12 = vmul.f32 %v8843_v9, %v4756_v32  ;;  %v4375_v29 = vmul.f32 %v4322_v49, %v8657_v42  ;;  %v8946_v45 = vsub.f32 %v8771_v15, %v4230_v6 }
 0x4c7   : > { %v4513_v52 = vsub.f32 1.5, %v4512_v53 }
 0x4c8   : > { %v6041_v50 = vpop.eup %6040  ;;  %v4828_v1 = vadd.f32 %v8849_v19, %v4792_v12  ;;  %v4407_v36 = vadd.f32 1e-05, %v4375_v29  ;;  %v4294_v55 = vmul.f32 %v8946_v45, %v8946_v45 }
 0x4c9   : > { %v4514_v31 = vmul.f32 %v6039_v23, %v4513_v52  ;;  %v4520_v44 = vmul.f32 %v6041_v50, %v4406_v0  ;;  %vm4526_vm12 = vweird.f32 %v6041_v50 }
 0x4ca   : > { %v4860_v8 = vadd.f32 %v6095_v54, %v4828_v1  ;;  %6042 = vrsqrt.f32 %v4407_v36  ;;  %4351 = vadd.xlane.f32.xlu0 %v4294_v55  ;;  %vm4527_vm14 = vmor %vm4525_vm13, %vm4526_vm12  ;;  %vm4535_vm0 = vweird.f32 %v4407_v36  ;;  %v6097_v55 = vld [vmem:[%s6820_s14 + $0x48] sm:$0xff] }
 0x4cb   : > { %v4518_v13 = vsel %vm4517_vm11, %v6039_v23, %v4514_v31  ;;  %v4521_v39 = vmul.f32 %v6041_v50, %v4520_v44  ;;  %v4187_v56 = vpop.xlane.xlu2 %4186 }
 0x4cc   : > { %4892 = vst [vmem:[%s8866_s25 + $0x38] sm:$0xff] %v4860_v8  ;;  %v4757_v15 = vmul.f32 %v4518_v13, %v8749_v20  ;;  %v4231_v59 = vmul.f32 %v8657_v42, %v4187_v56 }
 0x4cd   : > { %v4522_v61 = vmul.f32 0.5, %v4521_v39  ;;  %v4324_v27 = vpop.xlane.xlu1 %4323 }
 0x4ce   : > { %v4793_v26 = vmul.f32 %v8843_v9, %v4757_v15  ;;  %v4376_v62 = vmul.f32 %v4324_v27, %v8657_v42  ;;  %v8958_v14 = vsub.f32 %v8781_v11, %v4231_v59 }
 0x4cf   : > { %v4523_v51 = vsub.f32 1.5, %v4522_v61 }
 0x4d0   : > { %v6043_v23 = vpop.eup %6042  ;;  %v4829_v38 = vadd.f32 %v8849_v19, %v4793_v26  ;;  %v4408_v20 = vadd.f32 1e-05, %v4376_v62  ;;  %v4295_v40 = vmul.f32 %v8958_v14, %v8958_v14 }
 0x4d1   : > { %v4524_v2 = vmul.f32 %v6041_v50, %v4523_v51  ;;  %v4530_v48 = vmul.f32 %v6043_v23, %v4407_v36  ;;  %vm4536_vm15 = vweird.f32 %v6043_v23 }
 0x4d2   : > { %v4861_v21 = vadd.f32 %v6096_v3, %v4829_v38  ;;  %6044 = vrsqrt.f32 %v4408_v20  ;;  %4353 = vadd.xlane.f32.xlu1 %v4295_v40  ;;  %vm4537_vm1 = vmor %vm4535_vm0, %vm4536_vm15  ;;  %vm4545_vm3 = vweird.f32 %v4408_v20 }
 0x4d3   : > { %v4528_v16 = vsel %vm4527_vm14, %v6041_v50, %v4524_v2  ;;  %v4531_v58 = vmul.f32 %v6043_v23, %v4530_v48  ;;  %v4189_v32 = vpop.xlane.xlu0 %4188  ;;  %v6098_v48 = vld [vmem:[%s6820_s14 + $0x50] sm:$0xff] }
 0x4d4   : > { %4893 = vst [vmem:[%s8866_s25 + $0x40] sm:$0xff] %v4861_v21  ;;  %v4758_v11 = vmul.f32 %v4528_v16, %v8759_v63  ;;  %v4232_v53 = vmul.f32 %v8657_v42, %v4189_v32 }
 0x4d5   : > { %v4532_v18 = vmul.f32 0.5, %v4531_v58  ;;  %v4326_v0 = vpop.xlane.xlu2 %4325 }
 0x4d6   : > { %v4794_v6 = vmul.f32 %v8843_v9, %v4758_v11  ;;  %v4377_v49 = vmul.f32 %v4326_v0, %v8657_v42  ;;  %v8970_v29 = vsub.f32 %v8791_v25, %v4232_v53 }
 0x4d7   : > { %v4533_v12 = vsub.f32 1.5, %v4532_v18 }
 0x4d8   : > { %v6045_v52 = vpop.eup %6044  ;;  %v4830_v50 = vadd.f32 %v8849_v19, %v4794_v6  ;;  %v4409_v63 = vadd.f32 1e-05, %v4377_v49  ;;  %v4296_v44 = vmul.f32 %v8970_v29, %v8970_v29 }
 0x4d9   : > { %v4534_v1 = vmul.f32 %v6043_v23, %v4533_v12  ;;  %v4540_v31 = vmul.f32 %v6045_v52, %v4408_v20  ;;  %vm4546_vm2 = vweird.f32 %v6045_v52  ;;  %v6099_v12 = vld [vmem:[%s6820_s14 + $0x58] sm:$0xff] }
 0x4da   : > { %v4862_v54 = vadd.f32 %v6097_v55, %v4830_v50  ;;  %6046 = vrsqrt.f32 %v4409_v63  ;;  %4355 = vadd.xlane.f32.xlu2 %v4296_v44  ;;  %vm4547_vm4 = vmor %vm4545_vm3, %vm4546_vm2  ;;  %vm4555_vm6 = vweird.f32 %v4409_v63 }
 0x4db   : > { %v4538_v8 = vsel %vm4537_vm1, %v6043_v23, %v4534_v1  ;;  %v4541_v13 = vmul.f32 %v6045_v52, %v4540_v31  ;;  %v4191_v39 = vpop.xlane.xlu1 %4190 }
 0x4dc   : > { %4894 = vst [vmem:[%s8866_s25 + $0x48] sm:$0xff] %v4862_v54  ;;  %v4759_v25 = vmul.f32 %v4538_v8, %v8769_v4  ;;  %v4233_v56 = vmul.f32 %v8657_v42, %v4191_v39 }
 0x4dd   : > { %v4542_v15 = vmul.f32 0.5, %v4541_v13  ;;  %v4328_v36 = vpop.xlane.xlu0 %4327 }
 0x4de   : > { %v4795_v61 = vmul.f32 %v8843_v9, %v4759_v25  ;;  %v4378_v59 = vmul.f32 %v4328_v36, %v8657_v42  ;;  %v8982_v26 = vsub.f32 %v8801_v43, %v4233_v56  ;;  %v6100_v36 = vld [vmem:[%s6820_s14 + $0x60] sm:$0xff] }
 0x4df   : > { %v4543_v27 = vsub.f32 1.5, %v4542_v15 }
 0x4e0   : > { %v6047_v62 = vpop.eup %6046  ;;  %v4831_v51 = vadd.f32 %v8849_v19, %v4795_v61  ;;  %v4410_v4 = vadd.f32 1e-05, %v4378_v59  ;;  %v4297_v2 = vmul.f32 %v8982_v26, %v8982_v26 }
 0x4e1   : > { %v4544_v23 = vmul.f32 %v6045_v52, %v4543_v27  ;;  %v4550_v38 = vmul.f32 %v6047_v62, %v4409_v63  ;;  %vm4556_vm5 = vweird.f32 %v6047_v62 }
 0x4e2   : > { %v4863_v40 = vadd.f32 %v6098_v48, %v4831_v51  ;;  %6048 = vrsqrt.f32 %v4410_v4  ;;  %4357 = vadd.xlane.f32.xlu0 %v4297_v2  ;;  %vm4557_vm7 = vmor %vm4555_vm6, %vm4556_vm5  ;;  %vm4565_vm9 = vweird.f32 %v4410_v4 }
 0x4e3   : > { %v4548_v3 = vsel %vm4547_vm4, %v6045_v52, %v4544_v23  ;;  %v4551_v21 = vmul.f32 %v6047_v62, %v4550_v38  ;;  %v4193_v16 = vpop.xlane.xlu2 %4192 }
 0x4e4   : > { %4895 = vst [vmem:[%s8866_s25 + $0x50] sm:$0xff] %v4863_v40  ;;  %v4760_v43 = vmul.f32 %v4548_v3, %v8779_v46  ;;  %v4234_v11 = vmul.f32 %v8657_v42, %v4193_v16 }
 0x4e5   : > { %v4552_v58 = vmul.f32 0.5, %v4551_v21  ;;  %v6101_v21 = vld [vmem:[%s6820_s14 + $0x68] sm:$0xff] }
 0x4e6   : > { %v4796_v20 = vmul.f32 %v8843_v9, %v4760_v43  ;;  %v8993_v18 = vsub.f32 %v8807_v17, %v4234_v11 }
 0x4e7   : > { %v4553_v32 = vsub.f32 1.5, %v4552_v58 }
 0x4e8   : > { %v6049_v53 = vpop.eup %6048  ;;  %v4832_v0 = vadd.f32 %v8849_v19, %v4796_v20  ;;  %v4298_v46 = vmul.f32 %v8993_v18, %v8993_v18 }
 0x4e9   : > { %v4554_v6 = vmul.f32 %v6047_v62, %v4553_v32  ;;  %v4560_v49 = vmul.f32 %v6049_v53, %v4410_v4  ;;  %vm4566_vm8 = vweird.f32 %v6049_v53 }
 0x4ea   : > { %v4864_v52 = vadd.f32 %v6099_v12, %v4832_v0  ;;  %4359 = vadd.xlane.f32.xlu1 %v4298_v46  ;;  %vm4567_vm10 = vmor %vm4565_vm9, %vm4566_vm8 }
 0x4eb   : > { %v4558_v50 = vsel %vm4557_vm7, %v6047_v62, %v4554_v6  ;;  %v4561_v1 = vmul.f32 %v6049_v53, %v4560_v49  ;;  %v4195_v31 = vpop.xlane.xlu0 %4194 }
 0x4ec   : > { %4896 = vst [vmem:[%s8866_s25 + $0x58] sm:$0xff] %v4864_v52  ;;  %v4761_v17 = vmul.f32 %v4558_v50, %v8789_v57  ;;  %v4235_v55 = vmul.f32 %v8657_v42, %v4195_v31 }
 0x4ed   : > { %v4562_v44 = vmul.f32 0.5, %v4561_v1  ;;  %v4332_v54 = vpop.xlane.xlu2 %4331 }
 0x4ee   : > { %v4797_v63 = vmul.f32 %v8843_v9, %v4761_v17  ;;  %v4380_v8 = vmul.f32 %v4332_v54, %v8657_v42  ;;  %v9005_v25 = vsub.f32 %v8816_v34, %v4235_v55 }
 0x4ef   : > { %v4563_v13 = vsub.f32 1.5, %v4562_v44 }
 0x4f0   : > { %v4833_v39 = vadd.f32 %v8849_v19, %v4797_v63  ;;  %v4412_v15 = vadd.f32 1e-05, %v4380_v8  ;;  %v4299_v57 = vmul.f32 %v9005_v25, %v9005_v25 }
 0x4f1   : > { %v4564_v56 = vmul.f32 %v6049_v53, %v4563_v13 }
 0x4f2   : > { %v4865_v61 = vadd.f32 %v6100_v36, %v4833_v39  ;;  %6050 = vrsqrt.f32 %v4412_v15  ;;  %4361 = vadd.xlane.f32.xlu2 %v4299_v57  ;;  %vm4585_vm12 = vweird.f32 %v4412_v15  ;;  %v6102_v39 = vld [vmem:[%s6820_s14 + $0x78] sm:$0xff] }
 0x4f3   : > { %v4568_v59 = vsel %vm4567_vm10, %v6049_v53, %v4564_v56  ;;  %v4197_v34 = vpop.xlane.xlu1 %4196 }
 0x4f4   : > { %4897 = vst [vmem:[%s8866_s25 + $0x60] sm:$0xff] %v4865_v61  ;;  %v4762_v27 = vmul.f32 %v4568_v59, %v8799_v24  ;;  %v4236_v62 = vmul.f32 %v8657_v42, %v4197_v34 }
 0x4f5   : > { %v4334_v4 = vpop.xlane.xlu0 %4333 }
 0x4f6   : > { %v4798_v51 = vmul.f32 %v8843_v9, %v4762_v27  ;;  %v9016_v23 = vsub.f32 %v8828_v10, %v4236_v62  ;;  %v4381_v38 = vmul.f32 %v4334_v4, %v8657_v42 }
 0x4f8   : > { %v6051_v2 = vpop.eup %6050  ;;  %v4834_v48 = vadd.f32 %v8849_v19, %v4798_v51  ;;  %v4413_v3 = vadd.f32 1e-05, %v4381_v38  ;;  %v4300_v24 = vmul.f32 %v9016_v23, %v9016_v23 }
 0x4f9   : > { %v4580_v40 = vmul.f32 %v6051_v2, %v4412_v15  ;;  %vm4586_vm11 = vweird.f32 %v6051_v2 }
 0x4fa   : > { %v4866_v43 = vadd.f32 %v6101_v21, %v4834_v48  ;;  %6052 = vrsqrt.f32 %v4413_v3  ;;  %4363 = vadd.xlane.f32.xlu0 %v4300_v24  ;;  %vm4587_vm13 = vmor %vm4585_vm12, %vm4586_vm11  ;;  %vm4595_vm15 = vweird.f32 %v4413_v3 }
 0x4fb   : > { %v4581_v16 = vmul.f32 %v6051_v2, %v4580_v40  ;;  %v4330_v58 = vpop.xlane.xlu1 %4329 }
 0x4fc   : > { %4898 = vst [vmem:[%s8866_s25 + $0x68] sm:$0xff] %v4866_v43  ;;  %v4379_v10 = vmul.f32 %v4330_v58, %v8657_v42  ;;  %v6103_v43 = vld [vmem:[%s6820_s14 + $0x80] sm:$0xff] }
 0x4fd   : > { %v4582_v11 = vmul.f32 0.5, %v4581_v16 }
 0x4fe   : > { %v4411_v32 = vadd.f32 1e-05, %v4379_v10 }
 0x4ff   : > { %v4583_v20 = vsub.f32 1.5, %v4582_v11 }
 0x500   : > { %v6053_v53 = vpop.eup %6052  ;;  %6054 = vrsqrt.f32 %v4411_v32  ;;  %vm4575_vm2 = vweird.f32 %v4411_v32 }
 0x501   : > { %v4584_v0 = vmul.f32 %v6051_v2, %v4583_v20  ;;  %v4590_v6 = vmul.f32 %v6053_v53, %v4413_v3  ;;  %vm4596_vm14 = vweird.f32 %v6053_v53 }
 0x502   : > { %vm4597_vm0 = vmor %vm4595_vm15, %vm4596_vm14 }
 0x503   : > { %v4588_v49 = vsel %vm4587_vm13, %v6051_v2, %v4584_v0  ;;  %v4591_v12 = vmul.f32 %v6053_v53, %v4590_v6  ;;  %v4336_v52 = vpop.xlane.xlu1 %4335 }
 0x504   : > { %v4764_v46 = vmul.f32 %v4588_v49, %v8813_v35  ;;  %v4382_v50 = vmul.f32 %v4336_v52, %v8657_v42  ;;  %v6104_v52 = vld [vmem:[%s6820_s14 + $0x70] sm:$0xff] }
 0x505   : > { %v4592_v17 = vmul.f32 0.5, %v4591_v12  ;;  %v4338_v31 = vpop.xlane.xlu2 %4337 }
 0x506   : > { %v4800_v1 = vmul.f32 %v8843_v9, %v4764_v46  ;;  %v6055_v44 = vpop.eup %6054  ;;  %v4414_v55 = vadd.f32 1e-05, %v4382_v50  ;;  %v4383_v54 = vmul.f32 %v4338_v31, %v8657_v42 }
 0x507   : > { %v4593_v8 = vsub.f32 1.5, %v4592_v17  ;;  %v4570_v13 = vmul.f32 %v6055_v44, %v4411_v32  ;;  %vm4576_vm1 = vweird.f32 %v6055_v44 }
 0x508   : > { %v4836_v63 = vadd.f32 %v8849_v19, %v4800_v1  ;;  %6056 = vrsqrt.f32 %v4414_v55  ;;  %v4415_v35 = vadd.f32 1e-05, %v4383_v54  ;;  %vm4577_vm3 = vmor %vm4575_vm2, %vm4576_vm1  ;;  %vm4605_vm5 = vweird.f32 %v4414_v55 }
 0x509   : > { %v4594_v56 = vmul.f32 %v6053_v53, %v4593_v8  ;;  %v4571_v57 = vmul.f32 %v6055_v44, %v4570_v13 }
 0x50a   : > { %v4868_v15 = vadd.f32 %v6102_v39, %v4836_v63  ;;  %6058 = vrsqrt.f32 %v4415_v35  ;;  %vm4615_vm8 = vweird.f32 %v4415_v35 }
 0x50b   : > { %v4598_v36 = vsel %vm4597_vm0, %v6053_v53, %v4594_v56  ;;  %v4572_v61 = vmul.f32 0.5, %v4571_v57 }
 0x50c   : > { %4900 = vst [vmem:[%s8866_s25 + $0x78] sm:$0xff] %v4868_v15  ;;  %v4765_v59 = vmul.f32 %v4598_v36, %v8826_v33 }
 0x50d   : > { %v4573_v27 = vsub.f32 1.5, %v4572_v61  ;;  %v4340_v34 = vpop.xlane.xlu0 %4339  ;;  %v6105_v61 = vld [vmem:[%s6820_s14 + $0x88] sm:$0xff] }
 0x50e   : > { %v6057_v62 = vpop.eup %6056  ;;  %v4801_v51 = vmul.f32 %v8843_v9, %v4765_v59  ;;  %v4384_v4 = vmul.f32 %v4340_v34, %v8657_v42 }
 0x50f   : > { %v4574_v38 = vmul.f32 %v6055_v44, %v4573_v27  ;;  %v4600_v2 = vmul.f32 %v6057_v62, %v4414_v55  ;;  %vm4606_vm4 = vweird.f32 %v6057_v62 }
 0x510   : > { %v6059_v48 = vpop.eup %6058  ;;  %v4837_v40 = vadd.f32 %v8849_v19, %v4801_v51  ;;  %v4416_v3 = vadd.f32 1e-05, %v4384_v4  ;;  %vm4607_vm7 = vmor %vm4605_vm5, %vm4606_vm4  ;;  %v6106_v51 = vld [vmem:[%s6820_s14 + $0x90] sm:$0xff] }
 0x511   : > { %v4578_v24 = vsel %vm4577_vm3, %v6055_v44, %v4574_v38  ;;  %v4601_v33 = vmul.f32 %v6057_v62, %v4600_v2  ;;  %v4610_v21 = vmul.f32 %v6059_v48, %v4415_v35  ;;  %vm4616_vm6 = vweird.f32 %v6059_v48 }
 0x512   : > { %v4869_v16 = vadd.f32 %v6103_v43, %v4837_v40  ;;  %v4763_v58 = vmul.f32 %v4578_v24, %v8834_v30  ;;  %6060 = vrsqrt.f32 %v4416_v3  ;;  %vm4617_vm9 = vmor %vm4615_vm8, %vm4616_vm6  ;;  %vm4625_vm11 = vweird.f32 %v4416_v3 }
 0x513   : > { %v4602_v11 = vmul.f32 0.5, %v4601_v33  ;;  %v4611_v10 = vmul.f32 %v6059_v48, %v4610_v21 }
 0x514   : > { %4901 = vst [vmem:[%s8866_s25 + $0x80] sm:$0xff] %v4869_v16  ;;  %v4799_v20 = vmul.f32 %v8843_v9, %v4763_v58 }
 0x515   : > { %v4603_v32 = vsub.f32 1.5, %v4602_v11  ;;  %v4612_v53 = vmul.f32 0.5, %v4611_v10  ;;  %v4342_v0 = vpop.xlane.xlu1 %4341 }
 0x516   : > { %v4835_v6 = vadd.f32 %v8849_v19, %v4799_v20  ;;  %v4385_v49 = vmul.f32 %v4342_v0, %v8657_v42  ;;  %v6107_v20 = vld [vmem:[%s6820_s14 + $0x98] sm:$0xff] }
 0x517   : > { %v4604_v46 = vmul.f32 %v6057_v62, %v4603_v32  ;;  %v4613_v12 = vsub.f32 1.5, %v4612_v53 }
 0x518   : > { %v6061_v30 = vpop.eup %6060  ;;  %v4867_v50 = vadd.f32 %v6104_v52, %v4835_v6  ;;  %v4417_v1 = vadd.f32 1e-05, %v4385_v49 }
 0x519   : > { %v4608_v17 = vsel %vm4607_vm7, %v6057_v62, %v4604_v46  ;;  %v4614_v31 = vmul.f32 %v6059_v48, %v4613_v12  ;;  %v4620_v44 = vmul.f32 %v6061_v30, %v4416_v3  ;;  %vm4626_vm10 = vweird.f32 %v6061_v30 }
 0x51a   : > { %4899 = vst [vmem:[%s8866_s25 + $0x70] sm:$0xff] %v4867_v50  ;;  %v4766_v54 = vmul.f32 %v4608_v17, %v8847_v37  ;;  %6062 = vrsqrt.f32 %v4417_v1  ;;  %vm4627_vm12 = vmor %vm4625_vm11, %vm4626_vm10  ;;  %vm4635_vm14 = vweird.f32 %v4417_v1 }
 0x51b   : > { %v4618_v63 = vsel %vm4617_vm9, %v6059_v48, %v4614_v31  ;;  %v4621_v8 = vmul.f32 %v6061_v30, %v4620_v44  ;;  %v6108_v44 = vld [vmem:[%s6820_s14 + $0xa0] sm:$0xff] }
 0x51c   : > { %v4802_v55 = vmul.f32 %v8843_v9, %v4766_v54  ;;  %v4767_v13 = vmul.f32 %v4618_v63, %v8858_v5 }
 0x51d   : > { %v4622_v39 = vmul.f32 0.5, %v4621_v8  ;;  %v4344_v15 = vpop.xlane.xlu2 %4343 }
 0x51e   : > { %v4838_v56 = vadd.f32 %v8849_v19, %v4802_v55  ;;  %v4803_v35 = vmul.f32 %v8843_v9, %v4767_v13  ;;  %v4386_v57 = vmul.f32 %v4344_v15, %v8657_v42 }
 0x51f   : > { %v4623_v36 = vsub.f32 1.5, %v4622_v39 }
 0x520   : > { %v6063_v37 = vpop.eup %6062  ;;  %v4870_v59 = vadd.f32 %v6105_v61, %v4838_v56  ;;  %v4839_v27 = vadd.f32 %v8849_v19, %v4803_v35  ;;  %v4418_v34 = vadd.f32 1e-05, %v4386_v57 }
 0x521   : > { %v4624_v5 = vmul.f32 %v6061_v30, %v4623_v36  ;;  %v4630_v62 = vmul.f32 %v6063_v37, %v4417_v1  ;;  %vm4636_vm13 = vweird.f32 %v6063_v37 }
 0x522   : > { %4902 = vst [vmem:[%s8866_s25 + $0x88] sm:$0xff] %v4870_v59  ;;  %v4871_v4 = vadd.f32 %v6106_v51, %v4839_v27  ;;  %6064 = vrsqrt.f32 %v4418_v34  ;;  %vm4637_vm15 = vmor %vm4635_vm14, %vm4636_vm13  ;;  %vm4645_vm1 = vweird.f32 %v4418_v34  ;;  %v6109_v59 = vld [vmem:[%s6820_s14 + $0xa8] sm:$0xff] }
 0x523   : > { %v4628_v38 = vsel %vm4627_vm12, %v6061_v30, %v4624_v5  ;;  %v4631_v2 = vmul.f32 %v6063_v37, %v4630_v62 }
 0x524   : > { %4903 = vst [vmem:[%s8866_s25 + $0x90] sm:$0xff] %v4871_v4  ;;  %v4768_v48 = vmul.f32 %v4628_v38, %v8874_v7 }
 0x525   : > { %v4632_v40 = vmul.f32 0.5, %v4631_v2  ;;  %v4346_v24 = vpop.xlane.xlu0 %4345 }
 0x526   : > { %v4804_v33 = vmul.f32 %v8843_v9, %v4768_v48  ;;  %v4387_v21 = vmul.f32 %v4346_v24, %v8657_v42 }
 0x527   : > { %v4633_v3 = vsub.f32 1.5, %v4632_v40 }
 0x528   : > { %v6065_v43 = vpop.eup %6064  ;;  %v4840_v16 = vadd.f32 %v8849_v19, %v4804_v33  ;;  %v4419_v58 = vadd.f32 1e-05, %v4387_v21 }
 0x529   : > { %v4634_v11 = vmul.f32 %v6063_v37, %v4633_v3  ;;  %v4640_v10 = vmul.f32 %v6065_v43, %v4418_v34  ;;  %vm4646_vm0 = vweird.f32 %v6065_v43  ;;  %v6110_v3 = vld [vmem:[%s6820_s14 + $0xb0] sm:$0xff] }
 0x52a   : > { %v4872_v32 = vadd.f32 %v6107_v20, %v4840_v16  ;;  %6066 = vrsqrt.f32 %v4419_v58  ;;  %vm4647_vm2 = vmor %vm4645_vm1, %vm4646_vm0  ;;  %vm4655_vm4 = vweird.f32 %v4419_v58 }
 0x52b   : > { %v4638_v7 = vsel %vm4637_vm15, %v6063_v37, %v4634_v11  ;;  %v4641_v53 = vmul.f32 %v6065_v43, %v4640_v10 }
 0x52c   : > { %4904 = vst [vmem:[%s8866_s25 + $0x98] sm:$0xff] %v4872_v32  ;;  %v4769_v0 = vmul.f32 %v4638_v7, %v8886_v60 }
 0x52d   : > { %v4642_v6 = vmul.f32 0.5, %v4641_v53  ;;  %v4348_v49 = vpop.xlane.xlu1 %4347  ;;  %v9087_v53 = vld [vmem:[#allocation7] ss:$0 sm:$0xff] }
 0x52e   : > { %v4805_v46 = vmul.f32 %v8843_v9, %v4769_v0  ;;  %v4388_v12 = vmul.f32 %v4348_v49, %v8657_v42 }
 0x52f   : > { %v4643_v30 = vsub.f32 1.5, %v4642_v6 }
 0x530   : > { %v6067_v52 = vpop.eup %6066  ;;  %v4841_v50 = vadd.f32 %v8849_v19, %v4805_v46  ;;  %v4420_v1 = vadd.f32 1e-05, %v4388_v12  ;;  %v6113_v46 = vld [vmem:[%s6820_s14 + $0xb8] sm:$0xff] }
 0x531   : > { %v4644_v17 = vmul.f32 %v6065_v43, %v4643_v30  ;;  %v4650_v31 = vmul.f32 %v6067_v52, %v4419_v58  ;;  %vm4656_vm3 = vweird.f32 %v6067_v52 }
 0x532   : > { %v4873_v54 = vadd.f32 %v6108_v44, %v4841_v50  ;;  %6068 = vrsqrt.f32 %v4420_v1  ;;  %vm4657_vm5 = vmor %vm4655_vm4, %vm4656_vm3  ;;  %vm4665_vm7 = vweird.f32 %v4420_v1 }
 0x533   : > { %v4648_v60 = vsel %vm4647_vm2, %v6065_v43, %v4644_v17  ;;  %v4651_v63 = vmul.f32 %v6067_v52, %v4650_v31 }
 0x534   : > { %4905 = vst [vmem:[%s8866_s25 + $0xa0] sm:$0xff] %v4873_v54  ;;  %v4770_v8 = vmul.f32 %v4648_v60, %v8898_v47 }
 0x535   : > { %v4652_v55 = vmul.f32 0.5, %v4651_v63  ;;  %v4350_v13 = vpop.xlane.xlu2 %4349 }
 0x536   : > { %v4806_v39 = vmul.f32 %v8843_v9, %v4770_v8  ;;  %v4389_v15 = vmul.f32 %v4350_v13, %v8657_v42 }
 0x537   : > { %v4653_v56 = vsub.f32 1.5, %v4652_v55 }
 0x538   : > { %v6069_v35 = vpop.eup %6068  ;;  %v4842_v57 = vadd.f32 %v8849_v19, %v4806_v39  ;;  %v4421_v36 = vadd.f32 1e-05, %v4389_v15  ;;  %v6114_v39 = vld [vmem:[%s6820_s14 + $0xc0] sm:$0xff] }
 0x539   : > { %v4654_v37 = vmul.f32 %v6067_v52, %v4653_v56  ;;  %v4660_v61 = vmul.f32 %v6069_v35, %v4420_v1  ;;  %vm4666_vm6 = vweird.f32 %v6069_v35 }
 0x53a   : > { %v4874_v27 = vadd.f32 %v6109_v59, %v4842_v57  ;;  %6070 = vrsqrt.f32 %v4421_v36  ;;  %vm4667_vm8 = vmor %vm4665_vm7, %vm4666_vm6  ;;  %vm4675_vm10 = vweird.f32 %v4421_v36 }
 0x53b   : > { %v4658_v47 = vsel %vm4657_vm5, %v6067_v52, %v4654_v37  ;;  %v4661_v34 = vmul.f32 %v6069_v35, %v4660_v61 }
 0x53c   : > { %4906 = vst [vmem:[%s8866_s25 + $0xa8] sm:$0xff] %v4874_v27  ;;  %v4771_v5 = vmul.f32 %v4658_v47, %v8910_v41 }
 0x53d   : > { %v4662_v62 = vmul.f32 0.5, %v4661_v34  ;;  %v4352_v51 = vpop.xlane.xlu0 %4351 }
 0x53e   : > { %v4807_v4 = vmul.f32 %v8843_v9, %v4771_v5  ;;  %v4390_v38 = vmul.f32 %v4352_v51, %v8657_v42  ;;  %v6115_v51 = vld [vmem:[%s6820_s14 + $0xc8] sm:$0xff] }
 0x53f   : > { %v4663_v2 = vsub.f32 1.5, %v4662_v62 }
 0x540   : > { %v6071_v48 = vpop.eup %6070  ;;  %v4843_v40 = vadd.f32 %v8849_v19, %v4807_v4  ;;  %v4422_v24 = vadd.f32 1e-05, %v4390_v38  ;;  %v9083_v19 = vld [vmem:[%s9180_s9] ss:$0 sm:$0xff] }
 0x541   : > { %v4664_v33 = vmul.f32 %v6069_v35, %v4663_v2  ;;  %v4670_v21 = vmul.f32 %v6071_v48, %v4421_v36  ;;  %vm4676_vm9 = vweird.f32 %v6071_v48 }
 0x542   : > { %v4875_v43 = vadd.f32 %v6110_v3, %v4843_v40  ;;  %6072 = vrsqrt.f32 %v4422_v24  ;;  %vm4677_vm11 = vmor %vm4675_vm10, %vm4676_vm9  ;;  %vm4685_vm13 = vweird.f32 %v4422_v24 }
 0x543   : > { %v4668_v41 = vsel %vm4667_vm8, %v6069_v35, %v4664_v33  ;;  %v4671_v16 = vmul.f32 %v6071_v48, %v4670_v21 }
 0x544   : > { %4907 = vst [vmem:[%s8866_s25 + $0xb0] sm:$0xff] %v4875_v43  ;;  %v4772_v9 = vmul.f32 %v4668_v41, %v8922_v22 }
 0x545   : > { %v4672_v58 = vmul.f32 0.5, %v4671_v16  ;;  %v4354_v11 = vpop.xlane.xlu1 %4353 }
 0x546   : > { %v4808_v10 = vmul.f32 %v9083_v19, %v4772_v9  ;;  %v4391_v20 = vmul.f32 %v4354_v11, %v8657_v42 }
 0x547   : > { %v4673_v32 = vsub.f32 1.5, %v4672_v58  ;;  %v6116_v58 = vld [vmem:[%s6820_s14 + $0xd0] sm:$0xff] }
 0x548   : > { %v6073_v7 = vpop.eup %6072  ;;  %v4844_v0 = vadd.f32 %v9087_v53, %v4808_v10  ;;  %v4423_v22 = vadd.f32 1e-05, %v4391_v20 }
 0x549   : > { %v4674_v6 = vmul.f32 %v6071_v48, %v4673_v32  ;;  %v4680_v49 = vmul.f32 %v6073_v7, %v4422_v24  ;;  %vm4686_vm12 = vweird.f32 %v6073_v7 }
 0x54a   : > { %v4876_v12 = vadd.f32 %v6113_v46, %v4844_v0  ;;  %6074 = vrsqrt.f32 %v4423_v22  ;;  %vm4687_vm14 = vmor %vm4685_vm13, %vm4686_vm12  ;;  %vm4695_vm0 = vweird.f32 %v4423_v22 }
 0x54b   : > { %v4678_v30 = vsel %vm4677_vm11, %v6071_v48, %v4674_v6  ;;  %v4681_v52 = vmul.f32 %v6073_v7, %v4680_v49 }
 0x54c   : > { %4908 = vst [vmem:[%s8866_s25 + $0xb8] sm:$0xff] %v4876_v12  ;;  %v4773_v50 = vmul.f32 %v4678_v30, %v8934_v28 }
 0x54d   : > { %v4682_v1 = vmul.f32 0.5, %v4681_v52  ;;  %v4356_v17 = vpop.xlane.xlu2 %4355 }
 0x54e   : > { %v4809_v31 = vmul.f32 %v9083_v19, %v4773_v50  ;;  %v4392_v44 = vmul.f32 %v4356_v17, %v8657_v42  ;;  %v6117_v50 = vld [vmem:[%s6820_s14 + $0xd8] sm:$0xff] }
 0x54f   : > { %v4683_v54 = vsub.f32 1.5, %v4682_v1 }
 0x550   : > { %v6075_v60 = vpop.eup %6074  ;;  %v4845_v63 = vadd.f32 %v9087_v53, %v4809_v31  ;;  %v4424_v8 = vadd.f32 1e-05, %v4392_v44 }
 0x551   : > { %v4684_v55 = vmul.f32 %v6073_v7, %v4683_v54  ;;  %v4690_v13 = vmul.f32 %v6075_v60, %v4423_v22  ;;  %vm4696_vm15 = vweird.f32 %v6075_v60 }
 0x552   : > { %v4877_v15 = vadd.f32 %v6114_v39, %v4845_v63  ;;  %6076 = vrsqrt.f32 %v4424_v8  ;;  %vm4697_vm1 = vmor %vm4695_vm0, %vm4696_vm15  ;;  %vm4705_vm3 = vweird.f32 %v4424_v8 }
 0x553   : > { %v4688_v28 = vsel %vm4687_vm14, %v6073_v7, %v4684_v55  ;;  %v4691_v56 = vmul.f32 %v6075_v60, %v4690_v13 }
 0x554   : > { %4909 = vst [vmem:[%s8866_s25 + $0xc0] sm:$0xff] %v4877_v15  ;;  %v4774_v35 = vmul.f32 %v4688_v28, %v8946_v45 }
 0x555   : > { %v4692_v57 = vmul.f32 0.5, %v4691_v56  ;;  %v4358_v36 = vpop.xlane.xlu0 %4357  ;;  %v6118_v56 = vld [vmem:[%s6820_s14 + $0xe0] sm:$0xff] }
 0x556   : > { %v4810_v37 = vmul.f32 %v9083_v19, %v4774_v35  ;;  %v4393_v61 = vmul.f32 %v4358_v36, %v8657_v42 }
 0x557   : > { %v4693_v59 = vsub.f32 1.5, %v4692_v57 }
 0x558   : > { %v6077_v27 = vpop.eup %6076  ;;  %v4846_v47 = vadd.f32 %v9087_v53, %v4810_v37  ;;  %v4425_v34 = vadd.f32 1e-05, %v4393_v61 }
 0x559   : > { %v4694_v5 = vmul.f32 %v6075_v60, %v4693_v59  ;;  %v4700_v62 = vmul.f32 %v6077_v27, %v4424_v8  ;;  %vm4706_vm2 = vweird.f32 %v6077_v27 }
 0x55a   : > { %v4878_v4 = vadd.f32 %v6115_v51, %v4846_v47  ;;  %6078 = vrsqrt.f32 %v4425_v34  ;;  %vm4707_vm4 = vmor %vm4705_vm3, %vm4706_vm2  ;;  %vm4715_vm6 = vweird.f32 %v4425_v34 }
 0x55b   : > { %v4698_v45 = vsel %vm4697_vm1, %v6075_v60, %v4694_v5  ;;  %v4701_v38 = vmul.f32 %v6077_v27, %v4700_v62  ;;  %v6119_v5 = vld [vmem:[%s6820_s14 + $0xe8] sm:$0xff] }
 0x55c   : > { %4910 = vst [vmem:[%s8866_s25 + $0xc8] sm:$0xff] %v4878_v4  ;;  %v4775_v2 = vmul.f32 %v4698_v45, %v8958_v14 }
 0x55d   : > { %v4702_v48 = vmul.f32 0.5, %v4701_v38  ;;  %v4360_v40 = vpop.xlane.xlu1 %4359 }
 0x55e   : > { %v4811_v24 = vmul.f32 %v9083_v19, %v4775_v2  ;;  %v4394_v33 = vmul.f32 %v4360_v40, %v8657_v42 }
 0x55f   : > { %v4703_v21 = vsub.f32 1.5, %v4702_v48 }
 0x560   : > { %v6079_v3 = vpop.eup %6078  ;;  %v4847_v43 = vadd.f32 %v9087_v53, %v4811_v24  ;;  %v4426_v41 = vadd.f32 1e-05, %v4394_v33  ;;  %v6120_v24 = vld [vmem:[%s6820_s14 + $0xf0] sm:$0xff] }
 0x561   : > { %v4704_v16 = vmul.f32 %v6077_v27, %v4703_v21  ;;  %v4710_v9 = vmul.f32 %v6079_v3, %v4425_v34  ;;  %vm4716_vm5 = vweird.f32 %v6079_v3 }
 0x562   : > { %v4879_v11 = vadd.f32 %v6116_v58, %v4847_v43  ;;  %6080 = vrsqrt.f32 %v4426_v41  ;;  %vm4717_vm7 = vmor %vm4715_vm6, %vm4716_vm5  ;;  %vm4725_vm9 = vweird.f32 %v4426_v41 }
 0x563   : > { %v4708_v14 = vsel %vm4707_vm4, %v6077_v27, %v4704_v16  ;;  %v4711_v10 = vmul.f32 %v6079_v3, %v4710_v9 }
 0x564   : > { %4911 = vst [vmem:[%s8866_s25 + $0xd0] sm:$0xff] %v4879_v11  ;;  %v4776_v20 = vmul.f32 %v4708_v14, %v8970_v29 }
 0x565   : > { %v4712_v32 = vmul.f32 0.5, %v4711_v10  ;;  %v4362_v7 = vpop.xlane.xlu2 %4361 }
 0x566   : > { %v4812_v0 = vmul.f32 %v9083_v19, %v4776_v20  ;;  %v4395_v22 = vmul.f32 %v4362_v7, %v8657_v42 }
 0x567   : > { %v4713_v6 = vsub.f32 1.5, %v4712_v32 }
 0x568   : > { %v6081_v49 = vpop.eup %6080  ;;  %v4848_v46 = vadd.f32 %v9087_v53, %v4812_v0  ;;  %v4427_v12 = vadd.f32 1e-05, %v4395_v22 }
 0x569   : > { %v4714_v30 = vmul.f32 %v6079_v3, %v4713_v6  ;;  %v4720_v52 = vmul.f32 %v6081_v49, %v4426_v41  ;;  %vm4726_vm8 = vweird.f32 %v6081_v49  ;;  %v6121_v41 = vld [vmem:[%s6820_s14 + $0xf8] sm:$0xff] }
 0x56a   : > { %v4880_v1 = vadd.f32 %v6117_v50, %v4848_v46  ;;  %6082 = vrsqrt.f32 %v4427_v12  ;;  %vm4727_vm10 = vmor %vm4725_vm9, %vm4726_vm8  ;;  %vm4735_vm12 = vweird.f32 %v4427_v12 }
 0x56b   : > { %v4718_v29 = vsel %vm4717_vm7, %v6079_v3, %v4714_v30  ;;  %v4721_v17 = vmul.f32 %v6081_v49, %v4720_v52 }
 0x56c   : > { %4912 = vst [vmem:[%s8866_s25 + $0xd8] sm:$0xff] %v4880_v1  ;;  %v4777_v31 = vmul.f32 %v4718_v29, %v8982_v26 }
 0x56d   : > { %v4722_v44 = vmul.f32 0.5, %v4721_v17  ;;  %v4364_v54 = vpop.xlane.xlu0 %4363 }
 0x56e   : > { %v4813_v60 = vmul.f32 %v9083_v19, %v4777_v31  ;;  %v4396_v63 = vmul.f32 %v4364_v54, %v8657_v42 }
 0x56f   : > { %v4723_v8 = vsub.f32 1.5, %v4722_v44 }
 0x570   : > { %v6083_v55 = vpop.eup %6082  ;;  %v4849_v13 = vadd.f32 %v9087_v53, %v4813_v60  ;;  %v4428_v39 = vadd.f32 1e-05, %v4396_v63 }
 0x571   : > { %v4724_v15 = vmul.f32 %v6081_v49, %v4723_v8  ;;  %v4730_v28 = vmul.f32 %v6083_v55, %v4427_v12  ;;  %vm4736_vm11 = vweird.f32 %v6083_v55 }
 0x572   : > { %v4881_v35 = vadd.f32 %v6118_v56, %v4849_v13  ;;  %6084 = vrsqrt.f32 %v4428_v39  ;;  %vm4737_vm13 = vmor %vm4735_vm12, %vm4736_vm11  ;;  %vm4745_vm15 = vweird.f32 %v4428_v39 }
 0x573   : > { %v4728_v26 = vsel %vm4727_vm10, %v6081_v49, %v4724_v15  ;;  %v4731_v57 = vmul.f32 %v6083_v55, %v4730_v28 }
 0x574   : > { %4913 = vst [vmem:[%s8866_s25 + $0xe0] sm:$0xff] %v4881_v35  ;;  %v4778_v42 = vmul.f32 %v4728_v26, %v8993_v18 }
 0x575   : > { %v4732_v36 = vmul.f32 0.5, %v4731_v57 }
 0x576   : > { %v4814_v37 = vmul.f32 %v9083_v19, %v4778_v42 }
 0x577   : > { %v4733_v61 = vsub.f32 1.5, %v4732_v36 }
 0x578   : > { %v6085_v59 = vpop.eup %6084  ;;  %v4850_v27 = vadd.f32 %v9087_v53, %v4814_v37 }
 0x579   : > { %v4734_v47 = vmul.f32 %v6083_v55, %v4733_v61  ;;  %v4740_v34 = vmul.f32 %v6085_v59, %v4428_v39  ;;  %vm4746_vm14 = vweird.f32 %v6085_v59 }
 0x57a   : > { %v4882_v62 = vadd.f32 %v6119_v5, %v4850_v27  ;;  %vm4747_vm0 = vmor %vm4745_vm15, %vm4746_vm14 }
 0x57b   : > { %v4738_v51 = vsel %vm4737_vm13, %v6083_v55, %v4734_v47  ;;  %v4741_v4 = vmul.f32 %v6085_v59, %v4740_v34 }
 0x57c   : > { %4914 = vst [vmem:[%s8866_s25 + $0xe8] sm:$0xff] %v4882_v62  ;;  %v4779_v18 = vmul.f32 %v4738_v51, %v9005_v25 }
 0x57d   : > { %v4742_v45 = vmul.f32 0.5, %v4741_v4 }
 0x57e   : > { %v4815_v38 = vmul.f32 %v9083_v19, %v4779_v18 }
 0x57f   : > { %v4743_v2 = vsub.f32 1.5, %v4742_v45 }
 0x580   : > { %v4851_v48 = vadd.f32 %v9087_v53, %v4815_v38 }
 0x581   : > { %v4744_v40 = vmul.f32 %v6085_v59, %v4743_v2 }
 0x582   : > { %v4883_v33 = vadd.f32 %v6120_v24, %v4851_v48 }
 0x583   : > { %v4748_v21 = vsel %vm4747_vm0, %v6085_v59, %v4744_v40 }
 0x584   : > { %4915 = vst [vmem:[%s8866_s25 + $0xf0] sm:$0xff] %v4883_v33  ;;  %v4780_v25 = vmul.f32 %v4748_v21, %v9016_v23 }
 0x586   : > { %v4816_v3 = vmul.f32 %v9083_v19, %v4780_v25 }
 0x588   : > { %v4852_v43 = vadd.f32 %v9087_v53, %v4816_v3 }
 0x58a   : > { %v4884_v16 = vadd.f32 %v6121_v41, %v4852_v43 }
 0x58c   : > { %4916 = vst [vmem:[%s8866_s25 + $0xf8] sm:$0xff] %v4884_v16 }
 0x58d   : > { %6239 = shalt.err (!%p6236_p8)
}
 0x58e   : > { %s6292_s14 = smov 128   ;;  %s6293_s22 = smov 8  }
 0x58f   : > { %5693 = dma.vmem_to_hbm [thread:$0]  (%p6392_p5), %s4931_s21, 4096, %s4933_s19, %s4918_s3, %s6292_s14, %s6292_s14, %s6293_s22  }
 0x590 PF: > { %p5715_p9 = scmp.ge.s32.totalorder %s6282_s20, 2  ;;  %s4947_s25 = sand.u32 1, %s6270_s17  }
 0x591   : > { %s4948_s26 = scalar_lea.sflag [#allocation4], %s4947_s25 }
 0x592   : > { %p5706_p10 = pnand %p5715_p9, %p6396_p6 }
 0x594   : > { %p5707_p11 = pneg %p5706_p10 }
 0x596   : > { %6265 = dma.done.wait (%p5707_p11), %s4948_s26, 4096  }
 0x597   : > { %6267 = vsyncadd (%p5707_p11), %s4948_s26, 4294963200  ;;  %s9314_s20 = sld [smem:[#allocation13_spill]]  ;;  %s9317_s17 = smov %s6274_s18 }
 0x598   : > { %s9315_s15 = sld [smem:[#allocation12_spill]] }
 0x599   : > { %s9316_s19 = sld [smem:[#allocation14_spill]] }
 0x59d   : > { %p23_p12 = scmp.ge.s32.totalorder %s9314_s20, 4  }
 0x59e   : > { %s9318_s18 = smov %s9315_s15 }
 0x59f   :  { %25 = sbr.rel (!%p23_p12) target bundleno = 8 (0x8), region = 118 }
 0x5a4   :  { %4954 = vsyncpa [#allocation3], 1 }
 0x5a5   :  { %4956 = vsyncpa [#allocation3 + $0x1], 1 }
 0x5a6   :  { %4957 = vsyncpa [#allocation6], 1 }
 0x5a7   :  { %4958 = vsyncpa [#allocation4], 1 }
 0x5a8   :  { %4960 = vsyncpa [#allocation4 + $0x1], 1 }

</bundles_post_ra>
